<compile_context>
chip_gen: v5e
topology: v5e:2x2
jax: 0.10.0
libtpu: 0.0.40
codegen_flags: <defaults>
</compile_context>

<pallas_src>
import functools

import jax
import jax.numpy as jnp
from jax import lax
from jax.experimental import pallas as pl
from jax.experimental.pallas import tpu as pltpu


def _round_up(x, m):
    return (x + m - 1) // m * m


def _fused_conv_kernel(x_cur_ref, x_halo_ref, w1_ref, b1_ref, w2_ref, b2_ref,
                       out_ref, *, taps):
    """x_cur: (64, tb) f32   x_halo: (64, halo_pad) f32
       w1: (8,64) bf16  b1: (8,1) f32   w2: (8,72) bf16  b2: (8,1) f32
       out: (8, tb) f32."""
    tb = out_ref.shape[1]

    def conv1_tanh_tanh(xb):
        # bf16 cast happens here (hidden under DMA) instead of a wrapper-side XLA pass.
        z = jnp.dot(w1_ref[...], xb.astype(jnp.bfloat16),
                    preferred_element_type=jnp.float32)
        return jnp.tanh(jnp.tanh(z + b1_ref[...]))

    # conv1 (1x1) + double tanh on this block and on the narrow halo columns.
    v_cur = conv1_tanh_tanh(x_cur_ref[...]).astype(jnp.bfloat16)    # (8, tb)
    v_halo = conv1_tanh_tanh(x_halo_ref[...]).astype(jnp.bfloat16)  # (8, halo_pad)
    v_ext = jnp.concatenate([v_cur, v_halo], axis=1)                # (8, tb+halo_pad) bf16

    # conv2 (3x3, valid): fuse the 9 taps into one K=72 matmul (built in bf16).
    vcat = jnp.concatenate([v_ext[:, k:k + tb] for k in taps], axis=0)   # (72, tb) bf16
    acc = jnp.dot(w2_ref[...], vcat, preferred_element_type=jnp.float32)  # (8, tb) f32
    out_ref[...] = acc + b2_ref[...]


def model_forward(x_nchw, w1, b1, w2, b2, *, block_cols=None):
    """x_nchw: (1, 64, H, W) f32.  Params mirror the PyTorch module:
       w1: (8, 64, 1, 1)  b1: (8,)   -- Conv2d(64, 8, 1)
       w2: (8, 8, 3, 3)   b2: (8,)   -- Conv2d(8, 8, 3)
       Returns (1, 8, H-2, W-2) f32."""
    N, C, H, W = x_nchw.shape
    assert N == 1 and C == 64 and H >= 3 and W >= 3
    Ho, Wo = H - 2, W - 2
    HW = H * W

    halo = 2 * W + 2                      # max flat-index shift of any 3x3 tap
    halo_pad = _round_up(halo, 128)       # lane-aligned narrow-halo width

    # Lane-block size: multiple of halo_pad, as large as possible while keeping
    # nb >= 4 (two v7x cores + double buffering) and tb <= ~2048.
    if block_cols is None:
        tb = halo_pad
        while tb * 2 <= max(2048, halo_pad) and pl.cdiv(HW, tb * 2) >= 4:
            tb *= 2
    else:
        tb = block_cols
        assert tb >= halo_pad and tb % halo_pad == 0
    HW_pad = _round_up(HW, tb)            # padded cdiv-style grid for awkward H*W
    nb = HW_pad // tb

    # Channels-first, spatially flattened; keep f32 (cast to bf16 in-kernel).
    x2d = x_nchw[0].reshape(C, HW)
    if HW_pad != HW:
        x2d = jnp.pad(x2d, ((0, 0), (0, HW_pad - HW)))

    w1m = w1[:, :, 0, 0].astype(jnp.bfloat16)                                # (8, 64)
    # (out, in, kh, kw) -> (out, kh, kw, in) -> (8, 72); column block t = dh*3+dw.
    w2cat = jnp.transpose(w2, (0, 2, 3, 1)).reshape(8, 72).astype(jnp.bfloat16)
    b1c = b1.reshape(8, 1).astype(jnp.float32)
    b2c = b2.reshape(8, 1).astype(jnp.float32)

    taps = tuple(dh * W + dw for dh in range(3) for dw in range(3))
    kernel = functools.partial(_fused_conv_kernel, taps=taps)

    r = tb // halo_pad                     # halo-blocks per lane block
    last_halo_blk = HW_pad // halo_pad - 1

    out2d = pl.pallas_call(
        kernel,
        out_shape=jax.ShapeDtypeStruct((8, HW_pad), jnp.float32),
        grid=(nb,),
        in_specs=[
            # current x block (f32, cast in-kernel)
            pl.BlockSpec((C, tb), lambda j: (0, j)),
            # narrow halo: first halo_pad columns of the NEXT block (clamped; the
            # clamped values only feed output positions the wrapper crops).
            pl.BlockSpec((C, halo_pad),
                         lambda j: (0, jnp.minimum((j + 1) * r, last_halo_blk))),
            pl.BlockSpec((8, C), lambda j: (0, 0)),     # w1
            pl.BlockSpec((8, 1), lambda j: (0, 0)),     # b1
            pl.BlockSpec((8, 72), lambda j: (0, 0)),    # w2cat
            pl.BlockSpec((8, 1), lambda j: (0, 0)),     # b2
        ],
        out_specs=pl.BlockSpec((8, tb), lambda j: (0, j)),
        compiler_params=pltpu.CompilerParams(
            dimension_semantics=("parallel",)),
    )(x2d, x2d, w1m, b1c, w2cat, b2c)

    # Crop pad tail + invalid border positions; already NCHW-ordered.
    out_hw = out2d[:, :HW].reshape(8, H, W)[:, :Ho, :Wo]
    return out_hw[None]                                  # (1, 8, Ho, Wo)


def reference_forward(x, w1, b1, w2, b2):
    dn = ('NCHW', 'OIHW', 'NCHW')
    v1 = jnp.tanh(lax.conv_general_dilated(x, w1, (1, 1), 'VALID',
                                           dimension_numbers=dn)
                  + b1.reshape(1, 8, 1, 1))
    v2 = jnp.tanh(v1)
    v3 = lax.conv_general_dilated(v2, w2, (1, 1), 'VALID',
                                  dimension_numbers=dn) + b2.reshape(1, 8, 1, 1)
    return v3


if __name__ == "__main__":
    key = jax.random.PRNGKey(0)
    k1, k2, k3, k4, k5 = jax.random.split(key, 5)

    # Deterministic synthetic parameters (shapes match the PyTorch module).
    w1 = 0.1 * jax.random.normal(k1, (8, 64, 1, 1), dtype=jnp.float32)
    b1 = 0.1 * jax.random.normal(k2, (8,), dtype=jnp.float32)
    w2 = 0.1 * jax.random.normal(k3, (8, 8, 3, 3), dtype=jnp.float32)
    b2 = 0.1 * jax.random.normal(k4, (8,), dtype=jnp.float32)

    # The module's natural input shape (NCHW); 1 MiB, gives a 4-step lane grid.
    x = jax.random.normal(k5, (1, 64, 64, 64), dtype=jnp.float32)

    fwd = jax.jit(model_forward)
    out = jax.block_until_ready(fwd(x, w1, b1, w2, b2))
    ref = jax.block_until_ready(reference_forward(x, w1, b1, w2, b2))

    assert out.shape == ref.shape == (1, 8, 62, 62)
    # bf16 MXU operands with f32 accumulation -> tolerance sized for bf16 rounding.
    assert jnp.allclose(out, ref, atol=3e-2, rtol=3e-2), \
        float(jnp.max(jnp.abs(out - ref)))

    print("KERNEL_OK")
</pallas_src>

<mosaic_0001>
module attributes {stable_mosaic.version = 11 : i64} {
  func.func @_fused_conv_kernel(%arg0: i32, %arg1: memref<64x1024xf32, #tpu.memory_space<vmem>>, %arg2: memref<64x256xf32, #tpu.memory_space<vmem>>, %arg3: memref<8x64xbf16, #tpu.memory_space<vmem>>, %arg4: memref<8x1xf32, #tpu.memory_space<vmem>>, %arg5: memref<8x72xbf16, #tpu.memory_space<vmem>>, %arg6: memref<8x1xf32, #tpu.memory_space<vmem>>, %arg7: memref<8x1024xf32, #tpu.memory_space<vmem>>) attributes {dimension_semantics = [#tpu.dimension_semantics<parallel>], iteration_bounds = array<i64: 4>, scalar_prefetch = 0 : i64, scratch_operands = 0 : i64, tpu.core_type = #tpu.core_type<tc>, window_params = [{transform_indices = @transform_0, window_bounds = array<i64: 64, 1024>}, {transform_indices = @transform_1, window_bounds = array<i64: 64, 256>}, {pipeline_mode = #tpu.pipeline_mode<synchronous>, transform_indices = @transform_2, window_bounds = array<i64: 8, 64>}, {pipeline_mode = #tpu.pipeline_mode<synchronous>, transform_indices = @transform_3, window_bounds = array<i64: 8, 1>}, {pipeline_mode = #tpu.pipeline_mode<synchronous>, transform_indices = @transform_4, window_bounds = array<i64: 8, 72>}, {pipeline_mode = #tpu.pipeline_mode<synchronous>, transform_indices = @transform_5, window_bounds = array<i64: 8, 1>}, {transform_indices = @transform_6, window_bounds = array<i64: 8, 1024>}]} {
    %c0 = arith.constant 0 : index
    %c0_0 = arith.constant 0 : index
    %0 = vector.load %arg1[%c0, %c0_0] : memref<64x1024xf32, #tpu.memory_space<vmem>>, vector<64x1024xf32>
    %c0_1 = arith.constant 0 : index
    %c0_2 = arith.constant 0 : index
    %1 = vector.load %arg3[%c0_1, %c0_2] : memref<8x64xbf16, #tpu.memory_space<vmem>>, vector<8x64xbf16>
    %2 = arith.truncf %0 : vector<64x1024xf32> to vector<64x1024xbf16>
    %cst = arith.constant dense<0.000000e+00> : vector<8x1024xf32>
    %3 = tpu.matmul %1, %2, %cst {dimension_numbers = #tpu.dot_dimension_numbers<[1], [0], [0], [1], [0, 0, 1, 1], [], []>} : vector<8x64xbf16>, vector<64x1024xbf16>, vector<8x1024xf32> -> vector<8x1024xf32>
    %c0_3 = arith.constant 0 : index
    %c0_4 = arith.constant 0 : index
    %4 = vector.load %arg4[%c0_3, %c0_4] : memref<8x1xf32, #tpu.memory_space<vmem>>, vector<8x1xf32>
    %5 = vector.broadcast %4 : vector<8x1xf32> to vector<8x1024xf32>
    %6 = arith.addf %3, %5 : vector<8x1024xf32>
    %7 = math.tanh %6 : vector<8x1024xf32>
    %8 = math.tanh %7 : vector<8x1024xf32>
    %9 = arith.truncf %8 : vector<8x1024xf32> to vector<8x1024xbf16>
    %c0_5 = arith.constant 0 : index
    %c0_6 = arith.constant 0 : index
    %10 = vector.load %arg2[%c0_5, %c0_6] : memref<64x256xf32, #tpu.memory_space<vmem>>, vector<64x256xf32>
    %c0_7 = arith.constant 0 : index
    %c0_8 = arith.constant 0 : index
    %11 = vector.load %arg3[%c0_7, %c0_8] : memref<8x64xbf16, #tpu.memory_space<vmem>>, vector<8x64xbf16>
    %12 = arith.truncf %10 : vector<64x256xf32> to vector<64x256xbf16>
    %cst_9 = arith.constant dense<0.000000e+00> : vector<8x256xf32>
    %13 = tpu.matmul %11, %12, %cst_9 {dimension_numbers = #tpu.dot_dimension_numbers<[1], [0], [0], [1], [0, 0, 1, 1], [], []>} : vector<8x64xbf16>, vector<64x256xbf16>, vector<8x256xf32> -> vector<8x256xf32>
    %c0_10 = arith.constant 0 : index
    %c0_11 = arith.constant 0 : index
    %14 = vector.load %arg4[%c0_10, %c0_11] : memref<8x1xf32, #tpu.memory_space<vmem>>, vector<8x1xf32>
    %15 = vector.broadcast %14 : vector<8x1xf32> to vector<8x256xf32>
    %16 = arith.addf %13, %15 : vector<8x256xf32>
    %17 = math.tanh %16 : vector<8x256xf32>
    %18 = math.tanh %17 : vector<8x256xf32>
    %19 = arith.truncf %18 : vector<8x256xf32> to vector<8x256xbf16>
    %20 = tpu.concatenate %9, %19 in 1 : vector<8x1024xbf16>, vector<8x256xbf16> -> vector<8x1280xbf16>
    %21 = vector.extract_strided_slice %20 {offsets = [0, 0], sizes = [8, 1024], strides = [1, 1]} : vector<8x1280xbf16> to vector<8x1024xbf16>
    %22 = vector.extract_strided_slice %20 {offsets = [0, 1], sizes = [8, 1024], strides = [1, 1]} : vector<8x1280xbf16> to vector<8x1024xbf16>
    %23 = vector.extract_strided_slice %20 {offsets = [0, 2], sizes = [8, 1024], strides = [1, 1]} : vector<8x1280xbf16> to vector<8x1024xbf16>
    %24 = vector.extract_strided_slice %20 {offsets = [0, 64], sizes = [8, 1024], strides = [1, 1]} : vector<8x1280xbf16> to vector<8x1024xbf16>
    %25 = vector.extract_strided_slice %20 {offsets = [0, 65], sizes = [8, 1024], strides = [1, 1]} : vector<8x1280xbf16> to vector<8x1024xbf16>
    %26 = vector.extract_strided_slice %20 {offsets = [0, 66], sizes = [8, 1024], strides = [1, 1]} : vector<8x1280xbf16> to vector<8x1024xbf16>
    %27 = vector.extract_strided_slice %20 {offsets = [0, 128], sizes = [8, 1024], strides = [1, 1]} : vector<8x1280xbf16> to vector<8x1024xbf16>
    %28 = vector.extract_strided_slice %20 {offsets = [0, 129], sizes = [8, 1024], strides = [1, 1]} : vector<8x1280xbf16> to vector<8x1024xbf16>
    %29 = vector.extract_strided_slice %20 {offsets = [0, 130], sizes = [8, 1024], strides = [1, 1]} : vector<8x1280xbf16> to vector<8x1024xbf16>
    %30 = tpu.concatenate %21, %22, %23, %24, %25, %26, %27, %28, %29 in 0 : vector<8x1024xbf16>, vector<8x1024xbf16>, vector<8x1024xbf16>, vector<8x1024xbf16>, vector<8x1024xbf16>, vector<8x1024xbf16>, vector<8x1024xbf16>, vector<8x1024xbf16>, vector<8x1024xbf16> -> vector<72x1024xbf16>
    %c0_12 = arith.constant 0 : index
    %c0_13 = arith.constant 0 : index
    %31 = vector.load %arg5[%c0_12, %c0_13] : memref<8x72xbf16, #tpu.memory_space<vmem>>, vector<8x72xbf16>
    %cst_14 = arith.constant dense<0.000000e+00> : vector<8x1024xf32>
    %32 = tpu.matmul %31, %30, %cst_14 {dimension_numbers = #tpu.dot_dimension_numbers<[1], [0], [0], [1], [0, 0, 1, 1], [], []>} : vector<8x72xbf16>, vector<72x1024xbf16>, vector<8x1024xf32> -> vector<8x1024xf32>
    %c0_15 = arith.constant 0 : index
    %c0_16 = arith.constant 0 : index
    %33 = vector.load %arg6[%c0_15, %c0_16] : memref<8x1xf32, #tpu.memory_space<vmem>>, vector<8x1xf32>
    %34 = vector.broadcast %33 : vector<8x1xf32> to vector<8x1024xf32>
    %35 = arith.addf %32, %34 : vector<8x1024xf32>
    %c0_17 = arith.constant 0 : index
    %c0_18 = arith.constant 0 : index
    %36 = vector.load %arg7[%c0_17, %c0_18] : memref<8x1024xf32, #tpu.memory_space<vmem>>, vector<8x1024xf32>
    tpu.vector_store %arg7[%c0_17, %c0_18], %35 {strides = array<i32>} : memref<8x1024xf32, #tpu.memory_space<vmem>>, vector<8x1024xf32>,
    return
  }
  func.func @transform_0(%arg0: i32) -> (i32, i32) {
    %c0_i32 = arith.constant 0 : i32
    %c0_i32_0 = arith.constant 0 : i32
    return %c0_i32, %arg0 : i32, i32
  }
  func.func @transform_1(%arg0: i32) -> (i32, i32) {
    %c1_i32 = arith.constant 1 : i32
    %0 = arith.addi %arg0, %c1_i32 : i32
    %c4_i32 = arith.constant 4 : i32
    %1 = arith.muli %0, %c4_i32 : i32
    %c15_i32 = arith.constant 15 : i32
    %2 = arith.minsi %1, %c15_i32 : i32
    %c0_i32 = arith.constant 0 : i32
    %c0_i32_0 = arith.constant 0 : i32
    return %c0_i32, %2 : i32, i32
  }
  func.func @transform_2(%arg0: i32) -> (i32, i32) {
    %c0_i32 = arith.constant 0 : i32
    %c0_i32_0 = arith.constant 0 : i32
    %c0_i32_1 = arith.constant 0 : i32
    return %c0_i32, %c0_i32_0 : i32, i32
  }
  func.func @transform_3(%arg0: i32) -> (i32, i32) {
    %c0_i32 = arith.constant 0 : i32
    %c0_i32_0 = arith.constant 0 : i32
    %c0_i32_1 = arith.constant 0 : i32
    return %c0_i32, %c0_i32_0 : i32, i32
  }
  func.func @transform_4(%arg0: i32) -> (i32, i32) {
    %c0_i32 = arith.constant 0 : i32
    %c0_i32_0 = arith.constant 0 : i32
    %c0_i32_1 = arith.constant 0 : i32
    return %c0_i32, %c0_i32_0 : i32, i32
  }
  func.func @transform_5(%arg0: i32) -> (i32, i32) {
    %c0_i32 = arith.constant 0 : i32
    %c0_i32_0 = arith.constant 0 : i32
    %c0_i32_1 = arith.constant 0 : i32
    return %c0_i32, %c0_i32_0 : i32, i32
  }
  func.func @transform_6(%arg0: i32) -> (i32, i32) {
    %c0_i32 = arith.constant 0 : i32
    %c0_i32_0 = arith.constant 0 : i32
    return %c0_i32, %arg0 : i32, i32
  }
}

</mosaic_0001>

<bundles_post_ra>
// kernel: squeeze.2
= control target key start
LH: loop header
LB: loop body
LE: loop exit
PB: predicated region body
PF: predicated region fallthrough
CT: control target
= control target key end

     0   :  { %2 = vsyncpa [#allocation1], 0  ;;  %s20333_s0 = inlined_call_operand.hbm [shape: f32[1,64,64,64], index: 0, kind: input, shape index: {}]   ;;  %s20334_s1 = inlined_call_operand.vmem [shape: f32[64,4096], index: 1, kind: output, shape index: {}]  }
   0x1   :  { %4 = vsyncpa [#allocation1 + $0x1], 0  ;;  %s14032_s6 = smov 0  }
   0x2 LB: > { %s14038_s7 = sadd.s32 4294967295, %s14017_s6   ;;  %p10887_p0 = scmp.ge.s32.totalorder %s14017_s6, 2  ;;  %s14017_s6 = sphi %s14032_s6, %s10_s6  }
   0x3   : > { %s25_s8 = sand.u32 (!%p10887_p0), 1, %s14017_s6   ;;  %s30_s9 = smul.u32 (!%p10887_p0), 3072, %s14017_s6 }
   0x4   : > { %24 = sbr.rel (%p10887_p0) target bundleno = 38 (0x26), region = 16  ;;  %s14046_s14 = scalar_lea.sflag (!%p10887_p0), [#allocation1], %s25_s8 }
   0x5   : > { %s13958_s10 = smul.u32 (!%p10887_p0), 3072, %s25_s8  ;;  %s31_s11 = ssub.s32 (!%p10887_p0), 4096, %s30_s9 }
   0x6   : > { %p32_p1 = scmp.lt.s32.totalorder (!%p10887_p0), %s31_s11, 3072 }
   0x7   : > { %s29_s15 = scalar_lea.vmem (!%p10887_p0), [#allocation0], %s13958_s10 }
   0x9   : > { %s20336_s11 = smov (!%p32_p1, %s31_s11), 3072 }
   0xa   : > { %s34_s12 = ssub.s32 3072, %s20336_s11 }
   0xb   : > { %s35_s13 = sshll.u32 %s34_s12, 4 }
   0xc   : > { %36 = vsyncadd %s14046_s14, %s35_s13  ;;  %p10888_p2 = scmp.ne.s32.totalorder %s20336_s11, 0  ;;  %s38_s18 = scalar_lea.hbm %s20333_s0, %s30_s9 }
   0xd   : > { %s39_s19 = sshll.u32 %s20336_s11, 4  ;;  %s40_s20 = sshll.u32 %s38_s18, 4  ;;  %s14054_s20 = int_to_ptr.hbm [resolvable:$true] %s40_s20 }
   0xe   : > { %s14056_s21 = sshll.u32 %s29_s15, 4  ;;  %s13970_s22 = sshra.s32 %s14054_s20, 4  ;;  %s43_s21 = int_to_ptr.vmem [resolvable:$true] %s14056_s21  ;;  %s13971_s22 = int_to_ptr.hbm [resolvable:$true] %s13970_s22 }
   0xf   : > { %s13972_s23 = sshrl.u32 %s39_s19, 4  ;;  %s13981_s27 = scalar_lea.hbm %s20333_s0, 4096 }
  0x10   : > { %s13977_s24 = scalar_lea.hbm %s13971_s22, %s13972_s23  ;;  %p13982_p6 = scmp.lt.s32.totalorder %s13971_s22, %s20333_s0 }
  0x11   : > { %p13978_p3 = scmp.ne.s32.totalorder %s13971_s22, %s13977_s24  ;;  %p13983_p7 = scmp.lt.s32.totalorder %s13981_s27, %s13977_s24 }
  0x13   : > { %p13979_p4 = pnand %p13978_p3, %p10888_p2  ;;  %p13984_p8 = por %p13983_p7, %p13982_p6 }
  0x15   : > { %p13980_p5 = pneg %p13979_p4 }
  0x17   : > { %p13985_p9 = pnand %p13984_p8, %p13980_p5 }
  0x19   : > { %13988 = shalt.err (!%p13985_p9)
}
  0x1a   : > { %s13989_s30 = sshra.s32 %s43_s21, 4  ;;  %s14019_s3 = smov [#allocation0]   ;;  %s13990_s30 = int_to_ptr.vmem [resolvable:$true] %s13989_s30 }
  0x1b   : > { %s13996_s2 = scalar_lea.vmem %s13990_s30, %s13972_s23  ;;  %s14000_s4 = scalar_lea.vmem %s14019_s3, 6144 }
  0x1c   : > { %p13997_p10 = scmp.ne.s32.totalorder %s13990_s30, %s13996_s2  ;;  %p14002_p13 = scmp.lt.s32.totalorder %s14000_s4, %s13996_s2 }
  0x1e   : > { %p13998_p11 = pnand %p13997_p10, %p10888_p2 }
  0x20   : > { %p13999_p12 = pneg %p13998_p11 }
  0x22   : > { %p14004_p0 = pnand %p14002_p13, %p13999_p12 }
  0x24   : > { %14007 = shalt.err (!%p14004_p0)
}
  0x25   : > { %45 = dma.hbm_to_vmem [thread:$0]  (%p10888_p2), %s14054_s20, %s39_s19, %s43_s21, %s14046_s14  }
  0x26 PF: > { %p10889_p1 = scmp.ge.s32.totalorder %s14017_s6, 1  ;;  %p47_p2 = scmp.lt.s32.totalorder %s14017_s6, 3 }
  0x28   : > { %p48_p3 = pnand %p10889_p1, %p47_p2 }
  0x29   : > { %s53_s5 = sand.u32 (!%p48_p3), 1, %s14038_s7  }
  0x2a   : > { %51 = sbr.rel (%p48_p3) target bundleno = 1467 (0x5bb), region = 20  ;;  %s54_s9 = scalar_lea.sflag (!%p48_p3), [#allocation1], %s53_s5 }
  0x2b   : > { %s13959_s8 = smul.u32 (!%p48_p3), 3072, %s53_s5 }
  0x2d   : > { %s14081_s10 = scalar_lea.vmem (!%p48_p3), [#allocation0], %s13959_s8 }
  0x2f   : > { %14013 = dma.done.wait %s54_s9, 49152  }
  0x30   : > { %14014 = vsyncadd %s54_s9, 4294918144  ;;  %s72_s11 = smul.u32 1536, %s14038_s7  ;;  %p10890_p5 = scmp.ge.s32.totalorder %s14038_s7, 1 }
  0x31   : > { %s14020_s15 = smov (!%p10890_p5), 64  }
  0x32   : > { %p76_p4 = scmp.lt.s32.totalorder %s72_s11, 2047  ;;  %91 = sbr.rel (%p10890_p5) target bundleno = 1060 (0x424), region = 24 }
  0x34   : > { %s20338_s11 = smov (!%p76_p4, %s72_s11), 2047 }
  0x35   : > { %s14087_s14 = scalar_lea.vmem %s20334_s1, %s20338_s11 }
  0x37   : > { %vm1437_vm0 = vcmask 1041409   ;;  %vm1441_vm1 = vcmask 1042434   ;;  %vm1445_vm2 = vcmask 1043459   ;;  %vm1449_vm3 = vcmask 1044484   ;;  %v11481_v0 = vld [vmem:[%s14081_s10 + $0x11] sm:$0x1]  }
  0x38   : > { %vm1453_vm4 = vcmask 1045509   ;;  %v11482_v1 = vld [vmem:[%s14081_s10 + $0x50] sm:$0x2]   ;;  %vm1457_vm5 = vcmask 1046534   ;;  %vm1461_vm6 = vcmask 1047559   ;;  %vm93_vm7 = vcmask 523264  }
  0x39   : > { %v11483_v2 = vld [vmem:[%s14081_s10 + $0x8f] sm:$0x4]   ;;  %v1507_v4 = vsel %vm1437_vm0, %v11482_v1, %v11481_v0  ;;  %v11464_v9 = vld [vmem:[%s14081_s10 + $0x1] sm:$0x1]   ;;  %v11490_v23 = vld [vmem:[%s14081_s10 + $0x19] sm:$0x1]  }
  0x3a   : > { %v11484_v3 = vld [vmem:[%s14081_s10 + $0xce] sm:$0x8]   ;;  %v1511_v7 = vsel %vm1441_vm1, %v11483_v2, %v1507_v4  ;;  %v11465_v10 = vld [vmem:[%s14081_s10 + $0x40] sm:$0x2]   ;;  %v11491_v24 = vld [vmem:[%s14081_s10 + $0x58] sm:$0x2]  }
  0x3b   : > { %v11485_v5 = vld [vmem:[%s14081_s10 + $0x10d] sm:$0x10]   ;;  %v1515_v11 = vsel %vm1445_vm2, %v11484_v3, %v1511_v7  ;;  %v1438_v12 = vsel %vm1437_vm0, %v11465_v10, %v11464_v9  ;;  %v11466_v13 = vld [vmem:[%s14081_s10 + $0x7f] sm:$0x4]   ;;  %v11492_v25 = vld [vmem:[%s14081_s10 + $0x97] sm:$0x4]   ;;  %v1542_v29 = vsel %vm1437_vm0, %v11491_v24, %v11490_v23 }
  0x3c   : > { %v11486_v6 = vld [vmem:[%s14081_s10 + $0x14c] sm:$0x20]   ;;  %v11467_v14 = vld [vmem:[%s14081_s10 + $0xbe] sm:$0x8]   ;;  %v1519_v16 = vsel %vm1449_vm3, %v11485_v5, %v1515_v11  ;;  %v1442_v18 = vsel %vm1441_vm1, %v11466_v13, %v1438_v12  ;;  %v11493_v30 = vld [vmem:[%s14081_s10 + $0xd6] sm:$0x8]   ;;  %v1546_v34 = vsel %vm1441_vm1, %v11492_v25, %v1542_v29 }
  0x3d   : > { %v11487_v8 = vld [vmem:[%s14081_s10 + $0x18b] sm:$0x40]   ;;  %v11468_v15 = vld [vmem:[%s14081_s10 + $0xfd] sm:$0x10]   ;;  %v1523_v21 = vsel %vm1453_vm4, %v11486_v6, %v1519_v16  ;;  %v1446_v22 = vsel %vm1445_vm2, %v11467_v14, %v1442_v18  ;;  %v11494_v31 = vld [vmem:[%s14081_s10 + $0x115] sm:$0x10]   ;;  %v1550_v39 = vsel %vm1445_vm2, %v11493_v30, %v1546_v34 }
  0x3e   : > { %v11488_v17 = vld [vmem:[%s14081_s10 + $0x1ca] sm:$0x80]   ;;  %v11469_v19 = vld [vmem:[%s14081_s10 + $0x13c] sm:$0x20]   ;;  %v1527_v26 = vsel %vm1457_vm5, %v11487_v8, %v1523_v21  ;;  %v1450_v27 = vsel %vm1449_vm3, %v11468_v15, %v1446_v22  ;;  %v11495_v35 = vld [vmem:[%s14081_s10 + $0x154] sm:$0x20]   ;;  %v1554_v44 = vsel %vm1449_vm3, %v11494_v31, %v1550_v39 }
  0x3f   : > { %v11470_v20 = vld [vmem:[%s14081_s10 + $0x17b] sm:$0x40]   ;;  %v1531_v32 = vsel %vm1461_vm6, %v11488_v17, %v1527_v26  ;;  %v1454_v33 = vsel %vm1453_vm4, %v11469_v19, %v1450_v27  ;;  %v11496_v36 = vld [vmem:[%s14081_s10 + $0x193] sm:$0x40]   ;;  %v11472_v37 = vld [vmem:[%s14081_s10 + $0x9] sm:$0x1]   ;;  %v1558_v49 = vsel %vm1453_vm4, %v11495_v35, %v1554_v44 }
  0x40   : > { %v11471_v28 = vld [vmem:[%s14081_s10 + $0x1ba] sm:$0x80]   ;;  %1532 = vrot.lane.b32.xlu1 %v1531_v32, %s14020_s15  ;;  %v1458_v38 = vsel %vm1457_vm5, %v11470_v20, %v1454_v33  ;;  %v11473_v40 = vld [vmem:[%s14081_s10 + $0x48] sm:$0x2]   ;;  %v11497_v45 = vld [vmem:[%s14081_s10 + $0x1d2] sm:$0x80]   ;;  %v1562_v54 = vsel %vm1457_vm5, %v11496_v36, %v1558_v49 }
  0x41   : > { %v11474_v41 = vld [vmem:[%s14081_s10 + $0x87] sm:$0x4]   ;;  %v1462_v43 = vsel %vm1461_vm6, %v11471_v28, %v1458_v38  ;;  %v1472_v46 = vsel %vm1437_vm0, %v11473_v40, %v11472_v37  ;;  %v11526_v52 = vld [vmem:[%s14081_s10 + $0x39] sm:$0x1]   ;;  %v1566_v0 = vsel %vm1461_vm6, %v11497_v45, %v1562_v54  ;;  %v11517_v3 = vld [vmem:[%s14081_s10 + $0x31] sm:$0x1]  }
  0x42   : > { %v11475_v42 = vld [vmem:[%s14081_s10 + $0xc6] sm:$0x8]   ;;  %1463 = vrot.lane.b32.xlu0 %v1462_v43, %s14020_s15  ;;  %v1476_v50 = vsel %vm1441_vm1, %v11474_v41, %v1472_v46  ;;  %v11527_v53 = vld [vmem:[%s14081_s10 + $0x78] sm:$0x2]   ;;  %v11518_v4 = vld [vmem:[%s14081_s10 + $0x70] sm:$0x2]  }
  0x43   : > { %v11476_v47 = vld [vmem:[%s14081_s10 + $0x105] sm:$0x10]   ;;  %v1480_v55 = vsel %vm1445_vm2, %v11475_v42, %v1476_v50  ;;  %v1682_v56 = vsel %vm1437_vm0, %v11527_v53, %v11526_v52  ;;  %v11528_v57 = vld [vmem:[%s14081_s10 + $0xb7] sm:$0x4]   ;;  %v11519_v5 = vld [vmem:[%s14081_s10 + $0xaf] sm:$0x4]   ;;  %v1647_v8 = vsel %vm1437_vm0, %v11518_v4, %v11517_v3 }
  0x44   : > { %v11477_v48 = vld [vmem:[%s14081_s10 + $0x144] sm:$0x20]   ;;  %v11529_v58 = vld [vmem:[%s14081_s10 + $0xf6] sm:$0x8]   ;;  %v1484_v60 = vsel %vm1449_vm3, %v11476_v47, %v1480_v55  ;;  %v1686_v62 = vsel %vm1441_vm1, %v11528_v57, %v1682_v56  ;;  %v11520_v9 = vld [vmem:[%s14081_s10 + $0xee] sm:$0x8]   ;;  %v1651_v14 = vsel %vm1441_vm1, %v11519_v5, %v1647_v8 }
  0x45   : > { %v11478_v51 = vld [vmem:[%s14081_s10 + $0x183] sm:$0x40]   ;;  %v11530_v59 = vld [vmem:[%s14081_s10 + $0x135] sm:$0x10]   ;;  %v1488_v1 = vsel %vm1453_vm4, %v11477_v48, %v1484_v60  ;;  %v1690_v2 = vsel %vm1445_vm2, %v11529_v58, %v1686_v62  ;;  %v11521_v10 = vld [vmem:[%s14081_s10 + $0x12d] sm:$0x10]   ;;  %v1655_v18 = vsel %vm1445_vm2, %v11520_v9, %v1651_v14 }
  0x46   : > { %v11479_v61 = vld [vmem:[%s14081_s10 + $0x1c2] sm:$0x80]   ;;  %v11531_v63 = vld [vmem:[%s14081_s10 + $0x174] sm:$0x20]   ;;  %v1492_v6 = vsel %vm1457_vm5, %v11478_v51, %v1488_v1  ;;  %v1694_v7 = vsel %vm1449_vm3, %v11530_v59, %v1690_v2  ;;  %v11522_v15 = vld [vmem:[%s14081_s10 + $0x16c] sm:$0x20]   ;;  %v1659_v22 = vsel %vm1449_vm3, %v11521_v10, %v1655_v18 }
  0x47   : > { %v1496_v11 = vsel %vm1461_vm6, %v11479_v61, %v1492_v6  ;;  %v1698_v12 = vsel %vm1453_vm4, %v11531_v63, %v1694_v7  ;;  %v11532_v13 = vld [vmem:[%s14081_s10 + $0x1b3] sm:$0x40]   ;;  %v11499_v16 = vld [vmem:[%s14081_s10 + $0x21] sm:$0x1]   ;;  %v11523_v23 = vld [vmem:[%s14081_s10 + $0x1ab] sm:$0x40]   ;;  %v1663_v28 = vsel %vm1453_vm4, %v11522_v15, %v1659_v22 }
  0x48   : > { %1567 = vrot.lane.b32.xlu1 %v1566_v0, %s14020_s15  ;;  %v11533_v17 = vld [vmem:[%s14081_s10 + $0x1f2] sm:$0x80]   ;;  %v11500_v19 = vld [vmem:[%s14081_s10 + $0x60] sm:$0x2]   ;;  %v1702_v27 = vsel %vm1457_vm5, %v11532_v13, %v1698_v12  ;;  %v11553_v31 = vld [vmem:[%s14081_s10 + $0x211] sm:$0x1]   ;;  %v1667_v38 = vsel %vm1457_vm5, %v11523_v23, %v1663_v28 }
  0x49   : > { %v11501_v20 = vld [vmem:[%s14081_s10 + $0x9f] sm:$0x4]   ;;  %v1577_v24 = vsel %vm1437_vm0, %v11500_v19, %v11499_v16  ;;  %v11554_v32 = vld [vmem:[%s14081_s10 + $0x250] sm:$0x2]   ;;  %v1706_v44 = vsel %vm1461_vm6, %v11533_v17, %v1702_v27  ;;  %v11544_v47 = vld [vmem:[%s14081_s10 + $0x209] sm:$0x1]  }
  0x4a   : > { %v11502_v21 = vld [vmem:[%s14081_s10 + $0xde] sm:$0x8]   ;;  %1497 = vrot.lane.b32.xlu0 %v1496_v11, %s14020_s15  ;;  %v1581_v29 = vsel %vm1441_vm1, %v11501_v20, %v1577_v24  ;;  %v1787_v34 = vsel %vm1437_vm0, %v11554_v32, %v11553_v31  ;;  %v11555_v35 = vld [vmem:[%s14081_s10 + $0x28f] sm:$0x4]   ;;  %v11545_v48 = vld [vmem:[%s14081_s10 + $0x248] sm:$0x2]  }
  0x4b   : > { %v11503_v25 = vld [vmem:[%s14081_s10 + $0x11d] sm:$0x10]   ;;  %v1585_v33 = vsel %vm1445_vm2, %v11502_v21, %v1581_v29  ;;  %v11556_v36 = vld [vmem:[%s14081_s10 + $0x2ce] sm:$0x8]   ;;  %v1791_v42 = vsel %vm1441_vm1, %v11555_v35, %v1787_v34  ;;  %v11546_v49 = vld [vmem:[%s14081_s10 + $0x287] sm:$0x4]   ;;  %v1752_v52 = vsel %vm1437_vm0, %v11545_v48, %v11544_v47 }
  0x4c   : > { %v11504_v26 = vld [vmem:[%s14081_s10 + $0x15c] sm:$0x20]   ;;  %v11557_v37 = vld [vmem:[%s14081_s10 + $0x30d] sm:$0x10]   ;;  %v1589_v40 = vsel %vm1449_vm3, %v11503_v25, %v1585_v33  ;;  %v1795_v46 = vsel %vm1445_vm2, %v11556_v36, %v1791_v42  ;;  %v11547_v53 = vld [vmem:[%s14081_s10 + $0x2c6] sm:$0x8]   ;;  %v1756_v59 = vsel %vm1441_vm1, %v11546_v49, %v1752_v52 }
  0x4d   : > { %v11505_v30 = vld [vmem:[%s14081_s10 + $0x19b] sm:$0x40]   ;;  %v11524_v39 = vld [vmem:[%s14081_s10 + $0x1ea] sm:$0x80]   ;;  %v1593_v45 = vsel %vm1453_vm4, %v11504_v26, %v1589_v40  ;;  %v1799_v51 = vsel %vm1449_vm3, %v11557_v37, %v1795_v46  ;;  %v11548_v54 = vld [vmem:[%s14081_s10 + $0x305] sm:$0x10]   ;;  %v1760_v63 = vsel %vm1445_vm2, %v11547_v53, %v1756_v59 }
  0x4e   : > { %v11506_v41 = vld [vmem:[%s14081_s10 + $0x1da] sm:$0x80]   ;;  %v11558_v43 = vld [vmem:[%s14081_s10 + $0x34c] sm:$0x20]   ;;  %v1597_v50 = vsel %vm1457_vm5, %v11505_v30, %v1593_v45  ;;  %v1671_v55 = vsel %vm1461_vm6, %v11524_v39, %v1667_v38  ;;  %v11549_v60 = vld [vmem:[%s14081_s10 + $0x344] sm:$0x20]   ;;  %v1764_v2 = vsel %vm1449_vm3, %v11548_v54, %v1760_v63 }
  0x4f   : > { %v1601_v56 = vsel %vm1461_vm6, %v11506_v41, %v1597_v50  ;;  %v1803_v57 = vsel %vm1453_vm4, %v11558_v43, %v1799_v51  ;;  %v11559_v58 = vld [vmem:[%s14081_s10 + $0x38b] sm:$0x40]   ;;  %v11508_v61 = vld [vmem:[%s14081_s10 + $0x29] sm:$0x1]   ;;  %v1768_v8 = vsel %vm1453_vm4, %v11549_v60, %v1764_v2  ;;  %v11571_v27 = vld [vmem:[%s14081_s10 + $0x221] sm:$0x1]  }
  0x50   : > { %1707 = vrot.lane.b32.xlu1 %v1706_v44, %s14020_s15  ;;  %1602 = vrot.lane.b32.xlu2 %v1601_v56, %s14020_s15  ;;  %v11560_v62 = vld [vmem:[%s14081_s10 + $0x3ca] sm:$0x80]   ;;  %v11509_v0 = vld [vmem:[%s14081_s10 + $0x68] sm:$0x2]   ;;  %v1807_v7 = vsel %vm1457_vm5, %v11559_v58, %v1803_v57  ;;  %vm1465_vm8 = vcmask 1048064  }
  0x51   : > { %v11510_v1 = vld [vmem:[%s14081_s10 + $0xa7] sm:$0x4]   ;;  %v1612_v4 = vsel %vm1437_vm0, %v11509_v0, %v11508_v61  ;;  %v1811_v23 = vsel %vm1461_vm6, %v11560_v62, %v1807_v7  ;;  %v11572_v28 = vld [vmem:[%s14081_s10 + $0x260] sm:$0x2]  }
  0x52   : > { %v11550_v3 = vld [vmem:[%s14081_s10 + $0x383] sm:$0x40]   ;;  %1672 = vrot.lane.b32.xlu0 %v1671_v55, %s14020_s15  ;;  %v1616_v9 = vsel %vm1441_vm1, %v11510_v1, %v1612_v4  ;;  %v1857_v31 = vsel %vm1437_vm0, %v11572_v28, %v11571_v27  ;;  %v11573_v32 = vld [vmem:[%s14081_s10 + $0x29f] sm:$0x4]   ;;  %v11563_v27 = vld [vmem:[%s14081_s10 + $0x258] sm:$0x2]  }
  0x53   : > { %v11511_v5 = vld [vmem:[%s14081_s10 + $0xe6] sm:$0x8]   ;;  %v1772_v17 = vsel %vm1457_vm5, %v11550_v3, %v1768_v8  ;;  %v11574_v33 = vld [vmem:[%s14081_s10 + $0x2de] sm:$0x8]   ;;  %v1861_v39 = vsel %vm1441_vm1, %v11573_v32, %v1857_v31  ;;  %v11598_v8 = vld [vmem:[%s14081_s10 + $0x239] sm:$0x1]  }
  0x54   : > { %v11512_v6 = vld [vmem:[%s14081_s10 + $0x125] sm:$0x10]   ;;  %v1620_v13 = vsel %vm1445_vm2, %v11511_v5, %v1616_v9  ;;  %v11575_v34 = vld [vmem:[%s14081_s10 + $0x31d] sm:$0x10]   ;;  %v1865_v44 = vsel %vm1445_vm2, %v11574_v33, %v1861_v39  ;;  %v11564_v28 = vld [vmem:[%s14081_s10 + $0x297] sm:$0x4]  }
  0x55   : > { %v11513_v10 = vld [vmem:[%s14081_s10 + $0x164] sm:$0x20]   ;;  %v1624_v19 = vsel %vm1449_vm3, %v11512_v6, %v1620_v13  ;;  %v11576_v40 = vld [vmem:[%s14081_s10 + $0x35c] sm:$0x20]   ;;  %v1869_v47 = vsel %vm1449_vm3, %v11575_v34, %v1865_v44  ;;  %v11601_v13 = vld [vmem:[%s14081_s10 + $0x2f6] sm:$0x8]  }
  0x56   : > { %v11514_v11 = vld [vmem:[%s14081_s10 + $0x1a3] sm:$0x40]   ;;  %v1628_v24 = vsel %vm1453_vm4, %v11513_v10, %v1624_v19  ;;  %v11577_v41 = vld [vmem:[%s14081_s10 + $0x39b] sm:$0x40]   ;;  %v1873_v53 = vsel %vm1453_vm4, %v11576_v40, %v1869_v47  ;;  %v11602_v19 = vld [vmem:[%s14081_s10 + $0x335] sm:$0x10]  }
  0x57   : > { %v11580_v12 = vld [vmem:[%s14081_s10 + $0x229] sm:$0x1]   ;;  %v1632_v29 = vsel %vm1457_vm5, %v11514_v11, %v1628_v24  ;;  %v11535_v45 = vld [vmem:[%s14081_s10 + $0x201] sm:$0x1]   ;;  %v1877_v62 = vsel %vm1457_vm5, %v11577_v41, %v1873_v53  ;;  %v11599_v11 = vld [vmem:[%s14081_s10 + $0x278] sm:$0x2]  }
  0x58   : > { %v11581_v14 = vld [vmem:[%s14081_s10 + $0x268] sm:$0x2]   ;;  %1812 = vrot.lane.b32.xlu1 %v1811_v23, %s14020_s15  ;;  %v11536_v46 = vld [vmem:[%s14081_s10 + $0x240] sm:$0x2]   ;;  %v11604_v24 = vld [vmem:[%s14081_s10 + $0x3b3] sm:$0x40]  }
  0x59   : > { %v11582_v15 = vld [vmem:[%s14081_s10 + $0x2a7] sm:$0x4]   ;;  %v1892_v21 = vsel %vm1437_vm0, %v11581_v14, %v11580_v12  ;;  %v1717_v48 = vsel %vm1437_vm0, %v11536_v46, %v11535_v45  ;;  %v11537_v49 = vld [vmem:[%s14081_s10 + $0x27f] sm:$0x4]   ;;  %v11600_v12 = vld [vmem:[%s14081_s10 + $0x2b7] sm:$0x4]  }
  0x5a   : > { %v11583_v16 = vld [vmem:[%s14081_s10 + $0x2e6] sm:$0x8]   ;;  %v1896_v25 = vsel %vm1441_vm1, %v11582_v15, %v1892_v21  ;;  %v11538_v50 = vld [vmem:[%s14081_s10 + $0x2be] sm:$0x8]   ;;  %v1721_v55 = vsel %vm1441_vm1, %v11537_v49, %v1717_v48  ;;  %v11605_v32 = vld [vmem:[%s14081_s10 + $0x3f2] sm:$0x80]  }
  0x5b   : > { %v11551_v18 = vld [vmem:[%s14081_s10 + $0x3c2] sm:$0x80]   ;;  %v1900_v30 = vsel %vm1445_vm2, %v11583_v16, %v1896_v25  ;;  %v11539_v51 = vld [vmem:[%s14081_s10 + $0x2fd] sm:$0x10]   ;;  %v1725_v58 = vsel %vm1445_vm2, %v11538_v50, %v1721_v55  ;;  %v11562_v25 = vld [vmem:[%s14081_s10 + $0x219] sm:$0x1]  }
  0x5c   : > { %v11515_v20 = vld [vmem:[%s14081_s10 + $0x1e2] sm:$0x80]   ;;  %v1776_v35 = vsel %vm1461_vm6, %v11551_v18, %v1772_v17  ;;  %v11578_v54 = vld [vmem:[%s14081_s10 + $0x3da] sm:$0x80]   ;;  %v1729_v63 = vsel %vm1449_vm3, %v11539_v51, %v1725_v58  ;;  %v1962_v18 = vsel %vm1437_vm0, %v11599_v11, %v11598_v8  ;;  %v1822_v33 = vsel %vm1437_vm0, %v11563_v27, %v11562_v25  ;;  %v11566_v34 = vld [vmem:[%s14081_s10 + $0x315] sm:$0x10]  }
  0x5d   : > { %v11584_v22 = vld [vmem:[%s14081_s10 + $0x325] sm:$0x10]   ;;  %v1636_v36 = vsel %vm1461_vm6, %v11515_v20, %v1632_v29  ;;  %1777 = vrot.lane.b32.xlu0 %v1776_v35, %s14020_s15  ;;  %v11540_v56 = vld [vmem:[%s14081_s10 + $0x33c] sm:$0x20]   ;;  %v1881_v14 = vsel %vm1461_vm6, %v11578_v54, %v1877_v62  ;;  %v11603_v20 = vld [vmem:[%s14081_s10 + $0x374] sm:$0x20]   ;;  %v1966_v23 = vsel %vm1441_vm1, %v11600_v12, %v1962_v18 }
  0x5e   : > { %v11585_v26 = vld [vmem:[%s14081_s10 + $0x364] sm:$0x20]   ;;  %v1904_v37 = vsel %vm1449_vm3, %v11584_v22, %v1900_v30  ;;  %1637 = vrot.lane.b32.xlu2 %v1636_v36, %s14020_s15  ;;  %v11541_v57 = vld [vmem:[%s14081_s10 + $0x37b] sm:$0x40]   ;;  %v1733_v5 = vsel %vm1453_vm4, %v11540_v56, %v1729_v63  ;;  %v11565_v29 = vld [vmem:[%s14081_s10 + $0x2d6] sm:$0x8]  }
  0x5f   : > { %v11586_v38 = vld [vmem:[%s14081_s10 + $0x3a3] sm:$0x40]   ;;  %v1908_v42 = vsel %vm1453_vm4, %v11585_v26, %v1904_v37  ;;  %v11607_v59 = vld [vmem:[%s14081_s10 + $0x401] sm:$0x1]   ;;  %v1737_v9 = vsel %vm1457_vm5, %v11541_v57, %v1733_v5  ;;  %v1970_v26 = vsel %vm1445_vm2, %v11601_v13, %v1966_v23  ;;  %v11567_v35 = vld [vmem:[%s14081_s10 + $0x354] sm:$0x20]   ;;  %v1826_v37 = vsel %vm1441_vm1, %v11564_v28, %v1822_v33 }
  0x60   : > { %v11587_v43 = vld [vmem:[%s14081_s10 + $0x3e2] sm:$0x80]   ;;  %v1912_v52 = vsel %vm1457_vm5, %v11586_v38, %v1908_v42  ;;  %v11608_v60 = vld [vmem:[%s14081_s10 + $0x440] sm:$0x2]   ;;  %v1974_v31 = vsel %vm1449_vm3, %v11602_v19, %v1970_v26  ;;  %v11568_v38 = vld [vmem:[%s14081_s10 + $0x393] sm:$0x40]   ;;  %v1830_v42 = vsel %vm1445_vm2, %v11565_v29, %v1826_v37 }
  0x61   : > { %v11609_v61 = vld [vmem:[%s14081_s10 + $0x47f] sm:$0x4]   ;;  %v1997_v1 = vsel %vm1437_vm0, %v11608_v60, %v11607_v59  ;;  %v1916_v4 = vsel %vm1461_vm6, %v11587_v43, %v1912_v52  ;;  %v1978_v36 = vsel %vm1453_vm4, %v11603_v20, %v1974_v31  ;;  %v11634_v39 = vld [vmem:[%s14081_s10 + $0x419] sm:$0x1]   ;;  %v1834_v48 = vsel %vm1449_vm3, %v11566_v34, %v1830_v42  ;;  %v11625_v54 = vld [vmem:[%s14081_s10 + $0x411] sm:$0x1]  }
  0x62   : > { %v11542_v0 = vld [vmem:[%s14081_s10 + $0x3ba] sm:$0x80]   ;;  %v2001_v6 = vsel %vm1441_vm1, %v11609_v61, %v1997_v1  ;;  %1917 = vrot.lane.b32.xlu1 %v1916_v4, %s14020_s15  ;;  %v11635_v40 = vld [vmem:[%s14081_s10 + $0x458] sm:$0x2]   ;;  %v1982_v41 = vsel %vm1457_vm5, %v11604_v24, %v1978_v36  ;;  %v1838_v52 = vsel %vm1453_vm4, %v11567_v35, %v1834_v48  ;;  %v11626_v55 = vld [vmem:[%s14081_s10 + $0x450] sm:$0x2]  }
  0x63   : > { %v11610_v2 = vld [vmem:[%s14081_s10 + $0x4be] sm:$0x8]   ;;  %v1741_v15 = vsel %vm1461_vm6, %v11542_v0, %v1737_v9  ;;  %v2102_v43 = vsel %vm1437_vm0, %v11635_v40, %v11634_v39  ;;  %v11636_v44 = vld [vmem:[%s14081_s10 + $0x497] sm:$0x4]   ;;  %v11627_v56 = vld [vmem:[%s14081_s10 + $0x48f] sm:$0x4]   ;;  %v1986_v57 = vsel %vm1461_vm6, %v11605_v32, %v1982_v41  ;;  %v1842_v58 = vsel %vm1457_vm5, %v11568_v38, %v1838_v52 }
  0x64   : > { %v11611_v3 = vld [vmem:[%s14081_s10 + $0x4fd] sm:$0x10]   ;;  %v2005_v10 = vsel %vm1445_vm2, %v11610_v2, %v2001_v6  ;;  %v11637_v45 = vld [vmem:[%s14081_s10 + $0x4d6] sm:$0x8]   ;;  %v2106_v50 = vsel %vm1441_vm1, %v11636_v44, %v2102_v43  ;;  %v2067_v61 = vsel %vm1437_vm0, %v11626_v55, %v11625_v54  ;;  %v11628_v62 = vld [vmem:[%s14081_s10 + $0x4ce] sm:$0x8]  }
  0x65   : > { %v11612_v7 = vld [vmem:[%s14081_s10 + $0x53c] sm:$0x20]   ;;  %v2009_v16 = vsel %vm1449_vm3, %v11611_v3, %v2005_v10  ;;  %1882 = vrot.lane.b32.xlu0 %v1881_v14, %s14020_s15  ;;  %v11638_v46 = vld [vmem:[%s14081_s10 + $0x515] sm:$0x10]   ;;  %v2110_v53 = vsel %vm1445_vm2, %v11637_v45, %v2106_v50  ;;  %v11629_v63 = vld [vmem:[%s14081_s10 + $0x50d] sm:$0x10]   ;;  %v2071_v3 = vsel %vm1441_vm1, %v11627_v56, %v2067_v61 }
  0x66   : > { %v11613_v17 = vld [vmem:[%s14081_s10 + $0x57b] sm:$0x40]   ;;  %1742 = vrot.lane.b32.xlu2 %v1741_v15, %s14020_s15  ;;  %v2013_v21 = vsel %vm1453_vm4, %v11612_v7, %v2009_v16  ;;  %v11569_v49 = vld [vmem:[%s14081_s10 + $0x3d2] sm:$0x80]   ;;  %v2114_v59 = vsel %vm1449_vm3, %v11638_v46, %v2110_v53  ;;  %v11630_v4 = vld [vmem:[%s14081_s10 + $0x54c] sm:$0x20]   ;;  %v2075_v7 = vsel %vm1445_vm2, %v11628_v62, %v2071_v3 }
  0x67   : > { %v11614_v22 = vld [vmem:[%s14081_s10 + $0x5ba] sm:$0x80]   ;;  %v2017_v30 = vsel %vm1457_vm5, %v11613_v17, %v2013_v21  ;;  %v11639_v51 = vld [vmem:[%s14081_s10 + $0x554] sm:$0x20]   ;;  %v1846_v0 = vsel %vm1461_vm6, %v11569_v49, %v1842_v58  ;;  %v11631_v5 = vld [vmem:[%s14081_s10 + $0x58b] sm:$0x40]   ;;  %v2079_v12 = vsel %vm1449_vm3, %v11629_v63, %v2075_v7 }
  0x68   : > { %v2021_v47 = vsel %vm1461_vm6, %v11614_v22, %v2017_v30  ;;  %v11640_v60 = vld [vmem:[%s14081_s10 + $0x593] sm:$0x40]   ;;  %v2118_v1 = vsel %vm1453_vm4, %v11639_v51, %v2114_v59  ;;  %v11589_v6 = vld [vmem:[%s14081_s10 + $0x231] sm:$0x1]   ;;  %v2083_v17 = vsel %vm1453_vm4, %v11630_v4, %v2079_v12  ;;  %v11652_v35 = vld [vmem:[%s14081_s10 + $0x429] sm:$0x1]  }
  0x69   : > { %v11641_v2 = vld [vmem:[%s14081_s10 + $0x5d2] sm:$0x80]   ;;  %v11590_v8 = vld [vmem:[%s14081_s10 + $0x270] sm:$0x2]   ;;  %v2122_v11 = vsel %vm1457_vm5, %v11640_v60, %v2118_v1  ;;  %v2087_v22 = vsel %vm1457_vm5, %v11631_v5, %v2083_v17  ;;  %v11653_v36 = vld [vmem:[%s14081_s10 + $0x468] sm:$0x2]  }
  0x6a   : > { %2022 = vrot.lane.b32.xlu1 %v2021_v47, %s14020_s15  ;;  %v11591_v9 = vld [vmem:[%s14081_s10 + $0x2af] sm:$0x4]   ;;  %v1927_v14 = vsel %vm1437_vm0, %v11590_v8, %v11589_v6  ;;  %v2126_v28 = vsel %vm1461_vm6, %v11641_v2, %v2122_v11  ;;  %v11654_v37 = vld [vmem:[%s14081_s10 + $0x4a7] sm:$0x4]   ;;  %v2172_v42 = vsel %vm1437_vm0, %v11653_v36, %v11652_v35  ;;  %v11680_v17 = vld [vmem:[%s14081_s10 + $0x640] sm:$0x2]  }
  0x6b   : > { %v11592_v10 = vld [vmem:[%s14081_s10 + $0x2ee] sm:$0x8]   ;;  %v1931_v18 = vsel %vm1441_vm1, %v11591_v9, %v1927_v14  ;;  %v11655_v43 = vld [vmem:[%s14081_s10 + $0x4e6] sm:$0x8]   ;;  %v2176_v48 = vsel %vm1441_vm1, %v11654_v37, %v2172_v42  ;;  %v11645_v35 = vld [vmem:[%s14081_s10 + $0x49f] sm:$0x4]  }
  0x6c   : > { %v11632_v13 = vld [vmem:[%s14081_s10 + $0x5ca] sm:$0x80]   ;;  %v1935_v23 = vsel %vm1445_vm2, %v11592_v10, %v1931_v18  ;;  %v11656_v44 = vld [vmem:[%s14081_s10 + $0x525] sm:$0x10]   ;;  %v2180_v52 = vsel %vm1445_vm2, %v11655_v43, %v2176_v48  ;;  %v11681_v18 = vld [vmem:[%s14081_s10 + $0x67f] sm:$0x4]  }
  0x6d   : > { %1987 = vrot.lane.b32.xlu0 %v1986_v57, %s14020_s15  ;;  %v11593_v15 = vld [vmem:[%s14081_s10 + $0x32d] sm:$0x10]   ;;  %v2091_v38 = vsel %vm1461_vm6, %v11632_v13, %v2087_v22  ;;  %v11657_v49 = vld [vmem:[%s14081_s10 + $0x564] sm:$0x20]   ;;  %v2184_v57 = vsel %vm1449_vm3, %v11656_v44, %v2180_v52  ;;  %v11646_v36 = vld [vmem:[%s14081_s10 + $0x4de] sm:$0x8]  }
  0x6e   : > { %1847 = vrot.lane.b32.xlu2 %v1846_v0, %s14020_s15  ;;  %v11594_v16 = vld [vmem:[%s14081_s10 + $0x36c] sm:$0x20]   ;;  %v1939_v29 = vsel %vm1449_vm3, %v11593_v15, %v1935_v23  ;;  %v11658_v50 = vld [vmem:[%s14081_s10 + $0x5a3] sm:$0x40]   ;;  %v2188_v62 = vsel %vm1453_vm4, %v11657_v49, %v2184_v57  ;;  %v11648_v42 = vld [vmem:[%s14081_s10 + $0x55c] sm:$0x20]  }
  0x6f   : > { %v11595_v19 = vld [vmem:[%s14081_s10 + $0x3ab] sm:$0x40]   ;;  %v1943_v33 = vsel %vm1453_vm4, %v11594_v16, %v1939_v29  ;;  %v11616_v51 = vld [vmem:[%s14081_s10 + $0x409] sm:$0x1]   ;;  %v2192_v3 = vsel %vm1457_vm5, %v11658_v50, %v2188_v62  ;;  %v11679_v16 = vld [vmem:[%s14081_s10 + $0x601] sm:$0x1]  }
  0x70   : > { %v11661_v20 = vld [vmem:[%s14081_s10 + $0x431] sm:$0x1]   ;;  %v1947_v39 = vsel %vm1457_vm5, %v11595_v19, %v1943_v33  ;;  %v11617_v53 = vld [vmem:[%s14081_s10 + $0x448] sm:$0x2]   ;;  %v2277_v23 = vsel %vm1437_vm0, %v11680_v17, %v11679_v16  ;;  %v11718_v52 = vld [vmem:[%s14081_s10 + $0x6de] sm:$0x8]  }
  0x71   : > { %v11662_v21 = vld [vmem:[%s14081_s10 + $0x470] sm:$0x2]   ;;  %v11618_v54 = vld [vmem:[%s14081_s10 + $0x487] sm:$0x4]   ;;  %v2032_v59 = vsel %vm1437_vm0, %v11617_v53, %v11616_v51  ;;  %v2281_v29 = vsel %vm1441_vm1, %v11681_v18, %v2277_v23  ;;  %v11717_v51 = vld [vmem:[%s14081_s10 + $0x69f] sm:$0x4]  }
  0x72   : > { %v2207_v24 = vsel %vm1437_vm0, %v11662_v21, %v11661_v20  ;;  %v11663_v25 = vld [vmem:[%s14081_s10 + $0x4af] sm:$0x4]   ;;  %2127 = vrot.lane.b32.xlu1 %v2126_v28, %s14020_s15  ;;  %v11619_v55 = vld [vmem:[%s14081_s10 + $0x4c6] sm:$0x8]   ;;  %v2036_v63 = vsel %vm1441_vm1, %v11618_v54, %v2032_v59  ;;  %v11719_v53 = vld [vmem:[%s14081_s10 + $0x71d] sm:$0x10]  }
  0x73   : > { %v11664_v26 = vld [vmem:[%s14081_s10 + $0x4ee] sm:$0x8]   ;;  %v2211_v31 = vsel %vm1441_vm1, %v11663_v25, %v2207_v24  ;;  %v11659_v58 = vld [vmem:[%s14081_s10 + $0x5e2] sm:$0x80]   ;;  %v2040_v4 = vsel %vm1445_vm2, %v11619_v55, %v2036_v63  ;;  %v11682_v24 = vld [vmem:[%s14081_s10 + $0x6be] sm:$0x8]  }
  0x74   : > { %v11665_v27 = vld [vmem:[%s14081_s10 + $0x52d] sm:$0x10]   ;;  %v2215_v34 = vsel %vm1445_vm2, %v11664_v26, %v2211_v31  ;;  %v11620_v60 = vld [vmem:[%s14081_s10 + $0x505] sm:$0x10]   ;;  %v2196_v19 = vsel %vm1461_vm6, %v11659_v58, %v2192_v3  ;;  %v11683_v25 = vld [vmem:[%s14081_s10 + $0x6fd] sm:$0x10]   ;;  %v2285_v33 = vsel %vm1445_vm2, %v11682_v24, %v2281_v29 }
  0x75   : > { %v11596_v30 = vld [vmem:[%s14081_s10 + $0x3ea] sm:$0x80]   ;;  %v2219_v40 = vsel %vm1449_vm3, %v11665_v27, %v2215_v34  ;;  %2092 = vrot.lane.b32.xlu0 %v2091_v38, %s14020_s15  ;;  %v11621_v61 = vld [vmem:[%s14081_s10 + $0x544] sm:$0x20]   ;;  %v2044_v10 = vsel %vm1449_vm3, %v11620_v60, %v2040_v4  ;;  %v11685_v31 = vld [vmem:[%s14081_s10 + $0x77b] sm:$0x40]   ;;  %v2289_v38 = vsel %vm1449_vm3, %v11683_v25, %v2285_v33 }
  0x76   : > { %v11666_v32 = vld [vmem:[%s14081_s10 + $0x56c] sm:$0x20]   ;;  %v1951_v45 = vsel %vm1461_vm6, %v11596_v30, %v1947_v39  ;;  %v11622_v0 = vld [vmem:[%s14081_s10 + $0x583] sm:$0x40]   ;;  %v2048_v14 = vsel %vm1453_vm4, %v11621_v61, %v2044_v10  ;;  %v11684_v30 = vld [vmem:[%s14081_s10 + $0x73c] sm:$0x20]  }
  0x77   : > { %v11667_v41 = vld [vmem:[%s14081_s10 + $0x5ab] sm:$0x40]   ;;  %v2223_v46 = vsel %vm1453_vm4, %v11666_v32, %v2219_v40  ;;  %1952 = vrot.lane.b32.xlu2 %v1951_v45, %s14020_s15  ;;  %v11688_v1 = vld [vmem:[%s14081_s10 + $0x609] sm:$0x1]   ;;  %v2052_v20 = vsel %vm1457_vm5, %v11622_v0, %v2048_v14  ;;  %v11643_v32 = vld [vmem:[%s14081_s10 + $0x421] sm:$0x1]   ;;  %v2293_v43 = vsel %vm1453_vm4, %v11684_v30, %v2289_v38 }
  0x78   : > { %v11668_v47 = vld [vmem:[%s14081_s10 + $0x5ea] sm:$0x80]   ;;  %v2227_v56 = vsel %vm1457_vm5, %v11667_v41, %v2223_v46  ;;  %v11689_v2 = vld [vmem:[%s14081_s10 + $0x648] sm:$0x2]   ;;  %v11644_v34 = vld [vmem:[%s14081_s10 + $0x460] sm:$0x2]   ;;  %v2297_v48 = vsel %vm1457_vm5, %v11685_v31, %v2293_v43 }
  0x79   : > { %v2312_v5 = vsel %vm1437_vm0, %v11689_v2, %v11688_v1  ;;  %v11690_v6 = vld [vmem:[%s14081_s10 + $0x687] sm:$0x4]   ;;  %v2231_v9 = vsel %vm1461_vm6, %v11668_v47, %v2227_v56  ;;  %v11686_v39 = vld [vmem:[%s14081_s10 + $0x7ba] sm:$0x80]   ;;  %v2137_v40 = vsel %vm1437_vm0, %v11644_v34, %v11643_v32  ;;  %v11706_v61 = vld [vmem:[%s14081_s10 + $0x619] sm:$0x1]  }
  0x7a   : > { %v11691_v7 = vld [vmem:[%s14081_s10 + $0x6c6] sm:$0x8]   ;;  %v2316_v12 = vsel %vm1441_vm1, %v11690_v6, %v2312_v5  ;;  %2232 = vrot.lane.b32.xlu1 %v2231_v9, %s14020_s15  ;;  %v11647_v41 = vld [vmem:[%s14081_s10 + $0x51d] sm:$0x10]   ;;  %v2141_v44 = vsel %vm1441_vm1, %v11645_v35, %v2137_v40  ;;  %v11707_v62 = vld [vmem:[%s14081_s10 + $0x658] sm:$0x2]   ;;  %v2301_v0 = vsel %vm1461_vm6, %v11686_v39, %v2297_v48 }
  0x7b   : > { %v11692_v8 = vld [vmem:[%s14081_s10 + $0x705] sm:$0x10]   ;;  %v2320_v15 = vsel %vm1445_vm2, %v11691_v7, %v2316_v12  ;;  %v11649_v45 = vld [vmem:[%s14081_s10 + $0x59b] sm:$0x40]   ;;  %v2145_v49 = vsel %vm1445_vm2, %v11646_v36, %v2141_v44  ;;  %v11708_v63 = vld [vmem:[%s14081_s10 + $0x697] sm:$0x4]   ;;  %v2382_v4 = vsel %vm1437_vm0, %v11707_v62, %v11706_v61 }
  0x7c   : > { %v11623_v11 = vld [vmem:[%s14081_s10 + $0x5c2] sm:$0x80]   ;;  %v2324_v21 = vsel %vm1449_vm3, %v11692_v8, %v2320_v15  ;;  %v11715_v46 = vld [vmem:[%s14081_s10 + $0x621] sm:$0x1]   ;;  %v2149_v55 = vsel %vm1449_vm3, %v11647_v41, %v2145_v49  ;;  %v11709_v5 = vld [vmem:[%s14081_s10 + $0x6d6] sm:$0x8]   ;;  %v2386_v10 = vsel %vm1441_vm1, %v11708_v63, %v2382_v4 }
  0x7d   : > { %v11693_v13 = vld [vmem:[%s14081_s10 + $0x744] sm:$0x20]   ;;  %v2056_v26 = vsel %vm1461_vm6, %v11623_v11, %v2052_v20  ;;  %2197 = vrot.lane.b32.xlu0 %v2196_v19, %s14020_s15  ;;  %v11716_v47 = vld [vmem:[%s14081_s10 + $0x660] sm:$0x2]   ;;  %v2153_v59 = vsel %vm1453_vm4, %v11648_v42, %v2149_v55  ;;  %v11710_v6 = vld [vmem:[%s14081_s10 + $0x715] sm:$0x10]   ;;  %v2390_v14 = vsel %vm1445_vm2, %v11709_v5, %v2386_v10 }
  0x7e   : > { %v11694_v22 = vld [vmem:[%s14081_s10 + $0x783] sm:$0x40]   ;;  %v2328_v27 = vsel %vm1453_vm4, %v11693_v13, %v2324_v21  ;;  %v2417_v50 = vsel %vm1437_vm0, %v11716_v47, %v11715_v46  ;;  %v11650_v56 = vld [vmem:[%s14081_s10 + $0x5da] sm:$0x80]   ;;  %v2157_v1 = vsel %vm1457_vm5, %v11649_v45, %v2153_v59  ;;  %v11711_v11 = vld [vmem:[%s14081_s10 + $0x754] sm:$0x20]   ;;  %v2394_v19 = vsel %vm1449_vm3, %v11710_v6, %v2390_v14 }
  0x7f   : > { %v11695_v28 = vld [vmem:[%s14081_s10 + $0x7c2] sm:$0x80]   ;;  %2057 = vrot.lane.b32.xlu2 %v2056_v26, %s14020_s15  ;;  %v2332_v37 = vsel %vm1457_vm5, %v11694_v22, %v2328_v27  ;;  %v2421_v57 = vsel %vm1441_vm1, %v11717_v51, %v2417_v50  ;;  %v11720_v58 = vld [vmem:[%s14081_s10 + $0x75c] sm:$0x20]   ;;  %v2161_v7 = vsel %vm1461_vm6, %v11650_v56, %v2157_v1  ;;  %v11712_v12 = vld [vmem:[%s14081_s10 + $0x793] sm:$0x40]   ;;  %v2398_v24 = vsel %vm1453_vm4, %v11711_v11, %v2394_v19 }
  0x80   : > { %v2336_v54 = vsel %vm1461_vm6, %v11695_v28, %v2332_v37  ;;  %v2425_v60 = vsel %vm1445_vm2, %v11718_v52, %v2421_v57  ;;  %v11721_v3 = vld [vmem:[%s14081_s10 + $0x79b] sm:$0x40]   ;;  %v11670_v13 = vld [vmem:[%s14081_s10 + $0x439] sm:$0x1]   ;;  %v2402_v29 = vsel %vm1457_vm5, %v11712_v12, %v2398_v24  ;;  %v11733_v42 = vld [vmem:[%s14081_s10 + $0x631] sm:$0x1]  }
  0x81   : > { %v2429_v2 = vsel %vm1449_vm3, %v11719_v53, %v2425_v60  ;;  %v11722_v9 = vld [vmem:[%s14081_s10 + $0x7da] sm:$0x80]   ;;  %v11671_v15 = vld [vmem:[%s14081_s10 + $0x478] sm:$0x2]   ;;  %v11734_v43 = vld [vmem:[%s14081_s10 + $0x670] sm:$0x2]  }
  0x82   : > { %2337 = vrot.lane.b32.xlu1 %v2336_v54, %s14020_s15  ;;  %v2433_v8 = vsel %vm1453_vm4, %v11720_v58, %v2429_v2  ;;  %v11672_v16 = vld [vmem:[%s14081_s10 + $0x4b7] sm:$0x4]   ;;  %v2242_v21 = vsel %vm1437_vm0, %v11671_v15, %v11670_v13  ;;  %v11735_v44 = vld [vmem:[%s14081_s10 + $0x6af] sm:$0x4]   ;;  %v2487_v49 = vsel %vm1437_vm0, %v11734_v43, %v11733_v42  ;;  %v11761_v24 = vld [vmem:[%s14081_s10 + $0x848] sm:$0x2]  }
  0x83   : > { %v11673_v17 = vld [vmem:[%s14081_s10 + $0x4f6] sm:$0x8]   ;;  %v2437_v18 = vsel %vm1457_vm5, %v11721_v3, %v2433_v8  ;;  %v2246_v25 = vsel %vm1441_vm1, %v11672_v16, %v2242_v21  ;;  %v11736_v50 = vld [vmem:[%s14081_s10 + $0x6ee] sm:$0x8]   ;;  %v2491_v55 = vsel %vm1441_vm1, %v11735_v44, %v2487_v49  ;;  %v11726_v42 = vld [vmem:[%s14081_s10 + $0x6a7] sm:$0x4]  }
  0x84   : > { %v11713_v20 = vld [vmem:[%s14081_s10 + $0x7d2] sm:$0x80]   ;;  %v2250_v30 = vsel %vm1445_vm2, %v11673_v17, %v2246_v25  ;;  %v2441_v35 = vsel %vm1461_vm6, %v11722_v9, %v2437_v18  ;;  %v11737_v51 = vld [vmem:[%s14081_s10 + $0x72d] sm:$0x10]   ;;  %v2495_v59 = vsel %vm1445_vm2, %v11736_v50, %v2491_v55  ;;  %v11762_v25 = vld [vmem:[%s14081_s10 + $0x887] sm:$0x4]  }
  0x85   : > { %2302 = vrot.lane.b32.xlu0 %v2301_v0, %s14020_s15  ;;  %v11674_v22 = vld [vmem:[%s14081_s10 + $0x535] sm:$0x10]   ;;  %v2406_v45 = vsel %vm1461_vm6, %v11713_v20, %v2402_v29  ;;  %v11738_v56 = vld [vmem:[%s14081_s10 + $0x76c] sm:$0x20]   ;;  %v2499_v0 = vsel %vm1449_vm3, %v11737_v51, %v2495_v59  ;;  %v11727_v43 = vld [vmem:[%s14081_s10 + $0x6e6] sm:$0x8]  }
  0x86   : > { %v11675_v23 = vld [vmem:[%s14081_s10 + $0x574] sm:$0x20]   ;;  %v2254_v36 = vsel %vm1449_vm3, %v11674_v22, %v2250_v30  ;;  %v11739_v57 = vld [vmem:[%s14081_s10 + $0x7ab] sm:$0x40]   ;;  %v2503_v5 = vsel %vm1453_vm4, %v11738_v56, %v2499_v0  ;;  %v11729_v49 = vld [vmem:[%s14081_s10 + $0x764] sm:$0x20]  }
  0x87   : > { %2162 = vrot.lane.b32.xlu2 %v2161_v7, %s14020_s15  ;;  %v11676_v26 = vld [vmem:[%s14081_s10 + $0x5b3] sm:$0x40]   ;;  %v2258_v40 = vsel %vm1453_vm4, %v11675_v23, %v2254_v36  ;;  %v11697_v58 = vld [vmem:[%s14081_s10 + $0x611] sm:$0x1]   ;;  %v2507_v10 = vsel %vm1457_vm5, %v11739_v57, %v2503_v5  ;;  %v11760_v23 = vld [vmem:[%s14081_s10 + $0x809] sm:$0x1]  }
  0x88   : > { %v11742_v27 = vld [vmem:[%s14081_s10 + $0x639] sm:$0x1]   ;;  %v2262_v46 = vsel %vm1457_vm5, %v11676_v26, %v2258_v40  ;;  %v11698_v60 = vld [vmem:[%s14081_s10 + $0x650] sm:$0x2]   ;;  %v2592_v30 = vsel %vm1437_vm0, %v11761_v24, %v11760_v23  ;;  %v11799_v59 = vld [vmem:[%s14081_s10 + $0x8e6] sm:$0x8]  }
  0x89   : > { %v11743_v28 = vld [vmem:[%s14081_s10 + $0x678] sm:$0x2]   ;;  %v11699_v61 = vld [vmem:[%s14081_s10 + $0x68f] sm:$0x4]   ;;  %v2347_v2 = vsel %vm1437_vm0, %v11698_v60, %v11697_v58  ;;  %v2596_v36 = vsel %vm1441_vm1, %v11762_v25, %v2592_v30  ;;  %v11798_v58 = vld [vmem:[%s14081_s10 + $0x8a7] sm:$0x4]  }
  0x8a   : > { %v2522_v31 = vsel %vm1437_vm0, %v11743_v28, %v11742_v27  ;;  %v11744_v32 = vld [vmem:[%s14081_s10 + $0x6b7] sm:$0x4]   ;;  %2442 = vrot.lane.b32.xlu1 %v2441_v35, %s14020_s15  ;;  %v11700_v62 = vld [vmem:[%s14081_s10 + $0x6ce] sm:$0x8]   ;;  %v2351_v6 = vsel %vm1441_vm1, %v11699_v61, %v2347_v2  ;;  %v11800_v60 = vld [vmem:[%s14081_s10 + $0x925] sm:$0x10]  }
  0x8b   : > { %v11745_v33 = vld [vmem:[%s14081_s10 + $0x6f6] sm:$0x8]   ;;  %v2526_v38 = vsel %vm1441_vm1, %v11744_v32, %v2522_v31  ;;  %v11740_v1 = vld [vmem:[%s14081_s10 + $0x7ea] sm:$0x80]   ;;  %v2355_v11 = vsel %vm1445_vm2, %v11700_v62, %v2351_v6  ;;  %v11763_v31 = vld [vmem:[%s14081_s10 + $0x8c6] sm:$0x8]  }
  0x8c   : > { %v11746_v34 = vld [vmem:[%s14081_s10 + $0x735] sm:$0x10]   ;;  %v2530_v41 = vsel %vm1445_vm2, %v11745_v33, %v2526_v38  ;;  %v11701_v3 = vld [vmem:[%s14081_s10 + $0x70d] sm:$0x10]   ;;  %v2511_v26 = vsel %vm1461_vm6, %v11740_v1, %v2507_v10  ;;  %v11764_v32 = vld [vmem:[%s14081_s10 + $0x905] sm:$0x10]   ;;  %v2600_v40 = vsel %vm1445_vm2, %v11763_v31, %v2596_v36 }
  0x8d   : > { %v11677_v37 = vld [vmem:[%s14081_s10 + $0x5f2] sm:$0x80]   ;;  %v2534_v47 = vsel %vm1449_vm3, %v11746_v34, %v2530_v41  ;;  %2407 = vrot.lane.b32.xlu0 %v2406_v45, %s14020_s15  ;;  %v11702_v4 = vld [vmem:[%s14081_s10 + $0x74c] sm:$0x20]   ;;  %v2359_v17 = vsel %vm1449_vm3, %v11701_v3, %v2355_v11  ;;  %v11766_v38 = vld [vmem:[%s14081_s10 + $0x983] sm:$0x40]   ;;  %v2604_v45 = vsel %vm1449_vm3, %v11764_v32, %v2600_v40 }
  0x8e   : > { %v11747_v39 = vld [vmem:[%s14081_s10 + $0x774] sm:$0x20]   ;;  %v2266_v52 = vsel %vm1461_vm6, %v11677_v37, %v2262_v46  ;;  %v11703_v7 = vld [vmem:[%s14081_s10 + $0x78b] sm:$0x40]   ;;  %v2363_v21 = vsel %vm1453_vm4, %v11702_v4, %v2359_v17  ;;  %v11765_v37 = vld [vmem:[%s14081_s10 + $0x944] sm:$0x20]  }
  0x8f   : > { %v11748_v48 = vld [vmem:[%s14081_s10 + $0x7b3] sm:$0x40]   ;;  %v2538_v53 = vsel %vm1453_vm4, %v11747_v39, %v2534_v47  ;;  %2267 = vrot.lane.b32.xlu2 %v2266_v52, %s14020_s15  ;;  %v11769_v8 = vld [vmem:[%s14081_s10 + $0x811] sm:$0x1]   ;;  %v2367_v27 = vsel %vm1457_vm5, %v11703_v7, %v2363_v21  ;;  %v11724_v39 = vld [vmem:[%s14081_s10 + $0x629] sm:$0x1]   ;;  %v2608_v50 = vsel %vm1453_vm4, %v11765_v37, %v2604_v45 }
  0x90   : > { %v11749_v54 = vld [vmem:[%s14081_s10 + $0x7f2] sm:$0x80]   ;;  %v2542_v63 = vsel %vm1457_vm5, %v11748_v48, %v2538_v53  ;;  %v11770_v9 = vld [vmem:[%s14081_s10 + $0x850] sm:$0x2]   ;;  %v11725_v41 = vld [vmem:[%s14081_s10 + $0x668] sm:$0x2]   ;;  %v2612_v55 = vsel %vm1457_vm5, %v11766_v38, %v2608_v50 }
  0x91   : > { %v2627_v12 = vsel %vm1437_vm0, %v11770_v9, %v11769_v8  ;;  %v11771_v13 = vld [vmem:[%s14081_s10 + $0x88f] sm:$0x4]   ;;  %v2546_v16 = vsel %vm1461_vm6, %v11749_v54, %v2542_v63  ;;  %v11767_v46 = vld [vmem:[%s14081_s10 + $0x9c2] sm:$0x80]   ;;  %v2452_v47 = vsel %vm1437_vm0, %v11725_v41, %v11724_v39  ;;  %v11787_v4 = vld [vmem:[%s14081_s10 + $0x821] sm:$0x1]  }
  0x92   : > { %v11772_v14 = vld [vmem:[%s14081_s10 + $0x8ce] sm:$0x8]   ;;  %v2631_v19 = vsel %vm1441_vm1, %v11771_v13, %v2627_v12  ;;  %2547 = vrot.lane.b32.xlu1 %v2546_v16, %s14020_s15  ;;  %v11728_v48 = vld [vmem:[%s14081_s10 + $0x725] sm:$0x10]   ;;  %v2456_v51 = vsel %vm1441_vm1, %v11726_v42, %v2452_v47  ;;  %v11788_v5 = vld [vmem:[%s14081_s10 + $0x860] sm:$0x2]   ;;  %v2616_v7 = vsel %vm1461_vm6, %v11767_v46, %v2612_v55 }
  0x93   : > { %v11773_v15 = vld [vmem:[%s14081_s10 + $0x90d] sm:$0x10]   ;;  %v2635_v22 = vsel %vm1445_vm2, %v11772_v14, %v2631_v19  ;;  %v11730_v52 = vld [vmem:[%s14081_s10 + $0x7a3] sm:$0x40]   ;;  %v2460_v56 = vsel %vm1445_vm2, %v11727_v43, %v2456_v51  ;;  %v11789_v6 = vld [vmem:[%s14081_s10 + $0x89f] sm:$0x4]   ;;  %v2697_v11 = vsel %vm1437_vm0, %v11788_v5, %v11787_v4 }
  0x94   : > { %v11704_v18 = vld [vmem:[%s14081_s10 + $0x7ca] sm:$0x80]   ;;  %v2639_v28 = vsel %vm1449_vm3, %v11773_v15, %v2635_v22  ;;  %v11796_v53 = vld [vmem:[%s14081_s10 + $0x829] sm:$0x1]   ;;  %v2464_v62 = vsel %vm1449_vm3, %v11728_v48, %v2460_v56  ;;  %v11790_v12 = vld [vmem:[%s14081_s10 + $0x8de] sm:$0x8]   ;;  %v2701_v17 = vsel %vm1441_vm1, %v11789_v6, %v2697_v11 }
  0x95   : > { %v11774_v20 = vld [vmem:[%s14081_s10 + $0x94c] sm:$0x20]   ;;  %v2371_v33 = vsel %vm1461_vm6, %v11704_v18, %v2367_v27  ;;  %2512 = vrot.lane.b32.xlu0 %v2511_v26, %s14020_s15  ;;  %v11797_v54 = vld [vmem:[%s14081_s10 + $0x868] sm:$0x2]   ;;  %v2468_v2 = vsel %vm1453_vm4, %v11729_v49, %v2464_v62  ;;  %v11791_v13 = vld [vmem:[%s14081_s10 + $0x91d] sm:$0x10]   ;;  %v2705_v21 = vsel %vm1445_vm2, %v11790_v12, %v2701_v17 }
  0x96   : > { %v11775_v29 = vld [vmem:[%s14081_s10 + $0x98b] sm:$0x40]   ;;  %v2643_v34 = vsel %vm1453_vm4, %v11774_v20, %v2639_v28  ;;  %v2732_v57 = vsel %vm1437_vm0, %v11797_v54, %v11796_v53  ;;  %v11731_v63 = vld [vmem:[%s14081_s10 + $0x7e2] sm:$0x80]   ;;  %v2472_v8 = vsel %vm1457_vm5, %v11730_v52, %v2468_v2  ;;  %v11792_v18 = vld [vmem:[%s14081_s10 + $0x95c] sm:$0x20]   ;;  %v2709_v26 = vsel %vm1449_vm3, %v11791_v13, %v2705_v21 }
  0x97   : > { %v11776_v35 = vld [vmem:[%s14081_s10 + $0x9ca] sm:$0x80]   ;;  %2372 = vrot.lane.b32.xlu2 %v2371_v33, %s14020_s15  ;;  %v2647_v44 = vsel %vm1457_vm5, %v11775_v29, %v2643_v34  ;;  %v2736_v0 = vsel %vm1441_vm1, %v11798_v58, %v2732_v57  ;;  %v11801_v1 = vld [vmem:[%s14081_s10 + $0x964] sm:$0x20]   ;;  %v2476_v14 = vsel %vm1461_vm6, %v11731_v63, %v2472_v8  ;;  %v11793_v19 = vld [vmem:[%s14081_s10 + $0x99b] sm:$0x40]   ;;  %v2713_v31 = vsel %vm1453_vm4, %v11792_v18, %v2709_v26 }
  0x98   : > { %v2651_v61 = vsel %vm1461_vm6, %v11776_v35, %v2647_v44  ;;  %v2740_v3 = vsel %vm1445_vm2, %v11799_v59, %v2736_v0  ;;  %v11802_v10 = vld [vmem:[%s14081_s10 + $0x9a3] sm:$0x40]   ;;  %v11751_v20 = vld [vmem:[%s14081_s10 + $0x801] sm:$0x1]   ;;  %v2717_v36 = vsel %vm1457_vm5, %v11793_v19, %v2713_v31  ;;  %v11814_v49 = vld [vmem:[%s14081_s10 + $0x839] sm:$0x1]  }
  0x99   : > { %v2744_v9 = vsel %vm1449_vm3, %v11800_v60, %v2740_v3  ;;  %v11803_v16 = vld [vmem:[%s14081_s10 + $0x9e2] sm:$0x80]   ;;  %v11752_v22 = vld [vmem:[%s14081_s10 + $0x840] sm:$0x2]   ;;  %v11815_v50 = vld [vmem:[%s14081_s10 + $0x878] sm:$0x2]  }
  0x9a   : > { %2652 = vrot.lane.b32.xlu1 %v2651_v61, %s14020_s15  ;;  %v2748_v15 = vsel %vm1453_vm4, %v11801_v1, %v2744_v9  ;;  %v11753_v23 = vld [vmem:[%s14081_s10 + $0x87f] sm:$0x4]   ;;  %v2557_v28 = vsel %vm1437_vm0, %v11752_v22, %v11751_v20  ;;  %v11816_v51 = vld [vmem:[%s14081_s10 + $0x8b7] sm:$0x4]   ;;  %v2802_v56 = vsel %vm1437_vm0, %v11815_v50, %v11814_v49  ;;  %v11842_v31 = vld [vmem:[%s14081_s10 + $0xa50] sm:$0x2]  }
  0x9b   : > { %v11754_v24 = vld [vmem:[%s14081_s10 + $0x8be] sm:$0x8]   ;;  %v2752_v25 = vsel %vm1457_vm5, %v11802_v10, %v2748_v15  ;;  %v2561_v32 = vsel %vm1441_vm1, %v11753_v23, %v2557_v28  ;;  %v11817_v57 = vld [vmem:[%s14081_s10 + $0x8f6] sm:$0x8]   ;;  %v2806_v62 = vsel %vm1441_vm1, %v11816_v51, %v2802_v56  ;;  %v11848_v51 = vld [vmem:[%s14081_s10 + $0xbca] sm:$0x80]  }
  0x9c   : > { %v11794_v27 = vld [vmem:[%s14081_s10 + $0x9da] sm:$0x80]   ;;  %v2565_v37 = vsel %vm1445_vm2, %v11754_v24, %v2561_v32  ;;  %v2756_v42 = vsel %vm1461_vm6, %v11803_v16, %v2752_v25  ;;  %v11818_v58 = vld [vmem:[%s14081_s10 + $0x935] sm:$0x10]   ;;  %v2810_v2 = vsel %vm1445_vm2, %v11817_v57, %v2806_v62  ;;  %v11843_v32 = vld [vmem:[%s14081_s10 + $0xa8f] sm:$0x4]  }
  0x9d   : > { %2617 = vrot.lane.b32.xlu0 %v2616_v7, %s14020_s15  ;;  %v11755_v29 = vld [vmem:[%s14081_s10 + $0x8fd] sm:$0x10]   ;;  %v2721_v52 = vsel %vm1461_vm6, %v11794_v27, %v2717_v36  ;;  %v11819_v63 = vld [vmem:[%s14081_s10 + $0x974] sm:$0x20]   ;;  %v2814_v7 = vsel %vm1449_vm3, %v11818_v58, %v2810_v2  ;;  %v10942_v57 = vld [vmem:[%s14081_s10 + $0x120] ss:$2 sm:$0xff]  }
  0x9e   : > { %v11756_v30 = vld [vmem:[%s14081_s10 + $0x93c] sm:$0x20]   ;;  %v2569_v43 = vsel %vm1449_vm3, %v11755_v29, %v2565_v37  ;;  %v11820_v0 = vld [vmem:[%s14081_s10 + $0x9b3] sm:$0x40]   ;;  %v2818_v12 = vsel %vm1453_vm4, %v11819_v63, %v2814_v7  ;;  %v10978_v62 = vld [vmem:[%s14081_s10 + $0x1e0] ss:$2 sm:$0xff]  }
  0x9f   : > { %2477 = vrot.lane.b32.xlu2 %v2476_v14, %s14020_s15  ;;  %v11757_v33 = vld [vmem:[%s14081_s10 + $0x97b] sm:$0x40]   ;;  %v2573_v47 = vsel %vm1453_vm4, %v11756_v30, %v2569_v43  ;;  %v11778_v1 = vld [vmem:[%s14081_s10 + $0x819] sm:$0x1]   ;;  %v2822_v17 = vsel %vm1457_vm5, %v11820_v0, %v2818_v12  ;;  %v11841_v30 = vld [vmem:[%s14081_s10 + $0xa11] sm:$0x1]  }
  0xa0   : > { %v11823_v34 = vld [vmem:[%s14081_s10 + $0xa01] sm:$0x1]   ;;  %v2577_v53 = vsel %vm1457_vm5, %v11757_v33, %v2573_v47  ;;  %v11779_v3 = vld [vmem:[%s14081_s10 + $0x858] sm:$0x2]   ;;  %v2907_v37 = vsel %vm1437_vm0, %v11842_v31, %v11841_v30  ;;  %v10894_v47 = vld [vmem:[%s14081_s10 + $0x20] ss:$2 sm:$0xff]  }
  0xa1   : > { %v11824_v35 = vld [vmem:[%s14081_s10 + $0xa40] sm:$0x2]   ;;  %v11780_v4 = vld [vmem:[%s14081_s10 + $0x897] sm:$0x4]   ;;  %v2662_v9 = vsel %vm1437_vm0, %v11779_v3, %v11778_v1  ;;  %v2911_v43 = vsel %vm1441_vm1, %v11843_v32, %v2907_v37  ;;  %v10891_v1 = vld [vmem:[%s14081_s10 + $0x10] ss:$2 sm:$0xff]  }
  0xa2   : > { %v2837_v38 = vsel %vm1437_vm0, %v11824_v35, %v11823_v34  ;;  %v11825_v39 = vld [vmem:[%s14081_s10 + $0xa7f] sm:$0x4]   ;;  %2757 = vrot.lane.b32.xlu1 %v2756_v42, %s14020_s15  ;;  %v11781_v5 = vld [vmem:[%s14081_s10 + $0x8d6] sm:$0x8]   ;;  %v2666_v13 = vsel %vm1441_vm1, %v11780_v4, %v2662_v9  ;;  %v10903_v2 = vld [vmem:[%s14081_s10 + $0x50] ss:$2 sm:$0xff]  }
  0xa3   : > { %v11826_v40 = vld [vmem:[%s14081_s10 + $0xabe] sm:$0x8]   ;;  %v2841_v45 = vsel %vm1441_vm1, %v11825_v39, %v2837_v38  ;;  %v11821_v8 = vld [vmem:[%s14081_s10 + $0x9f2] sm:$0x80]   ;;  %v2670_v18 = vsel %vm1445_vm2, %v11781_v5, %v2666_v13  ;;  %v11844_v38 = vld [vmem:[%s14081_s10 + $0xace] sm:$0x8]  }
  0xa4   : > { %v11827_v41 = vld [vmem:[%s14081_s10 + $0xafd] sm:$0x10]   ;;  %v2845_v48 = vsel %vm1445_vm2, %v11826_v40, %v2841_v45  ;;  %v11782_v10 = vld [vmem:[%s14081_s10 + $0x915] sm:$0x10]   ;;  %v2826_v33 = vsel %vm1461_vm6, %v11821_v8, %v2822_v17  ;;  %v11845_v39 = vld [vmem:[%s14081_s10 + $0xb0d] sm:$0x10]  }
  0xa5   : > { %v11758_v44 = vld [vmem:[%s14081_s10 + $0x9ba] sm:$0x80]   ;;  %v2849_v54 = vsel %vm1449_vm3, %v11827_v41, %v2845_v48  ;;  %2722 = vrot.lane.b32.xlu0 %v2721_v52, %s14020_s15  ;;  %v11783_v11 = vld [vmem:[%s14081_s10 + $0x954] sm:$0x20]   ;;  %v2674_v24 = vsel %vm1449_vm3, %v11782_v10, %v2670_v18  ;;  %v11847_v45 = vld [vmem:[%s14081_s10 + $0xb8b] sm:$0x40]  }
  0xa6   : > { %v11828_v46 = vld [vmem:[%s14081_s10 + $0xb3c] sm:$0x20]   ;;  %v2581_v59 = vsel %vm1461_vm6, %v11758_v44, %v2577_v53  ;;  %v11784_v14 = vld [vmem:[%s14081_s10 + $0x993] sm:$0x40]   ;;  %v2678_v28 = vsel %vm1453_vm4, %v11783_v11, %v2674_v24  ;;  %v11846_v44 = vld [vmem:[%s14081_s10 + $0xb4c] sm:$0x20]  }
  0xa7   : > { %v11829_v55 = vld [vmem:[%s14081_s10 + $0xb7b] sm:$0x40]   ;;  %v2853_v60 = vsel %vm1453_vm4, %v11828_v46, %v2849_v54  ;;  %2582 = vrot.lane.b32.xlu2 %v2581_v59, %s14020_s15  ;;  %v11850_v15 = vld [vmem:[%s14081_s10 + $0xa19] sm:$0x1]   ;;  %v2682_v34 = vsel %vm1457_vm5, %v11784_v14, %v2678_v28  ;;  %v2915_v46 = vsel %vm1445_vm2, %v11844_v38, %v2911_v43  ;;  %v10906_v48 = vld [vmem:[%s14081_s10 + $0x60] ss:$2 sm:$0xff]  }
  0xa8   : > { %v11830_v61 = vld [vmem:[%s14081_s10 + $0xbba] sm:$0x80]   ;;  %v2857_v6 = vsel %vm1457_vm5, %v11829_v55, %v2853_v60  ;;  %v11851_v16 = vld [vmem:[%s14081_s10 + $0xa58] sm:$0x2]   ;;  %v2919_v50 = vsel %vm1449_vm3, %v11845_v39, %v2915_v46  ;;  %v10918_v53 = vld [vmem:[%s14081_s10 + $0xa0] ss:$2 sm:$0xff]  }
  0xa9   : > { %v2942_v19 = vsel %vm1437_vm0, %v11851_v16, %v11850_v15  ;;  %v11852_v20 = vld [vmem:[%s14081_s10 + $0xa97] sm:$0x4]   ;;  %v2861_v23 = vsel %vm1461_vm6, %v11830_v61, %v2857_v6  ;;  %10895 = vst.msk [vmem:[%s14087_s14 + $0x80] ss:$8 sm:$0xf] %vm93_vm7, %v10894_v47   ;;  %v2923_v54 = vsel %vm1453_vm4, %v11846_v44, %v2919_v50 }
  0xaa   : > { %v11853_v21 = vld [vmem:[%s14081_s10 + $0xad6] sm:$0x8]   ;;  %v2946_v26 = vsel %vm1441_vm1, %v11852_v20, %v2942_v19  ;;  %2862 = vrot.lane.b32.xlu1 %v2861_v23, %s14020_s15  ;;  %v1603_v52 = vpop.permute.xlu2 %1602   ;;  %10907 = vst.msk [vmem:[%s14087_s14 + $0x81] ss:$8 sm:$0xf] %vm93_vm7, %v10906_v48   ;;  %v2927_v56 = vsel %vm1457_vm5, %v11847_v45, %v2923_v54 }
  0xab   : > { %v11854_v22 = vld [vmem:[%s14081_s10 + $0xb15] sm:$0x10]   ;;  %v2950_v29 = vsel %vm1445_vm2, %v11853_v21, %v2946_v26  ;;  %v10930_v55 = vld [vmem:[%s14081_s10 + $0xe0] ss:$2 sm:$0xff]   ;;  %v2931_v61 = vsel %vm1461_vm6, %v11848_v51, %v2927_v56  ;;  %v10915_v3 = vld [vmem:[%s14081_s10 + $0x90] ss:$2 sm:$0xff]  }
  0xac   : > { %v11785_v25 = vld [vmem:[%s14081_s10 + $0x9d2] sm:$0x80]   ;;  %v2954_v35 = vsel %vm1449_vm3, %v11854_v22, %v2950_v29  ;;  %10919 = vst.msk [vmem:[%s14087_s14 + $0x82] ss:$8 sm:$0xf] %vm93_vm7, %v10918_v53  }
  0xad   : > { %v11855_v27 = vld [vmem:[%s14081_s10 + $0xb54] sm:$0x20]   ;;  %v2686_v40 = vsel %vm1461_vm6, %v11785_v25, %v2682_v34  ;;  %2827 = vrot.lane.b32.xlu0 %v2826_v33, %s14020_s15  ;;  %10931 = vst.msk [vmem:[%s14087_s14 + $0x83] ss:$8 sm:$0xf] %vm93_vm7, %v10930_v55  }
  0xae   : > { %v11856_v36 = vld [vmem:[%s14081_s10 + $0xb93] sm:$0x40]   ;;  %v2958_v41 = vsel %vm1453_vm4, %v11855_v27, %v2954_v35  ;;  %v10954_v59 = vld [vmem:[%s14081_s10 + $0x160] ss:$2 sm:$0xff]   ;;  %v10927_v4 = vld [vmem:[%s14081_s10 + $0xd0] ss:$2 sm:$0xff]  }
  0xaf   : > { %v11857_v42 = vld [vmem:[%s14081_s10 + $0xbd2] sm:$0x80]   ;;  %2687 = vrot.lane.b32.xlu2 %v2686_v40, %s14020_s15  ;;  %v2962_v49 = vsel %vm1457_vm5, %v11856_v36, %v2958_v41  ;;  %10943 = vst.msk [vmem:[%s14087_s14 + $0x84] ss:$8 sm:$0xf] %vm93_vm7, %v10942_v57  }
  0xb0   : > { %v2966_v58 = vsel %vm1461_vm6, %v11857_v42, %v2962_v49  ;;  %v10966_v60 = vld [vmem:[%s14081_s10 + $0x1a0] ss:$2 sm:$0xff]   ;;  %10955 = vst.msk [vmem:[%s14087_s14 + $0x85] ss:$8 sm:$0xf] %vm93_vm7, %v10954_v59  }
  0xb1   : > { %10967 = vst.msk [vmem:[%s14087_s14 + $0x86] ss:$8 sm:$0xf] %vm93_vm7, %v10966_v60   ;;  %v10939_v5 = vld [vmem:[%s14081_s10 + $0x110] ss:$2 sm:$0xff]  }
  0xb2   : > { %2967 = vrot.lane.b32.xlu1 %v2966_v58, %s14020_s15  ;;  %10979 = vst.msk [vmem:[%s14087_s14 + $0x87] ss:$8 sm:$0xf] %vm93_vm7, %v10978_v62   ;;  %v1533_v63 = vpop.permute.xlu1 %1532   ;;  %v10951_v6 = vld [vmem:[%s14081_s10 + $0x150] ss:$2 sm:$0xff]  }
  0xb3   : > { %11507 = vst.msk [vmem:[%s14087_s14 + $0x80] sm:$0xff] %vm1465_vm8, %v1603_v52   ;;  %v10963_v9 = vld [vmem:[%s14081_s10 + $0x190] ss:$2 sm:$0xff]   ;;  %v11805_v12 = vld [vmem:[%s14081_s10 + $0x831] sm:$0x1]  }
  0xb4   : > { %10896 = vst.msk [vmem:[%s14087_s14 + $0x80] ss:$8 sm:$0xf0] %vm93_vm7, %v10894_v47   ;;  %v14792_v0 = vpop.permute.xlu0 %1463   ;;  %v10975_v11 = vld [vmem:[%s14081_s10 + $0x1d0] ss:$2 sm:$0xff]  }
  0xb5   : > { %2932 = vrot.lane.b32.xlu0 %v2931_v61, %s14020_s15  ;;  %10908 = vst.msk [vmem:[%s14087_s14 + $0x81] ss:$8 sm:$0xf0] %vm93_vm7, %v10906_v48   ;;  %v11806_v13 = vld [vmem:[%s14081_s10 + $0x870] sm:$0x2]  }
  0xb6   : > { %10920 = vst.msk [vmem:[%s14087_s14 + $0x82] ss:$8 sm:$0xf0] %vm93_vm7, %v10918_v53   ;;  %v2767_v14 = vsel %vm1437_vm0, %v11806_v13, %v11805_v12  ;;  %v11807_v15 = vld [vmem:[%s14081_s10 + $0x8af] sm:$0x4]  }
  0xb7   : > { %10932 = vst.msk [vmem:[%s14087_s14 + $0x83] ss:$8 sm:$0xf0] %vm93_vm7, %v10930_v55   ;;  %v2771_v16 = vsel %vm1441_vm1, %v11807_v15, %v2767_v14  ;;  %v11808_v17 = vld [vmem:[%s14081_s10 + $0x8ee] sm:$0x8]  }
  0xb8   : > { %10944 = vst.msk [vmem:[%s14087_s14 + $0x84] ss:$8 sm:$0xf0] %vm93_vm7, %v10942_v57   ;;  %v14816_v7 = vpop.permute.xlu2 %1637   ;;  %v2775_v18 = vsel %vm1445_vm2, %v11808_v17, %v2771_v16  ;;  %v11809_v19 = vld [vmem:[%s14081_s10 + $0x92d] sm:$0x10]  }
  0xb9   : > { %10956 = vst.msk [vmem:[%s14087_s14 + $0x85] ss:$8 sm:$0xf0] %vm93_vm7, %v10954_v59   ;;  %v11810_v20 = vld [vmem:[%s14081_s10 + $0x96c] sm:$0x20]   ;;  %v2779_v21 = vsel %vm1449_vm3, %v11809_v19, %v2775_v18 }
  0xba   : > { %10968 = vst.msk [vmem:[%s14087_s14 + $0x86] ss:$8 sm:$0xf0] %vm93_vm7, %v10966_v60   ;;  %v14818_v8 = vpop.permute.xlu1 %1567   ;;  %v11811_v22 = vld [vmem:[%s14081_s10 + $0x9ab] sm:$0x40]   ;;  %v2783_v23 = vsel %vm1453_vm4, %v11810_v20, %v2779_v21 }
  0xbb   : > { %10980 = vst.msk [vmem:[%s14087_s14 + $0x87] ss:$8 sm:$0xf0] %vm93_vm7, %v10978_v62   ;;  %v11812_v24 = vld [vmem:[%s14081_s10 + $0x9ea] sm:$0x80]   ;;  %v2787_v25 = vsel %vm1457_vm5, %v11811_v22, %v2783_v23 }
  0xbc   : > { %10892 = vst.msk [vmem:[%s14087_s14 + $0x40] ss:$8 sm:$0xf] %vm93_vm7, %v10891_v1   ;;  %v14823_v10 = vpop.permute.xlu0 %1497   ;;  %v11877_v26 = vld [vmem:[%s14081_s10 + $0xa31] sm:$0x1]   ;;  %v2791_v28 = vsel %vm1461_vm6, %v11812_v24, %v2787_v25 }
  0xbd   : > { %10904 = vst.msk [vmem:[%s14087_s14 + $0x41] ss:$8 sm:$0xf] %vm93_vm7, %v10903_v2   ;;  %v92_v27 = vld [vmem:[%s14081_s10] ss:$2 sm:$0xff]   ;;  %2792 = vrot.lane.b32.xlu2 %v2791_v28, %s14020_s15 }
  0xbe   : > { %10916 = vst.msk [vmem:[%s14087_s14 + $0x42] ss:$8 sm:$0xf] %vm93_vm7, %v10915_v3   ;;  %v11878_v29 = vld [vmem:[%s14081_s10 + $0xa70] sm:$0x2]  }
  0xbf   : > { %10928 = vst.msk [vmem:[%s14087_s14 + $0x43] ss:$8 sm:$0xf] %vm93_vm7, %v10927_v4   ;;  %v10900_v30 = vld [vmem:[%s14081_s10 + $0x40] ss:$2 sm:$0xff]   ;;  %v3047_v31 = vsel %vm1437_vm0, %v11878_v29, %v11877_v26 }
  0xc0   : > { %10940 = vst.msk [vmem:[%s14087_s14 + $0x44] ss:$8 sm:$0xf] %vm93_vm7, %v10939_v5   ;;  %v11879_v32 = vld [vmem:[%s14081_s10 + $0xaaf] sm:$0x4]   ;;  %v14875_v36 = vpop.permute.xlu2 %1742  }
  0xc1   : > { %10952 = vst.msk [vmem:[%s14087_s14 + $0x45] ss:$8 sm:$0xf] %vm93_vm7, %v10951_v6   ;;  %v10912_v33 = vld [vmem:[%s14081_s10 + $0x80] ss:$2 sm:$0xff]   ;;  %v3051_v34 = vsel %vm1441_vm1, %v11879_v32, %v3047_v31 }
  0xc2   : > { %10964 = vst.msk [vmem:[%s14087_s14 + $0x46] ss:$8 sm:$0xf] %vm93_vm7, %v10963_v9   ;;  %v11880_v35 = vld [vmem:[%s14081_s10 + $0xaee] sm:$0x8]   ;;  %v14892_v46 = vpop.permute.xlu1 %1707  }
  0xc3   : > { %10976 = vst.msk [vmem:[%s14087_s14 + $0x47] ss:$8 sm:$0xf] %vm93_vm7, %v10975_v11   ;;  %v10924_v37 = vld [vmem:[%s14081_s10 + $0xc0] ss:$2 sm:$0xff]   ;;  %v3055_v38 = vsel %vm1445_vm2, %v11880_v35, %v3051_v34 }
  0xc4   : > { %11489 = vst.msk [vmem:[%s14087_s14 + $0x40] sm:$0xff] %vm1465_vm8, %v1533_v63   ;;  %v11881_v39 = vld [vmem:[%s14081_s10 + $0xb2d] sm:$0x10]   ;;  %v10936_v40 = vld [vmem:[%s14081_s10 + $0x100] ss:$2 sm:$0xff]  }
  0xc5   : > { %10893 = vst.msk [vmem:[%s14087_s14 + $0x40] ss:$8 sm:$0xf0] %vm93_vm7, %v10891_v1   ;;  %v3059_v41 = vsel %vm1449_vm3, %v11881_v39, %v3055_v38  ;;  %v11882_v42 = vld [vmem:[%s14081_s10 + $0xb6c] sm:$0x20]  }
  0xc6   : > { %10905 = vst.msk [vmem:[%s14087_s14 + $0x41] ss:$8 sm:$0xf0] %vm93_vm7, %v10903_v2   ;;  %v10948_v43 = vld [vmem:[%s14081_s10 + $0x140] ss:$2 sm:$0xff]   ;;  %v3063_v44 = vsel %vm1453_vm4, %v11882_v42, %v3059_v41 }
  0xc7   : > { %10917 = vst.msk [vmem:[%s14087_s14 + $0x42] ss:$8 sm:$0xf0] %vm93_vm7, %v10915_v3   ;;  %v11883_v45 = vld [vmem:[%s14081_s10 + $0xbab] sm:$0x40]  }
  0xc8   : > { %10929 = vst.msk [vmem:[%s14087_s14 + $0x43] ss:$8 sm:$0xf0] %vm93_vm7, %v10927_v4   ;;  %v10960_v47 = vld [vmem:[%s14081_s10 + $0x180] ss:$2 sm:$0xff]   ;;  %v3067_v48 = vsel %vm1457_vm5, %v11883_v45, %v3063_v44 }
  0xc9   : > { %10941 = vst.msk [vmem:[%s14087_s14 + $0x44] ss:$8 sm:$0xf0] %vm93_vm7, %v10939_v5   ;;  %v11884_v49 = vld [vmem:[%s14081_s10 + $0xbea] sm:$0x80]  }
  0xca   : > { %10953 = vst.msk [vmem:[%s14087_s14 + $0x45] ss:$8 sm:$0xf0] %vm93_vm7, %v10951_v6   ;;  %v10972_v50 = vld [vmem:[%s14081_s10 + $0x1c0] ss:$2 sm:$0xff]   ;;  %v3071_v51 = vsel %vm1461_vm6, %v11884_v49, %v3067_v48 }
  0xcb   : > { %10965 = vst.msk [vmem:[%s14087_s14 + $0x46] ss:$8 sm:$0xf0] %vm93_vm7, %v10963_v9   ;;  %v11868_v52 = vld [vmem:[%s14081_s10 + $0xa29] sm:$0x1]   ;;  %3072 = vrot.lane.b32.xlu1 %v3071_v51, %s14020_s15  ;;  %v15010_v51 = vpop.permute.xlu0 %1672  }
  0xcc   : > { %10977 = vst.msk [vmem:[%s14087_s14 + $0x47] ss:$8 sm:$0xf0] %vm93_vm7, %v10975_v11   ;;  %v11869_v53 = vld [vmem:[%s14081_s10 + $0xa68] sm:$0x2]  }
  0xcd   : > { %94 = vst.msk [vmem:[%s14087_s14] ss:$8 sm:$0xf] %vm93_vm7, %v92_v27   ;;  %v3012_v54 = vsel %vm1437_vm0, %v11869_v53, %v11868_v52  ;;  %v11870_v55 = vld [vmem:[%s14081_s10 + $0xaa7] sm:$0x4]  }
  0xce   : > { %10901 = vst.msk [vmem:[%s14087_s14 + $0x1] ss:$8 sm:$0xf] %vm93_vm7, %v10900_v30   ;;  %v3016_v56 = vsel %vm1441_vm1, %v11870_v55, %v3012_v54  ;;  %v11871_v57 = vld [vmem:[%s14081_s10 + $0xae6] sm:$0x8]  }
  0xcf   : > { %10913 = vst.msk [vmem:[%s14087_s14 + $0x2] ss:$8 sm:$0xf] %vm93_vm7, %v10912_v33   ;;  %v3020_v58 = vsel %vm1445_vm2, %v11871_v57, %v3016_v56  ;;  %v11872_v59 = vld [vmem:[%s14081_s10 + $0xb25] sm:$0x10]  }
  0xd0   : > { %10925 = vst.msk [vmem:[%s14087_s14 + $0x3] ss:$8 sm:$0xf] %vm93_vm7, %v10924_v37   ;;  %v3024_v60 = vsel %vm1449_vm3, %v11872_v59, %v3020_v58  ;;  %v11873_v61 = vld [vmem:[%s14081_s10 + $0xb64] sm:$0x20]   ;;  %v15028_v59 = vpop.permute.xlu2 %1847  }
  0xd1   : > { %10937 = vst.msk [vmem:[%s14087_s14 + $0x4] ss:$8 sm:$0xf] %vm93_vm7, %v10936_v40   ;;  %v3028_v62 = vsel %vm1453_vm4, %v11873_v61, %v3024_v60  ;;  %v11874_v63 = vld [vmem:[%s14081_s10 + $0xba3] sm:$0x40]  }
  0xd2   : > { %10949 = vst.msk [vmem:[%s14087_s14 + $0x5] ss:$8 sm:$0xf] %vm93_vm7, %v10948_v43   ;;  %v3032_v1 = vsel %vm1457_vm5, %v11874_v63, %v3028_v62  ;;  %v11832_v2 = vld [vmem:[%s14081_s10 + $0xa09] sm:$0x1]  }
  0xd3   : > { %10961 = vst.msk [vmem:[%s14087_s14 + $0x6] ss:$8 sm:$0xf] %vm93_vm7, %v10960_v47   ;;  %v11833_v4 = vld [vmem:[%s14081_s10 + $0xa48] sm:$0x2]  }
  0xd4   : > { %10973 = vst.msk [vmem:[%s14087_s14 + $0x7] ss:$8 sm:$0xf] %vm93_vm7, %v10972_v50   ;;  %v2872_v5 = vsel %vm1437_vm0, %v11833_v4, %v11832_v2  ;;  %v11834_v6 = vld [vmem:[%s14081_s10 + $0xa87] sm:$0x4]  }
  0xd5   : > { %1466 = vst.msk [vmem:[%s14087_s14] sm:$0xff] %vm1465_vm8, %v14792_v0   ;;  %v11875_v0 = vld [vmem:[%s14081_s10 + $0xbe2] sm:$0x80]   ;;  %v2876_v9 = vsel %vm1441_vm1, %v11834_v6, %v2872_v5  ;;  %v11904_v20 = vld [vmem:[%s14081_s10 + $0xb] sm:$0x1]  }
  0xd6   : > { %95 = vst.msk [vmem:[%s14087_s14] ss:$8 sm:$0xf0] %vm93_vm7, %v92_v27   ;;  %v3036_v3 = vsel %vm1461_vm6, %v11875_v0, %v3032_v1  ;;  %v11835_v11 = vld [vmem:[%s14081_s10 + $0xac6] sm:$0x8]  }
  0xd7   : > { %10902 = vst.msk [vmem:[%s14087_s14 + $0x1] ss:$8 sm:$0xf0] %vm93_vm7, %v10900_v30   ;;  %3037 = vrot.lane.b32.xlu0 %v3036_v3, %s14020_s15  ;;  %v2880_v12 = vsel %vm1445_vm2, %v11835_v11, %v2876_v9  ;;  %v11836_v13 = vld [vmem:[%s14081_s10 + $0xb05] sm:$0x10]  }
  0xd8   : > { %10914 = vst.msk [vmem:[%s14087_s14 + $0x2] ss:$8 sm:$0xf0] %vm93_vm7, %v10912_v33   ;;  %v2884_v14 = vsel %vm1449_vm3, %v11836_v13, %v2880_v12  ;;  %v11837_v15 = vld [vmem:[%s14081_s10 + $0xb44] sm:$0x20]  }
  0xd9   : > { %10926 = vst.msk [vmem:[%s14087_s14 + $0x3] ss:$8 sm:$0xf0] %vm93_vm7, %v10924_v37   ;;  %v2888_v16 = vsel %vm1453_vm4, %v11837_v15, %v2884_v14  ;;  %v11838_v17 = vld [vmem:[%s14081_s10 + $0xb83] sm:$0x40]  }
  0xda   : > { %10938 = vst.msk [vmem:[%s14087_s14 + $0x4] ss:$8 sm:$0xf0] %vm93_vm7, %v10936_v40   ;;  %v2892_v18 = vsel %vm1457_vm5, %v11838_v17, %v2888_v16  ;;  %v11839_v19 = vld [vmem:[%s14081_s10 + $0xbc2] sm:$0x80]  }
  0xdb   : > { %10950 = vst.msk [vmem:[%s14087_s14 + $0x5] ss:$8 sm:$0xf0] %vm93_vm7, %v10948_v43   ;;  %v11905_v21 = vld [vmem:[%s14081_s10 + $0x4a] sm:$0x2]  }
  0xdc   : > { %10962 = vst.msk [vmem:[%s14087_s14 + $0x6] ss:$8 sm:$0xf0] %vm93_vm7, %v10960_v47   ;;  %v11906_v22 = vld [vmem:[%s14081_s10 + $0x89] sm:$0x4]  }
  0xdd   : > { %10974 = vst.msk [vmem:[%s14087_s14 + $0x7] ss:$8 sm:$0xf0] %vm93_vm7, %v10972_v50   ;;  %v11907_v23 = vld [vmem:[%s14081_s10 + $0xc8] sm:$0x8]  }
  0xde   : > { %11516 = vst.msk [vmem:[%s14087_s14 + $0xa0] sm:$0xff] %vm1465_vm8, %v14816_v7   ;;  %v2896_v7 = vsel %vm1461_vm6, %v11839_v19, %v2892_v18  ;;  %v11908_v24 = vld [vmem:[%s14081_s10 + $0x107] sm:$0x10]   ;;  %v11895_v29 = vld [vmem:[%s14081_s10 + $0x3] sm:$0x1]  }
  0xdf   : > { %11498 = vst.msk [vmem:[%s14087_s14 + $0x60] sm:$0xff] %vm1465_vm8, %v14818_v8   ;;  %2897 = vrot.lane.b32.xlu2 %v2896_v7, %s14020_s15  ;;  %v3152_v8 = vsel %vm1437_vm0, %v11905_v21, %v11904_v20  ;;  %v11909_v25 = vld [vmem:[%s14081_s10 + $0x146] sm:$0x20]   ;;  %v11896_v31 = vld [vmem:[%s14081_s10 + $0x42] sm:$0x2]   ;;  %v15083_v7 = vpop.permute.xlu1 %1812   ;;  %v15085_v20 = vpop.permute.xlu0 %1777  }
  0xe0   : > { %11480 = vst.msk [vmem:[%s14087_s14 + $0x20] sm:$0xff] %vm1465_vm8, %v14823_v10   ;;  %v3156_v10 = vsel %vm1441_vm1, %v11906_v22, %v3152_v8  ;;  %v11910_v27 = vld [vmem:[%s14081_s10 + $0x185] sm:$0x40]   ;;  %v11897_v32 = vld [vmem:[%s14081_s10 + $0x81] sm:$0x4]   ;;  %v3117_v35 = vsel %vm1437_vm0, %v11896_v31, %v11895_v29 }
  0xe1   : > { %v3160_v26 = vsel %vm1445_vm2, %v11907_v23, %v3156_v10  ;;  %v11911_v28 = vld [vmem:[%s14081_s10 + $0x1c4] sm:$0x80]   ;;  %v11898_v33 = vld [vmem:[%s14081_s10 + $0xc0] sm:$0x8]   ;;  %v3121_v41 = vsel %vm1441_vm1, %v11897_v32, %v3117_v35  ;;  %v10984_v43 = vld [vmem:[%s14081_s10 + $0x200] ss:$2 sm:$0xff]  }
  0xe2   : > { %v3164_v30 = vsel %vm1449_vm3, %v11908_v24, %v3160_v26  ;;  %v11899_v37 = vld [vmem:[%s14081_s10 + $0xff] sm:$0x10]   ;;  %v10996_v44 = vld [vmem:[%s14081_s10 + $0x240] ss:$2 sm:$0xff]   ;;  %v3125_v47 = vsel %vm1445_vm2, %v11898_v33, %v3121_v41  ;;  %v10909_v60 = vld [vmem:[%s14081_s10 + $0x70] ss:$2 sm:$0xff]   ;;  %v15134_v41 = vpop.permute.xlu2 %1952  }
  0xe3   : > { %v3168_v34 = vsel %vm1453_vm4, %v11909_v25, %v3164_v30  ;;  %v11900_v38 = vld [vmem:[%s14081_s10 + $0x13e] sm:$0x20]   ;;  %10985 = vst.msk [vmem:[%s14087_s14 + $0x100] ss:$8 sm:$0xf] %vm93_vm7, %v10984_v43   ;;  %v3129_v49 = vsel %vm1449_vm3, %v11899_v37, %v3125_v47 }
  0xe4   : > { %v11901_v39 = vld [vmem:[%s14081_s10 + $0x17d] sm:$0x40]   ;;  %v3172_v40 = vsel %vm1457_vm5, %v11910_v27, %v3168_v34  ;;  %v11008_v48 = vld [vmem:[%s14081_s10 + $0x280] ss:$2 sm:$0xff]   ;;  %v3133_v52 = vsel %vm1453_vm4, %v11900_v38, %v3129_v49  ;;  %v11859_v61 = vld [vmem:[%s14081_s10 + $0xa21] sm:$0x1]  }
  0xe5   : > { %v11902_v42 = vld [vmem:[%s14081_s10 + $0x1bc] sm:$0x80]   ;;  %v3176_v45 = vsel %vm1461_vm6, %v11911_v28, %v3172_v40  ;;  %10997 = vst.msk [vmem:[%s14087_s14 + $0x101] ss:$8 sm:$0xf] %vm93_vm7, %v10996_v44   ;;  %v3137_v54 = vsel %vm1457_vm5, %v11901_v39, %v3133_v52 }
  0xe6   : > { %3177 = vrot.lane.b32.xlu1 %v3176_v45, %s14020_s15  ;;  %v11020_v50 = vld [vmem:[%s14081_s10 + $0x2c0] ss:$2 sm:$0xff]   ;;  %11009 = vst.msk [vmem:[%s14087_s14 + $0x102] ss:$8 sm:$0xf] %vm93_vm7, %v11008_v48   ;;  %v3141_v56 = vsel %vm1461_vm6, %v11902_v42, %v3137_v54 }
  0xe7   : > { %v11032_v53 = vld [vmem:[%s14081_s10 + $0x300] ss:$2 sm:$0xff]   ;;  %11021 = vst.msk [vmem:[%s14087_s14 + $0x103] ss:$8 sm:$0xf] %vm93_vm7, %v11020_v50   ;;  %3142 = vrot.lane.b32.xlu0 %v3141_v56, %s14020_s15 }
  0xe8   : > { %v11044_v55 = vld [vmem:[%s14081_s10 + $0x340] ss:$2 sm:$0xff]   ;;  %11033 = vst.msk [vmem:[%s14087_s14 + $0x104] ss:$8 sm:$0xf] %vm93_vm7, %v11032_v53  }
  0xe9   : > { %v11056_v57 = vld [vmem:[%s14081_s10 + $0x380] ss:$2 sm:$0xff]   ;;  %11045 = vst.msk [vmem:[%s14087_s14 + $0x105] ss:$8 sm:$0xf] %vm93_vm7, %v11044_v55  }
  0xea   : > { %v11068_v58 = vld [vmem:[%s14081_s10 + $0x3c0] ss:$2 sm:$0xff]   ;;  %11057 = vst.msk [vmem:[%s14087_s14 + $0x106] ss:$8 sm:$0xf] %vm93_vm7, %v11056_v57  }
  0xeb   : > { %11069 = vst.msk [vmem:[%s14087_s14 + $0x107] ss:$8 sm:$0xf] %vm93_vm7, %v11068_v58   ;;  %v10921_v62 = vld [vmem:[%s14081_s10 + $0xb0] ss:$2 sm:$0xff]  }
  0xec   : > { %11543 = vst.msk [vmem:[%s14087_s14 + $0x100] sm:$0xff] %vm1465_vm8, %v14875_v36   ;;  %v10897_v36 = vld [vmem:[%s14081_s10 + $0x30] ss:$2 sm:$0xff]   ;;  %v11860_v63 = vld [vmem:[%s14081_s10 + $0xa60] sm:$0x2]  }
  0xed   : > { %10986 = vst.msk [vmem:[%s14087_s14 + $0x100] ss:$8 sm:$0xf0] %vm93_vm7, %v10984_v43   ;;  %v10933_v0 = vld [vmem:[%s14081_s10 + $0xf0] ss:$2 sm:$0xff]   ;;  %v2977_v1 = vsel %vm1437_vm0, %v11860_v63, %v11859_v61 }
  0xee   : > { %10998 = vst.msk [vmem:[%s14087_s14 + $0x101] ss:$8 sm:$0xf0] %vm93_vm7, %v10996_v44   ;;  %v11861_v2 = vld [vmem:[%s14081_s10 + $0xa9f] sm:$0x4]  }
  0xef   : > { %11010 = vst.msk [vmem:[%s14087_s14 + $0x102] ss:$8 sm:$0xf0] %vm93_vm7, %v11008_v48   ;;  %v10945_v3 = vld [vmem:[%s14081_s10 + $0x130] ss:$2 sm:$0xff]   ;;  %v2981_v4 = vsel %vm1441_vm1, %v11861_v2, %v2977_v1 }
  0xf0   : > { %11022 = vst.msk [vmem:[%s14087_s14 + $0x103] ss:$8 sm:$0xf0] %vm93_vm7, %v11020_v50   ;;  %v11862_v5 = vld [vmem:[%s14081_s10 + $0xade] sm:$0x8]   ;;  %v15150_v50 = vpop.permute.xlu1 %1917  }
  0xf1   : > { %11034 = vst.msk [vmem:[%s14087_s14 + $0x104] ss:$8 sm:$0xf0] %vm93_vm7, %v11032_v53   ;;  %v10957_v6 = vld [vmem:[%s14081_s10 + $0x170] ss:$2 sm:$0xff]   ;;  %v2985_v9 = vsel %vm1445_vm2, %v11862_v5, %v2981_v4 }
  0xf2   : > { %11046 = vst.msk [vmem:[%s14087_s14 + $0x105] ss:$8 sm:$0xf0] %vm93_vm7, %v11044_v55   ;;  %v11863_v11 = vld [vmem:[%s14081_s10 + $0xb1d] sm:$0x10]  }
  0xf3   : > { %11058 = vst.msk [vmem:[%s14087_s14 + $0x106] ss:$8 sm:$0xf0] %vm93_vm7, %v11056_v57   ;;  %v10969_v12 = vld [vmem:[%s14081_s10 + $0x1b0] ss:$2 sm:$0xff]   ;;  %v2989_v13 = vsel %vm1449_vm3, %v11863_v11, %v2985_v9 }
  0xf4   : > { %11070 = vst.msk [vmem:[%s14087_s14 + $0x107] ss:$8 sm:$0xf0] %vm93_vm7, %v11068_v58   ;;  %v11864_v14 = vld [vmem:[%s14081_s10 + $0xb5c] sm:$0x20]  }
  0xf5   : > { %10899 = vst.msk [vmem:[%s14087_s14 + $0xc0] ss:$8 sm:$0xf0] %vm93_vm7, %v10897_v36   ;;  %v10981_v15 = vld [vmem:[%s14081_s10 + $0x1f0] ss:$2 sm:$0xff]   ;;  %v2993_v16 = vsel %vm1453_vm4, %v11864_v14, %v2989_v13 }
  0xf6   : > { %10911 = vst.msk [vmem:[%s14087_s14 + $0xc1] ss:$8 sm:$0xf0] %vm93_vm7, %v10909_v60   ;;  %v11865_v17 = vld [vmem:[%s14081_s10 + $0xb9b] sm:$0x40]  }
  0xf7   : > { %10923 = vst.msk [vmem:[%s14087_s14 + $0xc2] ss:$8 sm:$0xf0] %vm93_vm7, %v10921_v62   ;;  %v2997_v18 = vsel %vm1457_vm5, %v11865_v17, %v2993_v16  ;;  %v11866_v19 = vld [vmem:[%s14081_s10 + $0xbda] sm:$0x80]  }
  0xf8   : > { %10935 = vst.msk [vmem:[%s14087_s14 + $0xc3] ss:$8 sm:$0xf0] %vm93_vm7, %v10933_v0   ;;  %v3001_v21 = vsel %vm1461_vm6, %v11866_v19, %v2997_v18  ;;  %v11931_v8 = vld [vmem:[%s14081_s10 + $0x23] sm:$0x1]  }
  0xf9   : > { %10947 = vst.msk [vmem:[%s14087_s14 + $0xc4] ss:$8 sm:$0xf0] %vm93_vm7, %v10945_v3   ;;  %3002 = vrot.lane.b32.xlu2 %v3001_v21, %s14020_s15  ;;  %v11932_v22 = vld [vmem:[%s14081_s10 + $0x62] sm:$0x2]  }
  0xfa   : > { %10959 = vst.msk [vmem:[%s14087_s14 + $0xc5] ss:$8 sm:$0xf0] %vm93_vm7, %v10957_v6   ;;  %v3257_v23 = vsel %vm1437_vm0, %v11932_v22, %v11931_v8  ;;  %v11933_v10 = vld [vmem:[%s14081_s10 + $0xa1] sm:$0x4]  }
  0xfb   : > { %10971 = vst.msk [vmem:[%s14087_s14 + $0xc6] ss:$8 sm:$0xf0] %vm93_vm7, %v10969_v12   ;;  %v3261_v24 = vsel %vm1441_vm1, %v11933_v10, %v3257_v23  ;;  %v11934_v25 = vld [vmem:[%s14081_s10 + $0xe0] sm:$0x8]  }
  0xfc   : > { %10983 = vst.msk [vmem:[%s14087_s14 + $0xc7] ss:$8 sm:$0xf0] %vm93_vm7, %v10981_v15   ;;  %v11935_v26 = vld [vmem:[%s14081_s10 + $0x11f] sm:$0x10]  }
  0xfd   : > { %11534 = vst.msk [vmem:[%s14087_s14 + $0xe0] sm:$0xff] %vm1465_vm8, %v14892_v46   ;;  %v3265_v46 = vsel %vm1445_vm2, %v11934_v25, %v3261_v24  ;;  %v11936_v27 = vld [vmem:[%s14081_s10 + $0x15e] sm:$0x20]   ;;  %v11922_v33 = vld [vmem:[%s14081_s10 + $0x1b] sm:$0x1]  }
  0xfe   : > { %10898 = vst.msk [vmem:[%s14087_s14 + $0xc0] ss:$8 sm:$0xf] %vm93_vm7, %v10897_v36   ;;  %v3269_v28 = vsel %vm1449_vm3, %v11935_v26, %v3265_v46  ;;  %v11937_v29 = vld [vmem:[%s14081_s10 + $0x19d] sm:$0x40]  }
  0xff   : > { %10910 = vst.msk [vmem:[%s14087_s14 + $0xc1] ss:$8 sm:$0xf] %vm93_vm7, %v10909_v60   ;;  %v3273_v30 = vsel %vm1453_vm4, %v11936_v27, %v3269_v28  ;;  %v11938_v31 = vld [vmem:[%s14081_s10 + $0x1dc] sm:$0x80]  }
 0x100   : > { %10922 = vst.msk [vmem:[%s14087_s14 + $0xc2] ss:$8 sm:$0xf] %vm93_vm7, %v10921_v62   ;;  %v3277_v32 = vsel %vm1457_vm5, %v11937_v29, %v3273_v30  ;;  %v11923_v35 = vld [vmem:[%s14081_s10 + $0x5a] sm:$0x2]  }
 0x101   : > { %10934 = vst.msk [vmem:[%s14087_s14 + $0xc3] ss:$8 sm:$0xf] %vm93_vm7, %v10933_v0   ;;  %v3281_v34 = vsel %vm1461_vm6, %v11938_v31, %v3277_v32  ;;  %v3222_v37 = vsel %vm1437_vm0, %v11923_v35, %v11922_v33  ;;  %v11924_v38 = vld [vmem:[%s14081_s10 + $0x99] sm:$0x4]  }
 0x102   : > { %10946 = vst.msk [vmem:[%s14087_s14 + $0xc4] ss:$8 sm:$0xf] %vm93_vm7, %v10945_v3   ;;  %3282 = vrot.lane.b32.xlu1 %v3281_v34, %s14020_s15  ;;  %v3226_v39 = vsel %vm1441_vm1, %v11924_v38, %v3222_v37  ;;  %v11925_v40 = vld [vmem:[%s14081_s10 + $0xd8] sm:$0x8]  }
 0x103   : > { %10958 = vst.msk [vmem:[%s14087_s14 + $0xc5] ss:$8 sm:$0xf] %vm93_vm7, %v10957_v6   ;;  %v3230_v42 = vsel %vm1445_vm2, %v11925_v40, %v3226_v39  ;;  %v11926_v43 = vld [vmem:[%s14081_s10 + $0x117] sm:$0x10]  }
 0x104   : > { %10970 = vst.msk [vmem:[%s14087_s14 + $0xc6] ss:$8 sm:$0xf] %vm93_vm7, %v10969_v12   ;;  %v3234_v44 = vsel %vm1449_vm3, %v11926_v43, %v3230_v42  ;;  %v11927_v45 = vld [vmem:[%s14081_s10 + $0x156] sm:$0x20]   ;;  %v15256_v43 = vpop.permute.xlu0 %1882  }
 0x105   : > { %10982 = vst.msk [vmem:[%s14087_s14 + $0xc7] ss:$8 sm:$0xf] %vm93_vm7, %v10981_v15   ;;  %v3238_v47 = vsel %vm1453_vm4, %v11927_v45, %v3234_v44  ;;  %v11928_v48 = vld [vmem:[%s14081_s10 + $0x195] sm:$0x40]  }
 0x106   : > { %11525 = vst.msk [vmem:[%s14087_s14 + $0xc0] sm:$0xff] %vm1465_vm8, %v15010_v51   ;;  %v11929_v49 = vld [vmem:[%s14081_s10 + $0x1d4] sm:$0x80]   ;;  %v3242_v51 = vsel %vm1457_vm5, %v11928_v48, %v3238_v47  ;;  %v10987_v52 = vld [vmem:[%s14081_s10 + $0x210] ss:$2 sm:$0xff]  }
 0x107   : > { %v10999_v53 = vld [vmem:[%s14081_s10 + $0x250] ss:$2 sm:$0xff]   ;;  %v3246_v55 = vsel %vm1461_vm6, %v11929_v49, %v3242_v51  ;;  %10989 = vst.msk [vmem:[%s14087_s14 + $0x140] ss:$8 sm:$0xf0] %vm93_vm7, %v10987_v52  }
 0x108   : > { %v11011_v54 = vld [vmem:[%s14081_s10 + $0x290] ss:$2 sm:$0xff]   ;;  %3247 = vrot.lane.b32.xlu0 %v3246_v55, %s14020_s15  ;;  %11001 = vst.msk [vmem:[%s14087_s14 + $0x141] ss:$8 sm:$0xf0] %vm93_vm7, %v10999_v53  }
 0x109   : > { %v11023_v56 = vld [vmem:[%s14081_s10 + $0x2d0] ss:$2 sm:$0xff]   ;;  %11013 = vst.msk [vmem:[%s14087_s14 + $0x142] ss:$8 sm:$0xf0] %vm93_vm7, %v11011_v54  }
 0x10a   : > { %v11035_v57 = vld [vmem:[%s14081_s10 + $0x310] ss:$2 sm:$0xff]   ;;  %11025 = vst.msk [vmem:[%s14087_s14 + $0x143] ss:$8 sm:$0xf0] %vm93_vm7, %v11023_v56  }
 0x10b   : > { %v11047_v58 = vld [vmem:[%s14081_s10 + $0x350] ss:$2 sm:$0xff]   ;;  %11037 = vst.msk [vmem:[%s14087_s14 + $0x144] ss:$8 sm:$0xf0] %vm93_vm7, %v11035_v57  }
 0x10c   : > { %v11059_v36 = vld [vmem:[%s14081_s10 + $0x390] ss:$2 sm:$0xff]   ;;  %11049 = vst.msk [vmem:[%s14087_s14 + $0x145] ss:$8 sm:$0xf0] %vm93_vm7, %v11047_v58  }
 0x10d   : > { %v11071_v60 = vld [vmem:[%s14081_s10 + $0x3d0] ss:$2 sm:$0xff]   ;;  %v11886_v61 = vld [vmem:[%s14081_s10 + $0xa39] sm:$0x1]   ;;  %v11958_v13 = vld [vmem:[%s14081_s10 + $0x3b] sm:$0x1]  }
 0x10e   : > { %11061 = vst.msk [vmem:[%s14087_s14 + $0x146] ss:$8 sm:$0xf0] %vm93_vm7, %v11059_v36   ;;  %v11887_v62 = vld [vmem:[%s14081_s10 + $0xa78] sm:$0x2]  }
 0x10f   : > { %11073 = vst.msk [vmem:[%s14087_s14 + $0x147] ss:$8 sm:$0xf0] %vm93_vm7, %v11071_v60   ;;  %v3082_v63 = vsel %vm1437_vm0, %v11887_v62, %v11886_v61  ;;  %v11888_v0 = vld [vmem:[%s14081_s10 + $0xab7] sm:$0x4]  }
 0x110   : > { %11570 = vst.msk [vmem:[%s14087_s14 + $0x160] sm:$0xff] %vm1465_vm8, %v15028_v59   ;;  %v3086_v59 = vsel %vm1441_vm1, %v11888_v0, %v3082_v63  ;;  %v11889_v1 = vld [vmem:[%s14081_s10 + $0xaf6] sm:$0x8]   ;;  %v11959_v15 = vld [vmem:[%s14081_s10 + $0x7a] sm:$0x2]  }
 0x111   : > { %v11890_v2 = vld [vmem:[%s14081_s10 + $0xb35] sm:$0x10]   ;;  %10988 = vst.msk [vmem:[%s14087_s14 + $0x140] ss:$8 sm:$0xf] %vm93_vm7, %v10987_v52   ;;  %v3090_v3 = vsel %vm1445_vm2, %v11889_v1, %v3086_v59  ;;  %v3362_v16 = vsel %vm1437_vm0, %v11959_v15, %v11958_v13  ;;  %v15329_v13 = vpop.permute.xlu1 %2022  }
 0x112   : > { %v11891_v4 = vld [vmem:[%s14081_s10 + $0xb74] sm:$0x20]   ;;  %11000 = vst.msk [vmem:[%s14087_s14 + $0x141] ss:$8 sm:$0xf] %vm93_vm7, %v10999_v53   ;;  %v3094_v5 = vsel %vm1449_vm3, %v11890_v2, %v3090_v3  ;;  %v15274_v53 = vpop.permute.xlu2 %2057  }
 0x113   : > { %v11892_v6 = vld [vmem:[%s14081_s10 + $0xbb3] sm:$0x40]   ;;  %11012 = vst.msk [vmem:[%s14087_s14 + $0x142] ss:$8 sm:$0xf] %vm93_vm7, %v11011_v54   ;;  %v3098_v9 = vsel %vm1453_vm4, %v11891_v4, %v3094_v5 }
 0x114   : > { %v11893_v11 = vld [vmem:[%s14081_s10 + $0xbf2] sm:$0x80]   ;;  %11024 = vst.msk [vmem:[%s14087_s14 + $0x143] ss:$8 sm:$0xf] %vm93_vm7, %v11023_v56   ;;  %v3102_v12 = vsel %vm1457_vm5, %v11892_v6, %v3098_v9 }
 0x115   : > { %11036 = vst.msk [vmem:[%s14087_s14 + $0x144] ss:$8 sm:$0xf] %vm93_vm7, %v11035_v57   ;;  %v3106_v14 = vsel %vm1461_vm6, %v11893_v11, %v3102_v12  ;;  %v11960_v17 = vld [vmem:[%s14081_s10 + $0xb9] sm:$0x4]  }
 0x116   : > { %11048 = vst.msk [vmem:[%s14087_s14 + $0x145] ss:$8 sm:$0xf] %vm93_vm7, %v11047_v58   ;;  %3107 = vrot.lane.b32.xlu2 %v3106_v14, %s14020_s15  ;;  %v3366_v18 = vsel %vm1441_vm1, %v11960_v17, %v3362_v16  ;;  %v11961_v19 = vld [vmem:[%s14081_s10 + $0xf8] sm:$0x8]   ;;  %v15331_v14 = vpop.permute.xlu0 %1987  }
 0x117   : > { %11060 = vst.msk [vmem:[%s14087_s14 + $0x146] ss:$8 sm:$0xf] %vm93_vm7, %v11059_v36   ;;  %v3370_v21 = vsel %vm1445_vm2, %v11961_v19, %v3366_v18  ;;  %v11962_v8 = vld [vmem:[%s14081_s10 + $0x137] sm:$0x10]  }
 0x118   : > { %11072 = vst.msk [vmem:[%s14087_s14 + $0x147] ss:$8 sm:$0xf] %vm93_vm7, %v11071_v60   ;;  %v11963_v22 = vld [vmem:[%s14081_s10 + $0x176] sm:$0x20]  }
 0x119   : > { %11561 = vst.msk [vmem:[%s14087_s14 + $0x140] sm:$0xff] %vm1465_vm8, %v15083_v7   ;;  %v3374_v7 = vsel %vm1449_vm3, %v11962_v8, %v3370_v21  ;;  %v11964_v23 = vld [vmem:[%s14081_s10 + $0x1b5] sm:$0x40]   ;;  %v11949_v24 = vld [vmem:[%s14081_s10 + $0x33] sm:$0x1]  }
 0x11a   : > { %11552 = vst.msk [vmem:[%s14087_s14 + $0x120] sm:$0xff] %vm1465_vm8, %v15085_v20   ;;  %v3378_v20 = vsel %vm1453_vm4, %v11963_v22, %v3374_v7  ;;  %v11965_v10 = vld [vmem:[%s14081_s10 + $0x1f4] sm:$0x80]   ;;  %v11950_v46 = vld [vmem:[%s14081_s10 + $0x72] sm:$0x2]  }
 0x11b   : > { %v3382_v25 = vsel %vm1457_vm5, %v11964_v23, %v3378_v20  ;;  %v11951_v26 = vld [vmem:[%s14081_s10 + $0xb1] sm:$0x4]   ;;  %v3327_v29 = vsel %vm1437_vm0, %v11950_v46, %v11949_v24  ;;  %v10993_v35 = vld [vmem:[%s14081_s10 + $0x230] ss:$2 sm:$0xff]   ;;  %v11002_v54 = vld [vmem:[%s14081_s10 + $0x260] ss:$2 sm:$0xff]  }
 0x11c   : > { %v11952_v27 = vld [vmem:[%s14081_s10 + $0xf0] sm:$0x8]   ;;  %v3386_v28 = vsel %vm1461_vm6, %v11965_v10, %v3382_v25  ;;  %v3331_v33 = vsel %vm1441_vm1, %v11951_v26, %v3327_v29  ;;  %v11005_v37 = vld [vmem:[%s14081_s10 + $0x270] ss:$2 sm:$0xff]   ;;  %v11014_v56 = vld [vmem:[%s14081_s10 + $0x2a0] ss:$2 sm:$0xff]  }
 0x11d   : > { %v11953_v30 = vld [vmem:[%s14081_s10 + $0x12f] sm:$0x10]   ;;  %3387 = vrot.lane.b32.xlu1 %v3386_v28, %s14020_s15  ;;  %v3335_v38 = vsel %vm1445_vm2, %v11952_v27, %v3331_v33  ;;  %10994 = vst.msk [vmem:[%s14087_s14 + $0x1c0] ss:$8 sm:$0xf] %vm93_vm7, %v10993_v35  }
 0x11e   : > { %v11954_v31 = vld [vmem:[%s14081_s10 + $0x16e] sm:$0x20]   ;;  %v11017_v39 = vld [vmem:[%s14081_s10 + $0x2b0] ss:$2 sm:$0xff]   ;;  %v3339_v40 = vsel %vm1449_vm3, %v11953_v30, %v3335_v38  ;;  %v11026_v58 = vld [vmem:[%s14081_s10 + $0x2e0] ss:$2 sm:$0xff]  }
 0x11f   : > { %v11955_v32 = vld [vmem:[%s14081_s10 + $0x1ad] sm:$0x40]   ;;  %11006 = vst.msk [vmem:[%s14087_s14 + $0x1c1] ss:$8 sm:$0xf] %vm93_vm7, %v11005_v37   ;;  %v3343_v44 = vsel %vm1453_vm4, %v11954_v31, %v3339_v40 }
 0x120   : > { %v11956_v34 = vld [vmem:[%s14081_s10 + $0x1ec] sm:$0x80]   ;;  %v11029_v42 = vld [vmem:[%s14081_s10 + $0x2f0] ss:$2 sm:$0xff]   ;;  %v3347_v47 = vsel %vm1457_vm5, %v11955_v32, %v3343_v44  ;;  %v11038_v61 = vld [vmem:[%s14081_s10 + $0x320] ss:$2 sm:$0xff]   ;;  %v15380_v32 = vpop.permute.xlu2 %2162  }
 0x121   : > { %11018 = vst.msk [vmem:[%s14087_s14 + $0x1c2] ss:$8 sm:$0xf] %vm93_vm7, %v11017_v39   ;;  %v11041_v45 = vld [vmem:[%s14081_s10 + $0x330] ss:$2 sm:$0xff]   ;;  %v3351_v49 = vsel %vm1461_vm6, %v11956_v34, %v3347_v47 }
 0x122   : > { %11030 = vst.msk [vmem:[%s14087_s14 + $0x1c3] ss:$8 sm:$0xf] %vm93_vm7, %v11029_v42   ;;  %v11053_v48 = vld [vmem:[%s14081_s10 + $0x370] ss:$2 sm:$0xff]   ;;  %3352 = vrot.lane.b32.xlu0 %v3351_v49, %s14020_s15 }
 0x123   : > { %11042 = vst.msk [vmem:[%s14087_s14 + $0x1c4] ss:$8 sm:$0xf] %vm93_vm7, %v11041_v45   ;;  %v11065_v51 = vld [vmem:[%s14081_s10 + $0x3b0] ss:$2 sm:$0xff]  }
 0x124   : > { %11054 = vst.msk [vmem:[%s14087_s14 + $0x1c5] ss:$8 sm:$0xf] %vm93_vm7, %v11053_v48   ;;  %v11077_v52 = vld [vmem:[%s14081_s10 + $0x3f0] ss:$2 sm:$0xff]  }
 0x125   : > { %11066 = vst.msk [vmem:[%s14087_s14 + $0x1c6] ss:$8 sm:$0xf] %vm93_vm7, %v11065_v51   ;;  %v11913_v55 = vld [vmem:[%s14081_s10 + $0x13] sm:$0x1]  }
 0x126   : > { %11078 = vst.msk [vmem:[%s14087_s14 + $0x1c7] ss:$8 sm:$0xf] %vm93_vm7, %v11077_v52   ;;  %v11914_v57 = vld [vmem:[%s14081_s10 + $0x52] sm:$0x2]  }
 0x127   : > { %11597 = vst.msk [vmem:[%s14087_s14 + $0x1c0] sm:$0xff] %vm1465_vm8, %v15134_v41   ;;  %v10990_v41 = vld [vmem:[%s14081_s10 + $0x220] ss:$2 sm:$0xff]   ;;  %v3187_v36 = vsel %vm1437_vm0, %v11914_v57, %v11913_v55  ;;  %v11915_v60 = vld [vmem:[%s14081_s10 + $0x91] sm:$0x4]  }
 0x128   : > { %10995 = vst.msk [vmem:[%s14087_s14 + $0x1c0] ss:$8 sm:$0xf0] %vm93_vm7, %v10993_v35   ;;  %v3191_v62 = vsel %vm1441_vm1, %v11915_v60, %v3187_v36  ;;  %v11916_v63 = vld [vmem:[%s14081_s10 + $0xd0] sm:$0x8]  }
 0x129   : > { %11007 = vst.msk [vmem:[%s14087_s14 + $0x1c1] ss:$8 sm:$0xf0] %vm93_vm7, %v11005_v37   ;;  %v11050_v0 = vld [vmem:[%s14081_s10 + $0x360] ss:$2 sm:$0xff]   ;;  %v3195_v59 = vsel %vm1445_vm2, %v11916_v63, %v3191_v62 }
 0x12a   : > { %11019 = vst.msk [vmem:[%s14087_s14 + $0x1c2] ss:$8 sm:$0xf0] %vm93_vm7, %v11017_v39   ;;  %v11917_v1 = vld [vmem:[%s14081_s10 + $0x10f] sm:$0x10]  }
 0x12b   : > { %11031 = vst.msk [vmem:[%s14087_s14 + $0x1c3] ss:$8 sm:$0xf0] %vm93_vm7, %v11029_v42   ;;  %v11062_v2 = vld [vmem:[%s14081_s10 + $0x3a0] ss:$2 sm:$0xff]   ;;  %v3199_v3 = vsel %vm1449_vm3, %v11917_v1, %v3195_v59  ;;  %v15396_v42 = vpop.permute.xlu1 %2127  }
 0x12c   : > { %11043 = vst.msk [vmem:[%s14087_s14 + $0x1c4] ss:$8 sm:$0xf0] %vm93_vm7, %v11041_v45   ;;  %v11918_v4 = vld [vmem:[%s14081_s10 + $0x14e] sm:$0x20]  }
 0x12d   : > { %11055 = vst.msk [vmem:[%s14087_s14 + $0x1c5] ss:$8 sm:$0xf0] %vm93_vm7, %v11053_v48   ;;  %v11074_v5 = vld [vmem:[%s14081_s10 + $0x3e0] ss:$2 sm:$0xff]   ;;  %v3203_v6 = vsel %vm1453_vm4, %v11918_v4, %v3199_v3 }
 0x12e   : > { %11067 = vst.msk [vmem:[%s14087_s14 + $0x1c6] ss:$8 sm:$0xf0] %vm93_vm7, %v11065_v51   ;;  %v11919_v9 = vld [vmem:[%s14081_s10 + $0x18d] sm:$0x40]  }
 0x12f   : > { %11079 = vst.msk [vmem:[%s14087_s14 + $0x1c7] ss:$8 sm:$0xf0] %vm93_vm7, %v11077_v52   ;;  %v3207_v11 = vsel %vm1457_vm5, %v11919_v9, %v3203_v6  ;;  %v11920_v12 = vld [vmem:[%s14081_s10 + $0x1cc] sm:$0x80]  }
 0x130   : > { %10992 = vst.msk [vmem:[%s14087_s14 + $0x180] ss:$8 sm:$0xf0] %vm93_vm7, %v10990_v41   ;;  %v3211_v15 = vsel %vm1461_vm6, %v11920_v12, %v3207_v11  ;;  %v11985_v16 = vld [vmem:[%s14081_s10 + $0x213] sm:$0x1]  }
 0x131   : > { %11004 = vst.msk [vmem:[%s14087_s14 + $0x181] ss:$8 sm:$0xf0] %vm93_vm7, %v11002_v54   ;;  %3212 = vrot.lane.b32.xlu2 %v3211_v15, %s14020_s15  ;;  %v11986_v17 = vld [vmem:[%s14081_s10 + $0x252] sm:$0x2]  }
 0x132   : > { %11016 = vst.msk [vmem:[%s14087_s14 + $0x182] ss:$8 sm:$0xf0] %vm93_vm7, %v11014_v56   ;;  %v3467_v18 = vsel %vm1437_vm0, %v11986_v17, %v11985_v16  ;;  %v11987_v19 = vld [vmem:[%s14081_s10 + $0x291] sm:$0x4]  }
 0x133   : > { %11028 = vst.msk [vmem:[%s14087_s14 + $0x183] ss:$8 sm:$0xf0] %vm93_vm7, %v11026_v58   ;;  %v3471_v21 = vsel %vm1441_vm1, %v11987_v19, %v3467_v18  ;;  %v11988_v8 = vld [vmem:[%s14081_s10 + $0x2d0] sm:$0x8]  }
 0x134   : > { %11040 = vst.msk [vmem:[%s14087_s14 + $0x184] ss:$8 sm:$0xf0] %vm93_vm7, %v11038_v61   ;;  %v11989_v7 = vld [vmem:[%s14081_s10 + $0x30f] sm:$0x10]  }
 0x135   : > { %11052 = vst.msk [vmem:[%s14087_s14 + $0x185] ss:$8 sm:$0xf0] %vm93_vm7, %v11050_v0   ;;  %v11990_v22 = vld [vmem:[%s14081_s10 + $0x34e] sm:$0x20]  }
 0x136   : > { %11064 = vst.msk [vmem:[%s14087_s14 + $0x186] ss:$8 sm:$0xf0] %vm93_vm7, %v11062_v2   ;;  %v11991_v20 = vld [vmem:[%s14081_s10 + $0x38d] sm:$0x40]  }
 0x137   : > { %11076 = vst.msk [vmem:[%s14087_s14 + $0x187] ss:$8 sm:$0xf0] %vm93_vm7, %v11074_v5   ;;  %v11992_v24 = vld [vmem:[%s14081_s10 + $0x3cc] sm:$0x80]  }
 0x138   : > { %11588 = vst.msk [vmem:[%s14087_s14 + $0x1a0] sm:$0xff] %vm1465_vm8, %v15150_v50   ;;  %v3475_v50 = vsel %vm1445_vm2, %v11988_v8, %v3471_v21  ;;  %v11976_v46 = vld [vmem:[%s14081_s10 + $0x20b] sm:$0x1]   ;;  %v11080_v44 = vld [vmem:[%s14081_s10 + $0x400] ss:$2 sm:$0xff]  }
 0x139   : > { %10991 = vst.msk [vmem:[%s14087_s14 + $0x180] ss:$8 sm:$0xf] %vm93_vm7, %v10990_v41   ;;  %v3479_v23 = vsel %vm1449_vm3, %v11989_v7, %v3475_v50  ;;  %v11977_v27 = vld [vmem:[%s14081_s10 + $0x24a] sm:$0x2]  }
 0x13a   : > { %11003 = vst.msk [vmem:[%s14087_s14 + $0x181] ss:$8 sm:$0xf] %vm93_vm7, %v11002_v54   ;;  %v3483_v10 = vsel %vm1453_vm4, %v11990_v22, %v3479_v23  ;;  %v3432_v28 = vsel %vm1437_vm0, %v11977_v27, %v11976_v46  ;;  %v11978_v29 = vld [vmem:[%s14081_s10 + $0x289] sm:$0x4]  }
 0x13b   : > { %11015 = vst.msk [vmem:[%s14087_s14 + $0x182] ss:$8 sm:$0xf] %vm93_vm7, %v11014_v56   ;;  %v3487_v25 = vsel %vm1457_vm5, %v11991_v20, %v3483_v10  ;;  %v3436_v30 = vsel %vm1441_vm1, %v11978_v29, %v3432_v28  ;;  %v11979_v31 = vld [vmem:[%s14081_s10 + $0x2c8] sm:$0x8]  }
 0x13c   : > { %11027 = vst.msk [vmem:[%s14087_s14 + $0x183] ss:$8 sm:$0xf] %vm93_vm7, %v11026_v58   ;;  %v3491_v26 = vsel %vm1461_vm6, %v11992_v24, %v3487_v25  ;;  %v3440_v33 = vsel %vm1445_vm2, %v11979_v31, %v3436_v30  ;;  %v11980_v34 = vld [vmem:[%s14081_s10 + $0x307] sm:$0x10]  }
 0x13d   : > { %11039 = vst.msk [vmem:[%s14087_s14 + $0x184] ss:$8 sm:$0xf] %vm93_vm7, %v11038_v61   ;;  %3492 = vrot.lane.b32.xlu1 %v3491_v26, %s14020_s15  ;;  %v3444_v35 = vsel %vm1449_vm3, %v11980_v34, %v3440_v33  ;;  %v11981_v37 = vld [vmem:[%s14081_s10 + $0x346] sm:$0x20]   ;;  %v15502_v34 = vpop.permute.xlu0 %2092  }
 0x13e   : > { %11051 = vst.msk [vmem:[%s14087_s14 + $0x185] ss:$8 sm:$0xf] %vm93_vm7, %v11050_v0   ;;  %v3448_v38 = vsel %vm1453_vm4, %v11981_v37, %v3444_v35  ;;  %v11982_v39 = vld [vmem:[%s14081_s10 + $0x385] sm:$0x40]  }
 0x13f   : > { %11063 = vst.msk [vmem:[%s14087_s14 + $0x186] ss:$8 sm:$0xf] %vm93_vm7, %v11062_v2   ;;  %v11983_v40 = vld [vmem:[%s14081_s10 + $0x3c4] sm:$0x80]  }
 0x140   : > { %11075 = vst.msk [vmem:[%s14087_s14 + $0x187] ss:$8 sm:$0xf] %vm93_vm7, %v11074_v5   ;;  %v11092_v45 = vld [vmem:[%s14081_s10 + $0x440] ss:$2 sm:$0xff]  }
 0x141   : > { %11579 = vst.msk [vmem:[%s14087_s14 + $0x180] sm:$0xff] %vm1465_vm8, %v15256_v43   ;;  %v3452_v43 = vsel %vm1457_vm5, %v11982_v39, %v3448_v38  ;;  %v11104_v47 = vld [vmem:[%s14081_s10 + $0x480] ss:$2 sm:$0xff]   ;;  %v11940_v55 = vld [vmem:[%s14081_s10 + $0x2b] sm:$0x1]  }
 0x142   : > { %v3456_v48 = vsel %vm1461_vm6, %v11983_v40, %v3452_v43  ;;  %11082 = vst.msk [vmem:[%s14087_s14 + $0x200] ss:$8 sm:$0xf0] %vm93_vm7, %v11080_v44   ;;  %v11116_v49 = vld [vmem:[%s14081_s10 + $0x4c0] ss:$2 sm:$0xff]  }
 0x143   : > { %3457 = vrot.lane.b32.xlu0 %v3456_v48, %s14020_s15  ;;  %11094 = vst.msk [vmem:[%s14087_s14 + $0x201] ss:$8 sm:$0xf0] %vm93_vm7, %v11092_v45   ;;  %v11128_v51 = vld [vmem:[%s14081_s10 + $0x500] ss:$2 sm:$0xff]  }
 0x144   : > { %11106 = vst.msk [vmem:[%s14087_s14 + $0x202] ss:$8 sm:$0xf0] %vm93_vm7, %v11104_v47   ;;  %v11140_v52 = vld [vmem:[%s14081_s10 + $0x540] ss:$2 sm:$0xff]  }
 0x145   : > { %11118 = vst.msk [vmem:[%s14087_s14 + $0x203] ss:$8 sm:$0xf0] %vm93_vm7, %v11116_v49   ;;  %v11152_v41 = vld [vmem:[%s14081_s10 + $0x580] ss:$2 sm:$0xff]  }
 0x146   : > { %11130 = vst.msk [vmem:[%s14087_s14 + $0x204] ss:$8 sm:$0xf0] %vm93_vm7, %v11128_v51   ;;  %v11164_v54 = vld [vmem:[%s14081_s10 + $0x5c0] ss:$2 sm:$0xff]  }
 0x147   : > { %11142 = vst.msk [vmem:[%s14087_s14 + $0x205] ss:$8 sm:$0xf0] %vm93_vm7, %v11140_v52   ;;  %v11941_v56 = vld [vmem:[%s14081_s10 + $0x6a] sm:$0x2]  }
 0x148   : > { %11154 = vst.msk [vmem:[%s14087_s14 + $0x206] ss:$8 sm:$0xf0] %vm93_vm7, %v11152_v41   ;;  %v3292_v57 = vsel %vm1437_vm0, %v11941_v56, %v11940_v55  ;;  %v11942_v58 = vld [vmem:[%s14081_s10 + $0xa9] sm:$0x4]  }
 0x149   : > { %11166 = vst.msk [vmem:[%s14087_s14 + $0x207] ss:$8 sm:$0xf0] %vm93_vm7, %v11164_v54   ;;  %v11943_v36 = vld [vmem:[%s14081_s10 + $0xe8] sm:$0x8]  }
 0x14a   : > { %11624 = vst.msk [vmem:[%s14087_s14 + $0x220] sm:$0xff] %vm1465_vm8, %v15274_v53   ;;  %v3296_v53 = vsel %vm1441_vm1, %v11942_v58, %v3292_v57  ;;  %v11944_v60 = vld [vmem:[%s14081_s10 + $0x127] sm:$0x10]   ;;  %v12003_v21 = vld [vmem:[%s14081_s10 + $0x223] sm:$0x1]  }
 0x14b   : > { %11081 = vst.msk [vmem:[%s14087_s14 + $0x200] ss:$8 sm:$0xf] %vm93_vm7, %v11080_v44   ;;  %v3300_v61 = vsel %vm1445_vm2, %v11943_v36, %v3296_v53  ;;  %v11945_v62 = vld [vmem:[%s14081_s10 + $0x166] sm:$0x20]  }
 0x14c   : > { %11093 = vst.msk [vmem:[%s14087_s14 + $0x201] ss:$8 sm:$0xf] %vm93_vm7, %v11092_v45   ;;  %v3304_v63 = vsel %vm1449_vm3, %v11944_v60, %v3300_v61  ;;  %v11946_v0 = vld [vmem:[%s14081_s10 + $0x1a5] sm:$0x40]   ;;  %v15520_v45 = vpop.permute.xlu2 %2267  }
 0x14d   : > { %11105 = vst.msk [vmem:[%s14087_s14 + $0x202] ss:$8 sm:$0xf] %vm93_vm7, %v11104_v47   ;;  %v3308_v59 = vsel %vm1453_vm4, %v11945_v62, %v3304_v63  ;;  %v11947_v1 = vld [vmem:[%s14081_s10 + $0x1e4] sm:$0x80]  }
 0x14e   : > { %11117 = vst.msk [vmem:[%s14087_s14 + $0x203] ss:$8 sm:$0xf] %vm93_vm7, %v11116_v49   ;;  %v3312_v2 = vsel %vm1457_vm5, %v11946_v0, %v3308_v59  ;;  %v12012_v3 = vld [vmem:[%s14081_s10 + $0x22b] sm:$0x1]  }
 0x14f   : > { %11129 = vst.msk [vmem:[%s14087_s14 + $0x204] ss:$8 sm:$0xf] %vm93_vm7, %v11128_v51   ;;  %v3316_v4 = vsel %vm1461_vm6, %v11947_v1, %v3312_v2  ;;  %v12013_v5 = vld [vmem:[%s14081_s10 + $0x26a] sm:$0x2]  }
 0x150   : > { %11141 = vst.msk [vmem:[%s14087_s14 + $0x205] ss:$8 sm:$0xf] %vm93_vm7, %v11140_v52   ;;  %3317 = vrot.lane.b32.xlu2 %v3316_v4, %s14020_s15  ;;  %v3572_v6 = vsel %vm1437_vm0, %v12013_v5, %v12012_v3  ;;  %v12014_v9 = vld [vmem:[%s14081_s10 + $0x2a9] sm:$0x4]   ;;  %v15575_v3 = vpop.permute.xlu1 %2232   ;;  %v15577_v4 = vpop.permute.xlu0 %2197  }
 0x151   : > { %11153 = vst.msk [vmem:[%s14087_s14 + $0x206] ss:$8 sm:$0xf] %vm93_vm7, %v11152_v41   ;;  %v3576_v11 = vsel %vm1441_vm1, %v12014_v9, %v3572_v6  ;;  %v12015_v12 = vld [vmem:[%s14081_s10 + $0x2e8] sm:$0x8]  }
 0x152   : > { %11165 = vst.msk [vmem:[%s14087_s14 + $0x207] ss:$8 sm:$0xf] %vm93_vm7, %v11164_v54   ;;  %v3580_v15 = vsel %vm1445_vm2, %v12015_v12, %v3576_v11  ;;  %v12016_v16 = vld [vmem:[%s14081_s10 + $0x327] sm:$0x10]  }
 0x153   : > { %11615 = vst.msk [vmem:[%s14087_s14 + $0x200] sm:$0xff] %vm1465_vm8, %v15329_v13   ;;  %v3584_v13 = vsel %vm1449_vm3, %v12016_v16, %v3580_v15  ;;  %v12017_v17 = vld [vmem:[%s14081_s10 + $0x366] sm:$0x20]   ;;  %v12004_v50 = vld [vmem:[%s14081_s10 + $0x262] sm:$0x2]  }
 0x154   : > { %v12018_v18 = vld [vmem:[%s14081_s10 + $0x3a5] sm:$0x40]   ;;  %11606 = vst.msk [vmem:[%s14087_s14 + $0x1e0] sm:$0xff] %vm1465_vm8, %v15331_v14   ;;  %v3588_v14 = vsel %vm1453_vm4, %v12017_v17, %v3584_v13  ;;  %v12005_v7 = vld [vmem:[%s14081_s10 + $0x2a1] sm:$0x4]   ;;  %v3537_v20 = vsel %vm1437_vm0, %v12004_v50, %v12003_v21 }
 0x155   : > { %v12019_v19 = vld [vmem:[%s14081_s10 + $0x3e4] sm:$0x80]   ;;  %v3592_v8 = vsel %vm1457_vm5, %v12018_v18, %v3588_v14  ;;  %v12006_v22 = vld [vmem:[%s14081_s10 + $0x2e0] sm:$0x8]   ;;  %v3541_v46 = vsel %vm1441_vm1, %v12005_v7, %v3537_v20  ;;  %v11086_v27 = vld [vmem:[%s14081_s10 + $0x420] ss:$2 sm:$0xff]  }
 0x156   : > { %v3596_v23 = vsel %vm1461_vm6, %v12019_v19, %v3592_v8  ;;  %v12007_v10 = vld [vmem:[%s14081_s10 + $0x31f] sm:$0x10]   ;;  %v11098_v28 = vld [vmem:[%s14081_s10 + $0x460] ss:$2 sm:$0xff]   ;;  %v3545_v29 = vsel %vm1445_vm2, %v12006_v22, %v3541_v46  ;;  %v11095_v47 = vld [vmem:[%s14081_s10 + $0x450] ss:$2 sm:$0xff]  }
 0x157   : > { %v12008_v24 = vld [vmem:[%s14081_s10 + $0x35e] sm:$0x20]   ;;  %3597 = vrot.lane.b32.xlu1 %v3596_v23, %s14020_s15  ;;  %11087 = vst.msk [vmem:[%s14087_s14 + $0x280] ss:$8 sm:$0xf] %vm93_vm7, %v11086_v27   ;;  %v3549_v31 = vsel %vm1449_vm3, %v12007_v10, %v3545_v29 }
 0x158   : > { %v12009_v25 = vld [vmem:[%s14081_s10 + $0x39d] sm:$0x40]   ;;  %v11110_v30 = vld [vmem:[%s14081_s10 + $0x4a0] ss:$2 sm:$0xff]   ;;  %v3553_v35 = vsel %vm1453_vm4, %v12008_v24, %v3549_v31  ;;  %v11107_v49 = vld [vmem:[%s14081_s10 + $0x490] ss:$2 sm:$0xff]  }
 0x159   : > { %v12010_v26 = vld [vmem:[%s14081_s10 + $0x3dc] sm:$0x80]   ;;  %11099 = vst.msk [vmem:[%s14087_s14 + $0x281] ss:$8 sm:$0xf] %vm93_vm7, %v11098_v28   ;;  %v3557_v38 = vsel %vm1457_vm5, %v12009_v25, %v3553_v35  ;;  %v15626_v25 = vpop.permute.xlu2 %2372  }
 0x15a   : > { %v11122_v33 = vld [vmem:[%s14081_s10 + $0x4e0] ss:$2 sm:$0xff]   ;;  %11111 = vst.msk [vmem:[%s14087_s14 + $0x282] ss:$8 sm:$0xf] %vm93_vm7, %v11110_v30   ;;  %v3561_v40 = vsel %vm1461_vm6, %v12010_v26, %v3557_v38 }
 0x15b   : > { %v11134_v37 = vld [vmem:[%s14081_s10 + $0x520] ss:$2 sm:$0xff]   ;;  %11123 = vst.msk [vmem:[%s14087_s14 + $0x283] ss:$8 sm:$0xf] %vm93_vm7, %v11122_v33   ;;  %3562 = vrot.lane.b32.xlu0 %v3561_v40, %s14020_s15 }
 0x15c   : > { %v11146_v39 = vld [vmem:[%s14081_s10 + $0x560] ss:$2 sm:$0xff]   ;;  %11135 = vst.msk [vmem:[%s14087_s14 + $0x284] ss:$8 sm:$0xf] %vm93_vm7, %v11134_v37  }
 0x15d   : > { %v11158_v43 = vld [vmem:[%s14081_s10 + $0x5a0] ss:$2 sm:$0xff]   ;;  %11147 = vst.msk [vmem:[%s14087_s14 + $0x285] ss:$8 sm:$0xf] %vm93_vm7, %v11146_v39  }
 0x15e   : > { %v11170_v44 = vld [vmem:[%s14081_s10 + $0x5e0] ss:$2 sm:$0xff]   ;;  %11159 = vst.msk [vmem:[%s14087_s14 + $0x286] ss:$8 sm:$0xf] %vm93_vm7, %v11158_v43  }
 0x15f   : > { %11171 = vst.msk [vmem:[%s14087_s14 + $0x287] ss:$8 sm:$0xf] %vm93_vm7, %v11170_v44   ;;  %v11967_v48 = vld [vmem:[%s14081_s10 + $0x203] sm:$0x1]  }
 0x160   : > { %11651 = vst.msk [vmem:[%s14087_s14 + $0x280] sm:$0xff] %vm1465_vm8, %v15380_v32   ;;  %v11083_v32 = vld [vmem:[%s14081_s10 + $0x410] ss:$2 sm:$0xff]   ;;  %v11968_v51 = vld [vmem:[%s14081_s10 + $0x242] sm:$0x2]  }
 0x161   : > { %11088 = vst.msk [vmem:[%s14087_s14 + $0x280] ss:$8 sm:$0xf0] %vm93_vm7, %v11086_v27   ;;  %v11119_v52 = vld [vmem:[%s14081_s10 + $0x4d0] ss:$2 sm:$0xff]   ;;  %v3397_v41 = vsel %vm1437_vm0, %v11968_v51, %v11967_v48 }
 0x162   : > { %11100 = vst.msk [vmem:[%s14087_s14 + $0x281] ss:$8 sm:$0xf0] %vm93_vm7, %v11098_v28   ;;  %v11969_v54 = vld [vmem:[%s14081_s10 + $0x281] sm:$0x4]  }
 0x163   : > { %11112 = vst.msk [vmem:[%s14087_s14 + $0x282] ss:$8 sm:$0xf0] %vm93_vm7, %v11110_v30   ;;  %v11131_v55 = vld [vmem:[%s14081_s10 + $0x510] ss:$2 sm:$0xff]   ;;  %v3401_v56 = vsel %vm1441_vm1, %v11969_v54, %v3397_v41 }
 0x164   : > { %11124 = vst.msk [vmem:[%s14087_s14 + $0x283] ss:$8 sm:$0xf0] %vm93_vm7, %v11122_v33   ;;  %v11970_v57 = vld [vmem:[%s14081_s10 + $0x2c0] sm:$0x8]   ;;  %v15642_v33 = vpop.permute.xlu1 %2337  }
 0x165   : > { %11136 = vst.msk [vmem:[%s14087_s14 + $0x284] ss:$8 sm:$0xf0] %vm93_vm7, %v11134_v37   ;;  %v11143_v58 = vld [vmem:[%s14081_s10 + $0x550] ss:$2 sm:$0xff]   ;;  %v3405_v53 = vsel %vm1445_vm2, %v11970_v57, %v3401_v56 }
 0x166   : > { %11148 = vst.msk [vmem:[%s14087_s14 + $0x285] ss:$8 sm:$0xf0] %vm93_vm7, %v11146_v39   ;;  %v11971_v36 = vld [vmem:[%s14081_s10 + $0x2ff] sm:$0x10]  }
 0x167   : > { %11160 = vst.msk [vmem:[%s14087_s14 + $0x286] ss:$8 sm:$0xf0] %vm93_vm7, %v11158_v43   ;;  %v11155_v60 = vld [vmem:[%s14081_s10 + $0x590] ss:$2 sm:$0xff]   ;;  %v3409_v61 = vsel %vm1449_vm3, %v11971_v36, %v3405_v53 }
 0x168   : > { %11172 = vst.msk [vmem:[%s14087_s14 + $0x287] ss:$8 sm:$0xf0] %vm93_vm7, %v11170_v44   ;;  %v11972_v62 = vld [vmem:[%s14081_s10 + $0x33e] sm:$0x20]  }
 0x169   : > { %11085 = vst.msk [vmem:[%s14087_s14 + $0x240] ss:$8 sm:$0xf0] %vm93_vm7, %v11083_v32   ;;  %v11167_v63 = vld [vmem:[%s14081_s10 + $0x5d0] ss:$2 sm:$0xff]   ;;  %v3413_v0 = vsel %vm1453_vm4, %v11972_v62, %v3409_v61 }
 0x16a   : > { %11097 = vst.msk [vmem:[%s14087_s14 + $0x241] ss:$8 sm:$0xf0] %vm93_vm7, %v11095_v47   ;;  %v11973_v59 = vld [vmem:[%s14081_s10 + $0x37d] sm:$0x40]  }
 0x16b   : > { %11109 = vst.msk [vmem:[%s14087_s14 + $0x242] ss:$8 sm:$0xf0] %vm93_vm7, %v11107_v49   ;;  %v3417_v1 = vsel %vm1457_vm5, %v11973_v59, %v3413_v0  ;;  %v11974_v2 = vld [vmem:[%s14081_s10 + $0x3bc] sm:$0x80]  }
 0x16c   : > { %11121 = vst.msk [vmem:[%s14087_s14 + $0x243] ss:$8 sm:$0xf0] %vm93_vm7, %v11119_v52   ;;  %v3421_v5 = vsel %vm1461_vm6, %v11974_v2, %v3417_v1  ;;  %v12039_v6 = vld [vmem:[%s14081_s10 + $0x403] sm:$0x1]  }
 0x16d   : > { %11133 = vst.msk [vmem:[%s14087_s14 + $0x244] ss:$8 sm:$0xf0] %vm93_vm7, %v11131_v55   ;;  %3422 = vrot.lane.b32.xlu2 %v3421_v5, %s14020_s15  ;;  %v12040_v9 = vld [vmem:[%s14081_s10 + $0x442] sm:$0x2]  }
 0x16e   : > { %11145 = vst.msk [vmem:[%s14087_s14 + $0x245] ss:$8 sm:$0xf0] %vm93_vm7, %v11143_v58   ;;  %v3677_v11 = vsel %vm1437_vm0, %v12040_v9, %v12039_v6  ;;  %v12041_v12 = vld [vmem:[%s14081_s10 + $0x481] sm:$0x4]  }
 0x16f   : > { %11157 = vst.msk [vmem:[%s14087_s14 + $0x246] ss:$8 sm:$0xf0] %vm93_vm7, %v11155_v60   ;;  %v3681_v15 = vsel %vm1441_vm1, %v12041_v12, %v3677_v11  ;;  %v12042_v16 = vld [vmem:[%s14081_s10 + $0x4c0] sm:$0x8]  }
 0x170   : > { %11169 = vst.msk [vmem:[%s14087_s14 + $0x247] ss:$8 sm:$0xf0] %vm93_vm7, %v11167_v63   ;;  %v12043_v13 = vld [vmem:[%s14081_s10 + $0x4ff] sm:$0x10]  }
 0x171   : > { %11642 = vst.msk [vmem:[%s14087_s14 + $0x260] sm:$0xff] %vm1465_vm8, %v15396_v42   ;;  %v3685_v42 = vsel %vm1445_vm2, %v12042_v16, %v3681_v15  ;;  %v12044_v17 = vld [vmem:[%s14081_s10 + $0x53e] sm:$0x20]   ;;  %v12030_v50 = vld [vmem:[%s14081_s10 + $0x23b] sm:$0x1]  }
 0x172   : > { %11084 = vst.msk [vmem:[%s14087_s14 + $0x240] ss:$8 sm:$0xf] %vm93_vm7, %v11083_v32   ;;  %v3689_v18 = vsel %vm1449_vm3, %v12043_v13, %v3685_v42  ;;  %v12045_v14 = vld [vmem:[%s14081_s10 + $0x57d] sm:$0x40]  }
 0x173   : > { %11096 = vst.msk [vmem:[%s14087_s14 + $0x241] ss:$8 sm:$0xf] %vm93_vm7, %v11095_v47   ;;  %v3693_v19 = vsel %vm1453_vm4, %v12044_v17, %v3689_v18  ;;  %v12046_v21 = vld [vmem:[%s14081_s10 + $0x5bc] sm:$0x80]  }
 0x174   : > { %11108 = vst.msk [vmem:[%s14087_s14 + $0x242] ss:$8 sm:$0xf] %vm93_vm7, %v11107_v49   ;;  %v3697_v8 = vsel %vm1457_vm5, %v12045_v14, %v3693_v19  ;;  %v12031_v22 = vld [vmem:[%s14081_s10 + $0x27a] sm:$0x2]  }
 0x175   : > { %11120 = vst.msk [vmem:[%s14087_s14 + $0x243] ss:$8 sm:$0xf] %vm93_vm7, %v11119_v52   ;;  %v3701_v7 = vsel %vm1461_vm6, %v12046_v21, %v3697_v8  ;;  %v3642_v23 = vsel %vm1437_vm0, %v12031_v22, %v12030_v50  ;;  %v12032_v20 = vld [vmem:[%s14081_s10 + $0x2b9] sm:$0x4]  }
 0x176   : > { %11132 = vst.msk [vmem:[%s14087_s14 + $0x244] ss:$8 sm:$0xf] %vm93_vm7, %v11131_v55   ;;  %3702 = vrot.lane.b32.xlu1 %v3701_v7, %s14020_s15  ;;  %v3646_v10 = vsel %vm1441_vm1, %v12032_v20, %v3642_v23  ;;  %v12033_v24 = vld [vmem:[%s14081_s10 + $0x2f8] sm:$0x8]  }
 0x177   : > { %11144 = vst.msk [vmem:[%s14087_s14 + $0x245] ss:$8 sm:$0xf] %vm93_vm7, %v11143_v58   ;;  %v3650_v46 = vsel %vm1445_vm2, %v12033_v24, %v3646_v10  ;;  %v12034_v26 = vld [vmem:[%s14081_s10 + $0x337] sm:$0x10]  }
 0x178   : > { %11156 = vst.msk [vmem:[%s14087_s14 + $0x246] ss:$8 sm:$0xf] %vm93_vm7, %v11155_v60   ;;  %v3654_v27 = vsel %vm1449_vm3, %v12034_v26, %v3650_v46  ;;  %v12035_v28 = vld [vmem:[%s14081_s10 + $0x376] sm:$0x20]   ;;  %v15748_v26 = vpop.permute.xlu0 %2302  }
 0x179   : > { %11168 = vst.msk [vmem:[%s14087_s14 + $0x247] ss:$8 sm:$0xf] %vm93_vm7, %v11167_v63   ;;  %v3658_v29 = vsel %vm1453_vm4, %v12035_v28, %v3654_v27  ;;  %v12036_v30 = vld [vmem:[%s14081_s10 + $0x3b5] sm:$0x40]  }
 0x17a   : > { %11633 = vst.msk [vmem:[%s14087_s14 + $0x240] sm:$0xff] %vm1465_vm8, %v15502_v34   ;;  %v12037_v31 = vld [vmem:[%s14081_s10 + $0x3f4] sm:$0x80]   ;;  %v3662_v34 = vsel %vm1457_vm5, %v12036_v30, %v3658_v29  ;;  %v11089_v35 = vld [vmem:[%s14081_s10 + $0x430] ss:$2 sm:$0xff]  }
 0x17b   : > { %v11101_v37 = vld [vmem:[%s14081_s10 + $0x470] ss:$2 sm:$0xff]   ;;  %v3666_v39 = vsel %vm1461_vm6, %v12037_v31, %v3662_v34  ;;  %11091 = vst.msk [vmem:[%s14087_s14 + $0x2c0] ss:$8 sm:$0xf0] %vm93_vm7, %v11089_v35  }
 0x17c   : > { %v11113_v38 = vld [vmem:[%s14081_s10 + $0x4b0] ss:$2 sm:$0xff]   ;;  %3667 = vrot.lane.b32.xlu0 %v3666_v39, %s14020_s15  ;;  %11103 = vst.msk [vmem:[%s14087_s14 + $0x2c1] ss:$8 sm:$0xf0] %vm93_vm7, %v11101_v37  }
 0x17d   : > { %v11125_v40 = vld [vmem:[%s14081_s10 + $0x4f0] ss:$2 sm:$0xff]   ;;  %11115 = vst.msk [vmem:[%s14087_s14 + $0x2c2] ss:$8 sm:$0xf0] %vm93_vm7, %v11113_v38  }
 0x17e   : > { %v11137_v43 = vld [vmem:[%s14081_s10 + $0x530] ss:$2 sm:$0xff]   ;;  %11127 = vst.msk [vmem:[%s14087_s14 + $0x2c3] ss:$8 sm:$0xf0] %vm93_vm7, %v11125_v40  }
 0x17f   : > { %v11149_v44 = vld [vmem:[%s14081_s10 + $0x570] ss:$2 sm:$0xff]   ;;  %11139 = vst.msk [vmem:[%s14087_s14 + $0x2c4] ss:$8 sm:$0xf0] %vm93_vm7, %v11137_v43  }
 0x180   : > { %v11161_v32 = vld [vmem:[%s14081_s10 + $0x5b0] ss:$2 sm:$0xff]   ;;  %11151 = vst.msk [vmem:[%s14087_s14 + $0x2c5] ss:$8 sm:$0xf0] %vm93_vm7, %v11149_v44  }
 0x181   : > { %v11173_v47 = vld [vmem:[%s14081_s10 + $0x5f0] ss:$2 sm:$0xff]   ;;  %v11994_v48 = vld [vmem:[%s14081_s10 + $0x21b] sm:$0x1]   ;;  %11660 = vst.msk [vmem:[%s14087_s14 + $0x2a0] sm:$0xff] %vm1465_vm8, %v15577_v4  }
 0x182   : > { %11163 = vst.msk [vmem:[%s14087_s14 + $0x2c6] ss:$8 sm:$0xf0] %vm93_vm7, %v11161_v32   ;;  %v11995_v49 = vld [vmem:[%s14081_s10 + $0x25a] sm:$0x2]  }
 0x183   : > { %11175 = vst.msk [vmem:[%s14087_s14 + $0x2c7] ss:$8 sm:$0xf0] %vm93_vm7, %v11173_v47   ;;  %v3502_v51 = vsel %vm1437_vm0, %v11995_v49, %v11994_v48  ;;  %v11996_v52 = vld [vmem:[%s14081_s10 + $0x299] sm:$0x4]  }
 0x184   : > { %11678 = vst.msk [vmem:[%s14087_s14 + $0x2e0] sm:$0xff] %vm1465_vm8, %v15520_v45   ;;  %v3506_v45 = vsel %vm1441_vm1, %v11996_v52, %v3502_v51  ;;  %v11997_v41 = vld [vmem:[%s14081_s10 + $0x2d8] sm:$0x8]   ;;  %v12057_v15 = vld [vmem:[%s14081_s10 + $0x413] sm:$0x1]  }
 0x185   : > { %v11998_v54 = vld [vmem:[%s14081_s10 + $0x317] sm:$0x10]   ;;  %11090 = vst.msk [vmem:[%s14087_s14 + $0x2c0] ss:$8 sm:$0xf] %vm93_vm7, %v11089_v35   ;;  %v3510_v55 = vsel %vm1445_vm2, %v11997_v41, %v3506_v45 }
 0x186   : > { %v11999_v56 = vld [vmem:[%s14081_s10 + $0x356] sm:$0x20]   ;;  %11102 = vst.msk [vmem:[%s14087_s14 + $0x2c1] ss:$8 sm:$0xf] %vm93_vm7, %v11101_v37   ;;  %v3514_v57 = vsel %vm1449_vm3, %v11998_v54, %v3510_v55  ;;  %v15766_v37 = vpop.permute.xlu2 %2477  }
 0x187   : > { %v12000_v58 = vld [vmem:[%s14081_s10 + $0x395] sm:$0x40]   ;;  %11114 = vst.msk [vmem:[%s14087_s14 + $0x2c2] ss:$8 sm:$0xf] %vm93_vm7, %v11113_v38   ;;  %v3518_v53 = vsel %vm1453_vm4, %v11999_v56, %v3514_v57 }
 0x188   : > { %v12001_v36 = vld [vmem:[%s14081_s10 + $0x3d4] sm:$0x80]   ;;  %11126 = vst.msk [vmem:[%s14087_s14 + $0x2c3] ss:$8 sm:$0xf] %vm93_vm7, %v11125_v40   ;;  %v3522_v60 = vsel %vm1457_vm5, %v12000_v58, %v3518_v53 }
 0x189   : > { %v12066_v61 = vld [vmem:[%s14081_s10 + $0x41b] sm:$0x1]   ;;  %11138 = vst.msk [vmem:[%s14087_s14 + $0x2c4] ss:$8 sm:$0xf] %vm93_vm7, %v11137_v43   ;;  %v3526_v62 = vsel %vm1461_vm6, %v12001_v36, %v3522_v60 }
 0x18a   : > { %v12067_v63 = vld [vmem:[%s14081_s10 + $0x45a] sm:$0x2]   ;;  %11150 = vst.msk [vmem:[%s14087_s14 + $0x2c5] ss:$8 sm:$0xf] %vm93_vm7, %v11149_v44   ;;  %3527 = vrot.lane.b32.xlu2 %v3526_v62, %s14020_s15  ;;  %v15823_v62 = vpop.permute.xlu0 %2407  }
 0x18b   : > { %v3782_v0 = vsel %vm1437_vm0, %v12067_v63, %v12066_v61  ;;  %v12068_v59 = vld [vmem:[%s14081_s10 + $0x499] sm:$0x4]   ;;  %11162 = vst.msk [vmem:[%s14087_s14 + $0x2c6] ss:$8 sm:$0xf] %vm93_vm7, %v11161_v32   ;;  %v15821_v61 = vpop.permute.xlu1 %2442  }
 0x18c   : > { %v3786_v1 = vsel %vm1441_vm1, %v12068_v59, %v3782_v0  ;;  %v12069_v2 = vld [vmem:[%s14081_s10 + $0x4d8] sm:$0x8]   ;;  %11174 = vst.msk [vmem:[%s14087_s14 + $0x2c7] ss:$8 sm:$0xf] %vm93_vm7, %v11173_v47  }
 0x18d   : > { %v3790_v5 = vsel %vm1445_vm2, %v12069_v2, %v3786_v1  ;;  %v12070_v6 = vld [vmem:[%s14081_s10 + $0x517] sm:$0x10]   ;;  %11669 = vst.msk [vmem:[%s14087_s14 + $0x2c0] sm:$0xff] %vm1465_vm8, %v15575_v3   ;;  %v12058_v42 = vld [vmem:[%s14081_s10 + $0x452] sm:$0x2]  }
 0x18e   : > { %v3794_v3 = vsel %vm1449_vm3, %v12070_v6, %v3790_v5  ;;  %v12071_v9 = vld [vmem:[%s14081_s10 + $0x556] sm:$0x20]   ;;  %v12059_v13 = vld [vmem:[%s14081_s10 + $0x491] sm:$0x4]   ;;  %v3747_v14 = vsel %vm1437_vm0, %v12058_v42, %v12057_v15  ;;  %v11179_v22 = vld [vmem:[%s14081_s10 + $0x610] ss:$2 sm:$0xff]  }
 0x18f   : > { %v12072_v11 = vld [vmem:[%s14081_s10 + $0x595] sm:$0x40]   ;;  %v3798_v4 = vsel %vm1453_vm4, %v12071_v9, %v3794_v3  ;;  %v12060_v17 = vld [vmem:[%s14081_s10 + $0x4d0] sm:$0x8]   ;;  %v3751_v50 = vsel %vm1441_vm1, %v12059_v13, %v3747_v14  ;;  %v11191_v23 = vld [vmem:[%s14081_s10 + $0x650] ss:$2 sm:$0xff]  }
 0x190   : > { %v12073_v12 = vld [vmem:[%s14081_s10 + $0x5d4] sm:$0x80]   ;;  %v3802_v16 = vsel %vm1457_vm5, %v12072_v11, %v3798_v4  ;;  %v12061_v19 = vld [vmem:[%s14081_s10 + $0x50f] sm:$0x10]   ;;  %v3755_v20 = vsel %vm1445_vm2, %v12060_v17, %v3751_v50  ;;  %v11203_v10 = vld [vmem:[%s14081_s10 + $0x690] ss:$2 sm:$0xff]  }
 0x191   : > { %v3806_v18 = vsel %vm1461_vm6, %v12073_v12, %v3802_v16  ;;  %v12062_v21 = vld [vmem:[%s14081_s10 + $0x54e] sm:$0x20]   ;;  %11180 = vst.msk [vmem:[%s14087_s14 + $0x340] ss:$8 sm:$0xf] %vm93_vm7, %v11179_v22   ;;  %v3759_v24 = vsel %vm1449_vm3, %v12061_v19, %v3755_v20 }
 0x192   : > { %v12063_v8 = vld [vmem:[%s14081_s10 + $0x58d] sm:$0x40]   ;;  %3807 = vrot.lane.b32.xlu1 %v3806_v18, %s14020_s15  ;;  %11192 = vst.msk [vmem:[%s14087_s14 + $0x341] ss:$8 sm:$0xf] %vm93_vm7, %v11191_v23   ;;  %v3763_v27 = vsel %vm1453_vm4, %v12062_v21, %v3759_v24 }
 0x193   : > { %v12064_v7 = vld [vmem:[%s14081_s10 + $0x5cc] sm:$0x80]   ;;  %v11215_v46 = vld [vmem:[%s14081_s10 + $0x6d0] ss:$2 sm:$0xff]   ;;  %v3767_v29 = vsel %vm1457_vm5, %v12063_v8, %v3763_v27  ;;  %v11188_v38 = vld [vmem:[%s14081_s10 + $0x640] ss:$2 sm:$0xff]   ;;  %v15872_v8 = vpop.permute.xlu2 %2582  }
 0x194   : > { %11204 = vst.msk [vmem:[%s14087_s14 + $0x342] ss:$8 sm:$0xf] %vm93_vm7, %v11203_v10   ;;  %v11227_v28 = vld [vmem:[%s14081_s10 + $0x710] ss:$2 sm:$0xff]   ;;  %v3771_v31 = vsel %vm1461_vm6, %v12064_v7, %v3767_v29 }
 0x195   : > { %11216 = vst.msk [vmem:[%s14087_s14 + $0x343] ss:$8 sm:$0xf] %vm93_vm7, %v11215_v46   ;;  %v11239_v30 = vld [vmem:[%s14081_s10 + $0x750] ss:$2 sm:$0xff]   ;;  %3772 = vrot.lane.b32.xlu0 %v3771_v31, %s14020_s15 }
 0x196   : > { %11228 = vst.msk [vmem:[%s14087_s14 + $0x344] ss:$8 sm:$0xf] %vm93_vm7, %v11227_v28   ;;  %v11251_v34 = vld [vmem:[%s14081_s10 + $0x790] ss:$2 sm:$0xff]  }
 0x197   : > { %11240 = vst.msk [vmem:[%s14087_s14 + $0x345] ss:$8 sm:$0xf] %vm93_vm7, %v11239_v30   ;;  %v11263_v35 = vld [vmem:[%s14081_s10 + $0x7d0] ss:$2 sm:$0xff]  }
 0x198   : > { %11252 = vst.msk [vmem:[%s14087_s14 + $0x346] ss:$8 sm:$0xf] %vm93_vm7, %v11251_v34   ;;  %v12021_v39 = vld [vmem:[%s14081_s10 + $0x233] sm:$0x1]  }
 0x199   : > { %11264 = vst.msk [vmem:[%s14087_s14 + $0x347] ss:$8 sm:$0xf] %vm93_vm7, %v11263_v35   ;;  %v11200_v40 = vld [vmem:[%s14081_s10 + $0x680] ss:$2 sm:$0xff]  }
 0x19a   : > { %11705 = vst.msk [vmem:[%s14087_s14 + $0x340] sm:$0xff] %vm1465_vm8, %v15626_v25   ;;  %v11176_v25 = vld [vmem:[%s14081_s10 + $0x600] ss:$2 sm:$0xff]   ;;  %v12022_v43 = vld [vmem:[%s14081_s10 + $0x272] sm:$0x2]  }
 0x19b   : > { %11181 = vst.msk [vmem:[%s14087_s14 + $0x340] ss:$8 sm:$0xf0] %vm93_vm7, %v11179_v22   ;;  %v11212_v44 = vld [vmem:[%s14081_s10 + $0x6c0] ss:$2 sm:$0xff]   ;;  %v3607_v32 = vsel %vm1437_vm0, %v12022_v43, %v12021_v39 }
 0x19c   : > { %11193 = vst.msk [vmem:[%s14087_s14 + $0x341] ss:$8 sm:$0xf0] %vm93_vm7, %v11191_v23   ;;  %v12023_v47 = vld [vmem:[%s14081_s10 + $0x2b1] sm:$0x4]  }
 0x19d   : > { %11205 = vst.msk [vmem:[%s14087_s14 + $0x342] ss:$8 sm:$0xf0] %vm93_vm7, %v11203_v10   ;;  %v11224_v48 = vld [vmem:[%s14081_s10 + $0x700] ss:$2 sm:$0xff]   ;;  %v3611_v49 = vsel %vm1441_vm1, %v12023_v47, %v3607_v32 }
 0x19e   : > { %11217 = vst.msk [vmem:[%s14087_s14 + $0x343] ss:$8 sm:$0xf0] %vm93_vm7, %v11215_v46   ;;  %v12024_v51 = vld [vmem:[%s14081_s10 + $0x2f0] sm:$0x8]   ;;  %v15888_v46 = vpop.permute.xlu1 %2547  }
 0x19f   : > { %11229 = vst.msk [vmem:[%s14087_s14 + $0x344] ss:$8 sm:$0xf0] %vm93_vm7, %v11227_v28   ;;  %v11236_v52 = vld [vmem:[%s14081_s10 + $0x740] ss:$2 sm:$0xff]   ;;  %v3615_v45 = vsel %vm1445_vm2, %v12024_v51, %v3611_v49 }
 0x1a0   : > { %11241 = vst.msk [vmem:[%s14087_s14 + $0x345] ss:$8 sm:$0xf0] %vm93_vm7, %v11239_v30   ;;  %v12025_v41 = vld [vmem:[%s14081_s10 + $0x32f] sm:$0x10]  }
 0x1a1   : > { %11253 = vst.msk [vmem:[%s14087_s14 + $0x346] ss:$8 sm:$0xf0] %vm93_vm7, %v11251_v34   ;;  %v11248_v54 = vld [vmem:[%s14081_s10 + $0x780] ss:$2 sm:$0xff]   ;;  %v3619_v55 = vsel %vm1449_vm3, %v12025_v41, %v3615_v45 }
 0x1a2   : > { %11265 = vst.msk [vmem:[%s14087_s14 + $0x347] ss:$8 sm:$0xf0] %vm93_vm7, %v11263_v35   ;;  %v12026_v56 = vld [vmem:[%s14081_s10 + $0x36e] sm:$0x20]  }
 0x1a3   : > { %11178 = vst.msk [vmem:[%s14087_s14 + $0x300] ss:$8 sm:$0xf0] %vm93_vm7, %v11176_v25   ;;  %v11260_v57 = vld [vmem:[%s14081_s10 + $0x7c0] ss:$2 sm:$0xff]   ;;  %v3623_v58 = vsel %vm1453_vm4, %v12026_v56, %v3619_v55 }
 0x1a4   : > { %11190 = vst.msk [vmem:[%s14087_s14 + $0x301] ss:$8 sm:$0xf0] %vm93_vm7, %v11188_v38   ;;  %v12027_v53 = vld [vmem:[%s14081_s10 + $0x3ad] sm:$0x40]  }
 0x1a5   : > { %11202 = vst.msk [vmem:[%s14087_s14 + $0x302] ss:$8 sm:$0xf0] %vm93_vm7, %v11200_v40   ;;  %v3627_v36 = vsel %vm1457_vm5, %v12027_v53, %v3623_v58  ;;  %v12028_v60 = vld [vmem:[%s14081_s10 + $0x3ec] sm:$0x80]  }
 0x1a6   : > { %11214 = vst.msk [vmem:[%s14087_s14 + $0x303] ss:$8 sm:$0xf0] %vm93_vm7, %v11212_v44   ;;  %v3631_v63 = vsel %vm1461_vm6, %v12028_v60, %v3627_v36  ;;  %v12093_v0 = vld [vmem:[%s14081_s10 + $0x433] sm:$0x1]  }
 0x1a7   : > { %11226 = vst.msk [vmem:[%s14087_s14 + $0x304] ss:$8 sm:$0xf0] %vm93_vm7, %v11224_v48   ;;  %3632 = vrot.lane.b32.xlu2 %v3631_v63, %s14020_s15  ;;  %v12094_v59 = vld [vmem:[%s14081_s10 + $0x472] sm:$0x2]  }
 0x1a8   : > { %11238 = vst.msk [vmem:[%s14087_s14 + $0x305] ss:$8 sm:$0xf0] %vm93_vm7, %v11236_v52   ;;  %v3887_v1 = vsel %vm1437_vm0, %v12094_v59, %v12093_v0  ;;  %v12095_v2 = vld [vmem:[%s14081_s10 + $0x4b1] sm:$0x4]  }
 0x1a9   : > { %11250 = vst.msk [vmem:[%s14087_s14 + $0x306] ss:$8 sm:$0xf0] %vm93_vm7, %v11248_v54   ;;  %v3891_v5 = vsel %vm1441_vm1, %v12095_v2, %v3887_v1  ;;  %v12096_v6 = vld [vmem:[%s14081_s10 + $0x4f0] sm:$0x8]  }
 0x1aa   : > { %11262 = vst.msk [vmem:[%s14087_s14 + $0x307] ss:$8 sm:$0xf0] %vm93_vm7, %v11260_v57   ;;  %v12097_v3 = vld [vmem:[%s14081_s10 + $0x52f] sm:$0x10]  }
 0x1ab   : > { %11696 = vst.msk [vmem:[%s14087_s14 + $0x320] sm:$0xff] %vm1465_vm8, %v15642_v33   ;;  %v3895_v33 = vsel %vm1445_vm2, %v12096_v6, %v3891_v5  ;;  %v12098_v9 = vld [vmem:[%s14081_s10 + $0x56e] sm:$0x20]   ;;  %v12084_v42 = vld [vmem:[%s14081_s10 + $0x42b] sm:$0x1]  }
 0x1ac   : > { %11177 = vst.msk [vmem:[%s14087_s14 + $0x300] ss:$8 sm:$0xf] %vm93_vm7, %v11176_v25   ;;  %v3899_v11 = vsel %vm1449_vm3, %v12097_v3, %v3895_v33  ;;  %v12099_v4 = vld [vmem:[%s14081_s10 + $0x5ad] sm:$0x40]  }
 0x1ad   : > { %11189 = vst.msk [vmem:[%s14087_s14 + $0x301] ss:$8 sm:$0xf] %vm93_vm7, %v11188_v38   ;;  %v3903_v12 = vsel %vm1453_vm4, %v12098_v9, %v3899_v11  ;;  %v12100_v15 = vld [vmem:[%s14081_s10 + $0x5ec] sm:$0x80]  }
 0x1ae   : > { %11201 = vst.msk [vmem:[%s14087_s14 + $0x302] ss:$8 sm:$0xf] %vm93_vm7, %v11200_v40   ;;  %v3907_v16 = vsel %vm1457_vm5, %v12099_v4, %v3903_v12  ;;  %v12085_v17 = vld [vmem:[%s14081_s10 + $0x46a] sm:$0x2]  }
 0x1af   : > { %11213 = vst.msk [vmem:[%s14087_s14 + $0x303] ss:$8 sm:$0xf] %vm93_vm7, %v11212_v44   ;;  %v3911_v13 = vsel %vm1461_vm6, %v12100_v15, %v3907_v16  ;;  %v3852_v18 = vsel %vm1437_vm0, %v12085_v17, %v12084_v42  ;;  %v12086_v14 = vld [vmem:[%s14081_s10 + $0x4a9] sm:$0x4]  }
 0x1b0   : > { %11225 = vst.msk [vmem:[%s14087_s14 + $0x304] ss:$8 sm:$0xf] %vm93_vm7, %v11224_v48   ;;  %3912 = vrot.lane.b32.xlu1 %v3911_v13, %s14020_s15  ;;  %v3856_v19 = vsel %vm1441_vm1, %v12086_v14, %v3852_v18  ;;  %v12087_v21 = vld [vmem:[%s14081_s10 + $0x4e8] sm:$0x8]  }
 0x1b1   : > { %11237 = vst.msk [vmem:[%s14087_s14 + $0x305] ss:$8 sm:$0xf] %vm93_vm7, %v11236_v52   ;;  %v3860_v50 = vsel %vm1445_vm2, %v12087_v21, %v3856_v19  ;;  %v12088_v7 = vld [vmem:[%s14081_s10 + $0x527] sm:$0x10]  }
 0x1b2   : > { %11249 = vst.msk [vmem:[%s14087_s14 + $0x306] ss:$8 sm:$0xf] %vm93_vm7, %v11248_v54   ;;  %v3864_v22 = vsel %vm1449_vm3, %v12088_v7, %v3860_v50  ;;  %v12089_v23 = vld [vmem:[%s14081_s10 + $0x566] sm:$0x20]   ;;  %v15994_v7 = vpop.permute.xlu0 %2512  }
 0x1b3   : > { %11261 = vst.msk [vmem:[%s14087_s14 + $0x307] ss:$8 sm:$0xf] %vm93_vm7, %v11260_v57   ;;  %v3868_v20 = vsel %vm1453_vm4, %v12089_v23, %v3864_v22  ;;  %v12090_v10 = vld [vmem:[%s14081_s10 + $0x5a5] sm:$0x40]  }
 0x1b4   : > { %11687 = vst.msk [vmem:[%s14087_s14 + $0x300] sm:$0xff] %vm1465_vm8, %v15748_v26   ;;  %v12091_v24 = vld [vmem:[%s14081_s10 + $0x5e4] sm:$0x80]   ;;  %v3872_v26 = vsel %vm1457_vm5, %v12090_v10, %v3868_v20  ;;  %v11182_v27 = vld [vmem:[%s14081_s10 + $0x620] ss:$2 sm:$0xff]  }
 0x1b5   : > { %v11194_v28 = vld [vmem:[%s14081_s10 + $0x660] ss:$2 sm:$0xff]   ;;  %v3876_v30 = vsel %vm1461_vm6, %v12091_v24, %v3872_v26  ;;  %11184 = vst.msk [vmem:[%s14087_s14 + $0x380] ss:$8 sm:$0xf0] %vm93_vm7, %v11182_v27  }
 0x1b6   : > { %v11206_v29 = vld [vmem:[%s14081_s10 + $0x6a0] ss:$2 sm:$0xff]   ;;  %3877 = vrot.lane.b32.xlu0 %v3876_v30, %s14020_s15  ;;  %11196 = vst.msk [vmem:[%s14087_s14 + $0x381] ss:$8 sm:$0xf0] %vm93_vm7, %v11194_v28  }
 0x1b7   : > { %v11218_v31 = vld [vmem:[%s14081_s10 + $0x6e0] ss:$2 sm:$0xff]   ;;  %11208 = vst.msk [vmem:[%s14087_s14 + $0x382] ss:$8 sm:$0xf0] %vm93_vm7, %v11206_v29  }
 0x1b8   : > { %v11230_v34 = vld [vmem:[%s14081_s10 + $0x720] ss:$2 sm:$0xff]   ;;  %11220 = vst.msk [vmem:[%s14087_s14 + $0x383] ss:$8 sm:$0xf0] %vm93_vm7, %v11218_v31  }
 0x1b9   : > { %v11242_v35 = vld [vmem:[%s14081_s10 + $0x760] ss:$2 sm:$0xff]   ;;  %11232 = vst.msk [vmem:[%s14087_s14 + $0x384] ss:$8 sm:$0xf0] %vm93_vm7, %v11230_v34  }
 0x1ba   : > { %v11254_v25 = vld [vmem:[%s14081_s10 + $0x7a0] ss:$2 sm:$0xff]   ;;  %11244 = vst.msk [vmem:[%s14087_s14 + $0x385] ss:$8 sm:$0xf0] %vm93_vm7, %v11242_v35  }
 0x1bb   : > { %v11266_v38 = vld [vmem:[%s14081_s10 + $0x7e0] ss:$2 sm:$0xff]   ;;  %v12048_v39 = vld [vmem:[%s14081_s10 + $0x40b] sm:$0x1]   ;;  %11714 = vst.msk [vmem:[%s14087_s14 + $0x360] sm:$0xff] %vm1465_vm8, %v15823_v62  }
 0x1bc   : > { %11256 = vst.msk [vmem:[%s14087_s14 + $0x386] ss:$8 sm:$0xf0] %vm93_vm7, %v11254_v25   ;;  %v12049_v40 = vld [vmem:[%s14081_s10 + $0x44a] sm:$0x2]  }
 0x1bd   : > { %11268 = vst.msk [vmem:[%s14087_s14 + $0x387] ss:$8 sm:$0xf0] %vm93_vm7, %v11266_v38   ;;  %v3712_v43 = vsel %vm1437_vm0, %v12049_v40, %v12048_v39  ;;  %v12050_v44 = vld [vmem:[%s14081_s10 + $0x489] sm:$0x4]  }
 0x1be   : > { %11732 = vst.msk [vmem:[%s14087_s14 + $0x3a0] sm:$0xff] %vm1465_vm8, %v15766_v37   ;;  %v3716_v37 = vsel %vm1441_vm1, %v12050_v44, %v3712_v43  ;;  %v12051_v32 = vld [vmem:[%s14081_s10 + $0x4c8] sm:$0x8]   ;;  %v12111_v5 = vld [vmem:[%s14081_s10 + $0x603] sm:$0x1]  }
 0x1bf   : > { %v12052_v47 = vld [vmem:[%s14081_s10 + $0x507] sm:$0x10]   ;;  %11183 = vst.msk [vmem:[%s14087_s14 + $0x380] ss:$8 sm:$0xf] %vm93_vm7, %v11182_v27   ;;  %v3720_v48 = vsel %vm1445_vm2, %v12051_v32, %v3716_v37 }
 0x1c0   : > { %v12053_v49 = vld [vmem:[%s14081_s10 + $0x546] sm:$0x20]   ;;  %11195 = vst.msk [vmem:[%s14087_s14 + $0x381] ss:$8 sm:$0xf] %vm93_vm7, %v11194_v28   ;;  %v3724_v51 = vsel %vm1449_vm3, %v12052_v47, %v3720_v48  ;;  %v16012_v28 = vpop.permute.xlu2 %2687  }
 0x1c1   : > { %v12054_v52 = vld [vmem:[%s14081_s10 + $0x585] sm:$0x40]   ;;  %11207 = vst.msk [vmem:[%s14087_s14 + $0x382] ss:$8 sm:$0xf] %vm93_vm7, %v11206_v29   ;;  %v3728_v45 = vsel %vm1453_vm4, %v12053_v49, %v3724_v51 }
 0x1c2   : > { %v12055_v41 = vld [vmem:[%s14081_s10 + $0x5c4] sm:$0x80]   ;;  %11219 = vst.msk [vmem:[%s14087_s14 + $0x383] ss:$8 sm:$0xf] %vm93_vm7, %v11218_v31   ;;  %v3732_v54 = vsel %vm1457_vm5, %v12054_v52, %v3728_v45 }
 0x1c3   : > { %v12120_v55 = vld [vmem:[%s14081_s10 + $0x60b] sm:$0x1]   ;;  %11231 = vst.msk [vmem:[%s14087_s14 + $0x384] ss:$8 sm:$0xf] %vm93_vm7, %v11230_v34   ;;  %v3736_v56 = vsel %vm1461_vm6, %v12055_v41, %v3732_v54 }
 0x1c4   : > { %v12121_v57 = vld [vmem:[%s14081_s10 + $0x64a] sm:$0x2]   ;;  %11243 = vst.msk [vmem:[%s14087_s14 + $0x385] ss:$8 sm:$0xf] %vm93_vm7, %v11242_v35   ;;  %3737 = vrot.lane.b32.xlu2 %v3736_v56, %s14020_s15  ;;  %v16069_v56 = vpop.permute.xlu0 %2617  }
 0x1c5   : > { %v3992_v58 = vsel %vm1437_vm0, %v12121_v57, %v12120_v55  ;;  %v12122_v53 = vld [vmem:[%s14081_s10 + $0x689] sm:$0x4]   ;;  %11255 = vst.msk [vmem:[%s14087_s14 + $0x386] ss:$8 sm:$0xf] %vm93_vm7, %v11254_v25   ;;  %v16067_v55 = vpop.permute.xlu1 %2652  }
 0x1c6   : > { %v3996_v36 = vsel %vm1441_vm1, %v12122_v53, %v3992_v58  ;;  %v12123_v60 = vld [vmem:[%s14081_s10 + $0x6c8] sm:$0x8]   ;;  %11267 = vst.msk [vmem:[%s14087_s14 + $0x387] ss:$8 sm:$0xf] %vm93_vm7, %v11266_v38  }
 0x1c7   : > { %v4000_v63 = vsel %vm1445_vm2, %v12123_v60, %v3996_v36  ;;  %v12124_v0 = vld [vmem:[%s14081_s10 + $0x707] sm:$0x10]   ;;  %11723 = vst.msk [vmem:[%s14087_s14 + $0x380] sm:$0xff] %vm1465_vm8, %v15821_v61   ;;  %v12112_v33 = vld [vmem:[%s14081_s10 + $0x642] sm:$0x2]  }
 0x1c8   : > { %v4004_v61 = vsel %vm1449_vm3, %v12124_v0, %v4000_v63  ;;  %v12125_v59 = vld [vmem:[%s14081_s10 + $0x746] sm:$0x20]   ;;  %v12113_v3 = vld [vmem:[%s14081_s10 + $0x681] sm:$0x4]   ;;  %v3957_v4 = vsel %vm1437_vm0, %v12112_v33, %v12111_v5  ;;  %v11272_v17 = vld [vmem:[%s14081_s10 + $0x800] ss:$2 sm:$0xff]  }
 0x1c9   : > { %v12126_v1 = vld [vmem:[%s14081_s10 + $0x785] sm:$0x40]   ;;  %v4008_v62 = vsel %vm1453_vm4, %v12125_v59, %v4004_v61  ;;  %v12114_v9 = vld [vmem:[%s14081_s10 + $0x6c0] sm:$0x8]   ;;  %v3961_v42 = vsel %vm1441_vm1, %v12113_v3, %v3957_v4  ;;  %v11284_v18 = vld [vmem:[%s14081_s10 + $0x840] ss:$2 sm:$0xff]  }
 0x1ca   : > { %v12127_v2 = vld [vmem:[%s14081_s10 + $0x7c4] sm:$0x80]   ;;  %v4012_v6 = vsel %vm1457_vm5, %v12126_v1, %v4008_v62  ;;  %v12115_v12 = vld [vmem:[%s14081_s10 + $0x6ff] sm:$0x10]   ;;  %v3965_v14 = vsel %vm1445_vm2, %v12114_v9, %v3961_v42  ;;  %v11296_v19 = vld [vmem:[%s14081_s10 + $0x880] ss:$2 sm:$0xff]  }
 0x1cb   : > { %v4016_v11 = vsel %vm1461_vm6, %v12127_v2, %v4012_v6  ;;  %v12116_v15 = vld [vmem:[%s14081_s10 + $0x73e] sm:$0x20]   ;;  %11273 = vst.msk [vmem:[%s14087_s14 + $0x400] ss:$8 sm:$0xf] %vm93_vm7, %v11272_v17   ;;  %v3969_v21 = vsel %vm1449_vm3, %v12115_v12, %v3965_v14 }
 0x1cc   : > { %v12117_v16 = vld [vmem:[%s14081_s10 + $0x77d] sm:$0x40]   ;;  %4017 = vrot.lane.b32.xlu1 %v4016_v11, %s14020_s15  ;;  %11285 = vst.msk [vmem:[%s14087_s14 + $0x401] ss:$8 sm:$0xf] %vm93_vm7, %v11284_v18   ;;  %v3973_v22 = vsel %vm1453_vm4, %v12116_v15, %v3969_v21 }
 0x1cd   : > { %v12118_v13 = vld [vmem:[%s14081_s10 + $0x7bc] sm:$0x80]   ;;  %v11308_v50 = vld [vmem:[%s14081_s10 + $0x8c0] ss:$2 sm:$0xff]   ;;  %v3977_v20 = vsel %vm1457_vm5, %v12117_v16, %v3973_v22  ;;  %v11197_v29 = vld [vmem:[%s14081_s10 + $0x670] ss:$2 sm:$0xff]   ;;  %v16118_v16 = vpop.permute.xlu2 %2792  }
 0x1ce   : > { %11297 = vst.msk [vmem:[%s14087_s14 + $0x402] ss:$8 sm:$0xf] %vm93_vm7, %v11296_v19   ;;  %v11320_v23 = vld [vmem:[%s14081_s10 + $0x900] ss:$2 sm:$0xff]   ;;  %v3981_v24 = vsel %vm1461_vm6, %v12118_v13, %v3977_v20 }
 0x1cf   : > { %11309 = vst.msk [vmem:[%s14087_s14 + $0x403] ss:$8 sm:$0xf] %vm93_vm7, %v11308_v50   ;;  %v11332_v10 = vld [vmem:[%s14081_s10 + $0x940] ss:$2 sm:$0xff]   ;;  %3982 = vrot.lane.b32.xlu0 %v3981_v24, %s14020_s15 }
 0x1d0   : > { %11321 = vst.msk [vmem:[%s14087_s14 + $0x404] ss:$8 sm:$0xf] %vm93_vm7, %v11320_v23   ;;  %v11344_v26 = vld [vmem:[%s14081_s10 + $0x980] ss:$2 sm:$0xff]  }
 0x1d1   : > { %11333 = vst.msk [vmem:[%s14087_s14 + $0x405] ss:$8 sm:$0xf] %vm93_vm7, %v11332_v10   ;;  %v11356_v27 = vld [vmem:[%s14081_s10 + $0x9c0] ss:$2 sm:$0xff]  }
 0x1d2   : > { %11345 = vst.msk [vmem:[%s14087_s14 + $0x406] ss:$8 sm:$0xf] %vm93_vm7, %v11344_v26   ;;  %v12075_v30 = vld [vmem:[%s14081_s10 + $0x423] sm:$0x1]  }
 0x1d3   : > { %11357 = vst.msk [vmem:[%s14087_s14 + $0x407] ss:$8 sm:$0xf] %vm93_vm7, %v11356_v27   ;;  %v11209_v31 = vld [vmem:[%s14081_s10 + $0x6b0] ss:$2 sm:$0xff]  }
 0x1d4   : > { %11759 = vst.msk [vmem:[%s14087_s14 + $0x400] sm:$0xff] %vm1465_vm8, %v15872_v8   ;;  %v11185_v8 = vld [vmem:[%s14081_s10 + $0x630] ss:$2 sm:$0xff]   ;;  %v12076_v34 = vld [vmem:[%s14081_s10 + $0x462] sm:$0x2]  }
 0x1d5   : > { %11274 = vst.msk [vmem:[%s14087_s14 + $0x400] ss:$8 sm:$0xf0] %vm93_vm7, %v11272_v17   ;;  %v11221_v35 = vld [vmem:[%s14081_s10 + $0x6f0] ss:$2 sm:$0xff]   ;;  %v3817_v25 = vsel %vm1437_vm0, %v12076_v34, %v12075_v30 }
 0x1d6   : > { %11286 = vst.msk [vmem:[%s14087_s14 + $0x401] ss:$8 sm:$0xf0] %vm93_vm7, %v11284_v18   ;;  %v12077_v38 = vld [vmem:[%s14081_s10 + $0x4a1] sm:$0x4]  }
 0x1d7   : > { %11298 = vst.msk [vmem:[%s14087_s14 + $0x402] ss:$8 sm:$0xf0] %vm93_vm7, %v11296_v19   ;;  %v11233_v39 = vld [vmem:[%s14081_s10 + $0x730] ss:$2 sm:$0xff]   ;;  %v3821_v40 = vsel %vm1441_vm1, %v12077_v38, %v3817_v25 }
 0x1d8   : > { %11310 = vst.msk [vmem:[%s14087_s14 + $0x403] ss:$8 sm:$0xf0] %vm93_vm7, %v11308_v50   ;;  %v12078_v43 = vld [vmem:[%s14081_s10 + $0x4e0] sm:$0x8]   ;;  %v16134_v50 = vpop.permute.xlu1 %2757  }
 0x1d9   : > { %11322 = vst.msk [vmem:[%s14087_s14 + $0x404] ss:$8 sm:$0xf0] %vm93_vm7, %v11320_v23   ;;  %v11245_v44 = vld [vmem:[%s14081_s10 + $0x770] ss:$2 sm:$0xff]   ;;  %v3825_v37 = vsel %vm1445_vm2, %v12078_v43, %v3821_v40 }
 0x1da   : > { %11334 = vst.msk [vmem:[%s14087_s14 + $0x405] ss:$8 sm:$0xf0] %vm93_vm7, %v11332_v10   ;;  %v12079_v32 = vld [vmem:[%s14081_s10 + $0x51f] sm:$0x10]  }
 0x1db   : > { %11346 = vst.msk [vmem:[%s14087_s14 + $0x406] ss:$8 sm:$0xf0] %vm93_vm7, %v11344_v26   ;;  %v11257_v47 = vld [vmem:[%s14081_s10 + $0x7b0] ss:$2 sm:$0xff]   ;;  %v3829_v48 = vsel %vm1449_vm3, %v12079_v32, %v3825_v37 }
 0x1dc   : > { %11358 = vst.msk [vmem:[%s14087_s14 + $0x407] ss:$8 sm:$0xf0] %vm93_vm7, %v11356_v27   ;;  %v12080_v49 = vld [vmem:[%s14081_s10 + $0x55e] sm:$0x20]  }
 0x1dd   : > { %11187 = vst.msk [vmem:[%s14087_s14 + $0x3c0] ss:$8 sm:$0xf0] %vm93_vm7, %v11185_v8   ;;  %v11269_v51 = vld [vmem:[%s14081_s10 + $0x7f0] ss:$2 sm:$0xff]   ;;  %v3833_v52 = vsel %vm1453_vm4, %v12080_v49, %v3829_v48 }
 0x1de   : > { %11199 = vst.msk [vmem:[%s14087_s14 + $0x3c1] ss:$8 sm:$0xf0] %vm93_vm7, %v11197_v29   ;;  %v12081_v45 = vld [vmem:[%s14081_s10 + $0x59d] sm:$0x40]  }
 0x1df   : > { %11211 = vst.msk [vmem:[%s14087_s14 + $0x3c2] ss:$8 sm:$0xf0] %vm93_vm7, %v11209_v31   ;;  %v3837_v41 = vsel %vm1457_vm5, %v12081_v45, %v3833_v52  ;;  %v12082_v54 = vld [vmem:[%s14081_s10 + $0x5dc] sm:$0x80]  }
 0x1e0   : > { %11223 = vst.msk [vmem:[%s14087_s14 + $0x3c3] ss:$8 sm:$0xf0] %vm93_vm7, %v11221_v35   ;;  %v3841_v57 = vsel %vm1461_vm6, %v12082_v54, %v3837_v41  ;;  %v12147_v58 = vld [vmem:[%s14081_s10 + $0x623] sm:$0x1]  }
 0x1e1   : > { %11235 = vst.msk [vmem:[%s14087_s14 + $0x3c4] ss:$8 sm:$0xf0] %vm93_vm7, %v11233_v39   ;;  %3842 = vrot.lane.b32.xlu2 %v3841_v57, %s14020_s15  ;;  %v12148_v53 = vld [vmem:[%s14081_s10 + $0x662] sm:$0x2]  }
 0x1e2   : > { %11247 = vst.msk [vmem:[%s14087_s14 + $0x3c5] ss:$8 sm:$0xf0] %vm93_vm7, %v11245_v44   ;;  %v4097_v36 = vsel %vm1437_vm0, %v12148_v53, %v12147_v58  ;;  %v12149_v60 = vld [vmem:[%s14081_s10 + $0x6a1] sm:$0x4]  }
 0x1e3   : > { %11259 = vst.msk [vmem:[%s14087_s14 + $0x3c6] ss:$8 sm:$0xf0] %vm93_vm7, %v11257_v47   ;;  %v4101_v63 = vsel %vm1441_vm1, %v12149_v60, %v4097_v36  ;;  %v12150_v0 = vld [vmem:[%s14081_s10 + $0x6e0] sm:$0x8]  }
 0x1e4   : > { %11271 = vst.msk [vmem:[%s14087_s14 + $0x3c7] ss:$8 sm:$0xf0] %vm93_vm7, %v11269_v51   ;;  %v12151_v61 = vld [vmem:[%s14081_s10 + $0x71f] sm:$0x10]  }
 0x1e5   : > { %11750 = vst.msk [vmem:[%s14087_s14 + $0x3e0] sm:$0xff] %vm1465_vm8, %v15888_v46   ;;  %v4105_v46 = vsel %vm1445_vm2, %v12150_v0, %v4101_v63  ;;  %v12152_v59 = vld [vmem:[%s14081_s10 + $0x75e] sm:$0x20]   ;;  %v12138_v33 = vld [vmem:[%s14081_s10 + $0x61b] sm:$0x1]  }
 0x1e6   : > { %11186 = vst.msk [vmem:[%s14087_s14 + $0x3c0] ss:$8 sm:$0xf] %vm93_vm7, %v11185_v8   ;;  %v4109_v1 = vsel %vm1449_vm3, %v12151_v61, %v4105_v46  ;;  %v12153_v62 = vld [vmem:[%s14081_s10 + $0x79d] sm:$0x40]  }
 0x1e7   : > { %11198 = vst.msk [vmem:[%s14087_s14 + $0x3c1] ss:$8 sm:$0xf] %vm93_vm7, %v11197_v29   ;;  %v4113_v2 = vsel %vm1453_vm4, %v12152_v59, %v4109_v1  ;;  %v12154_v5 = vld [vmem:[%s14081_s10 + $0x7dc] sm:$0x80]  }
 0x1e8   : > { %11210 = vst.msk [vmem:[%s14087_s14 + $0x3c2] ss:$8 sm:$0xf] %vm93_vm7, %v11209_v31   ;;  %v4117_v6 = vsel %vm1457_vm5, %v12153_v62, %v4113_v2  ;;  %v12139_v9 = vld [vmem:[%s14081_s10 + $0x65a] sm:$0x2]  }
 0x1e9   : > { %11222 = vst.msk [vmem:[%s14087_s14 + $0x3c3] ss:$8 sm:$0xf] %vm93_vm7, %v11221_v35   ;;  %v4121_v3 = vsel %vm1461_vm6, %v12154_v5, %v4117_v6  ;;  %v4062_v11 = vsel %vm1437_vm0, %v12139_v9, %v12138_v33  ;;  %v12140_v4 = vld [vmem:[%s14081_s10 + $0x699] sm:$0x4]  }
 0x1ea   : > { %11234 = vst.msk [vmem:[%s14087_s14 + $0x3c4] ss:$8 sm:$0xf] %vm93_vm7, %v11233_v39   ;;  %4122 = vrot.lane.b32.xlu1 %v4121_v3, %s14020_s15  ;;  %v4066_v12 = vsel %vm1441_vm1, %v12140_v4, %v4062_v11  ;;  %v12141_v15 = vld [vmem:[%s14081_s10 + $0x6d8] sm:$0x8]  }
 0x1eb   : > { %11246 = vst.msk [vmem:[%s14087_s14 + $0x3c5] ss:$8 sm:$0xf] %vm93_vm7, %v11245_v44   ;;  %v4070_v42 = vsel %vm1445_vm2, %v12141_v15, %v4066_v12  ;;  %v12142_v13 = vld [vmem:[%s14081_s10 + $0x717] sm:$0x10]  }
 0x1ec   : > { %11258 = vst.msk [vmem:[%s14087_s14 + $0x3c6] ss:$8 sm:$0xf] %vm93_vm7, %v11257_v47   ;;  %v4074_v17 = vsel %vm1449_vm3, %v12142_v13, %v4070_v42  ;;  %v12143_v18 = vld [vmem:[%s14081_s10 + $0x756] sm:$0x20]   ;;  %v16240_v13 = vpop.permute.xlu0 %2722  }
 0x1ed   : > { %11270 = vst.msk [vmem:[%s14087_s14 + $0x3c7] ss:$8 sm:$0xf] %vm93_vm7, %v11269_v51   ;;  %v4078_v14 = vsel %vm1453_vm4, %v12143_v18, %v4074_v17  ;;  %v12144_v19 = vld [vmem:[%s14081_s10 + $0x795] sm:$0x40]  }
 0x1ee   : > { %11741 = vst.msk [vmem:[%s14087_s14 + $0x3c0] sm:$0xff] %vm1465_vm8, %v15994_v7   ;;  %v12145_v21 = vld [vmem:[%s14081_s10 + $0x7d4] sm:$0x80]   ;;  %v4082_v7 = vsel %vm1457_vm5, %v12144_v19, %v4078_v14  ;;  %v11275_v22 = vld [vmem:[%s14081_s10 + $0x810] ss:$2 sm:$0xff]  }
 0x1ef   : > { %v11287_v23 = vld [vmem:[%s14081_s10 + $0x850] ss:$2 sm:$0xff]   ;;  %v4086_v10 = vsel %vm1461_vm6, %v12145_v21, %v4082_v7  ;;  %11277 = vst.msk [vmem:[%s14087_s14 + $0x440] ss:$8 sm:$0xf0] %vm93_vm7, %v11275_v22  }
 0x1f0   : > { %v11299_v20 = vld [vmem:[%s14081_s10 + $0x890] ss:$2 sm:$0xff]   ;;  %4087 = vrot.lane.b32.xlu0 %v4086_v10, %s14020_s15  ;;  %11289 = vst.msk [vmem:[%s14087_s14 + $0x441] ss:$8 sm:$0xf0] %vm93_vm7, %v11287_v23  }
 0x1f1   : > { %v11311_v24 = vld [vmem:[%s14081_s10 + $0x8d0] ss:$2 sm:$0xff]   ;;  %11301 = vst.msk [vmem:[%s14087_s14 + $0x442] ss:$8 sm:$0xf0] %vm93_vm7, %v11299_v20  }
 0x1f2   : > { %v11323_v26 = vld [vmem:[%s14081_s10 + $0x910] ss:$2 sm:$0xff]   ;;  %11313 = vst.msk [vmem:[%s14087_s14 + $0x443] ss:$8 sm:$0xf0] %vm93_vm7, %v11311_v24  }
 0x1f3   : > { %v11335_v27 = vld [vmem:[%s14081_s10 + $0x950] ss:$2 sm:$0xff]   ;;  %11325 = vst.msk [vmem:[%s14087_s14 + $0x444] ss:$8 sm:$0xf0] %vm93_vm7, %v11323_v26  }
 0x1f4   : > { %v11347_v8 = vld [vmem:[%s14081_s10 + $0x990] ss:$2 sm:$0xff]   ;;  %11337 = vst.msk [vmem:[%s14087_s14 + $0x445] ss:$8 sm:$0xf0] %vm93_vm7, %v11335_v27  }
 0x1f5   : > { %v11359_v29 = vld [vmem:[%s14081_s10 + $0x9d0] ss:$2 sm:$0xff]   ;;  %v12102_v30 = vld [vmem:[%s14081_s10 + $0x43b] sm:$0x1]   ;;  %11768 = vst.msk [vmem:[%s14087_s14 + $0x420] sm:$0xff] %vm1465_vm8, %v16069_v56  }
 0x1f6   : > { %11349 = vst.msk [vmem:[%s14087_s14 + $0x446] ss:$8 sm:$0xf0] %vm93_vm7, %v11347_v8   ;;  %v12103_v31 = vld [vmem:[%s14081_s10 + $0x47a] sm:$0x2]  }
 0x1f7   : > { %11361 = vst.msk [vmem:[%s14087_s14 + $0x447] ss:$8 sm:$0xf0] %vm93_vm7, %v11359_v29   ;;  %v3922_v34 = vsel %vm1437_vm0, %v12103_v31, %v12102_v30  ;;  %v12104_v35 = vld [vmem:[%s14081_s10 + $0x4b9] sm:$0x4]  }
 0x1f8   : > { %11786 = vst.msk [vmem:[%s14087_s14 + $0x460] sm:$0xff] %vm1465_vm8, %v16012_v28   ;;  %v3926_v28 = vsel %vm1441_vm1, %v12104_v35, %v3922_v34  ;;  %v12105_v25 = vld [vmem:[%s14081_s10 + $0x4f8] sm:$0x8]   ;;  %v12165_v63 = vld [vmem:[%s14081_s10 + $0x633] sm:$0x1]  }
 0x1f9   : > { %v12106_v38 = vld [vmem:[%s14081_s10 + $0x537] sm:$0x10]   ;;  %11276 = vst.msk [vmem:[%s14087_s14 + $0x440] ss:$8 sm:$0xf] %vm93_vm7, %v11275_v22   ;;  %v3930_v39 = vsel %vm1445_vm2, %v12105_v25, %v3926_v28 }
 0x1fa   : > { %v12107_v40 = vld [vmem:[%s14081_s10 + $0x576] sm:$0x20]   ;;  %11288 = vst.msk [vmem:[%s14087_s14 + $0x441] ss:$8 sm:$0xf] %vm93_vm7, %v11287_v23   ;;  %v3934_v43 = vsel %vm1449_vm3, %v12106_v38, %v3930_v39  ;;  %v16258_v23 = vpop.permute.xlu2 %2897  }
 0x1fb   : > { %v12108_v44 = vld [vmem:[%s14081_s10 + $0x5b5] sm:$0x40]   ;;  %11300 = vst.msk [vmem:[%s14087_s14 + $0x442] ss:$8 sm:$0xf] %vm93_vm7, %v11299_v20   ;;  %v3938_v37 = vsel %vm1453_vm4, %v12107_v40, %v3934_v43 }
 0x1fc   : > { %v12109_v32 = vld [vmem:[%s14081_s10 + $0x5f4] sm:$0x80]   ;;  %11312 = vst.msk [vmem:[%s14087_s14 + $0x443] ss:$8 sm:$0xf] %vm93_vm7, %v11311_v24   ;;  %v3942_v47 = vsel %vm1457_vm5, %v12108_v44, %v3938_v37 }
 0x1fd   : > { %v12174_v48 = vld [vmem:[%s14081_s10 + $0x63b] sm:$0x1]   ;;  %11324 = vst.msk [vmem:[%s14087_s14 + $0x444] ss:$8 sm:$0xf] %vm93_vm7, %v11323_v26   ;;  %v3946_v49 = vsel %vm1461_vm6, %v12109_v32, %v3942_v47 }
 0x1fe   : > { %v12175_v51 = vld [vmem:[%s14081_s10 + $0x67a] sm:$0x2]   ;;  %11336 = vst.msk [vmem:[%s14087_s14 + $0x445] ss:$8 sm:$0xf] %vm93_vm7, %v11335_v27   ;;  %3947 = vrot.lane.b32.xlu2 %v3946_v49, %s14020_s15  ;;  %v16315_v49 = vpop.permute.xlu0 %2827  }
 0x1ff   : > { %v4202_v52 = vsel %vm1437_vm0, %v12175_v51, %v12174_v48  ;;  %v12176_v45 = vld [vmem:[%s14081_s10 + $0x6b9] sm:$0x4]   ;;  %11348 = vst.msk [vmem:[%s14087_s14 + $0x446] ss:$8 sm:$0xf] %vm93_vm7, %v11347_v8   ;;  %v16313_v48 = vpop.permute.xlu1 %2862  }
 0x200   : > { %v4206_v41 = vsel %vm1441_vm1, %v12176_v45, %v4202_v52  ;;  %v12177_v54 = vld [vmem:[%s14081_s10 + $0x6f8] sm:$0x8]   ;;  %11360 = vst.msk [vmem:[%s14087_s14 + $0x447] ss:$8 sm:$0xf] %vm93_vm7, %v11359_v29  }
 0x201   : > { %v4210_v57 = vsel %vm1445_vm2, %v12177_v54, %v4206_v41  ;;  %v12178_v58 = vld [vmem:[%s14081_s10 + $0x737] sm:$0x10]   ;;  %11777 = vst.msk [vmem:[%s14087_s14 + $0x440] sm:$0xff] %vm1465_vm8, %v16067_v55   ;;  %v12166_v46 = vld [vmem:[%s14081_s10 + $0x672] sm:$0x2]  }
 0x202   : > { %v4214_v55 = vsel %vm1449_vm3, %v12178_v58, %v4210_v57  ;;  %v12179_v53 = vld [vmem:[%s14081_s10 + $0x776] sm:$0x20]   ;;  %v12167_v61 = vld [vmem:[%s14081_s10 + $0x6b1] sm:$0x4]   ;;  %v4167_v62 = vsel %vm1437_vm0, %v12166_v46, %v12165_v63  ;;  %v11281_v9 = vld [vmem:[%s14081_s10 + $0x830] ss:$2 sm:$0xff]  }
 0x203   : > { %v12180_v36 = vld [vmem:[%s14081_s10 + $0x7b5] sm:$0x40]   ;;  %v4218_v56 = vsel %vm1453_vm4, %v12179_v53, %v4214_v55  ;;  %v12168_v59 = vld [vmem:[%s14081_s10 + $0x6f0] sm:$0x8]   ;;  %v4171_v33 = vsel %vm1441_vm1, %v12167_v61, %v4167_v62  ;;  %v11293_v11 = vld [vmem:[%s14081_s10 + $0x870] ss:$2 sm:$0xff]  }
 0x204   : > { %v12181_v60 = vld [vmem:[%s14081_s10 + $0x7f4] sm:$0x80]   ;;  %v4222_v0 = vsel %vm1457_vm5, %v12180_v36, %v4218_v56  ;;  %v12169_v2 = vld [vmem:[%s14081_s10 + $0x72f] sm:$0x10]   ;;  %v4175_v4 = vsel %vm1445_vm2, %v12168_v59, %v4171_v33  ;;  %v11305_v12 = vld [vmem:[%s14081_s10 + $0x8b0] ss:$2 sm:$0xff]  }
 0x205   : > { %v4226_v1 = vsel %vm1461_vm6, %v12181_v60, %v4222_v0  ;;  %v12170_v5 = vld [vmem:[%s14081_s10 + $0x76e] sm:$0x20]   ;;  %11282 = vst.msk [vmem:[%s14087_s14 + $0x4c0] ss:$8 sm:$0xf] %vm93_vm7, %v11281_v9   ;;  %v4179_v15 = vsel %vm1449_vm3, %v12169_v2, %v4175_v4 }
 0x206   : > { %v12171_v6 = vld [vmem:[%s14081_s10 + $0x7ad] sm:$0x40]   ;;  %4227 = vrot.lane.b32.xlu1 %v4226_v1, %s14020_s15  ;;  %11294 = vst.msk [vmem:[%s14087_s14 + $0x4c1] ss:$8 sm:$0xf] %vm93_vm7, %v11293_v11   ;;  %v4183_v17 = vsel %vm1453_vm4, %v12170_v5, %v4179_v15 }
 0x207   : > { %v12172_v3 = vld [vmem:[%s14081_s10 + $0x7ec] sm:$0x80]   ;;  %v11317_v42 = vld [vmem:[%s14081_s10 + $0x8f0] ss:$2 sm:$0xff]   ;;  %v4187_v14 = vsel %vm1457_vm5, %v12171_v6, %v4183_v17  ;;  %v11290_v20 = vld [vmem:[%s14081_s10 + $0x860] ss:$2 sm:$0xff]   ;;  %v16364_v6 = vpop.permute.xlu2 %3002  }
 0x208   : > { %11306 = vst.msk [vmem:[%s14087_s14 + $0x4c2] ss:$8 sm:$0xf] %vm93_vm7, %v11305_v12   ;;  %v11329_v18 = vld [vmem:[%s14081_s10 + $0x930] ss:$2 sm:$0xff]   ;;  %v4191_v21 = vsel %vm1461_vm6, %v12172_v3, %v4187_v14 }
 0x209   : > { %11318 = vst.msk [vmem:[%s14087_s14 + $0x4c3] ss:$8 sm:$0xf] %vm93_vm7, %v11317_v42   ;;  %v11341_v19 = vld [vmem:[%s14081_s10 + $0x970] ss:$2 sm:$0xff]   ;;  %4192 = vrot.lane.b32.xlu0 %v4191_v21, %s14020_s15 }
 0x20a   : > { %11330 = vst.msk [vmem:[%s14087_s14 + $0x4c4] ss:$8 sm:$0xf] %vm93_vm7, %v11329_v18   ;;  %v11353_v7 = vld [vmem:[%s14081_s10 + $0x9b0] ss:$2 sm:$0xff]  }
 0x20b   : > { %11342 = vst.msk [vmem:[%s14087_s14 + $0x4c5] ss:$8 sm:$0xf] %vm93_vm7, %v11341_v19   ;;  %v11365_v22 = vld [vmem:[%s14081_s10 + $0x9f0] ss:$2 sm:$0xff]  }
 0x20c   : > { %11354 = vst.msk [vmem:[%s14087_s14 + $0x4c6] ss:$8 sm:$0xf] %vm93_vm7, %v11353_v7   ;;  %v12129_v10 = vld [vmem:[%s14081_s10 + $0x613] sm:$0x1]  }
 0x20d   : > { %11366 = vst.msk [vmem:[%s14087_s14 + $0x4c7] ss:$8 sm:$0xf] %vm93_vm7, %v11365_v22   ;;  %v11302_v24 = vld [vmem:[%s14081_s10 + $0x8a0] ss:$2 sm:$0xff]  }
 0x20e   : > { %11813 = vst.msk [vmem:[%s14087_s14 + $0x4c0] sm:$0xff] %vm1465_vm8, %v16118_v16   ;;  %v11278_v16 = vld [vmem:[%s14081_s10 + $0x820] ss:$2 sm:$0xff]   ;;  %v12130_v26 = vld [vmem:[%s14081_s10 + $0x652] sm:$0x2]  }
 0x20f   : > { %11283 = vst.msk [vmem:[%s14087_s14 + $0x4c0] ss:$8 sm:$0xf0] %vm93_vm7, %v11281_v9   ;;  %v11314_v27 = vld [vmem:[%s14081_s10 + $0x8e0] ss:$2 sm:$0xff]   ;;  %v4027_v8 = vsel %vm1437_vm0, %v12130_v26, %v12129_v10 }
 0x210   : > { %11295 = vst.msk [vmem:[%s14087_s14 + $0x4c1] ss:$8 sm:$0xf0] %vm93_vm7, %v11293_v11   ;;  %v12131_v29 = vld [vmem:[%s14081_s10 + $0x691] sm:$0x4]  }
 0x211   : > { %11307 = vst.msk [vmem:[%s14087_s14 + $0x4c2] ss:$8 sm:$0xf0] %vm93_vm7, %v11305_v12   ;;  %v11326_v30 = vld [vmem:[%s14081_s10 + $0x920] ss:$2 sm:$0xff]   ;;  %v4031_v31 = vsel %vm1441_vm1, %v12131_v29, %v4027_v8 }
 0x212   : > { %11319 = vst.msk [vmem:[%s14087_s14 + $0x4c3] ss:$8 sm:$0xf0] %vm93_vm7, %v11317_v42   ;;  %v12132_v34 = vld [vmem:[%s14081_s10 + $0x6d0] sm:$0x8]   ;;  %v16380_v42 = vpop.permute.xlu1 %2967  }
 0x213   : > { %11331 = vst.msk [vmem:[%s14087_s14 + $0x4c4] ss:$8 sm:$0xf0] %vm93_vm7, %v11329_v18   ;;  %v11338_v35 = vld [vmem:[%s14081_s10 + $0x960] ss:$2 sm:$0xff]   ;;  %v4035_v28 = vsel %vm1445_vm2, %v12132_v34, %v4031_v31 }
 0x214   : > { %11343 = vst.msk [vmem:[%s14087_s14 + $0x4c5] ss:$8 sm:$0xf0] %vm93_vm7, %v11341_v19   ;;  %v12133_v25 = vld [vmem:[%s14081_s10 + $0x70f] sm:$0x10]  }
 0x215   : > { %11355 = vst.msk [vmem:[%s14087_s14 + $0x4c6] ss:$8 sm:$0xf0] %vm93_vm7, %v11353_v7   ;;  %v11350_v38 = vld [vmem:[%s14081_s10 + $0x9a0] ss:$2 sm:$0xff]   ;;  %v4039_v39 = vsel %vm1449_vm3, %v12133_v25, %v4035_v28 }
 0x216   : > { %11367 = vst.msk [vmem:[%s14087_s14 + $0x4c7] ss:$8 sm:$0xf0] %vm93_vm7, %v11365_v22   ;;  %v12134_v40 = vld [vmem:[%s14081_s10 + $0x74e] sm:$0x20]  }
 0x217   : > { %11280 = vst.msk [vmem:[%s14087_s14 + $0x480] ss:$8 sm:$0xf0] %vm93_vm7, %v11278_v16   ;;  %v11362_v43 = vld [vmem:[%s14081_s10 + $0x9e0] ss:$2 sm:$0xff]   ;;  %v4043_v44 = vsel %vm1453_vm4, %v12134_v40, %v4039_v39 }
 0x218   : > { %11292 = vst.msk [vmem:[%s14087_s14 + $0x481] ss:$8 sm:$0xf0] %vm93_vm7, %v11290_v20   ;;  %v12135_v37 = vld [vmem:[%s14081_s10 + $0x78d] sm:$0x40]  }
 0x219   : > { %11304 = vst.msk [vmem:[%s14087_s14 + $0x482] ss:$8 sm:$0xf0] %vm93_vm7, %v11302_v24   ;;  %v4047_v32 = vsel %vm1457_vm5, %v12135_v37, %v4043_v44  ;;  %v12136_v47 = vld [vmem:[%s14081_s10 + $0x7cc] sm:$0x80]  }
 0x21a   : > { %11316 = vst.msk [vmem:[%s14087_s14 + $0x483] ss:$8 sm:$0xf0] %vm93_vm7, %v11314_v27   ;;  %v4051_v51 = vsel %vm1461_vm6, %v12136_v47, %v4047_v32  ;;  %v12201_v52 = vld [vmem:[%s14081_s10 + $0x813] sm:$0x1]  }
 0x21b   : > { %11328 = vst.msk [vmem:[%s14087_s14 + $0x484] ss:$8 sm:$0xf0] %vm93_vm7, %v11326_v30   ;;  %4052 = vrot.lane.b32.xlu2 %v4051_v51, %s14020_s15  ;;  %v12202_v45 = vld [vmem:[%s14081_s10 + $0x852] sm:$0x2]  }
 0x21c   : > { %11340 = vst.msk [vmem:[%s14087_s14 + $0x485] ss:$8 sm:$0xf0] %vm93_vm7, %v11338_v35   ;;  %v4307_v41 = vsel %vm1437_vm0, %v12202_v45, %v12201_v52  ;;  %v12203_v54 = vld [vmem:[%s14081_s10 + $0x891] sm:$0x4]  }
 0x21d   : > { %11352 = vst.msk [vmem:[%s14087_s14 + $0x486] ss:$8 sm:$0xf0] %vm93_vm7, %v11350_v38   ;;  %v4311_v57 = vsel %vm1441_vm1, %v12203_v54, %v4307_v41  ;;  %v12204_v58 = vld [vmem:[%s14081_s10 + $0x8d0] sm:$0x8]  }
 0x21e   : > { %11364 = vst.msk [vmem:[%s14087_s14 + $0x487] ss:$8 sm:$0xf0] %vm93_vm7, %v11362_v43   ;;  %v12205_v55 = vld [vmem:[%s14081_s10 + $0x90f] sm:$0x10]  }
 0x21f   : > { %11804 = vst.msk [vmem:[%s14087_s14 + $0x4a0] sm:$0xff] %vm1465_vm8, %v16134_v50   ;;  %v4315_v50 = vsel %vm1445_vm2, %v12204_v58, %v4311_v57  ;;  %v12206_v53 = vld [vmem:[%s14081_s10 + $0x94e] sm:$0x20]   ;;  %v12192_v46 = vld [vmem:[%s14081_s10 + $0x80b] sm:$0x1]  }
 0x220   : > { %11279 = vst.msk [vmem:[%s14087_s14 + $0x480] ss:$8 sm:$0xf] %vm93_vm7, %v11278_v16   ;;  %v4319_v36 = vsel %vm1449_vm3, %v12205_v55, %v4315_v50  ;;  %v12207_v56 = vld [vmem:[%s14081_s10 + $0x98d] sm:$0x40]  }
 0x221   : > { %11291 = vst.msk [vmem:[%s14087_s14 + $0x481] ss:$8 sm:$0xf] %vm93_vm7, %v11290_v20   ;;  %v4323_v60 = vsel %vm1453_vm4, %v12206_v53, %v4319_v36  ;;  %v12208_v63 = vld [vmem:[%s14081_s10 + $0x9cc] sm:$0x80]  }
 0x222   : > { %11303 = vst.msk [vmem:[%s14087_s14 + $0x482] ss:$8 sm:$0xf] %vm93_vm7, %v11302_v24   ;;  %v4327_v0 = vsel %vm1457_vm5, %v12207_v56, %v4323_v60  ;;  %v12193_v59 = vld [vmem:[%s14081_s10 + $0x84a] sm:$0x2]  }
 0x223   : > { %11315 = vst.msk [vmem:[%s14087_s14 + $0x483] ss:$8 sm:$0xf] %vm93_vm7, %v11314_v27   ;;  %v4331_v61 = vsel %vm1461_vm6, %v12208_v63, %v4327_v0  ;;  %v4272_v1 = vsel %vm1437_vm0, %v12193_v59, %v12192_v46  ;;  %v12194_v62 = vld [vmem:[%s14081_s10 + $0x889] sm:$0x4]  }
 0x224   : > { %11327 = vst.msk [vmem:[%s14087_s14 + $0x484] ss:$8 sm:$0xf] %vm93_vm7, %v11326_v30   ;;  %4332 = vrot.lane.b32.xlu1 %v4331_v61, %s14020_s15  ;;  %v4276_v2 = vsel %vm1441_vm1, %v12194_v62, %v4272_v1  ;;  %v12195_v5 = vld [vmem:[%s14081_s10 + $0x8c8] sm:$0x8]  }
 0x225   : > { %11339 = vst.msk [vmem:[%s14087_s14 + $0x485] ss:$8 sm:$0xf] %vm93_vm7, %v11338_v35   ;;  %v4280_v33 = vsel %vm1445_vm2, %v12195_v5, %v4276_v2  ;;  %v12196_v3 = vld [vmem:[%s14081_s10 + $0x907] sm:$0x10]  }
 0x226   : > { %11351 = vst.msk [vmem:[%s14087_s14 + $0x486] ss:$8 sm:$0xf] %vm93_vm7, %v11350_v38   ;;  %v4284_v9 = vsel %vm1449_vm3, %v12196_v3, %v4280_v33  ;;  %v12197_v11 = vld [vmem:[%s14081_s10 + $0x946] sm:$0x20]   ;;  %v16486_v3 = vpop.permute.xlu0 %2932  }
 0x227   : > { %11363 = vst.msk [vmem:[%s14087_s14 + $0x487] ss:$8 sm:$0xf] %vm93_vm7, %v11362_v43   ;;  %v4288_v4 = vsel %vm1453_vm4, %v12197_v11, %v4284_v9  ;;  %v12198_v12 = vld [vmem:[%s14081_s10 + $0x985] sm:$0x40]  }
 0x228   : > { %11795 = vst.msk [vmem:[%s14087_s14 + $0x480] sm:$0xff] %vm1465_vm8, %v16240_v13   ;;  %v12199_v15 = vld [vmem:[%s14081_s10 + $0x9c4] sm:$0x80]   ;;  %v4292_v13 = vsel %vm1457_vm5, %v12198_v12, %v4288_v4  ;;  %v11368_v17 = vld [vmem:[%s14081_s10 + $0xa00] ss:$2 sm:$0xff]  }
 0x229   : > { %v11380_v18 = vld [vmem:[%s14081_s10 + $0xa40] ss:$2 sm:$0xff]   ;;  %v4296_v19 = vsel %vm1461_vm6, %v12199_v15, %v4292_v13  ;;  %11370 = vst.msk [vmem:[%s14087_s14 + $0x500] ss:$8 sm:$0xf0] %vm93_vm7, %v11368_v17  }
 0x22a   : > { %v11392_v14 = vld [vmem:[%s14081_s10 + $0xa80] ss:$2 sm:$0xff]   ;;  %4297 = vrot.lane.b32.xlu0 %v4296_v19, %s14020_s15  ;;  %11382 = vst.msk [vmem:[%s14087_s14 + $0x501] ss:$8 sm:$0xf0] %vm93_vm7, %v11380_v18  }
 0x22b   : > { %v11404_v21 = vld [vmem:[%s14081_s10 + $0xac0] ss:$2 sm:$0xff]   ;;  %11394 = vst.msk [vmem:[%s14087_s14 + $0x502] ss:$8 sm:$0xf0] %vm93_vm7, %v11392_v14  }
 0x22c   : > { %v11416_v7 = vld [vmem:[%s14081_s10 + $0xb00] ss:$2 sm:$0xff]   ;;  %11406 = vst.msk [vmem:[%s14087_s14 + $0x503] ss:$8 sm:$0xf0] %vm93_vm7, %v11404_v21  }
 0x22d   : > { %v11428_v22 = vld [vmem:[%s14081_s10 + $0xb40] ss:$2 sm:$0xff]   ;;  %11418 = vst.msk [vmem:[%s14087_s14 + $0x504] ss:$8 sm:$0xf0] %vm93_vm7, %v11416_v7  }
 0x22e   : > { %v11440_v16 = vld [vmem:[%s14081_s10 + $0xb80] ss:$2 sm:$0xff]   ;;  %11430 = vst.msk [vmem:[%s14087_s14 + $0x505] ss:$8 sm:$0xf0] %vm93_vm7, %v11428_v22  }
 0x22f   : > { %v11452_v20 = vld [vmem:[%s14081_s10 + $0xbc0] ss:$2 sm:$0xff]   ;;  %v12156_v10 = vld [vmem:[%s14081_s10 + $0x62b] sm:$0x1]   ;;  %11822 = vst.msk [vmem:[%s14087_s14 + $0x4e0] sm:$0xff] %vm1465_vm8, %v16315_v49  }
 0x230   : > { %11442 = vst.msk [vmem:[%s14087_s14 + $0x506] ss:$8 sm:$0xf0] %vm93_vm7, %v11440_v16   ;;  %v12157_v24 = vld [vmem:[%s14081_s10 + $0x66a] sm:$0x2]  }
 0x231   : > { %11454 = vst.msk [vmem:[%s14087_s14 + $0x507] ss:$8 sm:$0xf0] %vm93_vm7, %v11452_v20   ;;  %v4132_v26 = vsel %vm1437_vm0, %v12157_v24, %v12156_v10  ;;  %v12158_v27 = vld [vmem:[%s14081_s10 + $0x6a9] sm:$0x4]  }
 0x232   : > { %11840 = vst.msk [vmem:[%s14087_s14 + $0x520] sm:$0xff] %vm1465_vm8, %v16258_v23   ;;  %v4136_v23 = vsel %vm1441_vm1, %v12158_v27, %v4132_v26  ;;  %v12159_v8 = vld [vmem:[%s14081_s10 + $0x6e8] sm:$0x8]   ;;  %v12219_v57 = vld [vmem:[%s14081_s10 + $0x823] sm:$0x1]  }
 0x233   : > { %v12160_v29 = vld [vmem:[%s14081_s10 + $0x727] sm:$0x10]   ;;  %11369 = vst.msk [vmem:[%s14087_s14 + $0x500] ss:$8 sm:$0xf] %vm93_vm7, %v11368_v17   ;;  %v4140_v30 = vsel %vm1445_vm2, %v12159_v8, %v4136_v23 }
 0x234   : > { %v12161_v31 = vld [vmem:[%s14081_s10 + $0x766] sm:$0x20]   ;;  %11381 = vst.msk [vmem:[%s14087_s14 + $0x501] ss:$8 sm:$0xf] %vm93_vm7, %v11380_v18   ;;  %v4144_v34 = vsel %vm1449_vm3, %v12160_v29, %v4140_v30  ;;  %v16504_v18 = vpop.permute.xlu2 %3107  }
 0x235   : > { %v12162_v35 = vld [vmem:[%s14081_s10 + $0x7a5] sm:$0x40]   ;;  %11393 = vst.msk [vmem:[%s14087_s14 + $0x502] ss:$8 sm:$0xf] %vm93_vm7, %v11392_v14   ;;  %v4148_v28 = vsel %vm1453_vm4, %v12161_v31, %v4144_v34 }
 0x236   : > { %v12163_v25 = vld [vmem:[%s14081_s10 + $0x7e4] sm:$0x80]   ;;  %11405 = vst.msk [vmem:[%s14087_s14 + $0x503] ss:$8 sm:$0xf] %vm93_vm7, %v11404_v21   ;;  %v4152_v38 = vsel %vm1457_vm5, %v12162_v35, %v4148_v28 }
 0x237   : > { %v12228_v39 = vld [vmem:[%s14081_s10 + $0x82b] sm:$0x1]   ;;  %11417 = vst.msk [vmem:[%s14087_s14 + $0x504] ss:$8 sm:$0xf] %vm93_vm7, %v11416_v7   ;;  %v4156_v40 = vsel %vm1461_vm6, %v12163_v25, %v4152_v38 }
 0x238   : > { %v12229_v43 = vld [vmem:[%s14081_s10 + $0x86a] sm:$0x2]   ;;  %11429 = vst.msk [vmem:[%s14087_s14 + $0x505] ss:$8 sm:$0xf] %vm93_vm7, %v11428_v22   ;;  %4157 = vrot.lane.b32.xlu2 %v4156_v40, %s14020_s15  ;;  %v16561_v40 = vpop.permute.xlu0 %3037  }
 0x239   : > { %v4412_v44 = vsel %vm1437_vm0, %v12229_v43, %v12228_v39  ;;  %v12230_v37 = vld [vmem:[%s14081_s10 + $0x8a9] sm:$0x4]   ;;  %11441 = vst.msk [vmem:[%s14087_s14 + $0x506] ss:$8 sm:$0xf] %vm93_vm7, %v11440_v16   ;;  %v16559_v39 = vpop.permute.xlu1 %3072  }
 0x23a   : > { %v4416_v32 = vsel %vm1441_vm1, %v12230_v37, %v4412_v44  ;;  %v12231_v47 = vld [vmem:[%s14081_s10 + $0x8e8] sm:$0x8]   ;;  %11453 = vst.msk [vmem:[%s14087_s14 + $0x507] ss:$8 sm:$0xf] %vm93_vm7, %v11452_v20  }
 0x23b   : > { %v4420_v51 = vsel %vm1445_vm2, %v12231_v47, %v4416_v32  ;;  %v12232_v52 = vld [vmem:[%s14081_s10 + $0x927] sm:$0x10]   ;;  %11831 = vst.msk [vmem:[%s14087_s14 + $0x500] sm:$0xff] %vm1465_vm8, %v16313_v48   ;;  %v12220_v50 = vld [vmem:[%s14081_s10 + $0x862] sm:$0x2]  }
 0x23c   : > { %v4424_v48 = vsel %vm1449_vm3, %v12232_v52, %v4420_v51  ;;  %v12233_v45 = vld [vmem:[%s14081_s10 + $0x966] sm:$0x20]   ;;  %v12221_v55 = vld [vmem:[%s14081_s10 + $0x8a1] sm:$0x4]   ;;  %v4377_v56 = vsel %vm1437_vm0, %v12220_v50, %v12219_v57  ;;  %v11374_v59 = vld [vmem:[%s14081_s10 + $0xa20] ss:$2 sm:$0xff]  }
 0x23d   : > { %v12234_v41 = vld [vmem:[%s14081_s10 + $0x9a5] sm:$0x40]   ;;  %v4428_v49 = vsel %vm1453_vm4, %v12233_v45, %v4424_v48  ;;  %v12222_v53 = vld [vmem:[%s14081_s10 + $0x8e0] sm:$0x8]   ;;  %v4381_v46 = vsel %vm1441_vm1, %v12221_v55, %v4377_v56  ;;  %v11386_v1 = vld [vmem:[%s14081_s10 + $0xa60] ss:$2 sm:$0xff]  }
 0x23e   : > { %v12235_v54 = vld [vmem:[%s14081_s10 + $0x9e4] sm:$0x80]   ;;  %v4432_v58 = vsel %vm1457_vm5, %v12234_v41, %v4428_v49  ;;  %v12223_v60 = vld [vmem:[%s14081_s10 + $0x91f] sm:$0x10]   ;;  %v4385_v62 = vsel %vm1445_vm2, %v12222_v53, %v4381_v46  ;;  %v11398_v2 = vld [vmem:[%s14081_s10 + $0xaa0] ss:$2 sm:$0xff]  }
 0x23f   : > { %v4436_v36 = vsel %vm1461_vm6, %v12235_v54, %v4432_v58  ;;  %v12224_v63 = vld [vmem:[%s14081_s10 + $0x95e] sm:$0x20]   ;;  %11375 = vst.msk [vmem:[%s14087_s14 + $0x580] ss:$8 sm:$0xf] %vm93_vm7, %v11374_v59   ;;  %v4389_v5 = vsel %vm1449_vm3, %v12223_v60, %v4385_v62 }
 0x240   : > { %v12225_v0 = vld [vmem:[%s14081_s10 + $0x99d] sm:$0x40]   ;;  %4437 = vrot.lane.b32.xlu1 %v4436_v36, %s14020_s15  ;;  %11387 = vst.msk [vmem:[%s14087_s14 + $0x581] ss:$8 sm:$0xf] %vm93_vm7, %v11386_v1   ;;  %v4393_v9 = vsel %vm1453_vm4, %v12224_v63, %v4389_v5 }
 0x241   : > { %v12226_v61 = vld [vmem:[%s14081_s10 + $0x9dc] sm:$0x80]   ;;  %v11410_v33 = vld [vmem:[%s14081_s10 + $0xae0] ss:$2 sm:$0xff]   ;;  %v4397_v4 = vsel %vm1457_vm5, %v12225_v0, %v4393_v9  ;;  %v11383_v14 = vld [vmem:[%s14081_s10 + $0xa50] ss:$2 sm:$0xff]   ;;  %v16610_v0 = vpop.permute.xlu2 %3212   ;;  %v16612_v46 = vpop.permute.xlu1 %3177  }
 0x242   : > { %11399 = vst.msk [vmem:[%s14087_s14 + $0x582] ss:$8 sm:$0xf] %vm93_vm7, %v11398_v2   ;;  %v11422_v11 = vld [vmem:[%s14081_s10 + $0xb20] ss:$2 sm:$0xff]   ;;  %v4401_v15 = vsel %vm1461_vm6, %v12226_v61, %v4397_v4 }
 0x243   : > { %11411 = vst.msk [vmem:[%s14087_s14 + $0x583] ss:$8 sm:$0xf] %vm93_vm7, %v11410_v33   ;;  %v11434_v12 = vld [vmem:[%s14081_s10 + $0xb60] ss:$2 sm:$0xff]   ;;  %4402 = vrot.lane.b32.xlu0 %v4401_v15, %s14020_s15 }
 0x244   : > { %11423 = vst.msk [vmem:[%s14087_s14 + $0x584] ss:$8 sm:$0xf] %vm93_vm7, %v11422_v11   ;;  %v11446_v13 = vld [vmem:[%s14081_s10 + $0xba0] ss:$2 sm:$0xff]  }
 0x245   : > { %11435 = vst.msk [vmem:[%s14087_s14 + $0x585] ss:$8 sm:$0xf] %vm93_vm7, %v11434_v12   ;;  %v11458_v17 = vld [vmem:[%s14081_s10 + $0xbe0] ss:$2 sm:$0xff]  }
 0x246   : > { %11447 = vst.msk [vmem:[%s14087_s14 + $0x586] ss:$8 sm:$0xf] %vm93_vm7, %v11446_v13   ;;  %v12183_v19 = vld [vmem:[%s14081_s10 + $0x803] sm:$0x1]  }
 0x247   : > { %11459 = vst.msk [vmem:[%s14087_s14 + $0x587] ss:$8 sm:$0xf] %vm93_vm7, %v11458_v17   ;;  %v11395_v21 = vld [vmem:[%s14081_s10 + $0xa90] ss:$2 sm:$0xff]  }
 0x248   : > { %11867 = vst.msk [vmem:[%s14087_s14 + $0x580] sm:$0xff] %vm1465_vm8, %v16364_v6   ;;  %v11371_v6 = vld [vmem:[%s14081_s10 + $0xa10] ss:$2 sm:$0xff]   ;;  %v12184_v7 = vld [vmem:[%s14081_s10 + $0x842] sm:$0x2]  }
 0x249   : > { %11376 = vst.msk [vmem:[%s14087_s14 + $0x580] ss:$8 sm:$0xf0] %vm93_vm7, %v11374_v59   ;;  %v11407_v22 = vld [vmem:[%s14081_s10 + $0xad0] ss:$2 sm:$0xff]   ;;  %v4237_v16 = vsel %vm1437_vm0, %v12184_v7, %v12183_v19  ;;  %v16653_v7 = vpop.permute.xlu1 %3282  }
 0x24a   : > { %11388 = vst.msk [vmem:[%s14087_s14 + $0x581] ss:$8 sm:$0xf0] %vm93_vm7, %v11386_v1   ;;  %v12185_v20 = vld [vmem:[%s14081_s10 + $0x881] sm:$0x4]   ;;  %v16618_v1 = vpop.permute.xlu0 %3142  }
 0x24b   : > { %11400 = vst.msk [vmem:[%s14087_s14 + $0x582] ss:$8 sm:$0xf0] %vm93_vm7, %v11398_v2   ;;  %v11419_v10 = vld [vmem:[%s14081_s10 + $0xb10] ss:$2 sm:$0xff]   ;;  %v4241_v24 = vsel %vm1441_vm1, %v12185_v20, %v4237_v16 }
 0x24c   : > { %11412 = vst.msk [vmem:[%s14087_s14 + $0x583] ss:$8 sm:$0xf0] %vm93_vm7, %v11410_v33   ;;  %v12186_v26 = vld [vmem:[%s14081_s10 + $0x8c0] sm:$0x8]  }
 0x24d   : > { %11424 = vst.msk [vmem:[%s14087_s14 + $0x584] ss:$8 sm:$0xf0] %vm93_vm7, %v11422_v11   ;;  %v11431_v27 = vld [vmem:[%s14081_s10 + $0xb50] ss:$2 sm:$0xff]   ;;  %v4245_v23 = vsel %vm1445_vm2, %v12186_v26, %v4241_v24 }
 0x24e   : > { %11436 = vst.msk [vmem:[%s14087_s14 + $0x585] ss:$8 sm:$0xf0] %vm93_vm7, %v11434_v12   ;;  %v12187_v8 = vld [vmem:[%s14081_s10 + $0x8ff] sm:$0x10]  }
 0x24f   : > { %11448 = vst.msk [vmem:[%s14087_s14 + $0x586] ss:$8 sm:$0xf0] %vm93_vm7, %v11446_v13   ;;  %v11443_v29 = vld [vmem:[%s14081_s10 + $0xb90] ss:$2 sm:$0xff]   ;;  %v4249_v30 = vsel %vm1449_vm3, %v12187_v8, %v4245_v23 }
 0x250   : > { %11460 = vst.msk [vmem:[%s14087_s14 + $0x587] ss:$8 sm:$0xf0] %vm93_vm7, %v11458_v17   ;;  %v12188_v31 = vld [vmem:[%s14081_s10 + $0x93e] sm:$0x20]  }
 0x251   : > { %11373 = vst.msk [vmem:[%s14087_s14 + $0x540] ss:$8 sm:$0xf0] %vm93_vm7, %v11371_v6   ;;  %v11455_v34 = vld [vmem:[%s14081_s10 + $0xbd0] ss:$2 sm:$0xff]   ;;  %v4253_v35 = vsel %vm1453_vm4, %v12188_v31, %v4249_v30 }
 0x252   : > { %11385 = vst.msk [vmem:[%s14087_s14 + $0x541] ss:$8 sm:$0xf0] %vm93_vm7, %v11383_v14   ;;  %v12189_v28 = vld [vmem:[%s14081_s10 + $0x97d] sm:$0x40]   ;;  %v16658_v16 = vpop.permute.xlu0 %3247  }
 0x253   : > { %11397 = vst.msk [vmem:[%s14087_s14 + $0x542] ss:$8 sm:$0xf0] %vm93_vm7, %v11395_v21   ;;  %v4257_v25 = vsel %vm1457_vm5, %v12189_v28, %v4253_v35  ;;  %v12190_v38 = vld [vmem:[%s14081_s10 + $0x9bc] sm:$0x80]  }
 0x254   : > { %11409 = vst.msk [vmem:[%s14087_s14 + $0x543] ss:$8 sm:$0xf0] %vm93_vm7, %v11407_v22   ;;  %v4261_v43 = vsel %vm1461_vm6, %v12190_v38, %v4257_v25  ;;  %v12255_v44 = vld [vmem:[%s14081_s10 + $0xa03] sm:$0x1]  }
 0x255   : > { %11421 = vst.msk [vmem:[%s14087_s14 + $0x544] ss:$8 sm:$0xf0] %vm93_vm7, %v11419_v10   ;;  %4262 = vrot.lane.b32.xlu2 %v4261_v43, %s14020_s15  ;;  %v12256_v37 = vld [vmem:[%s14081_s10 + $0xa42] sm:$0x2]  }
 0x256   : > { %11433 = vst.msk [vmem:[%s14087_s14 + $0x545] ss:$8 sm:$0xf0] %vm93_vm7, %v11431_v27   ;;  %v4517_v32 = vsel %vm1437_vm0, %v12256_v37, %v12255_v44  ;;  %v12257_v47 = vld [vmem:[%s14081_s10 + $0xa81] sm:$0x4]   ;;  %v16695_v44 = vpop.permute.xlu1 %3387  }
 0x257   : > { %11445 = vst.msk [vmem:[%s14087_s14 + $0x546] ss:$8 sm:$0xf0] %vm93_vm7, %v11443_v29   ;;  %v4521_v51 = vsel %vm1441_vm1, %v12257_v47, %v4517_v32  ;;  %v12258_v52 = vld [vmem:[%s14081_s10 + $0xac0] sm:$0x8]  }
 0x258   : > { %11457 = vst.msk [vmem:[%s14087_s14 + $0x547] ss:$8 sm:$0xf0] %vm93_vm7, %v11455_v34   ;;  %v12259_v48 = vld [vmem:[%s14081_s10 + $0xaff] sm:$0x10]  }
 0x259   : > { %11858 = vst.msk [vmem:[%s14087_s14 + $0x560] sm:$0xff] %vm1465_vm8, %v16380_v42   ;;  %v4525_v42 = vsel %vm1445_vm2, %v12258_v52, %v4521_v51  ;;  %v12260_v45 = vld [vmem:[%s14081_s10 + $0xb3e] sm:$0x20]   ;;  %v12246_v50 = vld [vmem:[%s14081_s10 + $0x83b] sm:$0x1]  }
 0x25a   : > { %11372 = vst.msk [vmem:[%s14087_s14 + $0x540] ss:$8 sm:$0xf] %vm93_vm7, %v11371_v6   ;;  %v4529_v41 = vsel %vm1449_vm3, %v12259_v48, %v4525_v42  ;;  %v12261_v49 = vld [vmem:[%s14081_s10 + $0xb7d] sm:$0x40]   ;;  %v16702_v47 = vpop.permute.xlu0 %3352  }
 0x25b   : > { %11384 = vst.msk [vmem:[%s14087_s14 + $0x541] ss:$8 sm:$0xf] %vm93_vm7, %v11383_v14   ;;  %v4533_v54 = vsel %vm1453_vm4, %v12260_v45, %v4529_v41  ;;  %v12262_v57 = vld [vmem:[%s14081_s10 + $0xbbc] sm:$0x80]  }
 0x25c   : > { %11396 = vst.msk [vmem:[%s14087_s14 + $0x542] ss:$8 sm:$0xf] %vm93_vm7, %v11395_v21   ;;  %v4537_v58 = vsel %vm1457_vm5, %v12261_v49, %v4533_v54  ;;  %v12247_v53 = vld [vmem:[%s14081_s10 + $0x87a] sm:$0x2]   ;;  %v16651_v21 = vpop.permute.xlu2 %3317  }
 0x25d   : > { %11408 = vst.msk [vmem:[%s14087_s14 + $0x543] ss:$8 sm:$0xf] %vm93_vm7, %v11407_v22   ;;  %v4541_v55 = vsel %vm1461_vm6, %v12262_v57, %v4537_v58  ;;  %v4482_v36 = vsel %vm1437_vm0, %v12247_v53, %v12246_v50  ;;  %v12248_v56 = vld [vmem:[%s14081_s10 + $0x8b9] sm:$0x4]  }
 0x25e   : > { %11420 = vst.msk [vmem:[%s14087_s14 + $0x544] ss:$8 sm:$0xf] %vm93_vm7, %v11419_v10   ;;  %4542 = vrot.lane.b32.xlu1 %v4541_v55, %s14020_s15  ;;  %v4486_v60 = vsel %vm1441_vm1, %v12248_v56, %v4482_v36  ;;  %v12249_v63 = vld [vmem:[%s14081_s10 + $0x8f8] sm:$0x8]  }
 0x25f   : > { %11432 = vst.msk [vmem:[%s14087_s14 + $0x545] ss:$8 sm:$0xf] %vm93_vm7, %v11431_v27   ;;  %v4490_v61 = vsel %vm1445_vm2, %v12249_v63, %v4486_v60  ;;  %v12250_v59 = vld [vmem:[%s14081_s10 + $0x937] sm:$0x10]  }
 0x260   : > { %11444 = vst.msk [vmem:[%s14087_s14 + $0x546] ss:$8 sm:$0xf] %vm93_vm7, %v11443_v29   ;;  %v4494_v62 = vsel %vm1449_vm3, %v12250_v59, %v4490_v61  ;;  %v12251_v2 = vld [vmem:[%s14081_s10 + $0x976] sm:$0x20]  }
 0x261   : > { %11456 = vst.msk [vmem:[%s14087_s14 + $0x547] ss:$8 sm:$0xf] %vm93_vm7, %v11455_v34   ;;  %v4498_v5 = vsel %vm1453_vm4, %v12251_v2, %v4494_v62  ;;  %v12252_v33 = vld [vmem:[%s14081_s10 + $0x9b5] sm:$0x40]  }
 0x262   : > { %11849 = vst.msk [vmem:[%s14087_s14 + $0x540] sm:$0xff] %vm1465_vm8, %v16486_v3   ;;  %v12253_v3 = vld [vmem:[%s14081_s10 + $0x9f4] sm:$0x80]   ;;  %v4502_v9 = vsel %vm1457_vm5, %v12252_v33, %v4498_v5  ;;  %v11377_v11 = vld [vmem:[%s14081_s10 + $0xa30] ss:$2 sm:$0xff]   ;;  %v16748_v33 = vpop.permute.xlu1 %3492  }
 0x263   : > { %v11389_v4 = vld [vmem:[%s14081_s10 + $0xa70] ss:$2 sm:$0xff]   ;;  %v4506_v15 = vsel %vm1461_vm6, %v12253_v3, %v4502_v9  ;;  %11379 = vst.msk [vmem:[%s14087_s14 + $0x5c0] ss:$8 sm:$0xf0] %vm93_vm7, %v11377_v11  }
 0x264   : > { %v11401_v12 = vld [vmem:[%s14081_s10 + $0xab0] ss:$2 sm:$0xff]   ;;  %4507 = vrot.lane.b32.xlu0 %v4506_v15, %s14020_s15  ;;  %11391 = vst.msk [vmem:[%s14087_s14 + $0x5c1] ss:$8 sm:$0xf0] %vm93_vm7, %v11389_v4   ;;  %v16693_v43 = vpop.permute.xlu2 %3422  }
 0x265   : > { %v11413_v13 = vld [vmem:[%s14081_s10 + $0xaf0] ss:$2 sm:$0xff]   ;;  %11403 = vst.msk [vmem:[%s14087_s14 + $0x5c2] ss:$8 sm:$0xf0] %vm93_vm7, %v11401_v12  }
 0x266   : > { %v11425_v17 = vld [vmem:[%s14081_s10 + $0xb30] ss:$2 sm:$0xff]   ;;  %11415 = vst.msk [vmem:[%s14087_s14 + $0x5c3] ss:$8 sm:$0xf0] %vm93_vm7, %v11413_v13  }
 0x267   : > { %v11437_v6 = vld [vmem:[%s14081_s10 + $0xb70] ss:$2 sm:$0xff]   ;;  %11427 = vst.msk [vmem:[%s14087_s14 + $0x5c4] ss:$8 sm:$0xf0] %vm93_vm7, %v11425_v17  }
 0x268   : > { %v11449_v14 = vld [vmem:[%s14081_s10 + $0xbb0] ss:$2 sm:$0xff]   ;;  %11439 = vst.msk [vmem:[%s14087_s14 + $0x5c5] ss:$8 sm:$0xf0] %vm93_vm7, %v11437_v6  }
 0x269   : > { %v11461_v19 = vld [vmem:[%s14081_s10 + $0xbf0] ss:$2 sm:$0xff]   ;;  %v12210_v22 = vld [vmem:[%s14081_s10 + $0x81b] sm:$0x1]   ;;  %11876 = vst.msk [vmem:[%s14087_s14 + $0x5a0] sm:$0xff] %vm1465_vm8, %v16561_v40  }
 0x26a   : > { %11451 = vst.msk [vmem:[%s14087_s14 + $0x5c6] ss:$8 sm:$0xf0] %vm93_vm7, %v11449_v14   ;;  %v12211_v20 = vld [vmem:[%s14081_s10 + $0x85a] sm:$0x2]  }
 0x26b   : > { %11463 = vst.msk [vmem:[%s14087_s14 + $0x5c7] ss:$8 sm:$0xf0] %vm93_vm7, %v11461_v19   ;;  %v4342_v10 = vsel %vm1437_vm0, %v12211_v20, %v12210_v22  ;;  %v12212_v24 = vld [vmem:[%s14081_s10 + $0x899] sm:$0x4]  }
 0x26c   : > { %11894 = vst.msk [vmem:[%s14087_s14 + $0x5e0] sm:$0xff] %vm1465_vm8, %v16504_v18   ;;  %v4346_v18 = vsel %vm1441_vm1, %v12212_v24, %v4342_v10  ;;  %v12213_v26 = vld [vmem:[%s14081_s10 + $0x8d8] sm:$0x8]   ;;  %v12273_v54 = vld [vmem:[%s14081_s10 + $0xa13] sm:$0x1]   ;;  %v16746_v5 = vpop.permute.xlu2 %3527  }
 0x26d   : > { %v12214_v27 = vld [vmem:[%s14081_s10 + $0x917] sm:$0x10]   ;;  %11378 = vst.msk [vmem:[%s14087_s14 + $0x5c0] ss:$8 sm:$0xf] %vm93_vm7, %v11377_v11   ;;  %v4350_v23 = vsel %vm1445_vm2, %v12213_v26, %v4346_v18 }
 0x26e   : > { %v12215_v8 = vld [vmem:[%s14081_s10 + $0x956] sm:$0x20]   ;;  %11390 = vst.msk [vmem:[%s14087_s14 + $0x5c1] ss:$8 sm:$0xf] %vm93_vm7, %v11389_v4   ;;  %v4354_v29 = vsel %vm1449_vm3, %v12214_v27, %v4350_v23  ;;  %v16757_v4 = vpop.permute.xlu0 %3457  }
 0x26f   : > { %v12216_v30 = vld [vmem:[%s14081_s10 + $0x995] sm:$0x40]   ;;  %11402 = vst.msk [vmem:[%s14087_s14 + $0x5c2] ss:$8 sm:$0xf] %vm93_vm7, %v11401_v12   ;;  %v4358_v31 = vsel %vm1453_vm4, %v12215_v8, %v4354_v29 }
 0x270   : > { %v12217_v34 = vld [vmem:[%s14081_s10 + $0x9d4] sm:$0x80]   ;;  %11414 = vst.msk [vmem:[%s14087_s14 + $0x5c3] ss:$8 sm:$0xf] %vm93_vm7, %v11413_v13   ;;  %v4362_v35 = vsel %vm1457_vm5, %v12216_v30, %v4358_v31 }
 0x271   : > { %v12282_v28 = vld [vmem:[%s14081_s10 + $0xa1b] sm:$0x1]   ;;  %11426 = vst.msk [vmem:[%s14087_s14 + $0x5c4] ss:$8 sm:$0xf] %vm93_vm7, %v11425_v17   ;;  %v4366_v25 = vsel %vm1461_vm6, %v12217_v34, %v4362_v35 }
 0x272   : > { %v12283_v38 = vld [vmem:[%s14081_s10 + $0xa5a] sm:$0x2]   ;;  %11438 = vst.msk [vmem:[%s14087_s14 + $0x5c5] ss:$8 sm:$0xf] %vm93_vm7, %v11437_v6   ;;  %4367 = vrot.lane.b32.xlu2 %v4366_v25, %s14020_s15 }
 0x273   : > { %v4622_v37 = vsel %vm1437_vm0, %v12283_v38, %v12282_v28  ;;  %v12284_v32 = vld [vmem:[%s14081_s10 + $0xa99] sm:$0x4]   ;;  %11450 = vst.msk [vmem:[%s14087_s14 + $0x5c6] ss:$8 sm:$0xf] %vm93_vm7, %v11449_v14  }
 0x274   : > { %v4626_v51 = vsel %vm1441_vm1, %v12284_v32, %v4622_v37  ;;  %v12285_v52 = vld [vmem:[%s14081_s10 + $0xad8] sm:$0x8]   ;;  %11462 = vst.msk [vmem:[%s14087_s14 + $0x5c7] ss:$8 sm:$0xf] %vm93_vm7, %v11461_v19  }
 0x275   : > { %v4630_v42 = vsel %vm1445_vm2, %v12285_v52, %v4626_v51  ;;  %v12286_v48 = vld [vmem:[%s14081_s10 + $0xb17] sm:$0x10]   ;;  %11885 = vst.msk [vmem:[%s14087_s14 + $0x5c0] sm:$0xff] %vm1465_vm8, %v16559_v39   ;;  %v12274_v58 = vld [vmem:[%s14081_s10 + $0xa52] sm:$0x2]  }
 0x276   : > { %v4634_v39 = vsel %vm1449_vm3, %v12286_v48, %v4630_v42  ;;  %v12287_v45 = vld [vmem:[%s14081_s10 + $0xb56] sm:$0x20]   ;;  %v12275_v50 = vld [vmem:[%s14081_s10 + $0xa91] sm:$0x4]   ;;  %v4587_v36 = vsel %vm1437_vm0, %v12274_v58, %v12273_v54  ;;  %11921 = vst.msk [vmem:[%s14087_s14 + $0x48] sm:$0xff] %vm1465_vm8, %v16610_v0  }
 0x277   : > { %v12288_v41 = vld [vmem:[%s14081_s10 + $0xb95] sm:$0x40]   ;;  %v4638_v40 = vsel %vm1453_vm4, %v12287_v45, %v4634_v39  ;;  %v12276_v55 = vld [vmem:[%s14081_s10 + $0xad0] sm:$0x8]   ;;  %v4591_v61 = vsel %vm1441_vm1, %v12275_v50, %v4587_v36  ;;  %11912 = vst.msk [vmem:[%s14087_s14 + $0x28] sm:$0xff] %vm1465_vm8, %v16612_v46   ;;  %v16807_v50 = vpop.permute.xlu2 %3632  }
 0x278   : > { %v12289_v49 = vld [vmem:[%s14081_s10 + $0xbd4] sm:$0x80]   ;;  %v4642_v57 = vsel %vm1457_vm5, %v12288_v41, %v4638_v40  ;;  %v12277_v56 = vld [vmem:[%s14081_s10 + $0xb0f] sm:$0x10]   ;;  %v4595_v62 = vsel %vm1445_vm2, %v12276_v55, %v4591_v61  ;;  %11903 = vst.msk [vmem:[%s14087_s14 + $0x8] sm:$0xff] %vm1465_vm8, %v16618_v1   ;;  %v16809_v55 = vpop.permute.xlu1 %3597  }
 0x279   : > { %v4646_v53 = vsel %vm1461_vm6, %v12289_v49, %v4642_v57  ;;  %v12278_v60 = vld [vmem:[%s14081_s10 + $0xb4e] sm:$0x20]   ;;  %v4599_v3 = vsel %vm1449_vm3, %v12277_v56, %v4595_v62  ;;  %v12300_v35 = vld [vmem:[%s14081_s10 + $0xa2b] sm:$0x1]   ;;  %11948 = vst.msk [vmem:[%s14087_s14 + $0xa8] sm:$0xff] %vm1465_vm8, %v16651_v21  }
 0x27a   : > { %v12279_v63 = vld [vmem:[%s14081_s10 + $0xb8d] sm:$0x40]   ;;  %4647 = vrot.lane.b32.xlu1 %v4646_v53, %s14020_s15  ;;  %v4603_v12 = vsel %vm1453_vm4, %v12278_v60, %v4599_v3  ;;  %v12301_v38 = vld [vmem:[%s14081_s10 + $0xa6a] sm:$0x2]   ;;  %11939 = vst.msk [vmem:[%s14087_s14 + $0x88] sm:$0xff] %vm1465_vm8, %v16653_v7  }
 0x27b   : > { %v12280_v59 = vld [vmem:[%s14081_s10 + $0xbcc] sm:$0x80]   ;;  %v4607_v14 = vsel %vm1457_vm5, %v12279_v63, %v4603_v12  ;;  %v12302_v37 = vld [vmem:[%s14081_s10 + $0xaa9] sm:$0x4]   ;;  %v4692_v42 = vsel %vm1437_vm0, %v12301_v38, %v12300_v35  ;;  %11930 = vst.msk [vmem:[%s14087_s14 + $0x68] sm:$0xff] %vm1465_vm8, %v16658_v16   ;;  %v16819_v63 = vpop.permute.xlu0 %3562  }
 0x27c   : > { %v12237_v0 = vld [vmem:[%s14081_s10 + $0x833] sm:$0x1]   ;;  %v4611_v24 = vsel %vm1461_vm6, %v12280_v59, %v4607_v14  ;;  %v12303_v32 = vld [vmem:[%s14081_s10 + $0xae8] sm:$0x8]   ;;  %v4696_v40 = vsel %vm1441_vm1, %v12302_v37, %v4692_v42  ;;  %v12341_v14 = vld [vmem:[%s14081_s10 + $0x148] sm:$0x20]  }
 0x27d   : > { %v12238_v46 = vld [vmem:[%s14081_s10 + $0x872] sm:$0x2]   ;;  %4612 = vrot.lane.b32.xlu0 %v4611_v24, %s14020_s15  ;;  %v12304_v48 = vld [vmem:[%s14081_s10 + $0xb27] sm:$0x10]   ;;  %v4700_v57 = vsel %vm1445_vm2, %v12303_v32, %v4696_v40  ;;  %v12327_v24 = vld [vmem:[%s14081_s10 + $0x5] sm:$0x1]  }
 0x27e   : > { %v12239_v2 = vld [vmem:[%s14081_s10 + $0x8b1] sm:$0x4]   ;;  %v4447_v1 = vsel %vm1437_vm0, %v12238_v46, %v12237_v0  ;;  %v12305_v39 = vld [vmem:[%s14081_s10 + $0xb66] sm:$0x20]   ;;  %v4704_v36 = vsel %vm1449_vm3, %v12304_v48, %v4700_v57  ;;  %v12332_v35 = vld [vmem:[%s14081_s10 + $0x140] sm:$0x20]  }
 0x27f   : > { %v12240_v9 = vld [vmem:[%s14081_s10 + $0x8f0] sm:$0x8]   ;;  %v4451_v15 = vsel %vm1441_vm1, %v12239_v2, %v4447_v1  ;;  %v12306_v45 = vld [vmem:[%s14081_s10 + $0xba5] sm:$0x40]   ;;  %v4708_v61 = vsel %vm1453_vm4, %v12305_v39, %v4704_v36  ;;  %v12336_v1 = vld [vmem:[%s14081_s10 + $0xd] sm:$0x1]   ;;  %v16870_v42 = vpop.permute.xlu2 %3737  }
 0x280   : > { %v12241_v11 = vld [vmem:[%s14081_s10 + $0x92f] sm:$0x10]   ;;  %v4455_v19 = vsel %vm1445_vm2, %v12240_v9, %v4451_v15  ;;  %v12307_v49 = vld [vmem:[%s14081_s10 + $0xbe4] sm:$0x80]   ;;  %v4712_v2 = vsel %vm1457_vm5, %v12306_v45, %v4708_v61  ;;  %v12337_v9 = vld [vmem:[%s14081_s10 + $0x4c] sm:$0x2]   ;;  %v16872_v48 = vpop.permute.xlu1 %3702  }
 0x281   : > { %v12242_v13 = vld [vmem:[%s14081_s10 + $0x96e] sm:$0x20]   ;;  %v4459_v18 = vsel %vm1449_vm3, %v12241_v11, %v4455_v19  ;;  %v12264_v21 = vld [vmem:[%s14081_s10 + $0xa0b] sm:$0x1]   ;;  %v12338_v11 = vld [vmem:[%s14081_s10 + $0x8b] sm:$0x4]   ;;  %v4716_v12 = vsel %vm1461_vm6, %v12307_v49, %v4712_v2 }
 0x282   : > { %v12243_v17 = vld [vmem:[%s14081_s10 + $0x9ad] sm:$0x40]   ;;  %v4463_v29 = vsel %vm1453_vm4, %v12242_v13, %v4459_v18  ;;  %v12265_v7 = vld [vmem:[%s14081_s10 + $0xa4a] sm:$0x2]   ;;  %v4832_v13 = vsel %vm1437_vm0, %v12337_v9, %v12336_v1  ;;  %v12334_v37 = vld [vmem:[%s14081_s10 + $0x1be] sm:$0x80]  }
 0x283   : > { %v12244_v6 = vld [vmem:[%s14081_s10 + $0x9ec] sm:$0x80]   ;;  %v4467_v28 = vsel %vm1457_vm5, %v12243_v17, %v4463_v29  ;;  %v12266_v58 = vld [vmem:[%s14081_s10 + $0xa89] sm:$0x4]   ;;  %v4552_v16 = vsel %vm1437_vm0, %v12265_v7, %v12264_v21  ;;  %v12339_v17 = vld [vmem:[%s14081_s10 + $0xca] sm:$0x8]   ;;  %v16882_v49 = vpop.permute.xlu0 %3667  }
 0x284   : > { %v12309_v22 = vld [vmem:[%s14081_s10 + $0xa33] sm:$0x1]   ;;  %v4471_v51 = vsel %vm1461_vm6, %v12244_v6, %v4467_v28  ;;  %v12267_v56 = vld [vmem:[%s14081_s10 + $0xac8] sm:$0x8]   ;;  %v4556_v59 = vsel %vm1441_vm1, %v12266_v58, %v4552_v16  ;;  %v12340_v6 = vld [vmem:[%s14081_s10 + $0x109] sm:$0x10]  }
 0x285   : > { %v12310_v20 = vld [vmem:[%s14081_s10 + $0xa72] sm:$0x2]   ;;  %4472 = vrot.lane.b32.xlu2 %v4471_v51, %s14020_s15  ;;  %v12268_v60 = vld [vmem:[%s14081_s10 + $0xb07] sm:$0x10]   ;;  %v4560_v3 = vsel %vm1445_vm2, %v12267_v56, %v4556_v59  ;;  %4717 = vrot.lane.b32.xlu0 %v4716_v12, %s14020_s15 }
 0x286   : > { %v12311_v10 = vld [vmem:[%s14081_s10 + $0xab1] sm:$0x4]   ;;  %v4727_v26 = vsel %vm1437_vm0, %v12310_v20, %v12309_v22  ;;  %v12269_v0 = vld [vmem:[%s14081_s10 + $0xb46] sm:$0x20]   ;;  %v4564_v15 = vsel %vm1449_vm3, %v12268_v60, %v4560_v3  ;;  %v4836_v22 = vsel %vm1441_vm1, %v12338_v11, %v4832_v13  ;;  %v12342_v20 = vld [vmem:[%s14081_s10 + $0x187] sm:$0x40]  }
 0x287   : > { %v12312_v27 = vld [vmem:[%s14081_s10 + $0xaf0] sm:$0x8]   ;;  %v4731_v30 = vsel %vm1441_vm1, %v12311_v10, %v4727_v26  ;;  %v12270_v62 = vld [vmem:[%s14081_s10 + $0xb85] sm:$0x40]   ;;  %v4568_v19 = vsel %vm1453_vm4, %v12269_v0, %v4564_v15  ;;  %v12343_v10 = vld [vmem:[%s14081_s10 + $0x1c6] sm:$0x80]   ;;  %v4840_v26 = vsel %vm1445_vm2, %v12339_v17, %v4836_v22 }
 0x288   : > { %v12313_v23 = vld [vmem:[%s14081_s10 + $0xb2f] sm:$0x10]   ;;  %v4735_v25 = vsel %vm1445_vm2, %v12312_v27, %v4731_v30  ;;  %v12271_v46 = vld [vmem:[%s14081_s10 + $0xbc4] sm:$0x80]   ;;  %v4572_v18 = vsel %vm1457_vm5, %v12270_v62, %v4568_v19  ;;  %v12328_v27 = vld [vmem:[%s14081_s10 + $0x44] sm:$0x2]   ;;  %v4844_v30 = vsel %vm1449_vm3, %v12340_v6, %v4840_v26 }
 0x289   : > { %v12314_v8 = vld [vmem:[%s14081_s10 + $0xb6e] sm:$0x20]   ;;  %v4739_v52 = vsel %vm1449_vm3, %v12313_v23, %v4735_v25  ;;  %v12329_v23 = vld [vmem:[%s14081_s10 + $0x83] sm:$0x4]   ;;  %v4576_v29 = vsel %vm1461_vm6, %v12271_v46, %v4572_v18  ;;  %v4848_v25 = vsel %vm1453_vm4, %v12341_v14, %v4844_v30  ;;  %11975 = vst.msk [vmem:[%s14087_s14 + $0x108] sm:$0xff] %vm1465_vm8, %v16693_v43  }
 0x28a   : > { %v12315_v31 = vld [vmem:[%s14081_s10 + $0xbad] sm:$0x40]   ;;  %v4743_v41 = vsel %vm1453_vm4, %v12314_v8, %v4739_v52  ;;  %v12330_v8 = vld [vmem:[%s14081_s10 + $0xc2] sm:$0x8]   ;;  %v12291_v43 = vld [vmem:[%s14081_s10 + $0xa23] sm:$0x1]   ;;  %v4852_v32 = vsel %vm1457_vm5, %v12342_v20, %v4848_v25 }
 0x28b   : > { %v12316_v34 = vld [vmem:[%s14081_s10 + $0xbec] sm:$0x80]   ;;  %v4747_v54 = vsel %vm1457_vm5, %v12315_v31, %v4743_v41  ;;  %v4797_v31 = vsel %vm1437_vm0, %v12328_v27, %v12327_v24  ;;  %v12333_v28 = vld [vmem:[%s14081_s10 + $0x17f] sm:$0x40]   ;;  %11966 = vst.msk [vmem:[%s14087_s14 + $0xe8] sm:$0xff] %vm1465_vm8, %v16695_v44   ;;  %v4856_v39 = vsel %vm1461_vm6, %v12343_v10, %v4852_v32 }
 0x28c   : > { %v4751_v53 = vsel %vm1461_vm6, %v12316_v34, %v4747_v54  ;;  %v12331_v34 = vld [vmem:[%s14081_s10 + $0x101] sm:$0x10]   ;;  %v4801_v38 = vsel %vm1441_vm1, %v12329_v23, %v4797_v31  ;;  %v12292_v44 = vld [vmem:[%s14081_s10 + $0xa62] sm:$0x2]   ;;  %11957 = vst.msk [vmem:[%s14087_s14 + $0xc8] sm:$0xff] %vm1465_vm8, %v16702_v47   ;;  %v16933_v31 = vpop.permute.xlu2 %3842  }
 0x28d   : > { %4752 = vrot.lane.b32.xlu1 %v4751_v53, %s14020_s15  ;;  %4577 = vrot.lane.b32.xlu2 %v4576_v29, %s14020_s15  ;;  %v4805_v51 = vsel %vm1445_vm2, %v12330_v8, %v4801_v38  ;;  %v12293_v52 = vld [vmem:[%s14081_s10 + $0xaa1] sm:$0x4]   ;;  %v4657_v47 = vsel %vm1437_vm0, %v12292_v44, %v12291_v43  ;;  %v12363_v16 = vld [vmem:[%s14081_s10 + $0x25] sm:$0x1]  }
 0x28e   : > { %v4809_v45 = vsel %vm1449_vm3, %v12331_v34, %v4805_v51  ;;  %v12294_v41 = vld [vmem:[%s14081_s10 + $0xae0] sm:$0x8]   ;;  %v4661_v54 = vsel %vm1441_vm1, %v12293_v52, %v4657_v47  ;;  %v12364_v56 = vld [vmem:[%s14081_s10 + $0x64] sm:$0x2]   ;;  %v12354_v12 = vld [vmem:[%s14081_s10 + $0x1d] sm:$0x1]   ;;  %v16935_v34 = vpop.permute.xlu1 %3807  }
 0x28f   : > { %v12295_v40 = vld [vmem:[%s14081_s10 + $0xb1f] sm:$0x10]   ;;  %v4813_v21 = vsel %vm1453_vm4, %v12332_v35, %v4809_v45  ;;  %v4665_v36 = vsel %vm1445_vm2, %v12294_v41, %v4661_v54  ;;  %v12365_v60 = vld [vmem:[%s14081_s10 + $0xa3] sm:$0x4]   ;;  %v4937_v0 = vsel %vm1437_vm0, %v12364_v56, %v12363_v16  ;;  %v12355_v17 = vld [vmem:[%s14081_s10 + $0x5c] sm:$0x2]  }
 0x290   : > { %v12296_v57 = vld [vmem:[%s14081_s10 + $0xb5e] sm:$0x20]   ;;  %v4817_v53 = vsel %vm1457_vm5, %v12333_v28, %v4813_v21  ;;  %v4669_v59 = vsel %vm1449_vm3, %v12295_v40, %v4665_v36  ;;  %v12366_v62 = vld [vmem:[%s14081_s10 + $0xe2] sm:$0x8]   ;;  %v4941_v1 = vsel %vm1441_vm1, %v12365_v60, %v4937_v0  ;;  %v12356_v6 = vld [vmem:[%s14081_s10 + $0x9b] sm:$0x4]   ;;  %v4902_v20 = vsel %vm1437_vm0, %v12355_v17, %v12354_v12 }
 0x291   : > { %v12297_v7 = vld [vmem:[%s14081_s10 + $0xb9d] sm:$0x40]   ;;  %v4821_v61 = vsel %vm1461_vm6, %v12334_v37, %v4817_v53  ;;  %v12367_v46 = vld [vmem:[%s14081_s10 + $0x121] sm:$0x10]   ;;  %v4673_v3 = vsel %vm1453_vm4, %v12296_v57, %v4669_v59  ;;  %v4945_v13 = vsel %vm1445_vm2, %v12366_v62, %v4941_v1  ;;  %v12357_v14 = vld [vmem:[%s14081_s10 + $0xda] sm:$0x8]   ;;  %v4906_v27 = vsel %vm1441_vm1, %v12356_v6, %v4902_v20  ;;  %v16945_v37 = vpop.permute.xlu0 %3772  }
 0x292   : > { %v12298_v58 = vld [vmem:[%s14081_s10 + $0xbdc] sm:$0x80]   ;;  %v12368_v2 = vld [vmem:[%s14081_s10 + $0x160] sm:$0x20]   ;;  %4822 = vrot.lane.b32.xlu0 %v4821_v61, %s14020_s15  ;;  %v4677_v15 = vsel %vm1457_vm5, %v12297_v7, %v4673_v3  ;;  %v4949_v22 = vsel %vm1449_vm3, %v12367_v46, %v4945_v13  ;;  %v12358_v10 = vld [vmem:[%s14081_s10 + $0x119] sm:$0x10]   ;;  %v4910_v29 = vsel %vm1445_vm2, %v12357_v14, %v4906_v27 }
 0x293   : > { %v12369_v9 = vld [vmem:[%s14081_s10 + $0x19f] sm:$0x40]   ;;  %v4681_v19 = vsel %vm1461_vm6, %v12298_v58, %v4677_v15  ;;  %v12359_v24 = vld [vmem:[%s14081_s10 + $0x158] sm:$0x20]   ;;  %v4953_v26 = vsel %vm1453_vm4, %v12368_v2, %v4949_v22  ;;  %12002 = vst.msk [vmem:[%s14087_s14 + $0x168] sm:$0xff] %vm1465_vm8, %v16746_v5   ;;  %v4914_v28 = vsel %vm1449_vm3, %v12358_v10, %v4910_v29 }
 0x294   : > { %v12370_v11 = vld [vmem:[%s14081_s10 + $0x1de] sm:$0x80]   ;;  %v12360_v18 = vld [vmem:[%s14081_s10 + $0x197] sm:$0x40]   ;;  %v12318_v5 = vld [vmem:[%s14081_s10 + $0xa3b] sm:$0x1]   ;;  %v4957_v8 = vsel %vm1457_vm5, %v12369_v9, %v4953_v26  ;;  %v4918_v43 = vsel %vm1453_vm4, %v12359_v24, %v4914_v28  ;;  %v16996_v20 = vpop.permute.xlu2 %3947  }
 0x295   : > { %4857 = vrot.lane.b32.xlu1 %v4856_v39, %s14020_s15  ;;  %4682 = vrot.lane.b32.xlu2 %v4681_v19, %s14020_s15  ;;  %v12361_v23 = vld [vmem:[%s14081_s10 + $0x1d6] sm:$0x80]   ;;  %11993 = vst.msk [vmem:[%s14087_s14 + $0x148] sm:$0xff] %vm1465_vm8, %v16748_v33   ;;  %v4961_v35 = vsel %vm1461_vm6, %v12370_v11, %v4957_v8  ;;  %v4922_v39 = vsel %vm1457_vm5, %v12360_v18, %v4918_v43 }
 0x296   : > { %v12319_v33 = vld [vmem:[%s14081_s10 + $0xa7a] sm:$0x2]   ;;  %11984 = vst.msk [vmem:[%s14087_s14 + $0x128] sm:$0xff] %vm1465_vm8, %v16757_v4   ;;  %v12390_v47 = vld [vmem:[%s14081_s10 + $0x3d] sm:$0x1]   ;;  %v4926_v21 = vsel %vm1461_vm6, %v12361_v23, %v4922_v39  ;;  %v16998_v10 = vpop.permute.xlu1 %3912  }
 0x297   : > { %v12320_v30 = vld [vmem:[%s14081_s10 + $0xab9] sm:$0x4]   ;;  %v4762_v4 = vsel %vm1437_vm0, %v12319_v33, %v12318_v5  ;;  %v12391_v41 = vld [vmem:[%s14081_s10 + $0x7c] sm:$0x2]   ;;  %v12381_v61 = vld [vmem:[%s14081_s10 + $0x35] sm:$0x1]  }
 0x298   : > { %v12321_v25 = vld [vmem:[%s14081_s10 + $0xaf8] sm:$0x8]   ;;  %v4766_v32 = vsel %vm1441_vm1, %v12320_v30, %v4762_v4  ;;  %v12392_v40 = vld [vmem:[%s14081_s10 + $0xbb] sm:$0x4]   ;;  %v5042_v57 = vsel %vm1437_vm0, %v12391_v41, %v12390_v47  ;;  %v12382_v62 = vld [vmem:[%s14081_s10 + $0x74] sm:$0x2]  }
 0x299   : > { %v12322_v38 = vld [vmem:[%s14081_s10 + $0xb37] sm:$0x10]   ;;  %v4770_v45 = vsel %vm1445_vm2, %v12321_v25, %v4766_v32  ;;  %v12393_v7 = vld [vmem:[%s14081_s10 + $0xfa] sm:$0x8]   ;;  %v5046_v16 = vsel %vm1441_vm1, %v12392_v40, %v5042_v57  ;;  %v12383_v46 = vld [vmem:[%s14081_s10 + $0xb3] sm:$0x4]   ;;  %v5007_v9 = vsel %vm1437_vm0, %v12382_v62, %v12381_v61  ;;  %v17008_v23 = vpop.permute.xlu0 %3877  }
 0x29a   : > { %v12323_v51 = vld [vmem:[%s14081_s10 + $0xb76] sm:$0x20]   ;;  %v4774_v54 = vsel %vm1449_vm3, %v12322_v38, %v4770_v45  ;;  %v12394_v58 = vld [vmem:[%s14081_s10 + $0x139] sm:$0x10]   ;;  %4927 = vrot.lane.b32.xlu0 %v4926_v21, %s14020_s15  ;;  %v5050_v0 = vsel %vm1445_vm2, %v12393_v7, %v5046_v16  ;;  %v12384_v2 = vld [vmem:[%s14081_s10 + $0xf2] sm:$0x8]   ;;  %v5011_v17 = vsel %vm1441_vm1, %v12383_v46, %v5007_v9 }
 0x29b   : > { %v12324_v44 = vld [vmem:[%s14081_s10 + $0xbb5] sm:$0x40]   ;;  %v12395_v53 = vld [vmem:[%s14081_s10 + $0x178] sm:$0x20]   ;;  %v4778_v36 = vsel %vm1453_vm4, %v12323_v51, %v4774_v54  ;;  %v5054_v1 = vsel %vm1449_vm3, %v12394_v58, %v5050_v0  ;;  %v12385_v11 = vld [vmem:[%s14081_s10 + $0x131] sm:$0x10]   ;;  %v5015_v19 = vsel %vm1445_vm2, %v12384_v2, %v5011_v17 }
 0x29c   : > { %v12325_v52 = vld [vmem:[%s14081_s10 + $0xbf4] sm:$0x80]   ;;  %v12396_v56 = vld [vmem:[%s14081_s10 + $0x1b7] sm:$0x40]   ;;  %v4782_v59 = vsel %vm1457_vm5, %v12324_v44, %v4778_v36  ;;  %v12386_v12 = vld [vmem:[%s14081_s10 + $0x170] sm:$0x20]   ;;  %v5058_v13 = vsel %vm1453_vm4, %v12395_v53, %v5054_v1  ;;  %v5019_v18 = vsel %vm1449_vm3, %v12385_v11, %v5015_v19  ;;  %v17059_v9 = vpop.permute.xlu2 %4052  }
 0x29d   : > { %4962 = vrot.lane.b32.xlu1 %v4961_v35, %s14020_s15  ;;  %v12397_v60 = vld [vmem:[%s14081_s10 + $0x1f6] sm:$0x80]   ;;  %v4786_v3 = vsel %vm1461_vm6, %v12325_v52, %v4782_v59  ;;  %v12387_v15 = vld [vmem:[%s14081_s10 + $0x1af] sm:$0x40]   ;;  %12029 = vst.msk [vmem:[%s14087_s14 + $0x1c8] sm:$0xff] %vm1465_vm8, %v16807_v50   ;;  %v5062_v14 = vsel %vm1457_vm5, %v12396_v56, %v5058_v13  ;;  %v5023_v5 = vsel %vm1453_vm4, %v12386_v12, %v5019_v18 }
 0x29e   : > { %4787 = vrot.lane.b32.xlu2 %v4786_v3, %s14020_s15  ;;  %v12388_v6 = vld [vmem:[%s14081_s10 + $0x1ee] sm:$0x80]   ;;  %12020 = vst.msk [vmem:[%s14087_s14 + $0x1a8] sm:$0xff] %vm1465_vm8, %v16809_v55   ;;  %v5066_v24 = vsel %vm1461_vm6, %v12397_v60, %v5062_v14  ;;  %v5027_v35 = vsel %vm1457_vm5, %v12387_v15, %v5023_v5  ;;  %v12408_v21 = vld [vmem:[%s14081_s10 + $0x20d] sm:$0x1]   ;;  %v17061_v11 = vpop.permute.xlu1 %4017  }
 0x29f   : > { %v12345_v50 = vld [vmem:[%s14081_s10 + $0x15] sm:$0x1]   ;;  %12011 = vst.msk [vmem:[%s14087_s14 + $0x188] sm:$0xff] %vm1465_vm8, %v16819_v63   ;;  %v5031_v43 = vsel %vm1461_vm6, %v12388_v6, %v5027_v35  ;;  %v12409_v7 = vld [vmem:[%s14081_s10 + $0x24c] sm:$0x2]  }
 0x2a0   : > { %v12346_v55 = vld [vmem:[%s14081_s10 + $0x54] sm:$0x2]   ;;  %v12410_v58 = vld [vmem:[%s14081_s10 + $0x28b] sm:$0x4]   ;;  %v5112_v56 = vsel %vm1437_vm0, %v12409_v7, %v12408_v21  ;;  %12056 = vst.msk [vmem:[%s14087_s14 + $0x228] sm:$0xff] %vm1465_vm8, %v16870_v42  }
 0x2a1   : > { %v12347_v22 = vld [vmem:[%s14081_s10 + $0x93] sm:$0x4]   ;;  %v4867_v63 = vsel %vm1437_vm0, %v12346_v55, %v12345_v50  ;;  %v12411_v53 = vld [vmem:[%s14081_s10 + $0x2ca] sm:$0x8]   ;;  %v5116_v62 = vsel %vm1441_vm1, %v12410_v58, %v5112_v56  ;;  %12047 = vst.msk [vmem:[%s14087_s14 + $0x208] sm:$0xff] %vm1465_vm8, %v16872_v48   ;;  %v17071_v6 = vpop.permute.xlu0 %3982  }
 0x2a2   : > { %v12348_v26 = vld [vmem:[%s14081_s10 + $0xd2] sm:$0x8]   ;;  %v4871_v8 = vsel %vm1441_vm1, %v12347_v22, %v4867_v63  ;;  %5032 = vrot.lane.b32.xlu0 %v5031_v43, %s14020_s15  ;;  %v12412_v60 = vld [vmem:[%s14081_s10 + $0x309] sm:$0x10]   ;;  %v5120_v3 = vsel %vm1445_vm2, %v12411_v53, %v5116_v62  ;;  %12038 = vst.msk [vmem:[%s14087_s14 + $0x1e8] sm:$0xff] %vm1465_vm8, %v16882_v49  }
 0x2a3   : > { %v12349_v27 = vld [vmem:[%s14081_s10 + $0x111] sm:$0x10]   ;;  %v4875_v28 = vsel %vm1445_vm2, %v12348_v26, %v4871_v8  ;;  %v12413_v61 = vld [vmem:[%s14081_s10 + $0x348] sm:$0x20]   ;;  %v5124_v15 = vsel %vm1449_vm3, %v12412_v60, %v5120_v3  ;;  %v12435_v43 = vld [vmem:[%s14081_s10 + $0x225] sm:$0x1]  }
 0x2a4   : > { %v12350_v29 = vld [vmem:[%s14081_s10 + $0x150] sm:$0x20]   ;;  %v4879_v32 = vsel %vm1449_vm3, %v12349_v27, %v4875_v28  ;;  %v12414_v59 = vld [vmem:[%s14081_s10 + $0x387] sm:$0x40]   ;;  %v5128_v50 = vsel %vm1453_vm4, %v12413_v61, %v5124_v15  ;;  %v12440_v21 = vld [vmem:[%s14081_s10 + $0x360] sm:$0x20]   ;;  %v17122_v56 = vpop.permute.xlu2 %4157  }
 0x2a5   : > { %5067 = vrot.lane.b32.xlu1 %v5066_v24, %s14020_s15  ;;  %v12351_v33 = vld [vmem:[%s14081_s10 + $0x18f] sm:$0x40]   ;;  %v4883_v45 = vsel %vm1453_vm4, %v12350_v29, %v4879_v32  ;;  %v12415_v46 = vld [vmem:[%s14081_s10 + $0x3c6] sm:$0x80]   ;;  %v5132_v24 = vsel %vm1457_vm5, %v12414_v59, %v5128_v50  ;;  %v12442_v58 = vld [vmem:[%s14081_s10 + $0x3de] sm:$0x80]  }
 0x2a6   : > { %v12352_v30 = vld [vmem:[%s14081_s10 + $0x1ce] sm:$0x80]   ;;  %v4887_v54 = vsel %vm1457_vm5, %v12351_v33, %v4883_v45  ;;  %v12372_v42 = vld [vmem:[%s14081_s10 + $0x2d] sm:$0x1]   ;;  %v5136_v5 = vsel %vm1461_vm6, %v12415_v46, %v5132_v24  ;;  %12083 = vst.msk [vmem:[%s14087_s14 + $0x288] sm:$0xff] %vm1465_vm8, %v16933_v31   ;;  %v17124_v60 = vpop.permute.xlu1 %4122  }
 0x2a7   : > { %v12417_v4 = vld [vmem:[%s14081_s10 + $0x215] sm:$0x1]   ;;  %v4891_v36 = vsel %vm1461_vm6, %v12352_v30, %v4887_v54  ;;  %v12373_v48 = vld [vmem:[%s14081_s10 + $0x6c] sm:$0x2]   ;;  %v12441_v54 = vld [vmem:[%s14081_s10 + $0x39f] sm:$0x40]  }
 0x2a8   : > { %v12418_v25 = vld [vmem:[%s14081_s10 + $0x254] sm:$0x2]   ;;  %4892 = vrot.lane.b32.xlu2 %v4891_v36, %s14020_s15  ;;  %v12374_v1 = vld [vmem:[%s14081_s10 + $0xab] sm:$0x4]   ;;  %v4972_v49 = vsel %vm1437_vm0, %v12373_v48, %v12372_v42  ;;  %v12399_v31 = vld [vmem:[%s14081_s10 + $0x205] sm:$0x1]  }
 0x2a9   : > { %v12419_v38 = vld [vmem:[%s14081_s10 + $0x293] sm:$0x4]   ;;  %v5147_v51 = vsel %vm1437_vm0, %v12418_v25, %v12417_v4  ;;  %v12375_v13 = vld [vmem:[%s14081_s10 + $0xea] sm:$0x8]   ;;  %v4976_v14 = vsel %vm1441_vm1, %v12374_v1, %v4972_v49  ;;  %12074 = vst.msk [vmem:[%s14087_s14 + $0x268] sm:$0xff] %vm1465_vm8, %v16935_v34   ;;  %v17134_v46 = vpop.permute.xlu0 %4087  }
 0x2aa   : > { %v12420_v44 = vld [vmem:[%s14081_s10 + $0x2d2] sm:$0x8]   ;;  %v5151_v47 = vsel %vm1441_vm1, %v12419_v38, %v5147_v51  ;;  %v12376_v17 = vld [vmem:[%s14081_s10 + $0x129] sm:$0x10]   ;;  %v4980_v18 = vsel %vm1445_vm2, %v12375_v13, %v4976_v14  ;;  %5137 = vrot.lane.b32.xlu0 %v5136_v5, %s14020_s15  ;;  %v12400_v34 = vld [vmem:[%s14081_s10 + $0x244] sm:$0x2]  }
 0x2ab   : > { %v12421_v52 = vld [vmem:[%s14081_s10 + $0x311] sm:$0x10]   ;;  %v5155_v57 = vsel %vm1445_vm2, %v12420_v44, %v5151_v47  ;;  %v12377_v19 = vld [vmem:[%s14081_s10 + $0x168] sm:$0x20]   ;;  %v4984_v8 = vsel %vm1449_vm3, %v12376_v17, %v4980_v18  ;;  %v12436_v44 = vld [vmem:[%s14081_s10 + $0x264] sm:$0x2]  }
 0x2ac   : > { %v12422_v39 = vld [vmem:[%s14081_s10 + $0x350] sm:$0x20]   ;;  %v5159_v16 = vsel %vm1449_vm3, %v12421_v52, %v5155_v57  ;;  %v12378_v55 = vld [vmem:[%s14081_s10 + $0x1a7] sm:$0x40]   ;;  %v4988_v28 = vsel %vm1453_vm4, %v12377_v19, %v4984_v8  ;;  %v12437_v52 = vld [vmem:[%s14081_s10 + $0x2a3] sm:$0x4]  }
 0x2ad   : > { %v12423_v41 = vld [vmem:[%s14081_s10 + $0x38f] sm:$0x40]   ;;  %v5163_v0 = vsel %vm1453_vm4, %v12422_v39, %v5159_v16  ;;  %v12379_v22 = vld [vmem:[%s14081_s10 + $0x1e6] sm:$0x80]   ;;  %v4992_v32 = vsel %vm1457_vm5, %v12378_v55, %v4988_v28  ;;  %v12438_v39 = vld [vmem:[%s14081_s10 + $0x2e2] sm:$0x8]  }
 0x2ae   : > { %v12424_v40 = vld [vmem:[%s14081_s10 + $0x3ce] sm:$0x80]   ;;  %v5167_v2 = vsel %vm1457_vm5, %v12423_v41, %v5163_v0  ;;  %v12444_v63 = vld [vmem:[%s14081_s10 + $0x22d] sm:$0x1]   ;;  %v4996_v45 = vsel %vm1461_vm6, %v12379_v22, %v4992_v32  ;;  %v5217_v41 = vsel %vm1437_vm0, %v12436_v44, %v12435_v43  ;;  %v12401_v16 = vld [vmem:[%s14081_s10 + $0x283] sm:$0x4]  }
 0x2af   : > { %v5171_v12 = vsel %vm1461_vm6, %v12424_v40, %v5167_v2  ;;  %v12445_v26 = vld [vmem:[%s14081_s10 + $0x26c] sm:$0x2]   ;;  %v12439_v40 = vld [vmem:[%s14081_s10 + $0x321] sm:$0x10]   ;;  %v5221_v7 = vsel %vm1441_vm1, %v12437_v52, %v5217_v41  ;;  %12065 = vst.msk [vmem:[%s14087_s14 + $0x248] sm:$0xff] %vm1465_vm8, %v16945_v37   ;;  %v5077_v37 = vsel %vm1437_vm0, %v12400_v34, %v12399_v31  ;;  %v17185_v41 = vpop.permute.xlu2 %4262  }
 0x2b0   : > { %5172 = vrot.lane.b32.xlu1 %v5171_v12, %s14020_s15  ;;  %v12446_v27 = vld [vmem:[%s14081_s10 + $0x2ab] sm:$0x4]   ;;  %v5252_v29 = vsel %vm1437_vm0, %v12445_v26, %v12444_v63  ;;  %4997 = vrot.lane.b32.xlu2 %v4996_v45, %s14020_s15  ;;  %v5225_v36 = vsel %vm1445_vm2, %v12438_v39, %v5221_v7  ;;  %v12402_v0 = vld [vmem:[%s14081_s10 + $0x2c2] sm:$0x8]   ;;  %v5081_v2 = vsel %vm1441_vm1, %v12401_v16, %v5077_v37 }
 0x2b1   : > { %v12447_v33 = vld [vmem:[%s14081_s10 + $0x2ea] sm:$0x8]   ;;  %v5256_v4 = vsel %vm1441_vm1, %v12446_v27, %v5252_v29  ;;  %v5229_v59 = vsel %vm1449_vm3, %v12439_v40, %v5225_v36  ;;  %v12403_v62 = vld [vmem:[%s14081_s10 + $0x301] sm:$0x10]   ;;  %v5085_v15 = vsel %vm1445_vm2, %v12402_v0, %v5081_v2  ;;  %v12462_v5 = vld [vmem:[%s14081_s10 + $0x23d] sm:$0x1]   ;;  %v17187_v40 = vpop.permute.xlu1 %4227  }
 0x2b2   : > { %v12448_v30 = vld [vmem:[%s14081_s10 + $0x329] sm:$0x10]   ;;  %v5260_v51 = vsel %vm1445_vm2, %v12447_v33, %v5256_v4  ;;  %v5233_v42 = vsel %vm1453_vm4, %v12440_v21, %v5229_v59  ;;  %v12404_v3 = vld [vmem:[%s14081_s10 + $0x340] sm:$0x20]   ;;  %v5089_v14 = vsel %vm1449_vm3, %v12403_v62, %v5085_v15  ;;  %v12463_v33 = vld [vmem:[%s14081_s10 + $0x27c] sm:$0x2]  }
 0x2b3   : > { %v12449_v35 = vld [vmem:[%s14081_s10 + $0x368] sm:$0x20]   ;;  %v5264_v47 = vsel %vm1449_vm3, %v12448_v30, %v5260_v51  ;;  %v12405_v48 = vld [vmem:[%s14081_s10 + $0x37f] sm:$0x40]   ;;  %v5237_v12 = vsel %vm1457_vm5, %v12441_v54, %v5233_v42  ;;  %v5093_v18 = vsel %vm1453_vm4, %v12404_v3, %v5089_v14  ;;  %v12464_v30 = vld [vmem:[%s14081_s10 + $0x2bb] sm:$0x4]  }
 0x2b4   : > { %v12450_v25 = vld [vmem:[%s14081_s10 + $0x3a7] sm:$0x40]   ;;  %v5268_v57 = vsel %vm1453_vm4, %v12449_v35, %v5264_v47  ;;  %v12406_v1 = vld [vmem:[%s14081_s10 + $0x3be] sm:$0x80]   ;;  %v5241_v50 = vsel %vm1461_vm6, %v12442_v58, %v5237_v12  ;;  %v5097_v8 = vsel %vm1457_vm5, %v12405_v48, %v5093_v18  ;;  %v12465_v35 = vld [vmem:[%s14081_s10 + $0x2fa] sm:$0x8]   ;;  %v17197_v58 = vpop.permute.xlu0 %4192  }
 0x2b5   : > { %v12451_v38 = vld [vmem:[%s14081_s10 + $0x3e6] sm:$0x80]   ;;  %v5272_v53 = vsel %vm1457_vm5, %v12450_v25, %v5268_v57  ;;  %v12471_v49 = vld [vmem:[%s14081_s10 + $0x405] sm:$0x1]   ;;  %5242 = vrot.lane.b32.xlu0 %v5241_v50, %s14020_s15  ;;  %v5101_v28 = vsel %vm1461_vm6, %v12406_v1, %v5097_v8  ;;  %v5322_v25 = vsel %vm1437_vm0, %v12463_v33, %v12462_v5  ;;  %v12467_v43 = vld [vmem:[%s14081_s10 + $0x378] sm:$0x20]  }
 0x2b6   : > { %v5276_v61 = vsel %vm1461_vm6, %v12451_v38, %v5272_v53  ;;  %v12472_v13 = vld [vmem:[%s14081_s10 + $0x444] sm:$0x2]   ;;  %v12466_v38 = vld [vmem:[%s14081_s10 + $0x339] sm:$0x10]   ;;  %v5326_v44 = vsel %vm1441_vm1, %v12464_v30, %v5322_v25  ;;  %12110 = vst.msk [vmem:[%s14087_s14 + $0x2e8] sm:$0xff] %vm1465_vm8, %v16996_v20  }
 0x2b7   : > { %v12473_v17 = vld [vmem:[%s14081_s10 + $0x483] sm:$0x4]   ;;  %v5357_v19 = vsel %vm1437_vm0, %v12472_v13, %v12471_v49  ;;  %v12468_v32 = vld [vmem:[%s14081_s10 + $0x3b7] sm:$0x40]   ;;  %v5330_v45 = vsel %vm1445_vm2, %v12465_v35, %v5326_v44  ;;  %12101 = vst.msk [vmem:[%s14087_s14 + $0x2c8] sm:$0xff] %vm1465_vm8, %v16998_v10  }
 0x2b8   : > { %5277 = vrot.lane.b32.xlu1 %v5276_v61, %s14020_s15  ;;  %v12474_v55 = vld [vmem:[%s14081_s10 + $0x4c2] sm:$0x8]   ;;  %v5361_v63 = vsel %vm1441_vm1, %v12473_v17, %v5357_v19  ;;  %5102 = vrot.lane.b32.xlu2 %v5101_v28, %s14020_s15  ;;  %v12469_v52 = vld [vmem:[%s14081_s10 + $0x3f6] sm:$0x80]   ;;  %v5334_v54 = vsel %vm1449_vm3, %v12466_v38, %v5330_v45 }
 0x2b9   : > { %v12475_v22 = vld [vmem:[%s14081_s10 + $0x501] sm:$0x10]   ;;  %v5365_v29 = vsel %vm1445_vm2, %v12474_v55, %v5361_v63  ;;  %v12426_v20 = vld [vmem:[%s14081_s10 + $0x21d] sm:$0x1]   ;;  %12092 = vst.msk [vmem:[%s14087_s14 + $0x2a8] sm:$0xff] %vm1465_vm8, %v17008_v23   ;;  %v5338_v31 = vsel %vm1453_vm4, %v12467_v43, %v5334_v54  ;;  %v17248_v25 = vpop.permute.xlu1 %4332  }
 0x2ba   : > { %v12476_v24 = vld [vmem:[%s14081_s10 + $0x540] sm:$0x20]   ;;  %v5369_v4 = vsel %vm1449_vm3, %v12475_v22, %v5365_v29  ;;  %v12427_v10 = vld [vmem:[%s14081_s10 + $0x25c] sm:$0x2]   ;;  %v5342_v61 = vsel %vm1457_vm5, %v12468_v32, %v5338_v31  ;;  %v12489_v50 = vld [vmem:[%s14081_s10 + $0x415] sm:$0x1]  }
 0x2bb   : > { %v12477_v26 = vld [vmem:[%s14081_s10 + $0x57f] sm:$0x40]   ;;  %v5373_v51 = vsel %vm1453_vm4, %v12476_v24, %v5369_v4  ;;  %v12428_v47 = vld [vmem:[%s14081_s10 + $0x29b] sm:$0x4]   ;;  %v5182_v23 = vsel %vm1437_vm0, %v12427_v10, %v12426_v20  ;;  %v5346_v42 = vsel %vm1461_vm6, %v12469_v52, %v5342_v61  ;;  %v12490_v55 = vld [vmem:[%s14081_s10 + $0x454] sm:$0x2]  }
 0x2bc   : > { %v12478_v27 = vld [vmem:[%s14081_s10 + $0x5be] sm:$0x80]   ;;  %v5377_v39 = vsel %vm1457_vm5, %v12477_v26, %v5373_v51  ;;  %v12429_v57 = vld [vmem:[%s14081_s10 + $0x2da] sm:$0x8]   ;;  %v5186_v53 = vsel %vm1441_vm1, %v12428_v47, %v5182_v23  ;;  %v12491_v22 = vld [vmem:[%s14081_s10 + $0x493] sm:$0x4]   ;;  %v5427_v26 = vsel %vm1437_vm0, %v12490_v55, %v12489_v50  ;;  %v17250_v38 = vpop.permute.xlu0 %4297  }
 0x2bd   : > { %v5381_v21 = vsel %vm1461_vm6, %v12478_v27, %v5377_v39  ;;  %v12430_v7 = vld [vmem:[%s14081_s10 + $0x319] sm:$0x10]   ;;  %v5190_v59 = vsel %vm1445_vm2, %v12429_v57, %v5186_v53  ;;  %5347 = vrot.lane.b32.xlu0 %v5346_v42, %s14020_s15  ;;  %v12492_v24 = vld [vmem:[%s14081_s10 + $0x4d2] sm:$0x8]   ;;  %v5431_v33 = vsel %vm1441_vm1, %v12491_v22, %v5427_v26  ;;  %12137 = vst.msk [vmem:[%s14087_s14 + $0x348] sm:$0xff] %vm1465_vm8, %v17059_v9  }
 0x2be   : > { %v12431_v36 = vld [vmem:[%s14081_s10 + $0x358] sm:$0x20]   ;;  %v5194_v2 = vsel %vm1449_vm3, %v12430_v7, %v5190_v59  ;;  %v12493_v27 = vld [vmem:[%s14081_s10 + $0x511] sm:$0x10]   ;;  %v5435_v28 = vsel %vm1445_vm2, %v12492_v24, %v5431_v33  ;;  %12128 = vst.msk [vmem:[%s14087_s14 + $0x328] sm:$0xff] %vm1465_vm8, %v17061_v11  }
 0x2bf   : > { %v12432_v34 = vld [vmem:[%s14081_s10 + $0x397] sm:$0x40]   ;;  %v5198_v15 = vsel %vm1453_vm4, %v12431_v36, %v5194_v2  ;;  %v12494_v5 = vld [vmem:[%s14081_s10 + $0x550] sm:$0x20]   ;;  %v5439_v32 = vsel %vm1449_vm3, %v12493_v27, %v5435_v28  ;;  %12119 = vst.msk [vmem:[%s14087_s14 + $0x308] sm:$0xff] %vm1465_vm8, %v17071_v6  }
 0x2c0   : > { %5382 = vrot.lane.b32.xlu1 %v5381_v21, %s14020_s15  ;;  %v12433_v16 = vld [vmem:[%s14081_s10 + $0x3d6] sm:$0x80]   ;;  %v5202_v14 = vsel %vm1457_vm5, %v12432_v34, %v5198_v15  ;;  %v12495_v8 = vld [vmem:[%s14081_s10 + $0x58f] sm:$0x40]   ;;  %v5443_v52 = vsel %vm1453_vm4, %v12494_v5, %v5439_v32  ;;  %v12522_v50 = vld [vmem:[%s14081_s10 + $0x5a7] sm:$0x40]  }
 0x2c1   : > { %v12498_v37 = vld [vmem:[%s14081_s10 + $0x41d] sm:$0x1]   ;;  %v5206_v18 = vsel %vm1461_vm6, %v12433_v16, %v5202_v14  ;;  %v12496_v30 = vld [vmem:[%s14081_s10 + $0x5ce] sm:$0x80]   ;;  %v5447_v47 = vsel %vm1457_vm5, %v12495_v8, %v5443_v52  ;;  %v12523_v55 = vld [vmem:[%s14081_s10 + $0x5e6] sm:$0x80]  }
 0x2c2   : > { %v12499_v0 = vld [vmem:[%s14081_s10 + $0x45c] sm:$0x2]   ;;  %5207 = vrot.lane.b32.xlu2 %v5206_v18, %s14020_s15  ;;  %v12453_v9 = vld [vmem:[%s14081_s10 + $0x235] sm:$0x1]   ;;  %v5451_v7 = vsel %vm1461_vm6, %v12496_v30, %v5447_v47  ;;  %12164 = vst.msk [vmem:[%s14087_s14 + $0x3a8] sm:$0xff] %vm1465_vm8, %v17122_v56  }
 0x2c3   : > { %v12500_v62 = vld [vmem:[%s14081_s10 + $0x49b] sm:$0x4]   ;;  %v5462_v3 = vsel %vm1437_vm0, %v12499_v0, %v12498_v37  ;;  %v12454_v11 = vld [vmem:[%s14081_s10 + $0x274] sm:$0x2]   ;;  %v12480_v56 = vld [vmem:[%s14081_s10 + $0x40d] sm:$0x1]  }
 0x2c4   : > { %v12501_v48 = vld [vmem:[%s14081_s10 + $0x4da] sm:$0x8]   ;;  %v5466_v49 = vsel %vm1441_vm1, %v12500_v62, %v5462_v3  ;;  %v12455_v4 = vld [vmem:[%s14081_s10 + $0x2b3] sm:$0x4]   ;;  %v5287_v6 = vsel %vm1437_vm0, %v12454_v11, %v12453_v9  ;;  %v12516_v62 = vld [vmem:[%s14081_s10 + $0x42d] sm:$0x1]   ;;  %v17311_v26 = vpop.permute.xlu0 %4402  }
 0x2c5   : > { %v12502_v1 = vld [vmem:[%s14081_s10 + $0x519] sm:$0x10]   ;;  %v5470_v19 = vsel %vm1445_vm2, %v12501_v48, %v5466_v49  ;;  %v12456_v51 = vld [vmem:[%s14081_s10 + $0x2f2] sm:$0x8]   ;;  %v5291_v20 = vsel %vm1441_vm1, %v12455_v4, %v5287_v6  ;;  %5452 = vrot.lane.b32.xlu0 %v5451_v7, %s14020_s15  ;;  %v12517_v3 = vld [vmem:[%s14081_s10 + $0x46c] sm:$0x2]  }
 0x2c6   : > { %v12503_v12 = vld [vmem:[%s14081_s10 + $0x558] sm:$0x20]   ;;  %v5474_v63 = vsel %vm1449_vm3, %v12502_v1, %v5470_v19  ;;  %v12457_v44 = vld [vmem:[%s14081_s10 + $0x331] sm:$0x10]   ;;  %v5295_v21 = vsel %vm1445_vm2, %v12456_v51, %v5291_v20  ;;  %v12518_v48 = vld [vmem:[%s14081_s10 + $0x4ab] sm:$0x4]   ;;  %v5532_v49 = vsel %vm1437_vm0, %v12517_v3, %v12516_v62 }
 0x2c7   : > { %v12504_v13 = vld [vmem:[%s14081_s10 + $0x597] sm:$0x40]   ;;  %v5478_v29 = vsel %vm1453_vm4, %v12503_v12, %v5474_v63  ;;  %v12458_v39 = vld [vmem:[%s14081_s10 + $0x370] sm:$0x20]   ;;  %v5299_v31 = vsel %vm1449_vm3, %v12457_v44, %v5295_v21  ;;  %v12519_v1 = vld [vmem:[%s14081_s10 + $0x4ea] sm:$0x8]   ;;  %v5536_v19 = vsel %vm1441_vm1, %v12518_v48, %v5532_v49  ;;  %v17309_v63 = vpop.permute.xlu1 %4437  }
 0x2c8   : > { %v12505_v17 = vld [vmem:[%s14081_s10 + $0x5d6] sm:$0x80]   ;;  %v5482_v35 = vsel %vm1457_vm5, %v12504_v13, %v5478_v29  ;;  %v12459_v45 = vld [vmem:[%s14081_s10 + $0x3af] sm:$0x40]   ;;  %v5303_v61 = vsel %vm1453_vm4, %v12458_v39, %v5299_v31  ;;  %v12520_v13 = vld [vmem:[%s14081_s10 + $0x529] sm:$0x10]   ;;  %v5540_v24 = vsel %vm1445_vm2, %v12519_v1, %v5536_v19 }
 0x2c9   : > { %v5486_v43 = vsel %vm1461_vm6, %v12505_v17, %v5482_v35  ;;  %v12460_v10 = vld [vmem:[%s14081_s10 + $0x3ee] sm:$0x80]   ;;  %v5307_v42 = vsel %vm1457_vm5, %v12459_v45, %v5303_v61  ;;  %v12521_v17 = vld [vmem:[%s14081_s10 + $0x568] sm:$0x20]   ;;  %12155 = vst.msk [vmem:[%s14087_s14 + $0x388] sm:$0xff] %vm1465_vm8, %v17124_v60   ;;  %v5544_v5 = vsel %vm1449_vm3, %v12520_v13, %v5540_v24 }
 0x2ca   : > { %5487 = vrot.lane.b32.xlu1 %v5486_v43, %s14020_s15  ;;  %v12525_v54 = vld [vmem:[%s14081_s10 + $0x435] sm:$0x1]   ;;  %v5311_v12 = vsel %vm1461_vm6, %v12460_v10, %v5307_v42  ;;  %v12481_v60 = vld [vmem:[%s14081_s10 + $0x44c] sm:$0x2]   ;;  %12146 = vst.msk [vmem:[%s14087_s14 + $0x368] sm:$0xff] %vm1465_vm8, %v17134_v46   ;;  %v5548_v30 = vsel %vm1453_vm4, %v12521_v17, %v5544_v5 }
 0x2cb   : > { %v12526_v23 = vld [vmem:[%s14081_s10 + $0x474] sm:$0x2]   ;;  %5312 = vrot.lane.b32.xlu2 %v5311_v12, %s14020_s15  ;;  %v12482_v18 = vld [vmem:[%s14081_s10 + $0x48b] sm:$0x4]   ;;  %v5392_v46 = vsel %vm1437_vm0, %v12481_v60, %v12480_v56  ;;  %v5552_v4 = vsel %vm1457_vm5, %v12522_v50, %v5548_v30  ;;  %v12549_v62 = vld [vmem:[%s14081_s10 + $0x77f] sm:$0x40]  }
 0x2cc   : > { %v12527_v57 = vld [vmem:[%s14081_s10 + $0x4b3] sm:$0x4]   ;;  %v5567_v53 = vsel %vm1437_vm0, %v12526_v23, %v12525_v54  ;;  %v12483_v8 = vld [vmem:[%s14081_s10 + $0x4ca] sm:$0x8]   ;;  %v17321_v33 = vpop.permute.xlu2 %4367   ;;  %v5396_v9 = vsel %vm1441_vm1, %v12482_v18, %v5392_v46  ;;  %v5556_v44 = vsel %vm1461_vm6, %v12523_v55, %v5552_v4  ;;  %v12550_v3 = vld [vmem:[%s14081_s10 + $0x7be] sm:$0x80]  }
 0x2cd   : > { %v12528_v36 = vld [vmem:[%s14081_s10 + $0x4f2] sm:$0x8]   ;;  %v5571_v59 = vsel %vm1441_vm1, %v12527_v57, %v5567_v53  ;;  %v12484_v29 = vld [vmem:[%s14081_s10 + $0x509] sm:$0x10]   ;;  %v5400_v43 = vsel %vm1445_vm2, %v12483_v8, %v5396_v9  ;;  %5557 = vrot.lane.b32.xlu0 %v5556_v44, %s14020_s15  ;;  %v12543_v57 = vld [vmem:[%s14081_s10 + $0x605] sm:$0x1]  }
 0x2ce   : > { %v12529_v34 = vld [vmem:[%s14081_s10 + $0x531] sm:$0x10]   ;;  %v5575_v2 = vsel %vm1445_vm2, %v12528_v36, %v5571_v59  ;;  %v12485_v35 = vld [vmem:[%s14081_s10 + $0x548] sm:$0x20]   ;;  %v5404_v52 = vsel %vm1449_vm3, %v12484_v29, %v5400_v43  ;;  %v12544_v53 = vld [vmem:[%s14081_s10 + $0x644] sm:$0x2]  }
 0x2cf   : > { %v12530_v16 = vld [vmem:[%s14081_s10 + $0x570] sm:$0x20]   ;;  %v5579_v15 = vsel %vm1449_vm3, %v12529_v34, %v5575_v2  ;;  %v12486_v28 = vld [vmem:[%s14081_s10 + $0x587] sm:$0x40]   ;;  %v5408_v47 = vsel %vm1453_vm4, %v12485_v35, %v5404_v52  ;;  %v12545_v36 = vld [vmem:[%s14081_s10 + $0x683] sm:$0x4]   ;;  %v5637_v59 = vsel %vm1437_vm0, %v12544_v53, %v12543_v57 }
 0x2d0   : > { %v12531_v37 = vld [vmem:[%s14081_s10 + $0x5af] sm:$0x40]   ;;  %v5583_v14 = vsel %vm1453_vm4, %v12530_v16, %v5579_v15  ;;  %v12487_v11 = vld [vmem:[%s14081_s10 + $0x5c6] sm:$0x80]   ;;  %v5412_v7 = vsel %vm1457_vm5, %v12486_v28, %v5408_v47  ;;  %v12546_v34 = vld [vmem:[%s14081_s10 + $0x6c2] sm:$0x8]   ;;  %v5641_v2 = vsel %vm1441_vm1, %v12545_v36, %v5637_v59  ;;  %v17372_v15 = vpop.permute.xlu1 %4542  }
 0x2d1   : > { %v12532_v0 = vld [vmem:[%s14081_s10 + $0x5ee] sm:$0x80]   ;;  %v5587_v22 = vsel %vm1457_vm5, %v12531_v37, %v5583_v14  ;;  %v12552_v32 = vld [vmem:[%s14081_s10 + $0x60d] sm:$0x1]   ;;  %v5416_v16 = vsel %vm1461_vm6, %v12487_v11, %v5412_v7  ;;  %v12547_v37 = vld [vmem:[%s14081_s10 + $0x701] sm:$0x10]   ;;  %v5645_v1 = vsel %vm1445_vm2, %v12546_v34, %v5641_v2 }
 0x2d2   : > { %v5591_v27 = vsel %vm1461_vm6, %v12532_v0, %v5587_v22  ;;  %v12553_v6 = vld [vmem:[%s14081_s10 + $0x64c] sm:$0x2]   ;;  %v12548_v0 = vld [vmem:[%s14081_s10 + $0x740] sm:$0x20]   ;;  %12191 = vst.msk [vmem:[%s14087_s14 + $0x408] sm:$0xff] %vm1465_vm8, %v17185_v41   ;;  %v5649_v13 = vsel %vm1449_vm3, %v12547_v37, %v5645_v1 }
 0x2d3   : > { %5592 = vrot.lane.b32.xlu1 %v5591_v27, %s14020_s15  ;;  %v12554_v51 = vld [vmem:[%s14081_s10 + $0x68b] sm:$0x4]   ;;  %v5672_v20 = vsel %vm1437_vm0, %v12553_v6, %v12552_v32  ;;  %5417 = vrot.lane.b32.xlu2 %v5416_v16, %s14020_s15  ;;  %v12507_v41 = vld [vmem:[%s14081_s10 + $0x425] sm:$0x1]   ;;  %v5653_v14 = vsel %vm1453_vm4, %v12548_v0, %v5649_v13 }
 0x2d4   : > { %v12555_v39 = vld [vmem:[%s14081_s10 + $0x6ca] sm:$0x8]   ;;  %v5676_v21 = vsel %vm1441_vm1, %v12554_v51, %v5672_v20  ;;  %12182 = vst.msk [vmem:[%s14087_s14 + $0x3e8] sm:$0xff] %vm1465_vm8, %v17187_v40   ;;  %v12508_v40 = vld [vmem:[%s14081_s10 + $0x464] sm:$0x2]   ;;  %v5657_v24 = vsel %vm1457_vm5, %v12549_v62, %v5653_v14 }
 0x2d5   : > { %v12556_v45 = vld [vmem:[%s14081_s10 + $0x709] sm:$0x10]   ;;  %v5680_v31 = vsel %vm1445_vm2, %v12555_v39, %v5676_v21  ;;  %v12509_v12 = vld [vmem:[%s14081_s10 + $0x4a3] sm:$0x4]   ;;  %12173 = vst.msk [vmem:[%s14087_s14 + $0x3c8] sm:$0xff] %vm1465_vm8, %v17197_v58   ;;  %v5497_v58 = vsel %vm1437_vm0, %v12508_v40, %v12507_v41  ;;  %v5661_v8 = vsel %vm1461_vm6, %v12550_v3, %v5657_v24 }
 0x2d6   : > { %v12557_v10 = vld [vmem:[%s14081_s10 + $0x748] sm:$0x20]   ;;  %v5684_v61 = vsel %vm1449_vm3, %v12556_v45, %v5680_v31  ;;  %v12510_v17 = vld [vmem:[%s14081_s10 + $0x4e2] sm:$0x8]   ;;  %v5501_v19 = vsel %vm1441_vm1, %v12509_v12, %v5497_v58  ;;  %v17393_v46 = vpop.permute.xlu0 %4507   ;;  %5662 = vrot.lane.b32.xlu0 %v5661_v8, %s14020_s15  ;;  %v12570_v6 = vld [vmem:[%s14081_s10 + $0x61d] sm:$0x1]  }
 0x2d7   : > { %v12558_v54 = vld [vmem:[%s14081_s10 + $0x787] sm:$0x40]   ;;  %v5688_v42 = vsel %vm1453_vm4, %v12557_v10, %v5684_v61  ;;  %v12511_v50 = vld [vmem:[%s14081_s10 + $0x521] sm:$0x10]   ;;  %v5505_v60 = vsel %vm1445_vm2, %v12510_v17, %v5501_v19  ;;  %v12571_v52 = vld [vmem:[%s14081_s10 + $0x65c] sm:$0x2]  }
 0x2d8   : > { %v12559_v23 = vld [vmem:[%s14081_s10 + $0x7c6] sm:$0x80]   ;;  %v5692_v48 = vsel %vm1457_vm5, %v12558_v54, %v5688_v42  ;;  %v12512_v55 = vld [vmem:[%s14081_s10 + $0x560] sm:$0x20]   ;;  %v5509_v29 = vsel %vm1449_vm3, %v12511_v50, %v5505_v60  ;;  %v12572_v20 = vld [vmem:[%s14081_s10 + $0x69b] sm:$0x4]   ;;  %v5742_v47 = vsel %vm1437_vm0, %v12571_v52, %v12570_v6 }
 0x2d9   : > { %v5696_v49 = vsel %vm1461_vm6, %v12559_v23, %v5692_v48  ;;  %v12513_v56 = vld [vmem:[%s14081_s10 + $0x59f] sm:$0x40]   ;;  %v5513_v11 = vsel %vm1453_vm4, %v12512_v55, %v5509_v29  ;;  %v12573_v39 = vld [vmem:[%s14081_s10 + $0x6da] sm:$0x8]   ;;  %v5746_v7 = vsel %vm1441_vm1, %v12572_v20, %v5742_v47  ;;  %12218 = vst.msk [vmem:[%s14087_s14 + $0x468] sm:$0xff] %vm1465_vm8, %v17321_v33  }
 0x2da   : > { %v12514_v22 = vld [vmem:[%s14081_s10 + $0x5de] sm:$0x80]   ;;  %v5517_v51 = vsel %vm1457_vm5, %v12513_v56, %v5513_v11  ;;  %v12574_v21 = vld [vmem:[%s14081_s10 + $0x719] sm:$0x10]   ;;  %v5750_v34 = vsel %vm1445_vm2, %v12573_v39, %v5746_v7  ;;  %12209 = vst.msk [vmem:[%s14087_s14 + $0x448] sm:$0xff] %vm1465_vm8, %v17248_v25  }
 0x2db   : > { %5697 = vrot.lane.b32.xlu1 %v5696_v49, %s14020_s15  ;;  %v12579_v18 = vld [vmem:[%s14081_s10 + $0x625] sm:$0x1]   ;;  %v5521_v45 = vsel %vm1461_vm6, %v12514_v22, %v5517_v51  ;;  %v12575_v54 = vld [vmem:[%s14081_s10 + $0x758] sm:$0x20]   ;;  %v5754_v59 = vsel %vm1449_vm3, %v12574_v21, %v5750_v34  ;;  %12200 = vst.msk [vmem:[%s14087_s14 + $0x428] sm:$0xff] %vm1465_vm8, %v17250_v38  }
 0x2dc   : > { %v12580_v27 = vld [vmem:[%s14081_s10 + $0x664] sm:$0x2]   ;;  %v12576_v23 = vld [vmem:[%s14081_s10 + $0x797] sm:$0x40]   ;;  %5522 = vrot.lane.b32.xlu2 %v5521_v45, %s14020_s15  ;;  %v5758_v62 = vsel %vm1453_vm4, %v12575_v54, %v5754_v59  ;;  %v12597_v60 = vld [vmem:[%s14081_s10 + $0x635] sm:$0x1]  }
 0x2dd   : > { %v12581_v5 = vld [vmem:[%s14081_s10 + $0x6a3] sm:$0x4]   ;;  %v5777_v30 = vsel %vm1437_vm0, %v12580_v27, %v12579_v18  ;;  %v12577_v31 = vld [vmem:[%s14081_s10 + $0x7d6] sm:$0x80]   ;;  %v5762_v48 = vsel %vm1457_vm5, %v12576_v23, %v5758_v62  ;;  %v12599_v8 = vld [vmem:[%s14081_s10 + $0x6b3] sm:$0x4]  }
 0x2de   : > { %v12582_v9 = vld [vmem:[%s14081_s10 + $0x6e2] sm:$0x8]   ;;  %v5781_v4 = vsel %vm1441_vm1, %v12581_v5, %v5777_v30  ;;  %v12534_v33 = vld [vmem:[%s14081_s10 + $0x43d] sm:$0x1]   ;;  %v5766_v13 = vsel %vm1461_vm6, %v12577_v31, %v5762_v48  ;;  %v12598_v5 = vld [vmem:[%s14081_s10 + $0x674] sm:$0x2]  }
 0x2df   : > { %v12583_v35 = vld [vmem:[%s14081_s10 + $0x721] sm:$0x10]   ;;  %v5785_v44 = vsel %vm1445_vm2, %v12582_v9, %v5781_v4  ;;  %v4473_v53 = vpop.permute.xlu2 %4472   ;;  %v12535_v25 = vld [vmem:[%s14081_s10 + $0x47c] sm:$0x2]   ;;  %5767 = vrot.lane.b32.xlu0 %v5766_v13, %s14020_s15  ;;  %v12600_v29 = vld [vmem:[%s14081_s10 + $0x6f2] sm:$0x8]  }
 0x2e0   : > { %v12584_v28 = vld [vmem:[%s14081_s10 + $0x760] sm:$0x20]   ;;  %v5789_v10 = vsel %vm1449_vm3, %v12583_v35, %v5785_v44  ;;  %v12536_v16 = vld [vmem:[%s14081_s10 + $0x4bb] sm:$0x4]   ;;  %v5602_v38 = vsel %vm1437_vm0, %v12535_v25, %v12534_v33  ;;  %v5847_v35 = vsel %vm1437_vm0, %v12598_v5, %v12597_v60  ;;  %v12602_v11 = vld [vmem:[%s14081_s10 + $0x770] sm:$0x20]  }
 0x2e1   : > { %v12585_v43 = vld [vmem:[%s14081_s10 + $0x79f] sm:$0x40]   ;;  %v5793_v57 = vsel %vm1453_vm4, %v12584_v28, %v5789_v10  ;;  %v12537_v37 = vld [vmem:[%s14081_s10 + $0x4fa] sm:$0x8]   ;;  %v5606_v42 = vsel %vm1441_vm1, %v12536_v16, %v5602_v38  ;;  %v12601_v28 = vld [vmem:[%s14081_s10 + $0x731] sm:$0x10]  }
 0x2e2   : > { %v12586_v32 = vld [vmem:[%s14081_s10 + $0x7de] sm:$0x80]   ;;  %v5797_v36 = vsel %vm1457_vm5, %v12585_v43, %v5793_v57  ;;  %v12538_v0 = vld [vmem:[%s14081_s10 + $0x539] sm:$0x10]   ;;  %v5610_v1 = vsel %vm1445_vm2, %v12537_v37, %v5606_v42  ;;  %v12603_v4 = vld [vmem:[%s14081_s10 + $0x7af] sm:$0x40]  }
 0x2e3   : > { %v5801_v61 = vsel %vm1461_vm6, %v12586_v32, %v5797_v36  ;;  %v12539_v2 = vld [vmem:[%s14081_s10 + $0x578] sm:$0x20]   ;;  %v5614_v58 = vsel %vm1449_vm3, %v12538_v0, %v5610_v1  ;;  %v5851_v32 = vsel %vm1441_vm1, %v12599_v8, %v5847_v35  ;;  %v12604_v6 = vld [vmem:[%s14081_s10 + $0x7ee] sm:$0x80]   ;;  %12245 = vst.msk [vmem:[%s14087_s14 + $0x4c8] sm:$0xff] %vm1465_vm8, %v4473_v53  }
 0x2e4   : > { %5802 = vrot.lane.b32.xlu1 %v5801_v61, %s14020_s15  ;;  %v12540_v3 = vld [vmem:[%s14081_s10 + $0x5b7] sm:$0x40]   ;;  %v5618_v55 = vsel %vm1453_vm4, %v12539_v2, %v5614_v58  ;;  %v12561_v51 = vld [vmem:[%s14081_s10 + $0x615] sm:$0x1]   ;;  %v5855_v20 = vsel %vm1445_vm2, %v12600_v29, %v5851_v32  ;;  %12236 = vst.msk [vmem:[%s14087_s14 + $0x4a8] sm:$0xff] %vm1465_vm8, %v17309_v63  }
 0x2e5   : > { %v12541_v41 = vld [vmem:[%s14081_s10 + $0x5f6] sm:$0x80]   ;;  %v5622_v18 = vsel %vm1457_vm5, %v12540_v3, %v5618_v55  ;;  %v12562_v63 = vld [vmem:[%s14081_s10 + $0x654] sm:$0x2]   ;;  %v5859_v10 = vsel %vm1449_vm3, %v12601_v28, %v5855_v20  ;;  %12227 = vst.msk [vmem:[%s14087_s14 + $0x488] sm:$0xff] %vm1465_vm8, %v17311_v26  }
 0x2e6   : > { %v12606_v40 = vld [vmem:[%s14081_s10 + $0x63d] sm:$0x1]   ;;  %v5626_v30 = vsel %vm1461_vm6, %v12541_v41, %v5622_v18  ;;  %v12563_v39 = vld [vmem:[%s14081_s10 + $0x693] sm:$0x4]   ;;  %v5707_v26 = vsel %vm1437_vm0, %v12562_v63, %v12561_v51  ;;  %v5863_v54 = vsel %vm1453_vm4, %v12602_v11, %v5859_v10  ;;  %v12624_v41 = vld [vmem:[%s14081_s10 + $0x80d] sm:$0x1]  }
 0x2e7   : > { %v12607_v12 = vld [vmem:[%s14081_s10 + $0x67c] sm:$0x2]   ;;  %5627 = vrot.lane.b32.xlu2 %v5626_v30, %s14020_s15  ;;  %v4578_v44 = vpop.permute.xlu2 %4577   ;;  %v12564_v47 = vld [vmem:[%s14081_s10 + $0x6d2] sm:$0x8]   ;;  %v5711_v23 = vsel %vm1441_vm1, %v12563_v39, %v5707_v26  ;;  %v5867_v33 = vsel %vm1457_vm5, %v12603_v4, %v5863_v54  ;;  %v12627_v13 = vld [vmem:[%s14081_s10 + $0x8ca] sm:$0x8]  }
 0x2e8   : > { %v12608_v49 = vld [vmem:[%s14081_s10 + $0x6bb] sm:$0x4]   ;;  %v5882_v17 = vsel %vm1437_vm0, %v12607_v12, %v12606_v40  ;;  %v12565_v21 = vld [vmem:[%s14081_s10 + $0x711] sm:$0x10]   ;;  %v5715_v53 = vsel %vm1445_vm2, %v12564_v47, %v5711_v23  ;;  %v5871_v16 = vsel %vm1461_vm6, %v12604_v6, %v5867_v33  ;;  %v12625_v12 = vld [vmem:[%s14081_s10 + $0x84c] sm:$0x2]  }
 0x2e9   : > { %v12609_v50 = vld [vmem:[%s14081_s10 + $0x6fa] sm:$0x8]   ;;  %v5886_v56 = vsel %vm1441_vm1, %v12608_v49, %v5882_v17  ;;  %v12566_v57 = vld [vmem:[%s14081_s10 + $0x750] sm:$0x20]   ;;  %v5719_v61 = vsel %vm1449_vm3, %v12565_v21, %v5715_v53  ;;  %5872 = vrot.lane.b32.xlu0 %v5871_v16, %s14020_s15  ;;  %v12626_v49 = vld [vmem:[%s14081_s10 + $0x88b] sm:$0x4]  }
 0x2ea   : > { %v12610_v14 = vld [vmem:[%s14081_s10 + $0x739] sm:$0x10]   ;;  %v5890_v27 = vsel %vm1445_vm2, %v12609_v50, %v5886_v56  ;;  %v12567_v7 = vld [vmem:[%s14081_s10 + $0x78f] sm:$0x40]   ;;  %v5723_v62 = vsel %vm1453_vm4, %v12566_v57, %v5719_v61  ;;  %v5952_v50 = vsel %vm1437_vm0, %v12625_v12, %v12624_v41  ;;  %v12630_v55 = vld [vmem:[%s14081_s10 + $0x987] sm:$0x40]  }
 0x2eb   : > { %v12611_v19 = vld [vmem:[%s14081_s10 + $0x778] sm:$0x20]   ;;  %v5894_v9 = vsel %vm1449_vm3, %v12610_v14, %v5890_v27  ;;  %v12568_v31 = vld [vmem:[%s14081_s10 + $0x7ce] sm:$0x80]   ;;  %v5727_v1 = vsel %vm1457_vm5, %v12567_v7, %v5723_v62  ;;  %v12628_v14 = vld [vmem:[%s14081_s10 + $0x909] sm:$0x10]  }
 0x2ec   : > { %v12612_v22 = vld [vmem:[%s14081_s10 + $0x7b7] sm:$0x40]   ;;  %v5898_v43 = vsel %vm1453_vm4, %v12611_v19, %v5894_v9  ;;  %v12633_v36 = vld [vmem:[%s14081_s10 + $0x815] sm:$0x1]   ;;  %v17520_v48 = vpop.permute.xlu1 %4647   ;;  %v5731_v58 = vsel %vm1461_vm6, %v12568_v31, %v5727_v1  ;;  %v12629_v19 = vld [vmem:[%s14081_s10 + $0x948] sm:$0x20]  }
 0x2ed   : > { %v12613_v24 = vld [vmem:[%s14081_s10 + $0x7f6] sm:$0x80]   ;;  %v5902_v52 = vsel %vm1457_vm5, %v12612_v22, %v5898_v43  ;;  %v12634_v34 = vld [vmem:[%s14081_s10 + $0x854] sm:$0x2]   ;;  %v5956_v22 = vsel %vm1441_vm1, %v12626_v49, %v5952_v50  ;;  %12272 = vst.msk [vmem:[%s14087_s14 + $0x528] sm:$0xff] %vm1465_vm8, %v4578_v44  }
 0x2ee   : > { %v5906_v45 = vsel %vm1461_vm6, %v12613_v24, %v5902_v52  ;;  %v12635_v25 = vld [vmem:[%s14081_s10 + $0x893] sm:$0x4]   ;;  %v5987_v59 = vsel %vm1437_vm0, %v12634_v34, %v12633_v36  ;;  %v12631_v24 = vld [vmem:[%s14081_s10 + $0x9c6] sm:$0x80]   ;;  %v5960_v5 = vsel %vm1445_vm2, %v12627_v13, %v5956_v22  ;;  %12263 = vst.msk [vmem:[%s14087_s14 + $0x508] sm:$0xff] %vm1465_vm8, %v17372_v15  }
 0x2ef   : > { %5907 = vrot.lane.b32.xlu1 %v5906_v45, %s14020_s15  ;;  %v12636_v38 = vld [vmem:[%s14081_s10 + $0x8d2] sm:$0x8]   ;;  %v5991_v42 = vsel %vm1441_vm1, %v12635_v25, %v5987_v59  ;;  %5732 = vrot.lane.b32.xlu2 %v5731_v58, %s14020_s15  ;;  %v12588_v60 = vld [vmem:[%s14081_s10 + $0x62d] sm:$0x1]   ;;  %v4683_v18 = vpop.permute.xlu2 %4682   ;;  %v5964_v30 = vsel %vm1449_vm3, %v12628_v14, %v5960_v5  ;;  %v4613_v6 = vpop.permute.xlu0 %4612  }
 0x2f0   : > { %v12637_v37 = vld [vmem:[%s14081_s10 + $0x911] sm:$0x10]   ;;  %v5995_v40 = vsel %vm1445_vm2, %v12636_v38, %v5991_v42  ;;  %v12589_v15 = vld [vmem:[%s14081_s10 + $0x66c] sm:$0x2]   ;;  %12254 = vst.msk [vmem:[%s14087_s14 + $0x4e8] sm:$0xff] %vm1465_vm8, %v17393_v46   ;;  %v5968_v28 = vsel %vm1453_vm4, %v12629_v19, %v5964_v30 }
 0x2f1   : > { %v12638_v0 = vld [vmem:[%s14081_s10 + $0x950] sm:$0x20]   ;;  %v5999_v17 = vsel %vm1449_vm3, %v12637_v37, %v5995_v40  ;;  %v12590_v8 = vld [vmem:[%s14081_s10 + $0x6ab] sm:$0x4]   ;;  %v5812_v46 = vsel %vm1437_vm0, %v12589_v15, %v12588_v60  ;;  %v5972_v51 = vsel %vm1457_vm5, %v12630_v55, %v5968_v28  ;;  %v12651_v31 = vld [vmem:[%s14081_s10 + $0x825] sm:$0x1]  }
 0x2f2   : > { %v12639_v2 = vld [vmem:[%s14081_s10 + $0x98f] sm:$0x40]   ;;  %v6003_v56 = vsel %vm1453_vm4, %v12638_v0, %v5999_v17  ;;  %v12591_v9 = vld [vmem:[%s14081_s10 + $0x6ea] sm:$0x8]   ;;  %v5816_v11 = vsel %vm1441_vm1, %v12590_v8, %v5812_v46  ;;  %v5976_v39 = vsel %vm1461_vm6, %v12631_v24, %v5972_v51  ;;  %v12652_v36 = vld [vmem:[%s14081_s10 + $0x864] sm:$0x2]  }
 0x2f3   : > { %v12640_v3 = vld [vmem:[%s14081_s10 + $0x9ce] sm:$0x80]   ;;  %v6007_v27 = vsel %vm1457_vm5, %v12639_v2, %v6003_v56  ;;  %v12592_v35 = vld [vmem:[%s14081_s10 + $0x729] sm:$0x10]   ;;  %v5820_v44 = vsel %vm1445_vm2, %v12591_v9, %v5816_v11  ;;  %5977 = vrot.lane.b32.xlu0 %v5976_v39, %s14020_s15  ;;  %v12653_v34 = vld [vmem:[%s14081_s10 + $0x8a3] sm:$0x4]   ;;  %v6057_v59 = vsel %vm1437_vm0, %v12652_v36, %v12651_v31 }
 0x2f4   : > { %v6011_v29 = vsel %vm1461_vm6, %v12640_v3, %v6007_v27  ;;  %v12593_v4 = vld [vmem:[%s14081_s10 + $0x768] sm:$0x20]   ;;  %v5824_v45 = vsel %vm1449_vm3, %v12592_v35, %v5820_v44  ;;  %v12654_v25 = vld [vmem:[%s14081_s10 + $0x8e2] sm:$0x8]   ;;  %v6061_v42 = vsel %vm1441_vm1, %v12653_v34, %v6057_v59  ;;  %12299 = vst.msk [vmem:[%s14087_s14 + $0x588] sm:$0xff] %vm1465_vm8, %v4683_v18  }
 0x2f5   : > { %v12594_v43 = vld [vmem:[%s14081_s10 + $0x7a7] sm:$0x40]   ;;  %v5828_v54 = vsel %vm1453_vm4, %v12593_v4, %v5824_v45  ;;  %v12655_v38 = vld [vmem:[%s14081_s10 + $0x921] sm:$0x10]   ;;  %v6065_v12 = vsel %vm1445_vm2, %v12654_v25, %v6061_v42  ;;  %12290 = vst.msk [vmem:[%s14087_s14 + $0x568] sm:$0xff] %vm1465_vm8, %v17520_v48  }
 0x2f6   : > { %v12595_v32 = vld [vmem:[%s14081_s10 + $0x7e6] sm:$0x80]   ;;  %v5832_v33 = vsel %vm1457_vm5, %v12594_v43, %v5828_v54  ;;  %v12656_v37 = vld [vmem:[%s14081_s10 + $0x960] sm:$0x20]   ;;  %v6069_v58 = vsel %vm1449_vm3, %v12655_v38, %v6065_v12  ;;  %12281 = vst.msk [vmem:[%s14087_s14 + $0x548] sm:$0xff] %vm1465_vm8, %v4613_v6  }
 0x2f7   : > { %6012 = vrot.lane.b32.xlu1 %v6011_v29, %s14020_s15  ;;  %v12660_v52 = vld [vmem:[%s14081_s10 + $0x82d] sm:$0x1]   ;;  %v5836_v16 = vsel %vm1461_vm6, %v12595_v32, %v5832_v33  ;;  %v12657_v0 = vld [vmem:[%s14081_s10 + $0x99f] sm:$0x40]   ;;  %v6073_v19 = vsel %vm1453_vm4, %v12656_v37, %v6069_v58  ;;  %v4718_v60 = vpop.permute.xlu0 %4717   ;;  %v12678_v6 = vld [vmem:[%s14081_s10 + $0x83d] sm:$0x1]  }
 0x2f8   : > { %v12661_v20 = vld [vmem:[%s14081_s10 + $0x86c] sm:$0x2]   ;;  %5837 = vrot.lane.b32.xlu2 %v5836_v16, %s14020_s15  ;;  %v12658_v2 = vld [vmem:[%s14081_s10 + $0x9de] sm:$0x80]   ;;  %v4788_v41 = vpop.permute.xlu2 %4787   ;;  %v6077_v18 = vsel %vm1457_vm5, %v12657_v0, %v6073_v19  ;;  %v12643_v34 = vld [vmem:[%s14081_s10 + $0x85c] sm:$0x2]  }
 0x2f9   : > { %v12662_v63 = vld [vmem:[%s14081_s10 + $0x8ab] sm:$0x4]   ;;  %v6092_v10 = vsel %vm1437_vm0, %v12661_v20, %v12660_v52  ;;  %v12615_v3 = vld [vmem:[%s14081_s10 + $0x805] sm:$0x1]   ;;  %v6081_v29 = vsel %vm1461_vm6, %v12658_v2, %v6077_v18  ;;  %v12679_v52 = vld [vmem:[%s14081_s10 + $0x87c] sm:$0x2]  }
 0x2fa   : > { %v12663_v26 = vld [vmem:[%s14081_s10 + $0x8ea] sm:$0x8]   ;;  %v6096_v23 = vsel %vm1441_vm1, %v12662_v63, %v6092_v10  ;;  %v12616_v48 = vld [vmem:[%s14081_s10 + $0x844] sm:$0x2]   ;;  %v12680_v20 = vld [vmem:[%s14081_s10 + $0x8bb] sm:$0x4]   ;;  %v6162_v10 = vsel %vm1437_vm0, %v12679_v52, %v12678_v6 }
 0x2fb   : > { %v12664_v47 = vld [vmem:[%s14081_s10 + $0x929] sm:$0x10]   ;;  %v6100_v53 = vsel %vm1445_vm2, %v12663_v26, %v6096_v23  ;;  %v12617_v49 = vld [vmem:[%s14081_s10 + $0x883] sm:$0x4]   ;;  %v5917_v17 = vsel %vm1437_vm0, %v12616_v48, %v12615_v3  ;;  %6082 = vrot.lane.b32.xlu0 %v6081_v29, %s14020_s15  ;;  %v12681_v63 = vld [vmem:[%s14081_s10 + $0x8fa] sm:$0x8]   ;;  %v6166_v23 = vsel %vm1441_vm1, %v12680_v20, %v6162_v10 }
 0x2fc   : > { %v12665_v21 = vld [vmem:[%s14081_s10 + $0x968] sm:$0x20]   ;;  %v6104_v61 = vsel %vm1449_vm3, %v12664_v47, %v6100_v53  ;;  %v12618_v50 = vld [vmem:[%s14081_s10 + $0x8c2] sm:$0x8]   ;;  %v5921_v55 = vsel %vm1441_vm1, %v12617_v49, %v5917_v17  ;;  %v12682_v26 = vld [vmem:[%s14081_s10 + $0x939] sm:$0x10]   ;;  %v6170_v36 = vsel %vm1445_vm2, %v12681_v63, %v6166_v23 }
 0x2fd   : > { %v12666_v57 = vld [vmem:[%s14081_s10 + $0x9a7] sm:$0x40]   ;;  %v6108_v62 = vsel %vm1453_vm4, %v12665_v21, %v6104_v61  ;;  %v12619_v14 = vld [vmem:[%s14081_s10 + $0x901] sm:$0x10]   ;;  %v5925_v27 = vsel %vm1445_vm2, %v12618_v50, %v5921_v55  ;;  %v12683_v47 = vld [vmem:[%s14081_s10 + $0x978] sm:$0x20]   ;;  %v6174_v61 = vsel %vm1449_vm3, %v12682_v26, %v6170_v36 }
 0x2fe   : > { %v12667_v7 = vld [vmem:[%s14081_s10 + $0x9e6] sm:$0x80]   ;;  %v6112_v40 = vsel %vm1457_vm5, %v12666_v57, %v6108_v62  ;;  %v12620_v56 = vld [vmem:[%s14081_s10 + $0x940] sm:$0x20]   ;;  %v5929_v30 = vsel %vm1449_vm3, %v12619_v14, %v5925_v27  ;;  %v12684_v21 = vld [vmem:[%s14081_s10 + $0x9b7] sm:$0x40]   ;;  %v6178_v0 = vsel %vm1453_vm4, %v12683_v47, %v6174_v61 }
 0x2ff   : > { %v4753_v1 = vpop.permute.xlu1 %4752   ;;  %v6116_v13 = vsel %vm1461_vm6, %v12667_v7, %v6112_v40  ;;  %v12621_v22 = vld [vmem:[%s14081_s10 + $0x97f] sm:$0x40]   ;;  %v5933_v11 = vsel %vm1453_vm4, %v12620_v56, %v5929_v30  ;;  %v12685_v57 = vld [vmem:[%s14081_s10 + $0x9f6] sm:$0x80]   ;;  %12326 = vst.msk [vmem:[%s14087_s14 + $0x5e8] sm:$0xff] %vm1465_vm8, %v4788_v41  }
 0x300   : > { %6117 = vrot.lane.b32.xlu1 %v6116_v13, %s14020_s15  ;;  %v12622_v24 = vld [vmem:[%s14081_s10 + $0x9be] sm:$0x80]   ;;  %v5937_v51 = vsel %vm1457_vm5, %v12621_v22, %v5933_v11  ;;  %v12642_v7 = vld [vmem:[%s14081_s10 + $0x81d] sm:$0x1]   ;;  %12317 = vst.msk [vmem:[%s14087_s14 + $0x5c8] sm:$0xff] %vm1465_vm8, %v4753_v1   ;;  %v6182_v1 = vsel %vm1457_vm5, %v12684_v21, %v6178_v0 }
 0x301   : > { %v12687_v5 = vld [vmem:[%s14081_s10 + $0xa05] sm:$0x1]   ;;  %v5941_v39 = vsel %vm1461_vm6, %v12622_v24, %v5937_v51  ;;  %v12644_v25 = vld [vmem:[%s14081_s10 + $0x89b] sm:$0x4]   ;;  %12308 = vst.msk [vmem:[%s14087_s14 + $0x5a8] sm:$0xff] %vm1465_vm8, %v4718_v60   ;;  %v6022_v59 = vsel %vm1437_vm0, %v12643_v34, %v12642_v7  ;;  %v6186_v13 = vsel %vm1461_vm6, %v12685_v57, %v6182_v1 }
 0x302   : > { %v12688_v15 = vld [vmem:[%s14081_s10 + $0xa44] sm:$0x2]   ;;  %5942 = vrot.lane.b32.xlu2 %v5941_v39, %s14020_s15  ;;  %v4893_v31 = vpop.permute.xlu2 %4892   ;;  %v12645_v38 = vld [vmem:[%s14081_s10 + $0x8da] sm:$0x8]   ;;  %v6026_v62 = vsel %vm1441_vm1, %v12644_v25, %v6022_v59  ;;  %v12705_v60 = vld [vmem:[%s14081_s10 + $0xa15] sm:$0x1]  }
 0x303   : > { %v12689_v8 = vld [vmem:[%s14081_s10 + $0xa83] sm:$0x4]   ;;  %v6197_v46 = vsel %vm1437_vm0, %v12688_v15, %v12687_v5  ;;  %v12646_v37 = vld [vmem:[%s14081_s10 + $0x919] sm:$0x10]   ;;  %v6030_v40 = vsel %vm1445_vm2, %v12645_v38, %v6026_v62  ;;  %6187 = vrot.lane.b32.xlu0 %v6186_v13, %s14020_s15  ;;  %v12706_v5 = vld [vmem:[%s14081_s10 + $0xa54] sm:$0x2]  }
 0x304   : > { %v12690_v9 = vld [vmem:[%s14081_s10 + $0xac2] sm:$0x8]   ;;  %v6201_v4 = vsel %vm1441_vm1, %v12689_v8, %v6197_v46  ;;  %v12647_v42 = vld [vmem:[%s14081_s10 + $0x958] sm:$0x20]   ;;  %v4823_v41 = vpop.permute.xlu0 %4822   ;;  %v6034_v58 = vsel %vm1449_vm3, %v12646_v37, %v6030_v40  ;;  %v12707_v15 = vld [vmem:[%s14081_s10 + $0xa93] sm:$0x4]   ;;  %v6267_v46 = vsel %vm1437_vm0, %v12706_v5, %v12705_v60 }
 0x305   : > { %v12691_v35 = vld [vmem:[%s14081_s10 + $0xb01] sm:$0x10]   ;;  %v6205_v44 = vsel %vm1445_vm2, %v12690_v9, %v6201_v4  ;;  %v12648_v2 = vld [vmem:[%s14081_s10 + $0x997] sm:$0x40]   ;;  %v6038_v55 = vsel %vm1453_vm4, %v12647_v42, %v6034_v58  ;;  %v12708_v8 = vld [vmem:[%s14081_s10 + $0xad2] sm:$0x8]   ;;  %v6271_v4 = vsel %vm1441_vm1, %v12707_v15, %v6267_v46 }
 0x306   : > { %v12692_v28 = vld [vmem:[%s14081_s10 + $0xb40] sm:$0x20]   ;;  %v6209_v45 = vsel %vm1449_vm3, %v12691_v35, %v6205_v44  ;;  %v12649_v3 = vld [vmem:[%s14081_s10 + $0x9d6] sm:$0x80]   ;;  %v6042_v18 = vsel %vm1457_vm5, %v12648_v2, %v6038_v55  ;;  %v12709_v9 = vld [vmem:[%s14081_s10 + $0xb11] sm:$0x10]   ;;  %v6275_v52 = vsel %vm1445_vm2, %v12708_v8, %v6271_v4 }
 0x307   : > { %v12693_v43 = vld [vmem:[%s14081_s10 + $0xb7f] sm:$0x40]   ;;  %v6213_v54 = vsel %vm1453_vm4, %v12692_v28, %v6209_v45  ;;  %v4858_v33 = vpop.permute.xlu1 %4857   ;;  %v12714_v12 = vld [vmem:[%s14081_s10 + $0xa1d] sm:$0x1]   ;;  %v6046_v29 = vsel %vm1461_vm6, %v12649_v3, %v6042_v18  ;;  %v12710_v35 = vld [vmem:[%s14081_s10 + $0xb50] sm:$0x20]   ;;  %v6279_v45 = vsel %vm1449_vm3, %v12709_v9, %v6275_v52 }
 0x308   : > { %v12694_v32 = vld [vmem:[%s14081_s10 + $0xbbe] sm:$0x80]   ;;  %v6217_v53 = vsel %vm1457_vm5, %v12693_v43, %v6213_v54  ;;  %v12715_v48 = vld [vmem:[%s14081_s10 + $0xa5c] sm:$0x2]   ;;  %v12711_v28 = vld [vmem:[%s14081_s10 + $0xb8f] sm:$0x40]   ;;  %v6283_v21 = vsel %vm1453_vm4, %v12710_v35, %v6279_v45 }
 0x309   : > { %v6221_v16 = vsel %vm1461_vm6, %v12694_v32, %v6217_v53  ;;  %v12716_v49 = vld [vmem:[%s14081_s10 + $0xa9b] sm:$0x4]   ;;  %v6302_v17 = vsel %vm1437_vm0, %v12715_v48, %v12714_v12  ;;  %v12712_v43 = vld [vmem:[%s14081_s10 + $0xbce] sm:$0x80]   ;;  %12353 = vst.msk [vmem:[%s14087_s14 + $0x50] sm:$0xff] %vm1465_vm8, %v4893_v31  }
 0x30a   : > { %6222 = vrot.lane.b32.xlu1 %v6221_v16, %s14020_s15  ;;  %v12717_v50 = vld [vmem:[%s14081_s10 + $0xada] sm:$0x8]   ;;  %v6306_v56 = vsel %vm1441_vm1, %v12716_v49, %v6302_v17  ;;  %6047 = vrot.lane.b32.xlu2 %v6046_v29, %s14020_s15  ;;  %v12669_v32 = vld [vmem:[%s14081_s10 + $0x835] sm:$0x1]   ;;  %v4998_v6 = vpop.permute.xlu2 %4997  }
 0x30b   : > { %v12718_v14 = vld [vmem:[%s14081_s10 + $0xb19] sm:$0x10]   ;;  %v6310_v27 = vsel %vm1445_vm2, %v12717_v50, %v6306_v56  ;;  %12344 = vst.msk [vmem:[%s14087_s14 + $0x30] sm:$0xff] %vm1465_vm8, %v4858_v33   ;;  %v12670_v20 = vld [vmem:[%s14081_s10 + $0x874] sm:$0x2]   ;;  %v6287_v33 = vsel %vm1457_vm5, %v12711_v28, %v6283_v21 }
 0x30c   : > { %v12719_v19 = vld [vmem:[%s14081_s10 + $0xb58] sm:$0x20]   ;;  %v6314_v30 = vsel %vm1449_vm3, %v12718_v14, %v6310_v27  ;;  %v12671_v63 = vld [vmem:[%s14081_s10 + $0x8b3] sm:$0x4]   ;;  %12335 = vst.msk [vmem:[%s14087_s14 + $0x10] sm:$0xff] %vm1465_vm8, %v4823_v41   ;;  %v6127_v10 = vsel %vm1437_vm0, %v12670_v20, %v12669_v32  ;;  %v4928_v31 = vpop.permute.xlu0 %4927   ;;  %v6291_v16 = vsel %vm1461_vm6, %v12712_v43, %v6287_v33 }
 0x30d   : > { %v12720_v22 = vld [vmem:[%s14081_s10 + $0xb97] sm:$0x40]   ;;  %v6318_v11 = vsel %vm1453_vm4, %v12719_v19, %v6314_v30  ;;  %v12672_v26 = vld [vmem:[%s14081_s10 + $0x8f2] sm:$0x8]   ;;  %v6131_v54 = vsel %vm1441_vm1, %v12671_v63, %v6127_v10  ;;  %6292 = vrot.lane.b32.xlu0 %v6291_v16, %s14020_s15  ;;  %v12732_v41 = vld [vmem:[%s14081_s10 + $0xa2d] sm:$0x1]  }
 0x30e   : > { %v12721_v24 = vld [vmem:[%s14081_s10 + $0xbd6] sm:$0x80]   ;;  %v6322_v44 = vsel %vm1457_vm5, %v12720_v22, %v6318_v11  ;;  %v12673_v47 = vld [vmem:[%s14081_s10 + $0x931] sm:$0x10]   ;;  %v6135_v53 = vsel %vm1445_vm2, %v12672_v26, %v6131_v54  ;;  %v12733_v12 = vld [vmem:[%s14081_s10 + $0xa6c] sm:$0x2]  }
 0x30f   : > { %v4963_v51 = vpop.permute.xlu1 %4962   ;;  %v6326_v39 = vsel %vm1461_vm6, %v12721_v24, %v6322_v44  ;;  %v12674_v23 = vld [vmem:[%s14081_s10 + $0x970] sm:$0x20]   ;;  %v6139_v61 = vsel %vm1449_vm3, %v12673_v47, %v6135_v53  ;;  %v12734_v48 = vld [vmem:[%s14081_s10 + $0xaab] sm:$0x4]   ;;  %v6372_v17 = vsel %vm1437_vm0, %v12733_v12, %v12732_v41  ;;  %12380 = vst.msk [vmem:[%s14087_s14 + $0xb0] sm:$0xff] %vm1465_vm8, %v4998_v6  }
 0x310   : > { %v12675_v57 = vld [vmem:[%s14081_s10 + $0x9af] sm:$0x40]   ;;  %v6143_v62 = vsel %vm1453_vm4, %v12674_v23, %v6139_v61  ;;  %v12735_v49 = vld [vmem:[%s14081_s10 + $0xaea] sm:$0x8]   ;;  %v6376_v56 = vsel %vm1441_vm1, %v12734_v48, %v6372_v17  ;;  %12371 = vst.msk [vmem:[%s14087_s14 + $0x90] sm:$0xff] %vm1465_vm8, %v4963_v51  }
 0x311   : > { %v12676_v7 = vld [vmem:[%s14081_s10 + $0x9ee] sm:$0x80]   ;;  %v6147_v1 = vsel %vm1457_vm5, %v12675_v57, %v6143_v62  ;;  %v12736_v50 = vld [vmem:[%s14081_s10 + $0xb29] sm:$0x10]   ;;  %v6380_v5 = vsel %vm1445_vm2, %v12735_v49, %v6376_v56  ;;  %12362 = vst.msk [vmem:[%s14087_s14 + $0x70] sm:$0xff] %vm1465_vm8, %v4928_v31  }
 0x312   : > { %6327 = vrot.lane.b32.xlu1 %v6326_v39, %s14020_s15  ;;  %v12741_v36 = vld [vmem:[%s14081_s10 + $0xa35] sm:$0x1]   ;;  %v6151_v13 = vsel %vm1461_vm6, %v12676_v7, %v6147_v1  ;;  %v12737_v14 = vld [vmem:[%s14081_s10 + $0xb68] sm:$0x20]   ;;  %v5103_v60 = vpop.permute.xlu2 %5102   ;;  %v6384_v30 = vsel %vm1449_vm3, %v12736_v50, %v6380_v5  ;;  %v12768_v52 = vld [vmem:[%s14081_s10 + $0xf] sm:$0x1]  }
 0x313   : > { %v12742_v34 = vld [vmem:[%s14081_s10 + $0xa74] sm:$0x2]   ;;  %v12738_v19 = vld [vmem:[%s14081_s10 + $0xba7] sm:$0x40]   ;;  %6152 = vrot.lane.b32.xlu2 %v6151_v13, %s14020_s15  ;;  %v6388_v28 = vsel %vm1453_vm4, %v12737_v14, %v6384_v30  ;;  %v12769_v20 = vld [vmem:[%s14081_s10 + $0x4e] sm:$0x2]  }
 0x314   : > { %v12743_v25 = vld [vmem:[%s14081_s10 + $0xab3] sm:$0x4]   ;;  %v6407_v59 = vsel %vm1437_vm0, %v12742_v34, %v12741_v36  ;;  %v12739_v22 = vld [vmem:[%s14081_s10 + $0xbe6] sm:$0x80]   ;;  %v5033_v6 = vpop.permute.xlu0 %5032   ;;  %v6392_v51 = vsel %vm1457_vm5, %v12738_v19, %v6388_v28  ;;  %v12770_v63 = vld [vmem:[%s14081_s10 + $0x8d] sm:$0x4]   ;;  %v6512_v10 = vsel %vm1437_vm0, %v12769_v20, %v12768_v52 }
 0x315   : > { %v12744_v38 = vld [vmem:[%s14081_s10 + $0xaf2] sm:$0x8]   ;;  %v6411_v42 = vsel %vm1441_vm1, %v12743_v25, %v6407_v59  ;;  %v12696_v24 = vld [vmem:[%s14081_s10 + $0xa0d] sm:$0x1]   ;;  %v6396_v39 = vsel %vm1461_vm6, %v12739_v22, %v6392_v51  ;;  %v12771_v26 = vld [vmem:[%s14081_s10 + $0xcc] sm:$0x8]   ;;  %v6516_v23 = vsel %vm1441_vm1, %v12770_v63, %v6512_v10 }
 0x316   : > { %v12745_v37 = vld [vmem:[%s14081_s10 + $0xb31] sm:$0x10]   ;;  %v6415_v40 = vsel %vm1445_vm2, %v12744_v38, %v6411_v42  ;;  %v12697_v15 = vld [vmem:[%s14081_s10 + $0xa4c] sm:$0x2]   ;;  %v12772_v47 = vld [vmem:[%s14081_s10 + $0x10b] sm:$0x10]   ;;  %6397 = vrot.lane.b32.xlu0 %v6396_v39, %s14020_s15  ;;  %v6520_v53 = vsel %vm1445_vm2, %v12771_v26, %v6516_v23 }
 0x317   : > { %v12746_v0 = vld [vmem:[%s14081_s10 + $0xb70] sm:$0x20]   ;;  %v6419_v58 = vsel %vm1449_vm3, %v12745_v37, %v6415_v40  ;;  %v5068_v18 = vpop.permute.xlu1 %5067   ;;  %v12698_v8 = vld [vmem:[%s14081_s10 + $0xa8b] sm:$0x4]   ;;  %v6232_v46 = vsel %vm1437_vm0, %v12697_v15, %v12696_v24  ;;  %v12773_v21 = vld [vmem:[%s14081_s10 + $0x14a] sm:$0x20]   ;;  %v6524_v61 = vsel %vm1449_vm3, %v12772_v47, %v6520_v53 }
 0x318   : > { %v12747_v2 = vld [vmem:[%s14081_s10 + $0xbaf] sm:$0x40]   ;;  %v6423_v55 = vsel %vm1453_vm4, %v12746_v0, %v6419_v58  ;;  %v12699_v9 = vld [vmem:[%s14081_s10 + $0xaca] sm:$0x8]   ;;  %v6236_v11 = vsel %vm1441_vm1, %v12698_v8, %v6232_v46  ;;  %v12774_v57 = vld [vmem:[%s14081_s10 + $0x189] sm:$0x40]   ;;  %v6528_v62 = vsel %vm1453_vm4, %v12773_v21, %v6524_v61 }
 0x319   : > { %v12748_v3 = vld [vmem:[%s14081_s10 + $0xbee] sm:$0x80]   ;;  %v6427_v27 = vsel %vm1457_vm5, %v12747_v2, %v6423_v55  ;;  %v12700_v35 = vld [vmem:[%s14081_s10 + $0xb09] sm:$0x10]   ;;  %v6240_v44 = vsel %vm1445_vm2, %v12699_v9, %v6236_v11  ;;  %v12775_v7 = vld [vmem:[%s14081_s10 + $0x1c8] sm:$0x80]   ;;  %v6532_v40 = vsel %vm1457_vm5, %v12774_v57, %v6528_v62 }
 0x31a   : > { %v6431_v29 = vsel %vm1461_vm6, %v12748_v3, %v6427_v27  ;;  %v12701_v4 = vld [vmem:[%s14081_s10 + $0xb48] sm:$0x20]   ;;  %v6244_v45 = vsel %vm1449_vm3, %v12700_v35, %v6240_v44  ;;  %v12759_v31 = vld [vmem:[%s14081_s10 + $0x7] sm:$0x1]   ;;  %12407 = vst.msk [vmem:[%s14087_s14 + $0x110] sm:$0xff] %vm1465_vm8, %v5103_v60   ;;  %v6536_v13 = vsel %vm1461_vm6, %v12775_v7, %v6532_v40 }
 0x31b   : > { %6432 = vrot.lane.b32.xlu1 %v6431_v29, %s14020_s15  ;;  %v12702_v43 = vld [vmem:[%s14081_s10 + $0xb87] sm:$0x40]   ;;  %v6248_v54 = vsel %vm1453_vm4, %v12701_v4, %v6244_v45  ;;  %v12760_v36 = vld [vmem:[%s14081_s10 + $0x46] sm:$0x2]   ;;  %v12723_v3 = vld [vmem:[%s14081_s10 + $0xa25] sm:$0x1]  }
 0x31c   : > { %v12703_v32 = vld [vmem:[%s14081_s10 + $0xbc6] sm:$0x80]   ;;  %v6252_v33 = vsel %vm1457_vm5, %v12702_v43, %v6248_v54  ;;  %v12761_v34 = vld [vmem:[%s14081_s10 + $0x85] sm:$0x4]   ;;  %v6477_v59 = vsel %vm1437_vm0, %v12760_v36, %v12759_v31  ;;  %v5208_v41 = vpop.permute.xlu2 %5207   ;;  %12398 = vst.msk [vmem:[%s14087_s14 + $0xf0] sm:$0xff] %vm1465_vm8, %v5068_v18   ;;  %v5138_v60 = vpop.permute.xlu0 %5137  }
 0x31d   : > { %v12762_v25 = vld [vmem:[%s14081_s10 + $0xc4] sm:$0x8]   ;;  %v6256_v16 = vsel %vm1461_vm6, %v12703_v32, %v6252_v33  ;;  %v6481_v42 = vsel %vm1441_vm1, %v12761_v34, %v6477_v59  ;;  %v12724_v48 = vld [vmem:[%s14081_s10 + $0xa64] sm:$0x2]   ;;  %12389 = vst.msk [vmem:[%s14087_s14 + $0xd0] sm:$0xff] %vm1465_vm8, %v5033_v6  }
 0x31e   : > { %v12763_v38 = vld [vmem:[%s14081_s10 + $0x103] sm:$0x10]   ;;  %6257 = vrot.lane.b32.xlu2 %v6256_v16, %s14020_s15  ;;  %v6485_v12 = vsel %vm1445_vm2, %v12762_v25, %v6481_v42  ;;  %v12725_v49 = vld [vmem:[%s14081_s10 + $0xaa3] sm:$0x4]   ;;  %v6337_v17 = vsel %vm1437_vm0, %v12724_v48, %v12723_v3  ;;  %v12786_v6 = vld [vmem:[%s14081_s10 + $0x1f] sm:$0x1]  }
 0x31f   : > { %v12764_v37 = vld [vmem:[%s14081_s10 + $0x142] sm:$0x20]   ;;  %v6489_v58 = vsel %vm1449_vm3, %v12763_v38, %v6485_v12  ;;  %v12726_v50 = vld [vmem:[%s14081_s10 + $0xae2] sm:$0x8]   ;;  %v6341_v55 = vsel %vm1441_vm1, %v12725_v49, %v6337_v17  ;;  %v12787_v52 = vld [vmem:[%s14081_s10 + $0x5e] sm:$0x2]  }
 0x320   : > { %v12765_v0 = vld [vmem:[%s14081_s10 + $0x181] sm:$0x40]   ;;  %v12727_v14 = vld [vmem:[%s14081_s10 + $0xb21] sm:$0x10]   ;;  %v6493_v19 = vsel %vm1453_vm4, %v12764_v37, %v6489_v58  ;;  %v6345_v27 = vsel %vm1445_vm2, %v12726_v50, %v6341_v55  ;;  %v12788_v20 = vld [vmem:[%s14081_s10 + $0x9d] sm:$0x4]   ;;  %v6582_v10 = vsel %vm1437_vm0, %v12787_v52, %v12786_v6 }
 0x321   : > { %v12766_v2 = vld [vmem:[%s14081_s10 + $0x1c0] sm:$0x80]   ;;  %v12728_v56 = vld [vmem:[%s14081_s10 + $0xb60] sm:$0x20]   ;;  %v6497_v18 = vsel %vm1457_vm5, %v12765_v0, %v6493_v19  ;;  %v6349_v30 = vsel %vm1449_vm3, %v12727_v14, %v6345_v27  ;;  %v12789_v63 = vld [vmem:[%s14081_s10 + $0xdc] sm:$0x8]   ;;  %v6586_v23 = vsel %vm1441_vm1, %v12788_v20, %v6582_v10 }
 0x322   : > { %v5173_v1 = vpop.permute.xlu1 %5172   ;;  %v12729_v22 = vld [vmem:[%s14081_s10 + $0xb9f] sm:$0x40]   ;;  %v12795_v5 = vld [vmem:[%s14081_s10 + $0x27] sm:$0x1]   ;;  %v6501_v29 = vsel %vm1461_vm6, %v12766_v2, %v6497_v18  ;;  %v6353_v11 = vsel %vm1453_vm4, %v12728_v56, %v6349_v30  ;;  %v12790_v26 = vld [vmem:[%s14081_s10 + $0x11b] sm:$0x10]   ;;  %v6590_v36 = vsel %vm1445_vm2, %v12789_v63, %v6586_v23 }
 0x323   : > { %6537 = vrot.lane.b32.xlu1 %v6536_v13, %s14020_s15  ;;  %v12730_v24 = vld [vmem:[%s14081_s10 + $0xbde] sm:$0x80]   ;;  %v12796_v15 = vld [vmem:[%s14081_s10 + $0x66] sm:$0x2]   ;;  %6502 = vrot.lane.b32.xlu0 %v6501_v29, %s14020_s15  ;;  %v6357_v51 = vsel %vm1457_vm5, %v12729_v22, %v6353_v11  ;;  %v6594_v61 = vsel %vm1449_vm3, %v12790_v26, %v6590_v36 }
 0x324   : > { %v12797_v8 = vld [vmem:[%s14081_s10 + $0xa5] sm:$0x4]   ;;  %v6617_v46 = vsel %vm1437_vm0, %v12796_v15, %v12795_v5  ;;  %v6361_v39 = vsel %vm1461_vm6, %v12730_v24, %v6357_v51  ;;  %v12791_v47 = vld [vmem:[%s14081_s10 + $0x15a] sm:$0x20]   ;;  %12434 = vst.msk [vmem:[%s14087_s14 + $0x170] sm:$0xff] %vm1465_vm8, %v5208_v41  }
 0x325   : > { %v12798_v9 = vld [vmem:[%s14081_s10 + $0xe4] sm:$0x8]   ;;  %v6621_v4 = vsel %vm1441_vm1, %v12797_v8, %v6617_v46  ;;  %v12792_v21 = vld [vmem:[%s14081_s10 + $0x199] sm:$0x40]   ;;  %v12750_v7 = vld [vmem:[%s14081_s10 + $0xa3d] sm:$0x1]   ;;  %v5313_v31 = vpop.permute.xlu2 %5312   ;;  %v6598_v0 = vsel %vm1453_vm4, %v12791_v47, %v6594_v61 }
 0x326   : > { %v12799_v35 = vld [vmem:[%s14081_s10 + $0x123] sm:$0x10]   ;;  %v6625_v44 = vsel %vm1445_vm2, %v12798_v9, %v6621_v4  ;;  %6362 = vrot.lane.b32.xlu2 %v6361_v39, %s14020_s15  ;;  %v12793_v57 = vld [vmem:[%s14081_s10 + $0x1d8] sm:$0x80]   ;;  %12425 = vst.msk [vmem:[%s14087_s14 + $0x150] sm:$0xff] %vm1465_vm8, %v5173_v1   ;;  %v6602_v1 = vsel %vm1457_vm5, %v12792_v21, %v6598_v0 }
 0x327   : > { %v12800_v28 = vld [vmem:[%s14081_s10 + $0x162] sm:$0x20]   ;;  %v6629_v45 = vsel %vm1449_vm3, %v12799_v35, %v6625_v44  ;;  %v12751_v34 = vld [vmem:[%s14081_s10 + $0xa7c] sm:$0x2]   ;;  %12416 = vst.msk [vmem:[%s14087_s14 + $0x130] sm:$0xff] %vm1465_vm8, %v5138_v60   ;;  %v5243_v41 = vpop.permute.xlu0 %5242   ;;  %v6606_v13 = vsel %vm1461_vm6, %v12793_v57, %v6602_v1 }
 0x328   : > { %v12801_v43 = vld [vmem:[%s14081_s10 + $0x1a1] sm:$0x40]   ;;  %v6633_v54 = vsel %vm1453_vm4, %v12800_v28, %v6629_v45  ;;  %v12752_v25 = vld [vmem:[%s14081_s10 + $0xabb] sm:$0x4]   ;;  %v6442_v59 = vsel %vm1437_vm0, %v12751_v34, %v12750_v7  ;;  %v12822_v12 = vld [vmem:[%s14081_s10 + $0x3f] sm:$0x1]  }
 0x329   : > { %v12802_v32 = vld [vmem:[%s14081_s10 + $0x1e0] sm:$0x80]   ;;  %v6637_v53 = vsel %vm1457_vm5, %v12801_v43, %v6633_v54  ;;  %v12753_v38 = vld [vmem:[%s14081_s10 + $0xafa] sm:$0x8]   ;;  %v6446_v62 = vsel %vm1441_vm1, %v12752_v25, %v6442_v59  ;;  %v12823_v48 = vld [vmem:[%s14081_s10 + $0x7e] sm:$0x2]  }
 0x32a   : > { %v5278_v33 = vpop.permute.xlu1 %5277   ;;  %v6641_v16 = vsel %vm1461_vm6, %v12802_v32, %v6637_v53  ;;  %v12754_v37 = vld [vmem:[%s14081_s10 + $0xb39] sm:$0x10]   ;;  %v6450_v40 = vsel %vm1445_vm2, %v12753_v38, %v6446_v62  ;;  %v12824_v49 = vld [vmem:[%s14081_s10 + $0xbd] sm:$0x4]   ;;  %v6722_v17 = vsel %vm1437_vm0, %v12823_v48, %v12822_v12  ;;  %v12813_v60 = vld [vmem:[%s14081_s10 + $0x37] sm:$0x1]  }
 0x32b   : > { %6642 = vrot.lane.b32.xlu1 %v6641_v16, %s14020_s15  ;;  %v12755_v42 = vld [vmem:[%s14081_s10 + $0xb78] sm:$0x20]   ;;  %v6454_v58 = vsel %vm1449_vm3, %v12754_v37, %v6450_v40  ;;  %v12825_v50 = vld [vmem:[%s14081_s10 + $0xfc] sm:$0x8]   ;;  %6607 = vrot.lane.b32.xlu0 %v6606_v13, %s14020_s15  ;;  %v6726_v56 = vsel %vm1441_vm1, %v12824_v49, %v6722_v17 }
 0x32c   : > { %v12756_v2 = vld [vmem:[%s14081_s10 + $0xbb7] sm:$0x40]   ;;  %v12826_v14 = vld [vmem:[%s14081_s10 + $0x13b] sm:$0x10]   ;;  %v6458_v55 = vsel %vm1453_vm4, %v12755_v42, %v6454_v58  ;;  %v6730_v27 = vsel %vm1445_vm2, %v12825_v50, %v6726_v56  ;;  %v12814_v5 = vld [vmem:[%s14081_s10 + $0x76] sm:$0x2]  }
 0x32d   : > { %v12757_v3 = vld [vmem:[%s14081_s10 + $0xbf6] sm:$0x80]   ;;  %v12827_v19 = vld [vmem:[%s14081_s10 + $0x17a] sm:$0x20]   ;;  %v6462_v18 = vsel %vm1457_vm5, %v12756_v2, %v6458_v55  ;;  %v12815_v15 = vld [vmem:[%s14081_s10 + $0xb5] sm:$0x4]   ;;  %v6734_v30 = vsel %vm1449_vm3, %v12826_v14, %v6730_v27  ;;  %v6687_v46 = vsel %vm1437_vm0, %v12814_v5, %v12813_v60  ;;  %v5418_v6 = vpop.permute.xlu2 %5417  }
 0x32e   : > { %v12828_v22 = vld [vmem:[%s14081_s10 + $0x1b9] sm:$0x40]   ;;  %v12816_v8 = vld [vmem:[%s14081_s10 + $0xf4] sm:$0x8]   ;;  %v6466_v29 = vsel %vm1461_vm6, %v12757_v3, %v6462_v18  ;;  %v6738_v11 = vsel %vm1453_vm4, %v12827_v19, %v6734_v30  ;;  %v6691_v4 = vsel %vm1441_vm1, %v12815_v15, %v6687_v46  ;;  %12461 = vst.msk [vmem:[%s14087_s14 + $0x1d0] sm:$0xff] %vm1465_vm8, %v5313_v31  }
 0x32f   : > { %v12829_v24 = vld [vmem:[%s14081_s10 + $0x1f8] sm:$0x80]   ;;  %v12817_v9 = vld [vmem:[%s14081_s10 + $0x133] sm:$0x10]   ;;  %6467 = vrot.lane.b32.xlu2 %v6466_v29, %s14020_s15  ;;  %v6742_v44 = vsel %vm1457_vm5, %v12828_v22, %v6738_v11  ;;  %v6695_v52 = vsel %vm1445_vm2, %v12816_v8, %v6691_v4  ;;  %12452 = vst.msk [vmem:[%s14087_s14 + $0x1b0] sm:$0xff] %vm1465_vm8, %v5278_v33   ;;  %v5348_v31 = vpop.permute.xlu0 %5347  }
 0x330   : > { %v12818_v35 = vld [vmem:[%s14081_s10 + $0x172] sm:$0x20]   ;;  %v6746_v39 = vsel %vm1461_vm6, %v12829_v24, %v6742_v44  ;;  %v6699_v45 = vsel %vm1449_vm3, %v12817_v9, %v6695_v52  ;;  %12443 = vst.msk [vmem:[%s14087_s14 + $0x190] sm:$0xff] %vm1465_vm8, %v5243_v41   ;;  %v12840_v41 = vld [vmem:[%s14081_s10 + $0x20f] sm:$0x1]  }
 0x331   : > { %v12819_v28 = vld [vmem:[%s14081_s10 + $0x1b1] sm:$0x40]   ;;  %v6703_v21 = vsel %vm1453_vm4, %v12818_v35, %v6699_v45  ;;  %v12841_v12 = vld [vmem:[%s14081_s10 + $0x24e] sm:$0x2]   ;;  %12488 = vst.msk [vmem:[%s14087_s14 + $0x230] sm:$0xff] %vm1465_vm8, %v5418_v6  }
 0x332   : > { %v12820_v43 = vld [vmem:[%s14081_s10 + $0x1f0] sm:$0x80]   ;;  %v5383_v51 = vpop.permute.xlu1 %5382   ;;  %v6707_v33 = vsel %vm1457_vm5, %v12819_v28, %v6703_v21  ;;  %v12842_v48 = vld [vmem:[%s14081_s10 + $0x28d] sm:$0x4]   ;;  %v6792_v17 = vsel %vm1437_vm0, %v12841_v12, %v12840_v41  ;;  %12470 = vst.msk [vmem:[%s14087_s14 + $0x1f0] sm:$0xff] %vm1465_vm8, %v5348_v31  }
 0x333   : > { %v12777_v32 = vld [vmem:[%s14081_s10 + $0x17] sm:$0x1]   ;;  %6747 = vrot.lane.b32.xlu1 %v6746_v39, %s14020_s15  ;;  %v6711_v16 = vsel %vm1461_vm6, %v12820_v43, %v6707_v33  ;;  %v12843_v49 = vld [vmem:[%s14081_s10 + $0x2cc] sm:$0x8]   ;;  %v6796_v56 = vsel %vm1441_vm1, %v12842_v48, %v6792_v17  ;;  %12479 = vst.msk [vmem:[%s14087_s14 + $0x210] sm:$0xff] %vm1465_vm8, %v5383_v51  }
 0x334   : > { %v12778_v20 = vld [vmem:[%s14081_s10 + $0x56] sm:$0x2]   ;;  %6712 = vrot.lane.b32.xlu0 %v6711_v16, %s14020_s15  ;;  %v12844_v50 = vld [vmem:[%s14081_s10 + $0x30b] sm:$0x10]   ;;  %v6800_v5 = vsel %vm1445_vm2, %v12843_v49, %v6796_v56  ;;  %v12867_v31 = vld [vmem:[%s14081_s10 + $0x227] sm:$0x1]  }
 0x335   : > { %v12779_v63 = vld [vmem:[%s14081_s10 + $0x95] sm:$0x4]   ;;  %v6547_v10 = vsel %vm1437_vm0, %v12778_v20, %v12777_v32  ;;  %v12845_v14 = vld [vmem:[%s14081_s10 + $0x34a] sm:$0x20]   ;;  %v6804_v30 = vsel %vm1449_vm3, %v12844_v50, %v6800_v5  ;;  %v12832_v48 = vld [vmem:[%s14081_s10 + $0x246] sm:$0x2]  }
 0x336   : > { %v12780_v26 = vld [vmem:[%s14081_s10 + $0xd4] sm:$0x8]   ;;  %v6551_v54 = vsel %vm1441_vm1, %v12779_v63, %v6547_v10  ;;  %v12846_v19 = vld [vmem:[%s14081_s10 + $0x389] sm:$0x40]   ;;  %v5523_v60 = vpop.permute.xlu2 %5522   ;;  %v6808_v28 = vsel %vm1453_vm4, %v12845_v14, %v6804_v30  ;;  %v12833_v49 = vld [vmem:[%s14081_s10 + $0x285] sm:$0x4]  }
 0x337   : > { %v12781_v47 = vld [vmem:[%s14081_s10 + $0x113] sm:$0x10]   ;;  %v6555_v53 = vsel %vm1445_vm2, %v12780_v26, %v6551_v54  ;;  %v12847_v22 = vld [vmem:[%s14081_s10 + $0x3c8] sm:$0x80]   ;;  %v5453_v6 = vpop.permute.xlu0 %5452   ;;  %v6812_v51 = vsel %vm1457_vm5, %v12846_v19, %v6808_v28  ;;  %12515 = vst.msk [vmem:[%s14087_s14 + $0x290] sm:$0xff] %vm1465_vm8, %v5523_v60  }
 0x338   : > { %v12782_v23 = vld [vmem:[%s14081_s10 + $0x152] sm:$0x20]   ;;  %v6559_v61 = vsel %vm1449_vm3, %v12781_v47, %v6555_v53  ;;  %v12804_v24 = vld [vmem:[%s14081_s10 + $0x2f] sm:$0x1]   ;;  %v6816_v39 = vsel %vm1461_vm6, %v12847_v22, %v6812_v51  ;;  %12497 = vst.msk [vmem:[%s14087_s14 + $0x250] sm:$0xff] %vm1465_vm8, %v5453_v6  }
 0x339   : > { %v12783_v57 = vld [vmem:[%s14081_s10 + $0x191] sm:$0x40]   ;;  %v6563_v62 = vsel %vm1453_vm4, %v12782_v23, %v6559_v61  ;;  %v12805_v15 = vld [vmem:[%s14081_s10 + $0x6e] sm:$0x2]   ;;  %v12834_v50 = vld [vmem:[%s14081_s10 + $0x2c4] sm:$0x8]  }
 0x33a   : > { %v12784_v7 = vld [vmem:[%s14081_s10 + $0x1d0] sm:$0x80]   ;;  %v6567_v1 = vsel %vm1457_vm5, %v12783_v57, %v6563_v62  ;;  %v12806_v8 = vld [vmem:[%s14081_s10 + $0xad] sm:$0x4]   ;;  %v6652_v46 = vsel %vm1437_vm0, %v12805_v15, %v12804_v24  ;;  %v12835_v14 = vld [vmem:[%s14081_s10 + $0x303] sm:$0x10]  }
 0x33b   : > { %v12849_v36 = vld [vmem:[%s14081_s10 + $0x217] sm:$0x1]   ;;  %v6571_v13 = vsel %vm1461_vm6, %v12784_v7, %v6567_v1  ;;  %v12807_v9 = vld [vmem:[%s14081_s10 + $0xec] sm:$0x8]   ;;  %v6656_v11 = vsel %vm1441_vm1, %v12806_v8, %v6652_v46  ;;  %v12836_v56 = vld [vmem:[%s14081_s10 + $0x342] sm:$0x20]  }
 0x33c   : > { %v12850_v34 = vld [vmem:[%s14081_s10 + $0x256] sm:$0x2]   ;;  %6572 = vrot.lane.b32.xlu2 %v6571_v13, %s14020_s15  ;;  %v5488_v18 = vpop.permute.xlu1 %5487   ;;  %v12808_v35 = vld [vmem:[%s14081_s10 + $0x12b] sm:$0x10]   ;;  %v6660_v44 = vsel %vm1445_vm2, %v12807_v9, %v6656_v11  ;;  %6817 = vrot.lane.b32.xlu0 %v6816_v39, %s14020_s15 }
 0x33d   : > { %v12851_v25 = vld [vmem:[%s14081_s10 + $0x295] sm:$0x4]   ;;  %v6827_v59 = vsel %vm1437_vm0, %v12850_v34, %v12849_v36  ;;  %v12809_v4 = vld [vmem:[%s14081_s10 + $0x16a] sm:$0x20]   ;;  %v6664_v45 = vsel %vm1449_vm3, %v12808_v35, %v6660_v44  ;;  %v12868_v36 = vld [vmem:[%s14081_s10 + $0x266] sm:$0x2]  }
 0x33e   : > { %v12852_v38 = vld [vmem:[%s14081_s10 + $0x2d4] sm:$0x8]   ;;  %v6831_v42 = vsel %vm1441_vm1, %v12851_v25, %v6827_v59  ;;  %v12810_v43 = vld [vmem:[%s14081_s10 + $0x1a9] sm:$0x40]   ;;  %v6668_v54 = vsel %vm1453_vm4, %v12809_v4, %v6664_v45  ;;  %v12869_v34 = vld [vmem:[%s14081_s10 + $0x2a5] sm:$0x4]   ;;  %v6897_v59 = vsel %vm1437_vm0, %v12868_v36, %v12867_v31 }
 0x33f   : > { %v12853_v37 = vld [vmem:[%s14081_s10 + $0x313] sm:$0x10]   ;;  %v6835_v40 = vsel %vm1445_vm2, %v12852_v38, %v6831_v42  ;;  %v12811_v32 = vld [vmem:[%s14081_s10 + $0x1e8] sm:$0x80]   ;;  %v6672_v33 = vsel %vm1457_vm5, %v12810_v43, %v6668_v54  ;;  %v12870_v25 = vld [vmem:[%s14081_s10 + $0x2e4] sm:$0x8]   ;;  %v6901_v42 = vsel %vm1441_vm1, %v12869_v34, %v6897_v59  ;;  %v5558_v60 = vpop.permute.xlu0 %5557  }
 0x340   : > { %v12854_v0 = vld [vmem:[%s14081_s10 + $0x352] sm:$0x20]   ;;  %v6839_v58 = vsel %vm1449_vm3, %v12853_v37, %v6835_v40  ;;  %v12876_v52 = vld [vmem:[%s14081_s10 + $0x22f] sm:$0x1]   ;;  %v6676_v16 = vsel %vm1461_vm6, %v12811_v32, %v6672_v33  ;;  %v12871_v38 = vld [vmem:[%s14081_s10 + $0x323] sm:$0x10]   ;;  %v6905_v12 = vsel %vm1445_vm2, %v12870_v25, %v6901_v42 }
 0x341   : > { %v12855_v2 = vld [vmem:[%s14081_s10 + $0x391] sm:$0x40]   ;;  %v6843_v55 = vsel %vm1453_vm4, %v12854_v0, %v6839_v58  ;;  %v12877_v20 = vld [vmem:[%s14081_s10 + $0x26e] sm:$0x2]   ;;  %v12872_v37 = vld [vmem:[%s14081_s10 + $0x362] sm:$0x20]   ;;  %v5628_v41 = vpop.permute.xlu2 %5627   ;;  %v6909_v58 = vsel %vm1449_vm3, %v12871_v38, %v6905_v12 }
 0x342   : > { %v12856_v3 = vld [vmem:[%s14081_s10 + $0x3d0] sm:$0x80]   ;;  %v6847_v27 = vsel %vm1457_vm5, %v12855_v2, %v6843_v55  ;;  %v12878_v63 = vld [vmem:[%s14081_s10 + $0x2ad] sm:$0x4]   ;;  %v6932_v10 = vsel %vm1437_vm0, %v12877_v20, %v12876_v52  ;;  %v12873_v0 = vld [vmem:[%s14081_s10 + $0x3a1] sm:$0x40]   ;;  %v6913_v19 = vsel %vm1453_vm4, %v12872_v37, %v6909_v58 }
 0x343   : > { %v6851_v29 = vsel %vm1461_vm6, %v12856_v3, %v6847_v27  ;;  %v12879_v26 = vld [vmem:[%s14081_s10 + $0x2ec] sm:$0x8]   ;;  %v6936_v23 = vsel %vm1441_vm1, %v12878_v63, %v6932_v10  ;;  %v12874_v2 = vld [vmem:[%s14081_s10 + $0x3e0] sm:$0x80]   ;;  %12506 = vst.msk [vmem:[%s14087_s14 + $0x270] sm:$0xff] %vm1465_vm8, %v5488_v18   ;;  %v6917_v18 = vsel %vm1457_vm5, %v12873_v0, %v6913_v19 }
 0x344   : > { %6852 = vrot.lane.b32.xlu1 %v6851_v29, %s14020_s15  ;;  %v12880_v47 = vld [vmem:[%s14081_s10 + $0x32b] sm:$0x10]   ;;  %v6940_v53 = vsel %vm1445_vm2, %v12879_v26, %v6936_v23  ;;  %6677 = vrot.lane.b32.xlu2 %v6676_v16, %s14020_s15  ;;  %v12831_v3 = vld [vmem:[%s14081_s10 + $0x207] sm:$0x1]   ;;  %v6921_v29 = vsel %vm1461_vm6, %v12874_v2, %v6917_v18 }
 0x345   : > { %v12881_v21 = vld [vmem:[%s14081_s10 + $0x36a] sm:$0x20]   ;;  %v6944_v61 = vsel %vm1449_vm3, %v12880_v47, %v6940_v53  ;;  %v5593_v1 = vpop.permute.xlu1 %5592   ;;  %v6757_v17 = vsel %vm1437_vm0, %v12832_v48, %v12831_v3  ;;  %v12837_v22 = vld [vmem:[%s14081_s10 + $0x381] sm:$0x40]   ;;  %6922 = vrot.lane.b32.xlu0 %v6921_v29, %s14020_s15  ;;  %v12894_v6 = vld [vmem:[%s14081_s10 + $0x23f] sm:$0x1]  }
 0x346   : > { %v12882_v57 = vld [vmem:[%s14081_s10 + $0x3a9] sm:$0x40]   ;;  %v6948_v62 = vsel %vm1453_vm4, %v12881_v21, %v6944_v61  ;;  %v6761_v55 = vsel %vm1441_vm1, %v12833_v49, %v6757_v17  ;;  %v12838_v24 = vld [vmem:[%s14081_s10 + $0x3c0] sm:$0x80]   ;;  %v12895_v52 = vld [vmem:[%s14081_s10 + $0x27e] sm:$0x2]  }
 0x347   : > { %v12883_v7 = vld [vmem:[%s14081_s10 + $0x3e8] sm:$0x80]   ;;  %v6952_v40 = vsel %vm1457_vm5, %v12882_v57, %v6948_v62  ;;  %v6765_v27 = vsel %vm1445_vm2, %v12834_v50, %v6761_v55  ;;  %v12903_v5 = vld [vmem:[%s14081_s10 + $0x407] sm:$0x1]   ;;  %v12896_v20 = vld [vmem:[%s14081_s10 + $0x2bd] sm:$0x4]   ;;  %v7002_v10 = vsel %vm1437_vm0, %v12895_v52, %v12894_v6 }
 0x348   : > { %v6956_v13 = vsel %vm1461_vm6, %v12883_v7, %v6952_v40  ;;  %v12904_v15 = vld [vmem:[%s14081_s10 + $0x446] sm:$0x2]   ;;  %v6769_v30 = vsel %vm1449_vm3, %v12835_v14, %v6765_v27  ;;  %v12897_v63 = vld [vmem:[%s14081_s10 + $0x2fc] sm:$0x8]   ;;  %v7006_v23 = vsel %vm1441_vm1, %v12896_v20, %v7002_v10  ;;  %12542 = vst.msk [vmem:[%s14087_s14 + $0x2f0] sm:$0xff] %vm1465_vm8, %v5628_v41   ;;  %v5663_v41 = vpop.permute.xlu0 %5662  }
 0x349   : > { %v12905_v8 = vld [vmem:[%s14081_s10 + $0x485] sm:$0x4]   ;;  %v7037_v46 = vsel %vm1437_vm0, %v12904_v15, %v12903_v5  ;;  %v6773_v11 = vsel %vm1453_vm4, %v12836_v56, %v6769_v30  ;;  %v12898_v26 = vld [vmem:[%s14081_s10 + $0x33b] sm:$0x10]   ;;  %v5733_v31 = vpop.permute.xlu2 %5732   ;;  %v7010_v36 = vsel %vm1445_vm2, %v12897_v63, %v7006_v23  ;;  %12533 = vst.msk [vmem:[%s14087_s14 + $0x2d0] sm:$0xff] %vm1465_vm8, %v5593_v1  }
 0x34a   : > { %v12906_v9 = vld [vmem:[%s14081_s10 + $0x4c4] sm:$0x8]   ;;  %v7041_v4 = vsel %vm1441_vm1, %v12905_v8, %v7037_v46  ;;  %v6777_v51 = vsel %vm1457_vm5, %v12837_v22, %v6773_v11  ;;  %v12899_v47 = vld [vmem:[%s14081_s10 + $0x37a] sm:$0x20]   ;;  %v7014_v61 = vsel %vm1449_vm3, %v12898_v26, %v7010_v36  ;;  %12524 = vst.msk [vmem:[%s14087_s14 + $0x2b0] sm:$0xff] %vm1465_vm8, %v5558_v60  }
 0x34b   : > { %v12907_v35 = vld [vmem:[%s14081_s10 + $0x503] sm:$0x10]   ;;  %v7045_v44 = vsel %vm1445_vm2, %v12906_v9, %v7041_v4  ;;  %v6781_v39 = vsel %vm1461_vm6, %v12838_v24, %v6777_v51  ;;  %v12900_v21 = vld [vmem:[%s14081_s10 + $0x3b9] sm:$0x40]   ;;  %v7018_v0 = vsel %vm1453_vm4, %v12899_v47, %v7014_v61  ;;  %v12921_v60 = vld [vmem:[%s14081_s10 + $0x417] sm:$0x1]  }
 0x34c   : > { %6957 = vrot.lane.b32.xlu1 %v6956_v13, %s14020_s15  ;;  %v12908_v28 = vld [vmem:[%s14081_s10 + $0x542] sm:$0x20]   ;;  %v7049_v45 = vsel %vm1449_vm3, %v12907_v35, %v7045_v44  ;;  %6782 = vrot.lane.b32.xlu2 %v6781_v39, %s14020_s15  ;;  %v12901_v57 = vld [vmem:[%s14081_s10 + $0x3f8] sm:$0x80]   ;;  %v7022_v1 = vsel %vm1457_vm5, %v12900_v21, %v7018_v0 }
 0x34d   : > { %v12909_v43 = vld [vmem:[%s14081_s10 + $0x581] sm:$0x40]   ;;  %v7053_v54 = vsel %vm1453_vm4, %v12908_v28, %v7049_v45  ;;  %v12858_v7 = vld [vmem:[%s14081_s10 + $0x21f] sm:$0x1]   ;;  %v5698_v33 = vpop.permute.xlu1 %5697   ;;  %v7026_v13 = vsel %vm1461_vm6, %v12901_v57, %v7022_v1  ;;  %v12922_v5 = vld [vmem:[%s14081_s10 + $0x456] sm:$0x2]  }
 0x34e   : > { %v12910_v32 = vld [vmem:[%s14081_s10 + $0x5c0] sm:$0x80]   ;;  %v7057_v53 = vsel %vm1457_vm5, %v12909_v43, %v7053_v54  ;;  %v12859_v34 = vld [vmem:[%s14081_s10 + $0x25e] sm:$0x2]   ;;  %7027 = vrot.lane.b32.xlu0 %v7026_v13, %s14020_s15  ;;  %v12923_v15 = vld [vmem:[%s14081_s10 + $0x495] sm:$0x4]   ;;  %v7107_v46 = vsel %vm1437_vm0, %v12922_v5, %v12921_v60 }
 0x34f   : > { %v12860_v25 = vld [vmem:[%s14081_s10 + $0x29d] sm:$0x4]   ;;  %v7061_v16 = vsel %vm1461_vm6, %v12910_v32, %v7057_v53  ;;  %v6862_v59 = vsel %vm1437_vm0, %v12859_v34, %v12858_v7  ;;  %v12924_v8 = vld [vmem:[%s14081_s10 + $0x4d4] sm:$0x8]   ;;  %v7111_v4 = vsel %vm1441_vm1, %v12923_v15, %v7107_v46  ;;  %12569 = vst.msk [vmem:[%s14087_s14 + $0x350] sm:$0xff] %vm1465_vm8, %v5733_v31  }
 0x350   : > { %v12861_v38 = vld [vmem:[%s14081_s10 + $0x2dc] sm:$0x8]   ;;  %v6866_v62 = vsel %vm1441_vm1, %v12860_v25, %v6862_v59  ;;  %v12925_v9 = vld [vmem:[%s14081_s10 + $0x513] sm:$0x10]   ;;  %v7115_v52 = vsel %vm1445_vm2, %v12924_v8, %v7111_v4  ;;  %12560 = vst.msk [vmem:[%s14087_s14 + $0x330] sm:$0xff] %vm1465_vm8, %v5698_v33  }
 0x351   : > { %v12862_v37 = vld [vmem:[%s14081_s10 + $0x31b] sm:$0x10]   ;;  %v6870_v40 = vsel %vm1445_vm2, %v12861_v38, %v6866_v62  ;;  %v12926_v35 = vld [vmem:[%s14081_s10 + $0x552] sm:$0x20]   ;;  %v7119_v45 = vsel %vm1449_vm3, %v12925_v9, %v7115_v52  ;;  %12551 = vst.msk [vmem:[%s14087_s14 + $0x310] sm:$0xff] %vm1465_vm8, %v5663_v41   ;;  %v5768_v31 = vpop.permute.xlu0 %5767  }
 0x352   : > { %v12863_v42 = vld [vmem:[%s14081_s10 + $0x35a] sm:$0x20]   ;;  %v6874_v58 = vsel %vm1449_vm3, %v12862_v37, %v6870_v40  ;;  %v12927_v28 = vld [vmem:[%s14081_s10 + $0x591] sm:$0x40]   ;;  %v5838_v6 = vpop.permute.xlu2 %5837   ;;  %v7123_v21 = vsel %vm1453_vm4, %v12926_v35, %v7119_v45  ;;  %v12948_v41 = vld [vmem:[%s14081_s10 + $0x42f] sm:$0x1]  }
 0x353   : > { %v12864_v2 = vld [vmem:[%s14081_s10 + $0x399] sm:$0x40]   ;;  %v6878_v55 = vsel %vm1453_vm4, %v12863_v42, %v6874_v58  ;;  %v12928_v43 = vld [vmem:[%s14081_s10 + $0x5d0] sm:$0x80]   ;;  %v7127_v33 = vsel %vm1457_vm5, %v12927_v28, %v7123_v21  ;;  %12596 = vst.msk [vmem:[%s14087_s14 + $0x3b0] sm:$0xff] %vm1465_vm8, %v5838_v6  }
 0x354   : > { %7062 = vrot.lane.b32.xlu1 %v7061_v16, %s14020_s15  ;;  %v12865_v3 = vld [vmem:[%s14081_s10 + $0x3d8] sm:$0x80]   ;;  %v6882_v18 = vsel %vm1457_vm5, %v12864_v2, %v6878_v55  ;;  %v12885_v32 = vld [vmem:[%s14081_s10 + $0x237] sm:$0x1]   ;;  %v7131_v16 = vsel %vm1461_vm6, %v12928_v43, %v7127_v33  ;;  %v12913_v15 = vld [vmem:[%s14081_s10 + $0x44e] sm:$0x2]  }
 0x355   : > { %v12930_v12 = vld [vmem:[%s14081_s10 + $0x41f] sm:$0x1]   ;;  %v6886_v29 = vsel %vm1461_vm6, %v12865_v3, %v6882_v18  ;;  %v12886_v20 = vld [vmem:[%s14081_s10 + $0x276] sm:$0x2]   ;;  %v12914_v8 = vld [vmem:[%s14081_s10 + $0x48d] sm:$0x4]  }
 0x356   : > { %v12931_v48 = vld [vmem:[%s14081_s10 + $0x45e] sm:$0x2]   ;;  %6887 = vrot.lane.b32.xlu2 %v6886_v29, %s14020_s15  ;;  %v5803_v51 = vpop.permute.xlu1 %5802   ;;  %v12887_v63 = vld [vmem:[%s14081_s10 + $0x2b5] sm:$0x4]   ;;  %v6967_v10 = vsel %vm1437_vm0, %v12886_v20, %v12885_v32  ;;  %7132 = vrot.lane.b32.xlu0 %v7131_v16, %s14020_s15 }
 0x357   : > { %v12932_v49 = vld [vmem:[%s14081_s10 + $0x49d] sm:$0x4]   ;;  %v7142_v17 = vsel %vm1437_vm0, %v12931_v48, %v12930_v12  ;;  %v12888_v26 = vld [vmem:[%s14081_s10 + $0x2f4] sm:$0x8]   ;;  %v6971_v54 = vsel %vm1441_vm1, %v12887_v63, %v6967_v10  ;;  %v12949_v12 = vld [vmem:[%s14081_s10 + $0x46e] sm:$0x2]  }
 0x358   : > { %v12933_v50 = vld [vmem:[%s14081_s10 + $0x4dc] sm:$0x8]   ;;  %v7146_v56 = vsel %vm1441_vm1, %v12932_v49, %v7142_v17  ;;  %v12889_v47 = vld [vmem:[%s14081_s10 + $0x333] sm:$0x10]   ;;  %v6975_v53 = vsel %vm1445_vm2, %v12888_v26, %v6971_v54  ;;  %v12950_v48 = vld [vmem:[%s14081_s10 + $0x4ad] sm:$0x4]   ;;  %v7212_v17 = vsel %vm1437_vm0, %v12949_v12, %v12948_v41 }
 0x359   : > { %v12934_v14 = vld [vmem:[%s14081_s10 + $0x51b] sm:$0x10]   ;;  %v7150_v27 = vsel %vm1445_vm2, %v12933_v50, %v7146_v56  ;;  %v12890_v23 = vld [vmem:[%s14081_s10 + $0x372] sm:$0x20]   ;;  %v6979_v61 = vsel %vm1449_vm3, %v12889_v47, %v6975_v53  ;;  %v12951_v49 = vld [vmem:[%s14081_s10 + $0x4ec] sm:$0x8]   ;;  %v7216_v56 = vsel %vm1441_vm1, %v12950_v48, %v7212_v17 }
 0x35a   : > { %v12935_v19 = vld [vmem:[%s14081_s10 + $0x55a] sm:$0x20]   ;;  %v7154_v30 = vsel %vm1449_vm3, %v12934_v14, %v7150_v27  ;;  %v12891_v57 = vld [vmem:[%s14081_s10 + $0x3b1] sm:$0x40]   ;;  %v6983_v62 = vsel %vm1453_vm4, %v12890_v23, %v6979_v61  ;;  %v12952_v50 = vld [vmem:[%s14081_s10 + $0x52b] sm:$0x10]   ;;  %v7220_v5 = vsel %vm1445_vm2, %v12951_v49, %v7216_v56 }
 0x35b   : > { %v12936_v22 = vld [vmem:[%s14081_s10 + $0x599] sm:$0x40]   ;;  %v7158_v11 = vsel %vm1453_vm4, %v12935_v19, %v7154_v30  ;;  %v12892_v7 = vld [vmem:[%s14081_s10 + $0x3f0] sm:$0x80]   ;;  %v6987_v1 = vsel %vm1457_vm5, %v12891_v57, %v6983_v62  ;;  %v12953_v14 = vld [vmem:[%s14081_s10 + $0x56a] sm:$0x20]   ;;  %v7224_v30 = vsel %vm1449_vm3, %v12952_v50, %v7220_v5  ;;  %v5873_v6 = vpop.permute.xlu0 %5872  }
 0x35c   : > { %v12937_v24 = vld [vmem:[%s14081_s10 + $0x5d8] sm:$0x80]   ;;  %v7162_v44 = vsel %vm1457_vm5, %v12936_v22, %v7158_v11  ;;  %v12957_v36 = vld [vmem:[%s14081_s10 + $0x437] sm:$0x1]   ;;  %v6991_v13 = vsel %vm1461_vm6, %v12892_v7, %v6987_v1  ;;  %v12954_v19 = vld [vmem:[%s14081_s10 + $0x5a9] sm:$0x40]   ;;  %v5943_v60 = vpop.permute.xlu2 %5942   ;;  %v7228_v28 = vsel %vm1453_vm4, %v12953_v14, %v7224_v30 }
 0x35d   : > { %v7166_v39 = vsel %vm1461_vm6, %v12937_v24, %v7162_v44  ;;  %v12958_v34 = vld [vmem:[%s14081_s10 + $0x476] sm:$0x2]   ;;  %v12955_v22 = vld [vmem:[%s14081_s10 + $0x5e8] sm:$0x80]   ;;  %12587 = vst.msk [vmem:[%s14087_s14 + $0x390] sm:$0xff] %vm1465_vm8, %v5803_v51   ;;  %v7232_v51 = vsel %vm1457_vm5, %v12954_v19, %v7228_v28 }
 0x35e   : > { %7167 = vrot.lane.b32.xlu1 %v7166_v39, %s14020_s15  ;;  %v12959_v25 = vld [vmem:[%s14081_s10 + $0x4b5] sm:$0x4]   ;;  %v7247_v59 = vsel %vm1437_vm0, %v12958_v34, %v12957_v36  ;;  %6992 = vrot.lane.b32.xlu2 %v6991_v13, %s14020_s15  ;;  %v12912_v24 = vld [vmem:[%s14081_s10 + $0x40f] sm:$0x1]   ;;  %v7236_v39 = vsel %vm1461_vm6, %v12955_v22, %v7232_v51 }
 0x35f   : > { %v12960_v38 = vld [vmem:[%s14081_s10 + $0x4f4] sm:$0x8]   ;;  %v7251_v42 = vsel %vm1441_vm1, %v12959_v25, %v7247_v59  ;;  %12578 = vst.msk [vmem:[%s14087_s14 + $0x370] sm:$0xff] %vm1465_vm8, %v5768_v31   ;;  %v7072_v46 = vsel %vm1437_vm0, %v12913_v15, %v12912_v24  ;;  %v12915_v9 = vld [vmem:[%s14081_s10 + $0x4cc] sm:$0x8]   ;;  %7237 = vrot.lane.b32.xlu0 %v7236_v39, %s14020_s15 }
 0x360   : > { %v12961_v37 = vld [vmem:[%s14081_s10 + $0x533] sm:$0x10]   ;;  %v7255_v40 = vsel %vm1445_vm2, %v12960_v38, %v7251_v42  ;;  %v12916_v35 = vld [vmem:[%s14081_s10 + $0x50b] sm:$0x10]   ;;  %v7076_v11 = vsel %vm1441_vm1, %v12914_v8, %v7072_v46  ;;  %v12975_v31 = vld [vmem:[%s14081_s10 + $0x607] sm:$0x1]  }
 0x361   : > { %v12962_v0 = vld [vmem:[%s14081_s10 + $0x572] sm:$0x20]   ;;  %v7259_v58 = vsel %vm1449_vm3, %v12961_v37, %v7255_v40  ;;  %v5908_v18 = vpop.permute.xlu1 %5907   ;;  %v12917_v4 = vld [vmem:[%s14081_s10 + $0x54a] sm:$0x20]   ;;  %v7080_v44 = vsel %vm1445_vm2, %v12915_v9, %v7076_v11  ;;  %v12976_v36 = vld [vmem:[%s14081_s10 + $0x646] sm:$0x2]  }
 0x362   : > { %v12963_v2 = vld [vmem:[%s14081_s10 + $0x5b1] sm:$0x40]   ;;  %v7263_v55 = vsel %vm1453_vm4, %v12962_v0, %v7259_v58  ;;  %v12918_v43 = vld [vmem:[%s14081_s10 + $0x589] sm:$0x40]   ;;  %v7084_v45 = vsel %vm1449_vm3, %v12916_v35, %v7080_v44  ;;  %v12977_v34 = vld [vmem:[%s14081_s10 + $0x685] sm:$0x4]   ;;  %v7317_v59 = vsel %vm1437_vm0, %v12976_v36, %v12975_v31 }
 0x363   : > { %v12964_v3 = vld [vmem:[%s14081_s10 + $0x5f0] sm:$0x80]   ;;  %v7267_v27 = vsel %vm1457_vm5, %v12963_v2, %v7263_v55  ;;  %v12919_v32 = vld [vmem:[%s14081_s10 + $0x5c8] sm:$0x80]   ;;  %v7088_v54 = vsel %vm1453_vm4, %v12917_v4, %v7084_v45  ;;  %v12978_v25 = vld [vmem:[%s14081_s10 + $0x6c4] sm:$0x8]   ;;  %v7321_v42 = vsel %vm1441_vm1, %v12977_v34, %v7317_v59 }
 0x364   : > { %v7271_v29 = vsel %vm1461_vm6, %v12964_v3, %v7267_v27  ;;  %v12984_v52 = vld [vmem:[%s14081_s10 + $0x60f] sm:$0x1]   ;;  %v7092_v33 = vsel %vm1457_vm5, %v12918_v43, %v7088_v54  ;;  %v12979_v38 = vld [vmem:[%s14081_s10 + $0x703] sm:$0x10]   ;;  %12623 = vst.msk [vmem:[%s14087_s14 + $0x410] sm:$0xff] %vm1465_vm8, %v5943_v60   ;;  %v6048_v41 = vpop.permute.xlu2 %6047   ;;  %v7325_v12 = vsel %vm1445_vm2, %v12978_v25, %v7321_v42 }
 0x365   : > { %v12985_v20 = vld [vmem:[%s14081_s10 + $0x64e] sm:$0x2]   ;;  %v7096_v16 = vsel %vm1461_vm6, %v12919_v32, %v7092_v33  ;;  %v12980_v37 = vld [vmem:[%s14081_s10 + $0x742] sm:$0x20]   ;;  %12614 = vst.msk [vmem:[%s14087_s14 + $0x3f0] sm:$0xff] %vm1465_vm8, %v5908_v18   ;;  %v7329_v58 = vsel %vm1449_vm3, %v12979_v38, %v7325_v12  ;;  %v5978_v60 = vpop.permute.xlu0 %5977  }
 0x366   : > { %7272 = vrot.lane.b32.xlu1 %v7271_v29, %s14020_s15  ;;  %v12986_v63 = vld [vmem:[%s14081_s10 + $0x68d] sm:$0x4]   ;;  %v7352_v10 = vsel %vm1437_vm0, %v12985_v20, %v12984_v52  ;;  %v12981_v0 = vld [vmem:[%s14081_s10 + $0x781] sm:$0x40]   ;;  %7097 = vrot.lane.b32.xlu2 %v7096_v16, %s14020_s15  ;;  %v7333_v19 = vsel %vm1453_vm4, %v12980_v37, %v7329_v58 }
 0x367   : > { %v12987_v26 = vld [vmem:[%s14081_s10 + $0x6cc] sm:$0x8]   ;;  %v7356_v23 = vsel %vm1441_vm1, %v12986_v63, %v7352_v10  ;;  %v12982_v2 = vld [vmem:[%s14081_s10 + $0x7c0] sm:$0x80]   ;;  %12605 = vst.msk [vmem:[%s14087_s14 + $0x3d0] sm:$0xff] %vm1465_vm8, %v5873_v6   ;;  %v7337_v18 = vsel %vm1457_vm5, %v12981_v0, %v7333_v19 }
 0x368   : > { %v12988_v47 = vld [vmem:[%s14081_s10 + $0x70b] sm:$0x10]   ;;  %v7360_v53 = vsel %vm1445_vm2, %v12987_v26, %v7356_v23  ;;  %v12939_v3 = vld [vmem:[%s14081_s10 + $0x427] sm:$0x1]   ;;  %v7341_v29 = vsel %vm1461_vm6, %v12982_v2, %v7337_v18  ;;  %v13002_v6 = vld [vmem:[%s14081_s10 + $0x61f] sm:$0x1]  }
 0x369   : > { %v12989_v21 = vld [vmem:[%s14081_s10 + $0x74a] sm:$0x20]   ;;  %v7364_v61 = vsel %vm1449_vm3, %v12988_v47, %v7360_v53  ;;  %v6013_v1 = vpop.permute.xlu1 %6012   ;;  %v12940_v48 = vld [vmem:[%s14081_s10 + $0x466] sm:$0x2]   ;;  %7342 = vrot.lane.b32.xlu0 %v7341_v29, %s14020_s15  ;;  %v13003_v52 = vld [vmem:[%s14081_s10 + $0x65e] sm:$0x2]  }
 0x36a   : > { %v12990_v57 = vld [vmem:[%s14081_s10 + $0x789] sm:$0x40]   ;;  %v7368_v62 = vsel %vm1453_vm4, %v12989_v21, %v7364_v61  ;;  %v12941_v49 = vld [vmem:[%s14081_s10 + $0x4a5] sm:$0x4]   ;;  %v7177_v17 = vsel %vm1437_vm0, %v12940_v48, %v12939_v3  ;;  %v13004_v20 = vld [vmem:[%s14081_s10 + $0x69d] sm:$0x4]   ;;  %v7422_v10 = vsel %vm1437_vm0, %v13003_v52, %v13002_v6 }
 0x36b   : > { %v12991_v7 = vld [vmem:[%s14081_s10 + $0x7c8] sm:$0x80]   ;;  %v7372_v40 = vsel %vm1457_vm5, %v12990_v57, %v7368_v62  ;;  %v12942_v50 = vld [vmem:[%s14081_s10 + $0x4e4] sm:$0x8]   ;;  %v7181_v55 = vsel %vm1441_vm1, %v12941_v49, %v7177_v17  ;;  %v13005_v63 = vld [vmem:[%s14081_s10 + $0x6dc] sm:$0x8]   ;;  %v7426_v23 = vsel %vm1441_vm1, %v13004_v20, %v7422_v10 }
 0x36c   : > { %v7376_v13 = vsel %vm1461_vm6, %v12991_v7, %v7372_v40  ;;  %v12943_v14 = vld [vmem:[%s14081_s10 + $0x523] sm:$0x10]   ;;  %v7185_v27 = vsel %vm1445_vm2, %v12942_v50, %v7181_v55  ;;  %v13006_v26 = vld [vmem:[%s14081_s10 + $0x71b] sm:$0x10]   ;;  %12650 = vst.msk [vmem:[%s14087_s14 + $0x470] sm:$0xff] %vm1465_vm8, %v6048_v41   ;;  %v7430_v36 = vsel %vm1445_vm2, %v13005_v63, %v7426_v23 }
 0x36d   : > { %v12944_v56 = vld [vmem:[%s14081_s10 + $0x562] sm:$0x20]   ;;  %v7189_v30 = vsel %vm1449_vm3, %v12943_v14, %v7185_v27  ;;  %v13007_v47 = vld [vmem:[%s14081_s10 + $0x75a] sm:$0x20]   ;;  %v6153_v31 = vpop.permute.xlu2 %6152   ;;  %12641 = vst.msk [vmem:[%s14087_s14 + $0x450] sm:$0xff] %vm1465_vm8, %v6013_v1   ;;  %v7434_v61 = vsel %vm1449_vm3, %v13006_v26, %v7430_v36  ;;  %v6083_v41 = vpop.permute.xlu0 %6082  }
 0x36e   : > { %7377 = vrot.lane.b32.xlu1 %v7376_v13, %s14020_s15  ;;  %v12945_v22 = vld [vmem:[%s14081_s10 + $0x5a1] sm:$0x40]   ;;  %v7193_v11 = vsel %vm1453_vm4, %v12944_v56, %v7189_v30  ;;  %v13008_v21 = vld [vmem:[%s14081_s10 + $0x799] sm:$0x40]   ;;  %12632 = vst.msk [vmem:[%s14087_s14 + $0x430] sm:$0xff] %vm1465_vm8, %v5978_v60   ;;  %v7438_v0 = vsel %vm1453_vm4, %v13007_v47, %v7434_v61 }
 0x36f   : > { %v12946_v24 = vld [vmem:[%s14081_s10 + $0x5e0] sm:$0x80]   ;;  %v7197_v51 = vsel %vm1457_vm5, %v12945_v22, %v7193_v11  ;;  %v13009_v57 = vld [vmem:[%s14081_s10 + $0x7d8] sm:$0x80]   ;;  %v7442_v1 = vsel %vm1457_vm5, %v13008_v21, %v7438_v0  ;;  %v13029_v60 = vld [vmem:[%s14081_s10 + $0x637] sm:$0x1]  }
 0x370   : > { %v13011_v5 = vld [vmem:[%s14081_s10 + $0x627] sm:$0x1]   ;;  %v7201_v39 = vsel %vm1461_vm6, %v12946_v24, %v7197_v51  ;;  %v12966_v7 = vld [vmem:[%s14081_s10 + $0x43f] sm:$0x1]   ;;  %v7446_v13 = vsel %vm1461_vm6, %v13009_v57, %v7442_v1  ;;  %12677 = vst.msk [vmem:[%s14087_s14 + $0x4d0] sm:$0xff] %vm1465_vm8, %v6153_v31  }
 0x371   : > { %v13012_v15 = vld [vmem:[%s14081_s10 + $0x666] sm:$0x2]   ;;  %7202 = vrot.lane.b32.xlu2 %v7201_v39, %s14020_s15  ;;  %v12967_v34 = vld [vmem:[%s14081_s10 + $0x47e] sm:$0x2]   ;;  %7447 = vrot.lane.b32.xlu0 %v7446_v13, %s14020_s15 }
 0x372   : > { %v13013_v8 = vld [vmem:[%s14081_s10 + $0x6a5] sm:$0x4]   ;;  %v7457_v46 = vsel %vm1437_vm0, %v13012_v15, %v13011_v5  ;;  %v6118_v33 = vpop.permute.xlu1 %6117   ;;  %v12968_v25 = vld [vmem:[%s14081_s10 + $0x4bd] sm:$0x4]   ;;  %v7282_v59 = vsel %vm1437_vm0, %v12967_v34, %v12966_v7  ;;  %v13030_v5 = vld [vmem:[%s14081_s10 + $0x676] sm:$0x2]  }
 0x373   : > { %v13014_v9 = vld [vmem:[%s14081_s10 + $0x6e4] sm:$0x8]   ;;  %v7461_v4 = vsel %vm1441_vm1, %v13013_v8, %v7457_v46  ;;  %v12969_v38 = vld [vmem:[%s14081_s10 + $0x4fc] sm:$0x8]   ;;  %v7286_v62 = vsel %vm1441_vm1, %v12968_v25, %v7282_v59  ;;  %v13031_v15 = vld [vmem:[%s14081_s10 + $0x6b5] sm:$0x4]   ;;  %v7527_v46 = vsel %vm1437_vm0, %v13030_v5, %v13029_v60 }
 0x374   : > { %v13015_v35 = vld [vmem:[%s14081_s10 + $0x723] sm:$0x10]   ;;  %v7465_v44 = vsel %vm1445_vm2, %v13014_v9, %v7461_v4  ;;  %v12970_v37 = vld [vmem:[%s14081_s10 + $0x53b] sm:$0x10]   ;;  %v7290_v40 = vsel %vm1445_vm2, %v12969_v38, %v7286_v62  ;;  %v13032_v8 = vld [vmem:[%s14081_s10 + $0x6f4] sm:$0x8]   ;;  %v7531_v4 = vsel %vm1441_vm1, %v13031_v15, %v7527_v46 }
 0x375   : > { %v13016_v28 = vld [vmem:[%s14081_s10 + $0x762] sm:$0x20]   ;;  %v7469_v45 = vsel %vm1449_vm3, %v13015_v35, %v7465_v44  ;;  %v12971_v42 = vld [vmem:[%s14081_s10 + $0x57a] sm:$0x20]   ;;  %v7294_v58 = vsel %vm1449_vm3, %v12970_v37, %v7290_v40  ;;  %v13033_v9 = vld [vmem:[%s14081_s10 + $0x733] sm:$0x10]   ;;  %v7535_v52 = vsel %vm1445_vm2, %v13032_v8, %v7531_v4  ;;  %v6188_v31 = vpop.permute.xlu0 %6187  }
 0x376   : > { %v13017_v43 = vld [vmem:[%s14081_s10 + $0x7a1] sm:$0x40]   ;;  %v7473_v54 = vsel %vm1453_vm4, %v13016_v28, %v7469_v45  ;;  %v12972_v2 = vld [vmem:[%s14081_s10 + $0x5b9] sm:$0x40]   ;;  %v7298_v55 = vsel %vm1453_vm4, %v12971_v42, %v7294_v58  ;;  %v13034_v35 = vld [vmem:[%s14081_s10 + $0x772] sm:$0x20]   ;;  %v7539_v45 = vsel %vm1449_vm3, %v13033_v9, %v7535_v52 }
 0x377   : > { %v13018_v32 = vld [vmem:[%s14081_s10 + $0x7e0] sm:$0x80]   ;;  %v7477_v53 = vsel %vm1457_vm5, %v13017_v43, %v7473_v54  ;;  %v12973_v3 = vld [vmem:[%s14081_s10 + $0x5f8] sm:$0x80]   ;;  %v7302_v18 = vsel %vm1457_vm5, %v12972_v2, %v7298_v55  ;;  %v13035_v28 = vld [vmem:[%s14081_s10 + $0x7b1] sm:$0x40]   ;;  %v7543_v21 = vsel %vm1453_vm4, %v13034_v35, %v7539_v45 }
 0x378   : > { %v7481_v16 = vsel %vm1461_vm6, %v13018_v32, %v7477_v53  ;;  %v13038_v12 = vld [vmem:[%s14081_s10 + $0x63f] sm:$0x1]   ;;  %v7306_v29 = vsel %vm1461_vm6, %v12973_v3, %v7302_v18  ;;  %v13036_v43 = vld [vmem:[%s14081_s10 + $0x7f0] sm:$0x80]   ;;  %v6258_v6 = vpop.permute.xlu2 %6257   ;;  %12668 = vst.msk [vmem:[%s14087_s14 + $0x4b0] sm:$0xff] %vm1465_vm8, %v6118_v33   ;;  %v7547_v33 = vsel %vm1457_vm5, %v13035_v28, %v7543_v21 }
 0x379   : > { %7482 = vrot.lane.b32.xlu1 %v7481_v16, %s14020_s15  ;;  %v13039_v48 = vld [vmem:[%s14081_s10 + $0x67e] sm:$0x2]   ;;  %7307 = vrot.lane.b32.xlu2 %v7306_v29, %s14020_s15  ;;  %v12993_v32 = vld [vmem:[%s14081_s10 + $0x617] sm:$0x1]   ;;  %v7551_v16 = vsel %vm1461_vm6, %v13036_v43, %v7547_v33 }
 0x37a   : > { %v13040_v49 = vld [vmem:[%s14081_s10 + $0x6bd] sm:$0x4]   ;;  %v7562_v17 = vsel %vm1437_vm0, %v13039_v48, %v13038_v12  ;;  %v12994_v20 = vld [vmem:[%s14081_s10 + $0x656] sm:$0x2]   ;;  %12659 = vst.msk [vmem:[%s14087_s14 + $0x490] sm:$0xff] %vm1465_vm8, %v6083_v41   ;;  %7552 = vrot.lane.b32.xlu0 %v7551_v16, %s14020_s15 }
 0x37b   : > { %v13041_v50 = vld [vmem:[%s14081_s10 + $0x6fc] sm:$0x8]   ;;  %v7566_v56 = vsel %vm1441_vm1, %v13040_v49, %v7562_v17  ;;  %v12995_v63 = vld [vmem:[%s14081_s10 + $0x695] sm:$0x4]   ;;  %v7387_v10 = vsel %vm1437_vm0, %v12994_v20, %v12993_v32  ;;  %v13056_v41 = vld [vmem:[%s14081_s10 + $0x80f] sm:$0x1]  }
 0x37c   : > { %v13042_v14 = vld [vmem:[%s14081_s10 + $0x73b] sm:$0x10]   ;;  %v7570_v27 = vsel %vm1445_vm2, %v13041_v50, %v7566_v56  ;;  %v6223_v51 = vpop.permute.xlu1 %6222   ;;  %v12996_v26 = vld [vmem:[%s14081_s10 + $0x6d4] sm:$0x8]   ;;  %v7391_v54 = vsel %vm1441_vm1, %v12995_v63, %v7387_v10  ;;  %v13057_v12 = vld [vmem:[%s14081_s10 + $0x84e] sm:$0x2]  }
 0x37d   : > { %v13043_v19 = vld [vmem:[%s14081_s10 + $0x77a] sm:$0x20]   ;;  %v7574_v30 = vsel %vm1449_vm3, %v13042_v14, %v7570_v27  ;;  %v12997_v47 = vld [vmem:[%s14081_s10 + $0x713] sm:$0x10]   ;;  %v7395_v53 = vsel %vm1445_vm2, %v12996_v26, %v7391_v54  ;;  %v13058_v48 = vld [vmem:[%s14081_s10 + $0x88d] sm:$0x4]   ;;  %v7632_v17 = vsel %vm1437_vm0, %v13057_v12, %v13056_v41 }
 0x37e   : > { %v13044_v22 = vld [vmem:[%s14081_s10 + $0x7b9] sm:$0x40]   ;;  %v7578_v11 = vsel %vm1453_vm4, %v13043_v19, %v7574_v30  ;;  %v12998_v23 = vld [vmem:[%s14081_s10 + $0x752] sm:$0x20]   ;;  %v7399_v61 = vsel %vm1449_vm3, %v12997_v47, %v7395_v53  ;;  %v13059_v49 = vld [vmem:[%s14081_s10 + $0x8cc] sm:$0x8]   ;;  %v7636_v56 = vsel %vm1441_vm1, %v13058_v48, %v7632_v17 }
 0x37f   : > { %v13045_v24 = vld [vmem:[%s14081_s10 + $0x7f8] sm:$0x80]   ;;  %v7582_v44 = vsel %vm1457_vm5, %v13044_v22, %v7578_v11  ;;  %v12999_v57 = vld [vmem:[%s14081_s10 + $0x791] sm:$0x40]   ;;  %v7403_v62 = vsel %vm1453_vm4, %v12998_v23, %v7399_v61  ;;  %v13060_v50 = vld [vmem:[%s14081_s10 + $0x90b] sm:$0x10]   ;;  %v7640_v5 = vsel %vm1445_vm2, %v13059_v49, %v7636_v56 }
 0x380   : > { %v7586_v39 = vsel %vm1461_vm6, %v13045_v24, %v7582_v44  ;;  %v13000_v7 = vld [vmem:[%s14081_s10 + $0x7d0] sm:$0x80]   ;;  %v7407_v1 = vsel %vm1457_vm5, %v12999_v57, %v7403_v62  ;;  %v13061_v14 = vld [vmem:[%s14081_s10 + $0x94a] sm:$0x20]   ;;  %12704 = vst.msk [vmem:[%s14087_s14 + $0x530] sm:$0xff] %vm1465_vm8, %v6258_v6   ;;  %v6363_v60 = vpop.permute.xlu2 %6362   ;;  %v7644_v30 = vsel %vm1449_vm3, %v13060_v50, %v7640_v5  ;;  %v6293_v6 = vpop.permute.xlu0 %6292  }
 0x381   : > { %7587 = vrot.lane.b32.xlu1 %v7586_v39, %s14020_s15  ;;  %v13065_v36 = vld [vmem:[%s14081_s10 + $0x817] sm:$0x1]   ;;  %v7411_v13 = vsel %vm1461_vm6, %v13000_v7, %v7407_v1  ;;  %v13062_v19 = vld [vmem:[%s14081_s10 + $0x989] sm:$0x40]   ;;  %12695 = vst.msk [vmem:[%s14087_s14 + $0x510] sm:$0xff] %vm1465_vm8, %v6223_v51   ;;  %v7648_v28 = vsel %vm1453_vm4, %v13061_v14, %v7644_v30 }
 0x382   : > { %v13066_v34 = vld [vmem:[%s14081_s10 + $0x856] sm:$0x2]   ;;  %7412 = vrot.lane.b32.xlu2 %v7411_v13, %s14020_s15  ;;  %v13063_v22 = vld [vmem:[%s14081_s10 + $0x9c8] sm:$0x80]   ;;  %12686 = vst.msk [vmem:[%s14087_s14 + $0x4f0] sm:$0xff] %vm1465_vm8, %v6188_v31   ;;  %v7652_v51 = vsel %vm1457_vm5, %v13062_v19, %v7648_v28 }
 0x383   : > { %v13067_v25 = vld [vmem:[%s14081_s10 + $0x895] sm:$0x4]   ;;  %v7667_v59 = vsel %vm1437_vm0, %v13066_v34, %v13065_v36  ;;  %v13020_v24 = vld [vmem:[%s14081_s10 + $0x62f] sm:$0x1]   ;;  %v7656_v39 = vsel %vm1461_vm6, %v13063_v22, %v7652_v51  ;;  %v13083_v31 = vld [vmem:[%s14081_s10 + $0x827] sm:$0x1]  }
 0x384   : > { %v13068_v38 = vld [vmem:[%s14081_s10 + $0x8d4] sm:$0x8]   ;;  %v7671_v42 = vsel %vm1441_vm1, %v13067_v25, %v7667_v59  ;;  %v6328_v18 = vpop.permute.xlu1 %6327   ;;  %v13021_v15 = vld [vmem:[%s14081_s10 + $0x66e] sm:$0x2]   ;;  %7657 = vrot.lane.b32.xlu0 %v7656_v39, %s14020_s15  ;;  %v13084_v36 = vld [vmem:[%s14081_s10 + $0x866] sm:$0x2]  }
 0x385   : > { %v13069_v37 = vld [vmem:[%s14081_s10 + $0x913] sm:$0x10]   ;;  %v7675_v40 = vsel %vm1445_vm2, %v13068_v38, %v7671_v42  ;;  %v13022_v8 = vld [vmem:[%s14081_s10 + $0x6ad] sm:$0x4]   ;;  %v7492_v46 = vsel %vm1437_vm0, %v13021_v15, %v13020_v24  ;;  %v13085_v34 = vld [vmem:[%s14081_s10 + $0x8a5] sm:$0x4]   ;;  %v7737_v59 = vsel %vm1437_vm0, %v13084_v36, %v13083_v31 }
 0x386   : > { %v13070_v0 = vld [vmem:[%s14081_s10 + $0x952] sm:$0x20]   ;;  %v7679_v58 = vsel %vm1449_vm3, %v13069_v37, %v7675_v40  ;;  %v13023_v9 = vld [vmem:[%s14081_s10 + $0x6ec] sm:$0x8]   ;;  %v7496_v11 = vsel %vm1441_vm1, %v13022_v8, %v7492_v46  ;;  %v13086_v25 = vld [vmem:[%s14081_s10 + $0x8e4] sm:$0x8]   ;;  %v7741_v42 = vsel %vm1441_vm1, %v13085_v34, %v7737_v59 }
 0x387   : > { %v13071_v2 = vld [vmem:[%s14081_s10 + $0x991] sm:$0x40]   ;;  %v7683_v55 = vsel %vm1453_vm4, %v13070_v0, %v7679_v58  ;;  %v13024_v35 = vld [vmem:[%s14081_s10 + $0x72b] sm:$0x10]   ;;  %v7500_v44 = vsel %vm1445_vm2, %v13023_v9, %v7496_v11  ;;  %v13087_v38 = vld [vmem:[%s14081_s10 + $0x923] sm:$0x10]   ;;  %v7745_v12 = vsel %vm1445_vm2, %v13086_v25, %v7741_v42 }
 0x388   : > { %v13072_v3 = vld [vmem:[%s14081_s10 + $0x9d0] sm:$0x80]   ;;  %v7687_v27 = vsel %vm1457_vm5, %v13071_v2, %v7683_v55  ;;  %v13025_v4 = vld [vmem:[%s14081_s10 + $0x76a] sm:$0x20]   ;;  %v7504_v45 = vsel %vm1449_vm3, %v13024_v35, %v7500_v44  ;;  %v13088_v37 = vld [vmem:[%s14081_s10 + $0x962] sm:$0x20]   ;;  %v7749_v58 = vsel %vm1449_vm3, %v13087_v38, %v7745_v12 }
 0x389   : > { %v7691_v29 = vsel %vm1461_vm6, %v13072_v3, %v7687_v27  ;;  %v13026_v43 = vld [vmem:[%s14081_s10 + $0x7a9] sm:$0x40]   ;;  %v7508_v54 = vsel %vm1453_vm4, %v13025_v4, %v7504_v45  ;;  %v13089_v0 = vld [vmem:[%s14081_s10 + $0x9a1] sm:$0x40]   ;;  %12731 = vst.msk [vmem:[%s14087_s14 + $0x590] sm:$0xff] %vm1465_vm8, %v6363_v60   ;;  %v6468_v41 = vpop.permute.xlu2 %6467   ;;  %v7753_v19 = vsel %vm1453_vm4, %v13088_v37, %v7749_v58  ;;  %v6398_v60 = vpop.permute.xlu0 %6397  }
 0x38a   : > { %7692 = vrot.lane.b32.xlu1 %v7691_v29, %s14020_s15  ;;  %v13027_v32 = vld [vmem:[%s14081_s10 + $0x7e8] sm:$0x80]   ;;  %v7512_v33 = vsel %vm1457_vm5, %v13026_v43, %v7508_v54  ;;  %v13090_v2 = vld [vmem:[%s14081_s10 + $0x9e0] sm:$0x80]   ;;  %12722 = vst.msk [vmem:[%s14087_s14 + $0x570] sm:$0xff] %vm1465_vm8, %v6328_v18   ;;  %v7757_v18 = vsel %vm1457_vm5, %v13089_v0, %v7753_v19 }
 0x38b   : > { %v13092_v52 = vld [vmem:[%s14081_s10 + $0x82f] sm:$0x1]   ;;  %v7516_v16 = vsel %vm1461_vm6, %v13027_v32, %v7512_v33  ;;  %v13047_v3 = vld [vmem:[%s14081_s10 + $0x807] sm:$0x1]   ;;  %12713 = vst.msk [vmem:[%s14087_s14 + $0x550] sm:$0xff] %vm1465_vm8, %v6293_v6   ;;  %v7761_v29 = vsel %vm1461_vm6, %v13090_v2, %v7757_v18 }
 0x38c   : > { %v13093_v20 = vld [vmem:[%s14081_s10 + $0x86e] sm:$0x2]   ;;  %7517 = vrot.lane.b32.xlu2 %v7516_v16, %s14020_s15  ;;  %v13048_v48 = vld [vmem:[%s14081_s10 + $0x846] sm:$0x2]   ;;  %7762 = vrot.lane.b32.xlu0 %v7761_v29, %s14020_s15 }
 0x38d   : > { %v13094_v63 = vld [vmem:[%s14081_s10 + $0x8ad] sm:$0x4]   ;;  %v7772_v10 = vsel %vm1437_vm0, %v13093_v20, %v13092_v52  ;;  %v6433_v1 = vpop.permute.xlu1 %6432   ;;  %v13049_v49 = vld [vmem:[%s14081_s10 + $0x885] sm:$0x4]   ;;  %v7597_v17 = vsel %vm1437_vm0, %v13048_v48, %v13047_v3  ;;  %v13110_v6 = vld [vmem:[%s14081_s10 + $0x83f] sm:$0x1]  }
 0x38e   : > { %v13095_v26 = vld [vmem:[%s14081_s10 + $0x8ec] sm:$0x8]   ;;  %v7776_v23 = vsel %vm1441_vm1, %v13094_v63, %v7772_v10  ;;  %v13050_v50 = vld [vmem:[%s14081_s10 + $0x8c4] sm:$0x8]   ;;  %v7601_v55 = vsel %vm1441_vm1, %v13049_v49, %v7597_v17  ;;  %v13111_v52 = vld [vmem:[%s14081_s10 + $0x87e] sm:$0x2]  }
 0x38f   : > { %v13096_v47 = vld [vmem:[%s14081_s10 + $0x92b] sm:$0x10]   ;;  %v7780_v53 = vsel %vm1445_vm2, %v13095_v26, %v7776_v23  ;;  %v13051_v14 = vld [vmem:[%s14081_s10 + $0x903] sm:$0x10]   ;;  %v7605_v27 = vsel %vm1445_vm2, %v13050_v50, %v7601_v55  ;;  %v13112_v20 = vld [vmem:[%s14081_s10 + $0x8bd] sm:$0x4]   ;;  %v7842_v10 = vsel %vm1437_vm0, %v13111_v52, %v13110_v6 }
 0x390   : > { %v13097_v21 = vld [vmem:[%s14081_s10 + $0x96a] sm:$0x20]   ;;  %v7784_v61 = vsel %vm1449_vm3, %v13096_v47, %v7780_v53  ;;  %v13052_v56 = vld [vmem:[%s14081_s10 + $0x942] sm:$0x20]   ;;  %v7609_v30 = vsel %vm1449_vm3, %v13051_v14, %v7605_v27  ;;  %v13113_v63 = vld [vmem:[%s14081_s10 + $0x8fc] sm:$0x8]   ;;  %v7846_v23 = vsel %vm1441_vm1, %v13112_v20, %v7842_v10 }
 0x391   : > { %v13098_v57 = vld [vmem:[%s14081_s10 + $0x9a9] sm:$0x40]   ;;  %v7788_v62 = vsel %vm1453_vm4, %v13097_v21, %v7784_v61  ;;  %v13053_v22 = vld [vmem:[%s14081_s10 + $0x981] sm:$0x40]   ;;  %v7613_v11 = vsel %vm1453_vm4, %v13052_v56, %v7609_v30  ;;  %v13114_v26 = vld [vmem:[%s14081_s10 + $0x93b] sm:$0x10]   ;;  %v7850_v36 = vsel %vm1445_vm2, %v13113_v63, %v7846_v23 }
 0x392   : > { %v13099_v7 = vld [vmem:[%s14081_s10 + $0x9e8] sm:$0x80]   ;;  %v7792_v40 = vsel %vm1457_vm5, %v13098_v57, %v7788_v62  ;;  %v13054_v24 = vld [vmem:[%s14081_s10 + $0x9c0] sm:$0x80]   ;;  %v7617_v51 = vsel %vm1457_vm5, %v13053_v22, %v7613_v11  ;;  %v13115_v47 = vld [vmem:[%s14081_s10 + $0x97a] sm:$0x20]   ;;  %v7854_v61 = vsel %vm1449_vm3, %v13114_v26, %v7850_v36 }
 0x393   : > { %v7796_v13 = vsel %vm1461_vm6, %v13099_v7, %v7792_v40  ;;  %v13119_v5 = vld [vmem:[%s14081_s10 + $0xa07] sm:$0x1]   ;;  %v7621_v39 = vsel %vm1461_vm6, %v13054_v24, %v7617_v51  ;;  %v13116_v21 = vld [vmem:[%s14081_s10 + $0x9b9] sm:$0x40]   ;;  %12758 = vst.msk [vmem:[%s14087_s14 + $0x5f0] sm:$0xff] %vm1465_vm8, %v6468_v41   ;;  %v7858_v0 = vsel %vm1453_vm4, %v13115_v47, %v7854_v61 }
 0x394   : > { %7797 = vrot.lane.b32.xlu1 %v7796_v13, %s14020_s15  ;;  %v13120_v15 = vld [vmem:[%s14081_s10 + $0xa46] sm:$0x2]   ;;  %7622 = vrot.lane.b32.xlu2 %v7621_v39, %s14020_s15  ;;  %v13117_v57 = vld [vmem:[%s14081_s10 + $0x9f8] sm:$0x80]  }
 0x395   : > { %v13121_v8 = vld [vmem:[%s14081_s10 + $0xa85] sm:$0x4]   ;;  %v7877_v46 = vsel %vm1437_vm0, %v13120_v15, %v13119_v5  ;;  %v13074_v7 = vld [vmem:[%s14081_s10 + $0x81f] sm:$0x1]   ;;  %v6538_v33 = vpop.permute.xlu1 %6537   ;;  %12749 = vst.msk [vmem:[%s14087_s14 + $0x5d0] sm:$0xff] %vm1465_vm8, %v6433_v1   ;;  %v6503_v41 = vpop.permute.xlu0 %6502   ;;  %v7862_v1 = vsel %vm1457_vm5, %v13116_v21, %v7858_v0 }
 0x396   : > { %v13122_v9 = vld [vmem:[%s14081_s10 + $0xac4] sm:$0x8]   ;;  %v7881_v4 = vsel %vm1441_vm1, %v13121_v8, %v7877_v46  ;;  %v6573_v31 = vpop.permute.xlu2 %6572   ;;  %v13075_v34 = vld [vmem:[%s14081_s10 + $0x85e] sm:$0x2]   ;;  %12740 = vst.msk [vmem:[%s14087_s14 + $0x5b0] sm:$0xff] %vm1465_vm8, %v6398_v60   ;;  %v7866_v13 = vsel %vm1461_vm6, %v13117_v57, %v7862_v1 }
 0x397   : > { %v13123_v35 = vld [vmem:[%s14081_s10 + $0xb03] sm:$0x10]   ;;  %v7885_v44 = vsel %vm1445_vm2, %v13122_v9, %v7881_v4  ;;  %v13076_v25 = vld [vmem:[%s14081_s10 + $0x89d] sm:$0x4]   ;;  %v7702_v59 = vsel %vm1437_vm0, %v13075_v34, %v13074_v7  ;;  %7867 = vrot.lane.b32.xlu0 %v7866_v13, %s14020_s15  ;;  %v13137_v60 = vld [vmem:[%s14081_s10 + $0xa17] sm:$0x1]  }
 0x398   : > { %v13124_v28 = vld [vmem:[%s14081_s10 + $0xb42] sm:$0x20]   ;;  %v7889_v45 = vsel %vm1449_vm3, %v13123_v35, %v7885_v44  ;;  %v13077_v38 = vld [vmem:[%s14081_s10 + $0x8dc] sm:$0x8]   ;;  %v7706_v62 = vsel %vm1441_vm1, %v13076_v25, %v7702_v59  ;;  %v13138_v5 = vld [vmem:[%s14081_s10 + $0xa56] sm:$0x2]  }
 0x399   : > { %v13125_v43 = vld [vmem:[%s14081_s10 + $0xb81] sm:$0x40]   ;;  %v7893_v54 = vsel %vm1453_vm4, %v13124_v28, %v7889_v45  ;;  %v13078_v37 = vld [vmem:[%s14081_s10 + $0x91b] sm:$0x10]   ;;  %v7710_v40 = vsel %vm1445_vm2, %v13077_v38, %v7706_v62  ;;  %v13139_v15 = vld [vmem:[%s14081_s10 + $0xa95] sm:$0x4]   ;;  %v7947_v46 = vsel %vm1437_vm0, %v13138_v5, %v13137_v60 }
 0x39a   : > { %v13126_v32 = vld [vmem:[%s14081_s10 + $0xbc0] sm:$0x80]   ;;  %v7897_v53 = vsel %vm1457_vm5, %v13125_v43, %v7893_v54  ;;  %v13079_v42 = vld [vmem:[%s14081_s10 + $0x95a] sm:$0x20]   ;;  %v7714_v58 = vsel %vm1449_vm3, %v13078_v37, %v7710_v40  ;;  %v13140_v8 = vld [vmem:[%s14081_s10 + $0xad4] sm:$0x8]   ;;  %v7951_v4 = vsel %vm1441_vm1, %v13139_v15, %v7947_v46 }
 0x39b   : > { %v7901_v16 = vsel %vm1461_vm6, %v13126_v32, %v7897_v53  ;;  %v13080_v2 = vld [vmem:[%s14081_s10 + $0x999] sm:$0x40]   ;;  %v7718_v55 = vsel %vm1453_vm4, %v13079_v42, %v7714_v58  ;;  %v13141_v9 = vld [vmem:[%s14081_s10 + $0xb13] sm:$0x10]   ;;  %12785 = vst.msk [vmem:[%s14087_s14 + $0x58] sm:$0xff] %vm1465_vm8, %v6573_v31   ;;  %v7955_v52 = vsel %vm1445_vm2, %v13140_v8, %v7951_v4 }
 0x39c   : > { %7902 = vrot.lane.b32.xlu1 %v7901_v16, %s14020_s15  ;;  %v13081_v3 = vld [vmem:[%s14081_s10 + $0x9d8] sm:$0x80]   ;;  %v7722_v18 = vsel %vm1457_vm5, %v13080_v2, %v7718_v55  ;;  %v13142_v35 = vld [vmem:[%s14081_s10 + $0xb52] sm:$0x20]   ;;  %12776 = vst.msk [vmem:[%s14087_s14 + $0x38] sm:$0xff] %vm1465_vm8, %v6538_v33   ;;  %v7959_v45 = vsel %vm1449_vm3, %v13141_v9, %v7955_v52 }
 0x39d   : > { %v13146_v12 = vld [vmem:[%s14081_s10 + $0xa1f] sm:$0x1]   ;;  %v7726_v29 = vsel %vm1461_vm6, %v13081_v3, %v7722_v18  ;;  %v13143_v28 = vld [vmem:[%s14081_s10 + $0xb91] sm:$0x40]   ;;  %v6643_v51 = vpop.permute.xlu1 %6642   ;;  %12767 = vst.msk [vmem:[%s14087_s14 + $0x18] sm:$0xff] %vm1465_vm8, %v6503_v41   ;;  %v7963_v21 = vsel %vm1453_vm4, %v13142_v35, %v7959_v45  ;;  %v6608_v31 = vpop.permute.xlu0 %6607  }
 0x39e   : > { %v13147_v48 = vld [vmem:[%s14081_s10 + $0xa5e] sm:$0x2]   ;;  %7727 = vrot.lane.b32.xlu2 %v7726_v29, %s14020_s15  ;;  %v13144_v43 = vld [vmem:[%s14081_s10 + $0xbd0] sm:$0x80]   ;;  %v6678_v6 = vpop.permute.xlu2 %6677   ;;  %v7967_v33 = vsel %vm1457_vm5, %v13143_v28, %v7963_v21  ;;  %v13164_v41 = vld [vmem:[%s14081_s10 + $0xa2f] sm:$0x1]  }
 0x39f   : > { %v13148_v49 = vld [vmem:[%s14081_s10 + $0xa9d] sm:$0x4]   ;;  %v7982_v17 = vsel %vm1437_vm0, %v13147_v48, %v13146_v12  ;;  %v13101_v32 = vld [vmem:[%s14081_s10 + $0x837] sm:$0x1]   ;;  %v7971_v16 = vsel %vm1461_vm6, %v13144_v43, %v7967_v33  ;;  %v13165_v12 = vld [vmem:[%s14081_s10 + $0xa6e] sm:$0x2]  }
 0x3a0   : > { %v13149_v50 = vld [vmem:[%s14081_s10 + $0xadc] sm:$0x8]   ;;  %v7986_v56 = vsel %vm1441_vm1, %v13148_v49, %v7982_v17  ;;  %v13102_v20 = vld [vmem:[%s14081_s10 + $0x876] sm:$0x2]   ;;  %7972 = vrot.lane.b32.xlu0 %v7971_v16, %s14020_s15  ;;  %v13166_v48 = vld [vmem:[%s14081_s10 + $0xaad] sm:$0x4]   ;;  %v8052_v17 = vsel %vm1437_vm0, %v13165_v12, %v13164_v41 }
 0x3a1   : > { %v13150_v14 = vld [vmem:[%s14081_s10 + $0xb1b] sm:$0x10]   ;;  %v7990_v27 = vsel %vm1445_vm2, %v13149_v50, %v7986_v56  ;;  %v13103_v63 = vld [vmem:[%s14081_s10 + $0x8b5] sm:$0x4]   ;;  %v7807_v10 = vsel %vm1437_vm0, %v13102_v20, %v13101_v32  ;;  %v13167_v49 = vld [vmem:[%s14081_s10 + $0xaec] sm:$0x8]   ;;  %v8056_v56 = vsel %vm1441_vm1, %v13166_v48, %v8052_v17 }
 0x3a2   : > { %v13151_v19 = vld [vmem:[%s14081_s10 + $0xb5a] sm:$0x20]   ;;  %v7994_v30 = vsel %vm1449_vm3, %v13150_v14, %v7990_v27  ;;  %v13104_v26 = vld [vmem:[%s14081_s10 + $0x8f4] sm:$0x8]   ;;  %v7811_v54 = vsel %vm1441_vm1, %v13103_v63, %v7807_v10  ;;  %v13168_v50 = vld [vmem:[%s14081_s10 + $0xb2b] sm:$0x10]   ;;  %v8060_v5 = vsel %vm1445_vm2, %v13167_v49, %v8056_v56 }
 0x3a3   : > { %v13152_v22 = vld [vmem:[%s14081_s10 + $0xb99] sm:$0x40]   ;;  %v7998_v11 = vsel %vm1453_vm4, %v13151_v19, %v7994_v30  ;;  %v13105_v47 = vld [vmem:[%s14081_s10 + $0x933] sm:$0x10]   ;;  %v7815_v53 = vsel %vm1445_vm2, %v13104_v26, %v7811_v54  ;;  %v13169_v14 = vld [vmem:[%s14081_s10 + $0xb6a] sm:$0x20]   ;;  %v8064_v30 = vsel %vm1449_vm3, %v13168_v50, %v8060_v5 }
 0x3a4   : > { %v13153_v24 = vld [vmem:[%s14081_s10 + $0xbd8] sm:$0x80]   ;;  %v8002_v44 = vsel %vm1457_vm5, %v13152_v22, %v7998_v11  ;;  %v13106_v23 = vld [vmem:[%s14081_s10 + $0x972] sm:$0x20]   ;;  %v7819_v61 = vsel %vm1449_vm3, %v13105_v47, %v7815_v53  ;;  %v13170_v19 = vld [vmem:[%s14081_s10 + $0xba9] sm:$0x40]   ;;  %v8068_v28 = vsel %vm1453_vm4, %v13169_v14, %v8064_v30 }
 0x3a5   : > { %v8006_v39 = vsel %vm1461_vm6, %v13153_v24, %v8002_v44  ;;  %v13107_v57 = vld [vmem:[%s14081_s10 + $0x9b1] sm:$0x40]   ;;  %v7823_v62 = vsel %vm1453_vm4, %v13106_v23, %v7819_v61  ;;  %v13171_v22 = vld [vmem:[%s14081_s10 + $0xbe8] sm:$0x80]   ;;  %12812 = vst.msk [vmem:[%s14087_s14 + $0xb8] sm:$0xff] %vm1465_vm8, %v6678_v6   ;;  %v6748_v18 = vpop.permute.xlu1 %6747  }
 0x3a6   : > { %8007 = vrot.lane.b32.xlu1 %v8006_v39, %s14020_s15  ;;  %v13108_v7 = vld [vmem:[%s14081_s10 + $0x9f0] sm:$0x80]   ;;  %v7827_v1 = vsel %vm1457_vm5, %v13107_v57, %v7823_v62  ;;  %v13128_v24 = vld [vmem:[%s14081_s10 + $0xa0f] sm:$0x1]   ;;  %v6783_v60 = vpop.permute.xlu2 %6782   ;;  %12803 = vst.msk [vmem:[%s14087_s14 + $0x98] sm:$0xff] %vm1465_vm8, %v6643_v51   ;;  %v6713_v6 = vpop.permute.xlu0 %6712   ;;  %v8072_v51 = vsel %vm1457_vm5, %v13170_v19, %v8068_v28 }
 0x3a7   : > { %v13173_v36 = vld [vmem:[%s14081_s10 + $0xa37] sm:$0x1]   ;;  %v7831_v13 = vsel %vm1461_vm6, %v13108_v7, %v7827_v1  ;;  %v13129_v15 = vld [vmem:[%s14081_s10 + $0xa4e] sm:$0x2]   ;;  %12794 = vst.msk [vmem:[%s14087_s14 + $0x78] sm:$0xff] %vm1465_vm8, %v6608_v31   ;;  %v8076_v63 = vsel %vm1461_vm6, %v13171_v22, %v8072_v51 }
 0x3a8   : > { %v13174_v34 = vld [vmem:[%s14081_s10 + $0xa76] sm:$0x2]   ;;  %7832 = vrot.lane.b32.xlu2 %v7831_v13, %s14020_s15  ;;  %v13130_v8 = vld [vmem:[%s14081_s10 + $0xa8d] sm:$0x4]   ;;  %v7912_v46 = vsel %vm1437_vm0, %v13129_v15, %v13128_v24  ;;  %12839 = vst.msk [vmem:[%s14087_s14 + $0x118] sm:$0xff] %vm1465_vm8, %v6783_v60  }
 0x3a9   : > { %v13175_v25 = vld [vmem:[%s14081_s10 + $0xab5] sm:$0x4]   ;;  %v8087_v59 = vsel %vm1437_vm0, %v13174_v34, %v13173_v36  ;;  %v13131_v9 = vld [vmem:[%s14081_s10 + $0xacc] sm:$0x8]   ;;  %v7916_v11 = vsel %vm1441_vm1, %v13130_v8, %v7912_v46  ;;  %v13155_v52 = vld [vmem:[%s14081_s10 + $0xa27] sm:$0x1]   ;;  %8077 = vrot.lane.b32.xlu0 %v8076_v63, %s14020_s15 }
 0x3aa   : > { %v13176_v38 = vld [vmem:[%s14081_s10 + $0xaf4] sm:$0x8]   ;;  %v8091_v42 = vsel %vm1441_vm1, %v13175_v25, %v8087_v59  ;;  %v13132_v35 = vld [vmem:[%s14081_s10 + $0xb0b] sm:$0x10]   ;;  %v7920_v44 = vsel %vm1445_vm2, %v13131_v9, %v7916_v11  ;;  %v13156_v20 = vld [vmem:[%s14081_s10 + $0xa66] sm:$0x2]  }
 0x3ab   : > { %v13177_v37 = vld [vmem:[%s14081_s10 + $0xb33] sm:$0x10]   ;;  %v8095_v40 = vsel %vm1445_vm2, %v13176_v38, %v8091_v42  ;;  %v13133_v4 = vld [vmem:[%s14081_s10 + $0xb4a] sm:$0x20]   ;;  %v7924_v39 = vsel %vm1449_vm3, %v13132_v35, %v7920_v44  ;;  %12830 = vst.msk [vmem:[%s14087_s14 + $0xf8] sm:$0xff] %vm1465_vm8, %v6748_v18   ;;  %v8017_v45 = vsel %vm1437_vm0, %v13156_v20, %v13155_v52 }
 0x3ac   : > { %v13178_v0 = vld [vmem:[%s14081_s10 + $0xb72] sm:$0x20]   ;;  %v8099_v58 = vsel %vm1449_vm3, %v13177_v37, %v8095_v40  ;;  %v13134_v43 = vld [vmem:[%s14081_s10 + $0xb89] sm:$0x40]   ;;  %v13157_v10 = vld [vmem:[%s14081_s10 + $0xaa5] sm:$0x4]   ;;  %v7928_v47 = vsel %vm1453_vm4, %v13133_v4, %v7924_v39 }
 0x3ad   : > { %v13179_v2 = vld [vmem:[%s14081_s10 + $0xbb1] sm:$0x40]   ;;  %v8103_v55 = vsel %vm1453_vm4, %v13178_v0, %v8099_v58  ;;  %v13135_v32 = vld [vmem:[%s14081_s10 + $0xbc8] sm:$0x80]   ;;  %v13158_v26 = vld [vmem:[%s14081_s10 + $0xae4] sm:$0x8]   ;;  %v8021_v21 = vsel %vm1441_vm1, %v13157_v10, %v8017_v45  ;;  %v7932_v57 = vsel %vm1457_vm5, %v13134_v43, %v7928_v47 }
 0x3ae   : > { %v13180_v3 = vld [vmem:[%s14081_s10 + $0xbf0] sm:$0x80]   ;;  %v8107_v27 = vsel %vm1457_vm5, %v13179_v2, %v8103_v55  ;;  %12821 = vst.msk [vmem:[%s14087_s14 + $0xd8] sm:$0xff] %vm1465_vm8, %v6713_v6   ;;  %v13159_v54 = vld [vmem:[%s14081_s10 + $0xb23] sm:$0x10]   ;;  %v8025_v7 = vsel %vm1445_vm2, %v13158_v26, %v8021_v21  ;;  %v7936_v53 = vsel %vm1461_vm6, %v13135_v32, %v7932_v57  ;;  %v6818_v41 = vpop.permute.xlu0 %6817  }
 0x3af   : > { %v8111_v29 = vsel %vm1461_vm6, %v13180_v3, %v8107_v27  ;;  %v13160_v23 = vld [vmem:[%s14081_s10 + $0xb62] sm:$0x20]   ;;  %v13182_v33 = vld [vmem:[%s14081_s10 + $0xa3f] sm:$0x1]   ;;  %v8029_v36 = vsel %vm1449_vm3, %v13159_v54, %v8025_v7  ;;  %12848 = vst.msk [vmem:[%s14087_s14 + $0x138] sm:$0xff] %vm1465_vm8, %v6818_v41  }
 0x3b0   : > { %8112 = vrot.lane.b32.xlu1 %v8111_v29, %s14020_s15  ;;  %v13161_v31 = vld [vmem:[%s14081_s10 + $0xba1] sm:$0x40]   ;;  %v13183_v34 = vld [vmem:[%s14081_s10 + $0xa7e] sm:$0x2]   ;;  %7937 = vrot.lane.b32.xlu2 %v7936_v53, %s14020_s15  ;;  %v8033_v61 = vsel %vm1453_vm4, %v13160_v23, %v8029_v36  ;;  %v6888_v59 = vpop.permute.xlu2 %6887  }
 0x3b1   : > { %v13184_v25 = vld [vmem:[%s14081_s10 + $0xabd] sm:$0x4]   ;;  %v8122_v37 = vsel %vm1437_vm0, %v13183_v34, %v13182_v33  ;;  %12866 = vst.msk [vmem:[%s14087_s14 + $0x178] sm:$0xff] %vm1465_vm8, %v6888_v59   ;;  %v8037_v42 = vsel %vm1457_vm5, %v13161_v31, %v8033_v61  ;;  %v13162_v2 = vld [vmem:[%s14081_s10 + $0xbe0] sm:$0x80]  }
 0x3b2   : > { %v13185_v16 = vld [vmem:[%s14081_s10 + $0xafc] sm:$0x8]   ;;  %v8126_v0 = vsel %vm1441_vm1, %v13184_v25, %v8122_v37  ;;  %v8041_v12 = vsel %vm1461_vm6, %v13162_v2, %v8037_v42 }
 0x3b3   : > { %v13186_v62 = vld [vmem:[%s14081_s10 + $0xb3b] sm:$0x10]   ;;  %v8130_v3 = vsel %vm1445_vm2, %v13185_v16, %v8126_v0 }
 0x3b4   : > { %v8134_v1 = vsel %vm1449_vm3, %v13186_v62, %v8130_v3  ;;  %v13187_v40 = vld [vmem:[%s14081_s10 + $0xb7a] sm:$0x20]  }
 0x3b5   : > { %v8138_v48 = vsel %vm1453_vm4, %v13187_v40, %v8134_v1  ;;  %v13188_v49 = vld [vmem:[%s14081_s10 + $0xbb9] sm:$0x40]  }
 0x3b6   : > { %v6853_v38 = vpop.permute.xlu1 %6852   ;;  %v8142_v17 = vsel %vm1457_vm5, %v13188_v49, %v8138_v48  ;;  %v13189_v50 = vld [vmem:[%s14081_s10 + $0xbf8] sm:$0x80]  }
 0x3b7   : > { %12857 = vst.msk [vmem:[%s14087_s14 + $0x158] sm:$0xff] %vm1465_vm8, %v6853_v38   ;;  %v6923_v14 = vpop.permute.xlu0 %6922   ;;  %v8146_v19 = vsel %vm1461_vm6, %v13189_v50, %v8142_v17 }
 0x3b8   : > { %8042 = vrot.lane.b32.xlu2 %v8041_v12, %s14020_s15  ;;  %v6993_v13 = vpop.permute.xlu2 %6992   ;;  %12875 = vst.msk [vmem:[%s14087_s14 + $0x198] sm:$0xff] %vm1465_vm8, %v6923_v14  }
 0x3b9   : > { %12893 = vst.msk [vmem:[%s14087_s14 + $0x1d8] sm:$0xff] %vm1465_vm8, %v6993_v13  }
 0x3be   : > { %v6958_v58 = vpop.permute.xlu1 %6957  }
 0x3bf   : > { %12884 = vst.msk [vmem:[%s14087_s14 + $0x1b8] sm:$0xff] %vm1465_vm8, %v6958_v58  }
 0x3c0   : > { %8147 = vrot.lane.b32.xlu2 %v8146_v19, %s14020_s15  ;;  %v7098_v55 = vpop.permute.xlu2 %7097   ;;  %v7028_v22 = vpop.permute.xlu0 %7027  }
 0x3c1   : > { %12920 = vst.msk [vmem:[%s14087_s14 + $0x238] sm:$0xff] %vm1465_vm8, %v7098_v55  }
 0x3c2   : > { %12902 = vst.msk [vmem:[%s14087_s14 + $0x1f8] sm:$0xff] %vm1465_vm8, %v7028_v22  }
 0x3c6   : > { %v7063_v56 = vpop.permute.xlu1 %7062  }
 0x3c7   : > { %12911 = vst.msk [vmem:[%s14087_s14 + $0x218] sm:$0xff] %vm1465_vm8, %v7063_v56  }
 0x3c8   : > { %v7133_v18 = vpop.permute.xlu0 %7132  }
 0x3c9   : > { %12929 = vst.msk [vmem:[%s14087_s14 + $0x258] sm:$0xff] %vm1465_vm8, %v7133_v18  }
 0x3cb   : > { %v7203_v24 = vpop.permute.xlu2 %7202  }
 0x3cc   : > { %12947 = vst.msk [vmem:[%s14087_s14 + $0x298] sm:$0xff] %vm1465_vm8, %v7203_v24  }
 0x3d0   : > { %v7168_v60 = vpop.permute.xlu1 %7167  }
 0x3d1   : > { %12938 = vst.msk [vmem:[%s14087_s14 + $0x278] sm:$0xff] %vm1465_vm8, %v7168_v60   ;;  %v7238_v15 = vpop.permute.xlu0 %7237  }
 0x3d2   : > { %12956 = vst.msk [vmem:[%s14087_s14 + $0x2b8] sm:$0xff] %vm1465_vm8, %v7238_v15  }
 0x3d3   : > { %v7308_v27 = vpop.permute.xlu2 %7307  }
 0x3d4   : > { %12974 = vst.msk [vmem:[%s14087_s14 + $0x2f8] sm:$0xff] %vm1465_vm8, %v7308_v27  }
 0x3d8   : > { %v7273_v5 = vpop.permute.xlu1 %7272  }
 0x3d9   : > { %12965 = vst.msk [vmem:[%s14087_s14 + $0x2d8] sm:$0xff] %vm1465_vm8, %v7273_v5  }
 0x3db   : > { %v7343_v30 = vpop.permute.xlu0 %7342  }
 0x3dc   : > { %v7413_v8 = vpop.permute.xlu2 %7412   ;;  %12983 = vst.msk [vmem:[%s14087_s14 + $0x318] sm:$0xff] %vm1465_vm8, %v7343_v30  }
 0x3dd   : > { %13001 = vst.msk [vmem:[%s14087_s14 + $0x358] sm:$0xff] %vm1465_vm8, %v7413_v8  }
 0x3e0   : > { %v7378_v29 = vpop.permute.xlu1 %7377  }
 0x3e1   : > { %12992 = vst.msk [vmem:[%s14087_s14 + $0x338] sm:$0xff] %vm1465_vm8, %v7378_v29  }
 0x3e3   : > { %v7448_v35 = vpop.permute.xlu0 %7447  }
 0x3e4   : > { %13010 = vst.msk [vmem:[%s14087_s14 + $0x378] sm:$0xff] %vm1465_vm8, %v7448_v35  }
 0x3e6   : > { %v7518_v46 = vpop.permute.xlu2 %7517  }
 0x3e7   : > { %13028 = vst.msk [vmem:[%s14087_s14 + $0x3b8] sm:$0xff] %vm1465_vm8, %v7518_v46  }
 0x3eb   : > { %v7483_v9 = vpop.permute.xlu1 %7482  }
 0x3ec   : > { %13019 = vst.msk [vmem:[%s14087_s14 + $0x398] sm:$0xff] %vm1465_vm8, %v7483_v9   ;;  %v7553_v4 = vpop.permute.xlu0 %7552  }
 0x3ed   : > { %13037 = vst.msk [vmem:[%s14087_s14 + $0x3d8] sm:$0xff] %vm1465_vm8, %v7553_v4  }
 0x3ee   : > { %v7623_v28 = vpop.permute.xlu2 %7622  }
 0x3ef   : > { %13055 = vst.msk [vmem:[%s14087_s14 + $0x418] sm:$0xff] %vm1465_vm8, %v7623_v28  }
 0x3f3   : > { %v7588_v11 = vpop.permute.xlu1 %7587  }
 0x3f4   : > { %13046 = vst.msk [vmem:[%s14087_s14 + $0x3f8] sm:$0xff] %vm1465_vm8, %v7588_v11  }
 0x3f6   : > { %v7658_v6 = vpop.permute.xlu0 %7657  }
 0x3f7   : > { %13064 = vst.msk [vmem:[%s14087_s14 + $0x438] sm:$0xff] %vm1465_vm8, %v7658_v6  }
 0x3f8   : > { %v7728_v43 = vpop.permute.xlu2 %7727  }
 0x3f9   : > { %13082 = vst.msk [vmem:[%s14087_s14 + $0x478] sm:$0xff] %vm1465_vm8, %v7728_v43  }
 0x3fc   : > { %v7693_v32 = vpop.permute.xlu1 %7692  }
 0x3fd   : > { %13073 = vst.msk [vmem:[%s14087_s14 + $0x458] sm:$0xff] %vm1465_vm8, %v7693_v32  }
 0x3fe   : > { %v7763_v52 = vpop.permute.xlu0 %7762  }
 0x3ff   : > { %13091 = vst.msk [vmem:[%s14087_s14 + $0x498] sm:$0xff] %vm1465_vm8, %v7763_v52  }
 0x402   : > { %v7833_v51 = vpop.permute.xlu2 %7832  }
 0x403   : > { %13109 = vst.msk [vmem:[%s14087_s14 + $0x4d8] sm:$0xff] %vm1465_vm8, %v7833_v51  }
 0x406   : > { %v7798_v44 = vpop.permute.xlu1 %7797  }
 0x407   : > { %13100 = vst.msk [vmem:[%s14087_s14 + $0x4b8] sm:$0xff] %vm1465_vm8, %v7798_v44  }
 0x409   : > { %v7868_v39 = vpop.permute.xlu0 %7867  }
 0x40a   : > { %v7938_v20 = vpop.permute.xlu2 %7937   ;;  %13118 = vst.msk [vmem:[%s14087_s14 + $0x4f8] sm:$0xff] %vm1465_vm8, %v7868_v39  }
 0x40b   : > { %13136 = vst.msk [vmem:[%s14087_s14 + $0x538] sm:$0xff] %vm1465_vm8, %v7938_v20  }
 0x40e   : > { %v7903_v63 = vpop.permute.xlu1 %7902  }
 0x40f   : > { %13127 = vst.msk [vmem:[%s14087_s14 + $0x518] sm:$0xff] %vm1465_vm8, %v7903_v63  }
 0x412   : > { %v8043_v45 = vpop.permute.xlu2 %8042   ;;  %v7973_v26 = vpop.permute.xlu0 %7972  }
 0x413   : > { %13163 = vst.msk [vmem:[%s14087_s14 + $0x598] sm:$0xff] %vm1465_vm8, %v8043_v45  }
 0x414   : > { %13145 = vst.msk [vmem:[%s14087_s14 + $0x558] sm:$0xff] %vm1465_vm8, %v7973_v26  }
 0x418   : > { %v8008_v10 = vpop.permute.xlu1 %8007  }
 0x419   : > { %13154 = vst.msk [vmem:[%s14087_s14 + $0x578] sm:$0xff] %vm1465_vm8, %v8008_v10  }
 0x41a   : > { %v8148_v47 = vpop.permute.xlu2 %8147  }
 0x41b   : > { %13190 = vst.msk [vmem:[%s14087_s14 + $0x5f8] sm:$0xff] %vm1465_vm8, %v8148_v47   ;;  %v8078_v54 = vpop.permute.xlu0 %8077  }
 0x41c   : > { %13172 = vst.msk [vmem:[%s14087_s14 + $0x5b8] sm:$0xff] %vm1465_vm8, %v8078_v54  }
 0x422   : > { %v8113_v21 = vpop.permute.xlu1 %8112  }
 0x423   : > { %13181 = vst.msk [vmem:[%s14087_s14 + $0x5d8] sm:$0xff] %vm1465_vm8, %v8113_v21  }
 0x424 PF: > { %p13191_p6 = scmp.ne.s32.totalorder %s14038_s7, 1 }
 0x425   : > { %s14021_s7 = smov (!%p13191_p6), 64  }
 0x426   : > { %8154 = sbr.rel (%p13191_p6) target bundleno = 1467 (0x5bb), region = 28 }
 0x42b   : > { %v13381_v23 = vld [vmem:[%s14081_s10 + $0x1] sm:$0x1]   ;;  %vm8604_vm9 = vcmask 1041409   ;;  %vm8608_vm10 = vcmask 1042434   ;;  %vm8612_vm11 = vcmask 1043459   ;;  %vm8616_vm12 = vcmask 1044484  }
 0x42c   : > { %v13382_v57 = vld [vmem:[%s14081_s10 + $0x40] sm:$0x2]   ;;  %vm8620_vm13 = vcmask 1045509   ;;  %vm8624_vm14 = vcmask 1046534   ;;  %vm8628_vm15 = vcmask 1047559   ;;  %vm8156_vm0 = vcmask 523264  }
 0x42d   : > { %v8605_v7 = vsel %vm8604_vm9, %v13382_v57, %v13381_v23  ;;  %v13383_v31 = vld [vmem:[%s14081_s10 + $0x7f] sm:$0x4]   ;;  %v13398_v38 = vld [vmem:[%s14081_s10 + $0x11] sm:$0x1]   ;;  %v13389_v48 = vld [vmem:[%s14081_s10 + $0x9] sm:$0x1]  }
 0x42e   : > { %v13384_v33 = vld [vmem:[%s14081_s10 + $0xbe] sm:$0x8]   ;;  %v8609_v53 = vsel %vm8608_vm10, %v13383_v31, %v8605_v7  ;;  %v13399_v37 = vld [vmem:[%s14081_s10 + $0x50] sm:$0x2]   ;;  %v13390_v58 = vld [vmem:[%s14081_s10 + $0x48] sm:$0x2]  }
 0x42f   : > { %v13385_v36 = vld [vmem:[%s14081_s10 + $0xfd] sm:$0x10]   ;;  %v8613_v25 = vsel %vm8612_vm11, %v13384_v33, %v8609_v53  ;;  %v13400_v0 = vld [vmem:[%s14081_s10 + $0x8f] sm:$0x4]   ;;  %v8674_v42 = vsel %vm8604_vm9, %v13399_v37, %v13398_v38  ;;  %v13391_v17 = vld [vmem:[%s14081_s10 + $0x87] sm:$0x4]   ;;  %v8639_v55 = vsel %vm8604_vm9, %v13390_v58, %v13389_v48 }
 0x430   : > { %v13386_v34 = vld [vmem:[%s14081_s10 + $0x13c] sm:$0x20]   ;;  %v8617_v59 = vsel %vm8616_vm12, %v13385_v36, %v8613_v25  ;;  %v13401_v2 = vld [vmem:[%s14081_s10 + $0xce] sm:$0x8]   ;;  %v8678_v1 = vsel %vm8608_vm10, %v13400_v0, %v8674_v42  ;;  %v13392_v50 = vld [vmem:[%s14081_s10 + $0xc6] sm:$0x8]   ;;  %v8643_v60 = vsel %vm8608_vm10, %v13391_v17, %v8639_v55 }
 0x431   : > { %v13387_v16 = vld [vmem:[%s14081_s10 + $0x17b] sm:$0x40]   ;;  %v8621_v62 = vsel %vm8620_vm13, %v13386_v34, %v8617_v59  ;;  %v13402_v3 = vld [vmem:[%s14081_s10 + $0x10d] sm:$0x10]   ;;  %v8682_v13 = vsel %vm8612_vm11, %v13401_v2, %v8678_v1  ;;  %v13393_v56 = vld [vmem:[%s14081_s10 + $0x105] sm:$0x10]   ;;  %v8647_v8 = vsel %vm8612_vm11, %v13392_v50, %v8643_v60 }
 0x432   : > { %v13388_v61 = vld [vmem:[%s14081_s10 + $0x1ba] sm:$0x80]   ;;  %v8625_v41 = vsel %vm8624_vm14, %v13387_v16, %v8621_v62  ;;  %v13403_v40 = vld [vmem:[%s14081_s10 + $0x14c] sm:$0x20]   ;;  %v8686_v14 = vsel %vm8616_vm12, %v13402_v3, %v8682_v13  ;;  %v13394_v22 = vld [vmem:[%s14081_s10 + $0x144] sm:$0x20]   ;;  %v8651_v28 = vsel %vm8616_vm12, %v13393_v56, %v8647_v8 }
 0x433   : > { %v13404_v12 = vld [vmem:[%s14081_s10 + $0x18b] sm:$0x40]   ;;  %v8629_v49 = vsel %vm8628_vm15, %v13388_v61, %v8625_v41  ;;  %v8690_v24 = vsel %vm8620_vm13, %v13403_v40, %v8686_v14  ;;  %v13395_v18 = vld [vmem:[%s14081_s10 + $0x183] sm:$0x40]   ;;  %v13407_v27 = vld [vmem:[%s14081_s10 + $0x19] sm:$0x1]   ;;  %v8655_v6 = vsel %vm8620_vm13, %v13394_v22, %v8651_v28 }
 0x434   : > { %8630 = vrot.lane.b32.xlu0 %v8629_v49, %s14021_s7  ;;  %v13405_v19 = vld [vmem:[%s14081_s10 + $0x1ca] sm:$0x80]   ;;  %v13408_v5 = vld [vmem:[%s14081_s10 + $0x58] sm:$0x2]   ;;  %v8694_v15 = vsel %vm8624_vm14, %v13404_v12, %v8690_v24  ;;  %v13396_v11 = vld [vmem:[%s14081_s10 + $0x1c2] sm:$0x80]   ;;  %v8659_v63 = vsel %vm8624_vm14, %v13395_v18, %v8655_v6 }
 0x435   : > { %v8709_v29 = vsel %vm8604_vm9, %v13408_v5, %v13407_v27  ;;  %v13409_v30 = vld [vmem:[%s14081_s10 + $0x97] sm:$0x4]   ;;  %v8698_v35 = vsel %vm8628_vm15, %v13405_v19, %v8694_v15  ;;  %v13434_v44 = vld [vmem:[%s14081_s10 + $0x31] sm:$0x1]   ;;  %v8663_v21 = vsel %vm8628_vm15, %v13396_v11, %v8659_v63  ;;  %v13461_v2 = vld [vmem:[%s14081_s10 + $0x209] sm:$0x1]  }
 0x436   : > { %v13410_v46 = vld [vmem:[%s14081_s10 + $0xd6] sm:$0x8]   ;;  %v8713_v4 = vsel %vm8608_vm10, %v13409_v30, %v8709_v29  ;;  %8699 = vrot.lane.b32.xlu1 %v8698_v35, %s14021_s7  ;;  %v13435_v52 = vld [vmem:[%s14081_s10 + $0x70] sm:$0x2]   ;;  %v13462_v3 = vld [vmem:[%s14081_s10 + $0x248] sm:$0x2]  }
 0x437   : > { %v13411_v9 = vld [vmem:[%s14081_s10 + $0x115] sm:$0x10]   ;;  %v8717_v51 = vsel %vm8612_vm11, %v13410_v46, %v8713_v4  ;;  %v13436_v20 = vld [vmem:[%s14081_s10 + $0xaf] sm:$0x4]   ;;  %v8814_v10 = vsel %vm8604_vm9, %v13435_v52, %v13434_v44  ;;  %v8919_v40 = vsel %vm8604_vm9, %v13462_v3, %v13461_v2  ;;  %v13463_v12 = vld [vmem:[%s14081_s10 + $0x287] sm:$0x4]  }
 0x438   : > { %v13412_v43 = vld [vmem:[%s14081_s10 + $0x154] sm:$0x20]   ;;  %v8721_v39 = vsel %vm8616_vm12, %v13411_v9, %v8717_v51  ;;  %v13437_v26 = vld [vmem:[%s14081_s10 + $0xee] sm:$0x8]   ;;  %v8818_v23 = vsel %vm8608_vm10, %v13436_v20, %v8814_v10  ;;  %v13464_v48 = vld [vmem:[%s14081_s10 + $0x2c6] sm:$0x8]   ;;  %v8923_v17 = vsel %vm8608_vm10, %v13463_v12, %v8919_v40 }
 0x439   : > { %v13413_v32 = vld [vmem:[%s14081_s10 + $0x193] sm:$0x40]   ;;  %v13438_v47 = vld [vmem:[%s14081_s10 + $0x12d] sm:$0x10]   ;;  %v8725_v54 = vsel %vm8620_vm13, %v13412_v43, %v8721_v39  ;;  %v8822_v53 = vsel %vm8612_vm11, %v13437_v26, %v8818_v23  ;;  %v13465_v49 = vld [vmem:[%s14081_s10 + $0x305] sm:$0x10]   ;;  %v8927_v55 = vsel %vm8612_vm11, %v13464_v48, %v8923_v17 }
 0x43a   : > { %v13414_v45 = vld [vmem:[%s14081_s10 + $0x1d2] sm:$0x80]   ;;  %v13439_v57 = vld [vmem:[%s14081_s10 + $0x16c] sm:$0x20]   ;;  %v8729_v33 = vsel %vm8624_vm14, %v13413_v32, %v8725_v54  ;;  %v8826_v16 = vsel %vm8616_vm12, %v13438_v47, %v8822_v53  ;;  %v13466_v50 = vld [vmem:[%s14081_s10 + $0x344] sm:$0x20]   ;;  %v8931_v18 = vsel %vm8616_vm12, %v13465_v49, %v8927_v55 }
 0x43b   : > { %v13440_v7 = vld [vmem:[%s14081_s10 + $0x1ab] sm:$0x40]   ;;  %v13443_v31 = vld [vmem:[%s14081_s10 + $0x39] sm:$0x1]   ;;  %v8733_v37 = vsel %vm8628_vm15, %v13414_v45, %v8729_v33  ;;  %v8830_v0 = vsel %vm8620_vm13, %v13439_v57, %v8826_v16  ;;  %v13416_v56 = vld [vmem:[%s14081_s10 + $0x21] sm:$0x1]   ;;  %v8935_v28 = vsel %vm8620_vm13, %v13466_v50, %v8931_v18 }
 0x43c   : > { %v13444_v36 = vld [vmem:[%s14081_s10 + $0x78] sm:$0x2]   ;;  %8664 = vrot.lane.b32.xlu0 %v8663_v21, %s14021_s7  ;;  %v13441_v61 = vld [vmem:[%s14081_s10 + $0x1ea] sm:$0x80]   ;;  %v8834_v41 = vsel %vm8624_vm14, %v13440_v7, %v8830_v0  ;;  %v13417_v22 = vld [vmem:[%s14081_s10 + $0x60] sm:$0x2]  }
 0x43d   : > { %v13445_v34 = vld [vmem:[%s14081_s10 + $0xb7] sm:$0x4]   ;;  %v8849_v59 = vsel %vm8604_vm9, %v13444_v36, %v13443_v31  ;;  %v13418_v24 = vld [vmem:[%s14081_s10 + $0x9f] sm:$0x4]   ;;  %v8838_v60 = vsel %vm8628_vm15, %v13441_v61, %v8834_v41  ;;  %v13467_v27 = vld [vmem:[%s14081_s10 + $0x383] sm:$0x40]   ;;  %v8744_v5 = vsel %vm8604_vm9, %v13417_v22, %v13416_v56 }
 0x43e   : > { %v13446_v25 = vld [vmem:[%s14081_s10 + $0xf6] sm:$0x8]   ;;  %v8853_v62 = vsel %vm8608_vm10, %v13445_v34, %v8849_v59  ;;  %8734 = vrot.lane.b32.xlu1 %v8733_v37, %s14021_s7  ;;  %v13419_v15 = vld [vmem:[%s14081_s10 + $0xde] sm:$0x8]   ;;  %v8748_v30 = vsel %vm8608_vm10, %v13418_v24, %v8744_v5  ;;  %v13470_v35 = vld [vmem:[%s14081_s10 + $0x211] sm:$0x1]   ;;  %v8939_v21 = vsel %vm8624_vm14, %v13467_v27, %v8935_v28 }
 0x43f   : > { %v13447_v38 = vld [vmem:[%s14081_s10 + $0x135] sm:$0x10]   ;;  %v8857_v1 = vsel %vm8612_vm11, %v13446_v25, %v8853_v62  ;;  %v13420_v8 = vld [vmem:[%s14081_s10 + $0x11d] sm:$0x10]   ;;  %v8752_v11 = vsel %vm8612_vm11, %v13419_v15, %v8748_v30  ;;  %v13471_v4 = vld [vmem:[%s14081_s10 + $0x250] sm:$0x2]  }
 0x440   : > { %v13448_v42 = vld [vmem:[%s14081_s10 + $0x174] sm:$0x20]   ;;  %v8861_v13 = vsel %vm8616_vm12, %v13447_v38, %v8857_v1  ;;  %v13421_v46 = vld [vmem:[%s14081_s10 + $0x15c] sm:$0x20]   ;;  %v13472_v43 = vld [vmem:[%s14081_s10 + $0x28f] sm:$0x4]   ;;  %v8756_v51 = vsel %vm8616_vm12, %v13420_v8, %v8752_v11  ;;  %v8954_v52 = vsel %vm8604_vm9, %v13471_v4, %v13470_v35 }
 0x441   : > { %v13449_v58 = vld [vmem:[%s14081_s10 + $0x1b3] sm:$0x40]   ;;  %v8865_v14 = vsel %vm8620_vm13, %v13448_v42, %v8861_v13  ;;  %v13422_v9 = vld [vmem:[%s14081_s10 + $0x19b] sm:$0x40]   ;;  %v13473_v32 = vld [vmem:[%s14081_s10 + $0x2ce] sm:$0x8]   ;;  %v8760_v39 = vsel %vm8620_vm13, %v13421_v46, %v8756_v51  ;;  %v8958_v45 = vsel %vm8608_vm10, %v13472_v43, %v8954_v52 }
 0x442   : > { %v13450_v19 = vld [vmem:[%s14081_s10 + $0x1f2] sm:$0x80]   ;;  %v8869_v29 = vsel %vm8624_vm14, %v13449_v58, %v8865_v14  ;;  %v13468_v6 = vld [vmem:[%s14081_s10 + $0x3c2] sm:$0x80]   ;;  %v13423_v44 = vld [vmem:[%s14081_s10 + $0x1da] sm:$0x80]   ;;  %v8764_v54 = vsel %vm8624_vm14, %v13422_v9, %v8760_v39  ;;  %v8962_v23 = vsel %vm8612_vm11, %v13473_v32, %v8958_v45 }
 0x443   : > { %v13474_v20 = vld [vmem:[%s14081_s10 + $0x30d] sm:$0x10]   ;;  %v8873_v63 = vsel %vm8628_vm15, %v13450_v19, %v8869_v29  ;;  %v13488_v26 = vld [vmem:[%s14081_s10 + $0x221] sm:$0x1]   ;;  %v8768_v53 = vsel %vm8628_vm15, %v13423_v44, %v8764_v54  ;;  %v13425_v37 = vld [vmem:[%s14081_s10 + $0x29] sm:$0x1]   ;;  %v8943_v62 = vsel %vm8628_vm15, %v13468_v6, %v8939_v21 }
 0x444   : > { %8839 = vrot.lane.b32.xlu0 %v8838_v60, %s14021_s7  ;;  %v13475_v10 = vld [vmem:[%s14081_s10 + $0x34c] sm:$0x20]   ;;  %v13489_v47 = vld [vmem:[%s14081_s10 + $0x260] sm:$0x2]   ;;  %v8966_v36 = vsel %vm8616_vm12, %v13474_v20, %v8962_v23  ;;  %8769 = vrot.lane.b32.xlu2 %v8768_v53, %s14021_s7  ;;  %vm8632_vm1 = vcmask 1048064  }
 0x445   : > { %v9024_v57 = vsel %vm8604_vm9, %v13489_v47, %v13488_v26  ;;  %v13490_v7 = vld [vmem:[%s14081_s10 + $0x29f] sm:$0x4]   ;;  %v13476_v34 = vld [vmem:[%s14081_s10 + $0x38b] sm:$0x40]   ;;  %v8970_v61 = vsel %vm8620_vm13, %v13475_v10, %v8966_v36  ;;  %v13426_v0 = vld [vmem:[%s14081_s10 + $0x68] sm:$0x2]  }
 0x446   : > { %v13491_v31 = vld [vmem:[%s14081_s10 + $0x2de] sm:$0x8]   ;;  %v9028_v25 = vsel %vm8608_vm10, %v13490_v7, %v9024_v57  ;;  %8874 = vrot.lane.b32.xlu1 %v8873_v63, %s14021_s7  ;;  %v13477_v59 = vld [vmem:[%s14081_s10 + $0x3ca] sm:$0x80]   ;;  %v8779_v2 = vsel %vm8604_vm9, %v13426_v0, %v13425_v37  ;;  %v13427_v3 = vld [vmem:[%s14081_s10 + $0xa7] sm:$0x4]   ;;  %v8974_v40 = vsel %vm8624_vm14, %v13476_v34, %v8970_v61 }
 0x447   : > { %v13492_v33 = vld [vmem:[%s14081_s10 + $0x31d] sm:$0x10]   ;;  %v9032_v38 = vsel %vm8612_vm11, %v13491_v31, %v9028_v25  ;;  %v13428_v41 = vld [vmem:[%s14081_s10 + $0xe6] sm:$0x8]   ;;  %v8783_v48 = vsel %vm8608_vm10, %v13427_v3, %v8779_v2  ;;  %v8978_v18 = vsel %vm8628_vm15, %v13477_v59, %v8974_v40  ;;  %v13515_v29 = vld [vmem:[%s14081_s10 + $0x239] sm:$0x1]  }
 0x448   : > { %v13493_v16 = vld [vmem:[%s14081_s10 + $0x35c] sm:$0x20]   ;;  %v9036_v42 = vsel %vm8616_vm12, %v13492_v33, %v9032_v38  ;;  %v13429_v1 = vld [vmem:[%s14081_s10 + $0x125] sm:$0x10]   ;;  %v8787_v17 = vsel %vm8612_vm11, %v13428_v41, %v8783_v48  ;;  %v13516_v35 = vld [vmem:[%s14081_s10 + $0x278] sm:$0x2]  }
 0x449   : > { %v13494_v12 = vld [vmem:[%s14081_s10 + $0x39b] sm:$0x40]   ;;  %v13430_v49 = vld [vmem:[%s14081_s10 + $0x164] sm:$0x20]   ;;  %v9040_v58 = vsel %vm8620_vm13, %v13493_v16, %v9036_v42  ;;  %v8791_v55 = vsel %vm8616_vm12, %v13429_v1, %v8787_v17  ;;  %v13517_v28 = vld [vmem:[%s14081_s10 + $0x2b7] sm:$0x4]   ;;  %v9129_v6 = vsel %vm8604_vm9, %v13516_v35, %v13515_v29 }
 0x44a   : > { %v13431_v13 = vld [vmem:[%s14081_s10 + $0x1a3] sm:$0x40]   ;;  %v13495_v27 = vld [vmem:[%s14081_s10 + $0x3da] sm:$0x80]   ;;  %v8795_v5 = vsel %vm8620_vm13, %v13430_v49, %v8791_v55  ;;  %v9044_v30 = vsel %vm8624_vm14, %v13494_v12, %v9040_v58  ;;  %v13518_v11 = vld [vmem:[%s14081_s10 + $0x2f6] sm:$0x8]   ;;  %v9133_v20 = vsel %vm8608_vm10, %v13517_v28, %v9129_v6 }
 0x44b   : > { %v13497_v50 = vld [vmem:[%s14081_s10 + $0x229] sm:$0x1]   ;;  %v8799_v46 = vsel %vm8624_vm14, %v13431_v13, %v8795_v5  ;;  %v13519_v51 = vld [vmem:[%s14081_s10 + $0x335] sm:$0x10]   ;;  %v13452_v39 = vld [vmem:[%s14081_s10 + $0x201] sm:$0x1]   ;;  %v9048_v45 = vsel %vm8628_vm15, %v13495_v27, %v9044_v30  ;;  %v9137_v10 = vsel %vm8612_vm11, %v13518_v11, %v9133_v20 }
 0x44c   : > { %v13498_v14 = vld [vmem:[%s14081_s10 + $0x268] sm:$0x2]   ;;  %8944 = vrot.lane.b32.xlu0 %v8943_v62, %s14021_s7  ;;  %v13520_v63 = vld [vmem:[%s14081_s10 + $0x374] sm:$0x20]   ;;  %v13453_v26 = vld [vmem:[%s14081_s10 + $0x240] sm:$0x2]   ;;  %v9141_v23 = vsel %vm8616_vm12, %v13519_v51, %v9137_v10 }
 0x44d   : > { %v13499_v19 = vld [vmem:[%s14081_s10 + $0x2a7] sm:$0x4]   ;;  %v9059_v22 = vsel %vm8604_vm9, %v13498_v14, %v13497_v50  ;;  %v13454_v47 = vld [vmem:[%s14081_s10 + $0x27f] sm:$0x4]   ;;  %v13521_v57 = vld [vmem:[%s14081_s10 + $0x3b3] sm:$0x40]   ;;  %v8884_v7 = vsel %vm8604_vm9, %v13453_v26, %v13452_v39  ;;  %v9145_v53 = vsel %vm8620_vm13, %v13520_v63, %v9141_v23 }
 0x44e   : > { %v13432_v56 = vld [vmem:[%s14081_s10 + $0x1e2] sm:$0x80]   ;;  %v9063_v15 = vsel %vm8608_vm10, %v13499_v19, %v9059_v22  ;;  %8979 = vrot.lane.b32.xlu1 %v8978_v18, %s14021_s7  ;;  %v13455_v21 = vld [vmem:[%s14081_s10 + $0x2be] sm:$0x8]   ;;  %v8888_v36 = vsel %vm8608_vm10, %v13454_v47, %v8884_v7  ;;  %v13524_v25 = vld [vmem:[%s14081_s10 + $0x3] sm:$0x1]   ;;  %v9149_v40 = vsel %vm8624_vm14, %v13521_v57, %v9145_v53 }
 0x44f   : > { %v13500_v24 = vld [vmem:[%s14081_s10 + $0x2e6] sm:$0x8]   ;;  %v8803_v4 = vsel %vm8628_vm15, %v13432_v56, %v8799_v46  ;;  %v13456_v31 = vld [vmem:[%s14081_s10 + $0x2fd] sm:$0x10]   ;;  %v13525_v16 = vld [vmem:[%s14081_s10 + $0x42] sm:$0x2]   ;;  %v8892_v61 = vsel %vm8612_vm11, %v13455_v21, %v8888_v36 }
 0x450   : > { %v13501_v60 = vld [vmem:[%s14081_s10 + $0x325] sm:$0x10]   ;;  %v9067_v9 = vsel %vm8612_vm11, %v13500_v24, %v9063_v15  ;;  %8804 = vrot.lane.b32.xlu2 %v8803_v4, %s14021_s7  ;;  %v13457_v33 = vld [vmem:[%s14081_s10 + $0x33c] sm:$0x20]   ;;  %v9164_v59 = vsel %vm8604_vm9, %v13525_v16, %v13524_v25  ;;  %v13526_v38 = vld [vmem:[%s14081_s10 + $0x81] sm:$0x4]   ;;  %v8896_v2 = vsel %vm8616_vm12, %v13456_v31, %v8892_v61 }
 0x451   : > { %v13502_v8 = vld [vmem:[%s14081_s10 + $0x364] sm:$0x20]   ;;  %v9071_v43 = vsel %vm8616_vm12, %v13501_v60, %v9067_v9  ;;  %v13458_v34 = vld [vmem:[%s14081_s10 + $0x37b] sm:$0x40]   ;;  %v13527_v37 = vld [vmem:[%s14081_s10 + $0xc0] sm:$0x8]   ;;  %v9168_v41 = vsel %vm8608_vm10, %v13526_v38, %v9164_v59  ;;  %v8900_v12 = vsel %vm8620_vm13, %v13457_v33, %v8896_v2 }
 0x452   : > { %v13503_v32 = vld [vmem:[%s14081_s10 + $0x3a3] sm:$0x40]   ;;  %v9075_v44 = vsel %vm8620_vm13, %v13502_v8, %v9071_v43  ;;  %v13528_v0 = vld [vmem:[%s14081_s10 + $0xff] sm:$0x10]   ;;  %v13522_v42 = vld [vmem:[%s14081_s10 + $0x3f2] sm:$0x80]   ;;  %v9172_v48 = vsel %vm8612_vm11, %v13527_v37, %v9168_v41  ;;  %v8904_v17 = vsel %vm8624_vm14, %v13458_v34, %v8900_v12 }
 0x453   : > { %v13504_v52 = vld [vmem:[%s14081_s10 + $0x3e2] sm:$0x80]   ;;  %v9079_v54 = vsel %vm8624_vm14, %v13503_v32, %v9075_v44  ;;  %v13459_v3 = vld [vmem:[%s14081_s10 + $0x3ba] sm:$0x80]   ;;  %v13529_v1 = vld [vmem:[%s14081_s10 + $0x13e] sm:$0x20]   ;;  %v9176_v50 = vsel %vm8616_vm12, %v13528_v0, %v9172_v48  ;;  %v9153_v15 = vsel %vm8628_vm15, %v13522_v42, %v9149_v40 }
 0x454   : > { %9049 = vrot.lane.b32.xlu0 %v9048_v45, %s14021_s7  ;;  %v9083_v62 = vsel %vm8628_vm15, %v13504_v52, %v9079_v54  ;;  %v13542_v49 = vld [vmem:[%s14081_s10 + $0x13] sm:$0x1]   ;;  %v13530_v14 = vld [vmem:[%s14081_s10 + $0x17d] sm:$0x40]   ;;  %v8908_v22 = vsel %vm8628_vm15, %v13459_v3, %v8904_v17  ;;  %v9180_v24 = vsel %vm8620_vm13, %v13529_v1, %v9176_v50  ;;  %v13479_v5 = vld [vmem:[%s14081_s10 + $0x219] sm:$0x1]  }
 0x455   : > { %v13543_v13 = vld [vmem:[%s14081_s10 + $0x52] sm:$0x2]   ;;  %v13531_v60 = vld [vmem:[%s14081_s10 + $0x1bc] sm:$0x80]   ;;  %v13480_v29 = vld [vmem:[%s14081_s10 + $0x258] sm:$0x2]   ;;  %v9184_v9 = vsel %vm8624_vm14, %v13530_v14, %v9180_v24 }
 0x456   : > { %v13544_v58 = vld [vmem:[%s14081_s10 + $0x91] sm:$0x4]   ;;  %v9234_v19 = vsel %vm8604_vm9, %v13543_v13, %v13542_v49  ;;  %9084 = vrot.lane.b32.xlu1 %v9083_v62, %s14021_s7  ;;  %v13481_v30 = vld [vmem:[%s14081_s10 + $0x297] sm:$0x4]   ;;  %v8989_v11 = vsel %vm8604_vm9, %v13480_v29, %v13479_v5  ;;  %v13551_v44 = vld [vmem:[%s14081_s10 + $0x1b] sm:$0x1]   ;;  %v9188_v26 = vsel %vm8628_vm15, %v13531_v60, %v9184_v9 }
 0x457   : > { %v13545_v55 = vld [vmem:[%s14081_s10 + $0xd0] sm:$0x8]   ;;  %v9238_v18 = vsel %vm8608_vm10, %v13544_v58, %v9234_v19  ;;  %v13482_v46 = vld [vmem:[%s14081_s10 + $0x2d6] sm:$0x8]   ;;  %v8993_v6 = vsel %vm8608_vm10, %v13481_v30, %v8989_v11  ;;  %v13552_v52 = vld [vmem:[%s14081_s10 + $0x5a] sm:$0x2]  }
 0x458   : > { %v13546_v56 = vld [vmem:[%s14081_s10 + $0x10f] sm:$0x10]   ;;  %8909 = vrot.lane.b32.xlu2 %v8908_v22, %s14021_s7  ;;  %v9242_v8 = vsel %vm8612_vm11, %v13545_v55, %v9238_v18  ;;  %v13483_v4 = vld [vmem:[%s14081_s10 + $0x315] sm:$0x10]   ;;  %v8997_v20 = vsel %vm8612_vm11, %v13482_v46, %v8993_v6  ;;  %v9269_v63 = vsel %vm8604_vm9, %v13552_v52, %v13551_v44  ;;  %v13553_v39 = vld [vmem:[%s14081_s10 + $0x99] sm:$0x4]  }
 0x459   : > { %v13547_v27 = vld [vmem:[%s14081_s10 + $0x14e] sm:$0x20]   ;;  %v9246_v35 = vsel %vm8616_vm12, %v13546_v56, %v9242_v8  ;;  %v13484_v43 = vld [vmem:[%s14081_s10 + $0x354] sm:$0x20]   ;;  %v13554_v45 = vld [vmem:[%s14081_s10 + $0xd8] sm:$0x8]   ;;  %v9001_v21 = vsel %vm8616_vm12, %v13483_v4, %v8997_v20  ;;  %v9273_v23 = vsel %vm8608_vm10, %v13553_v39, %v9269_v63 }
 0x45a   : > { %v13548_v28 = vld [vmem:[%s14081_s10 + $0x18d] sm:$0x40]   ;;  %v9250_v32 = vsel %vm8620_vm13, %v13547_v27, %v9246_v35  ;;  %v13485_v51 = vld [vmem:[%s14081_s10 + $0x393] sm:$0x40]   ;;  %v13555_v10 = vld [vmem:[%s14081_s10 + $0x117] sm:$0x10]   ;;  %v9005_v31 = vsel %vm8620_vm13, %v13484_v43, %v9001_v21  ;;  %v9277_v33 = vsel %vm8612_vm11, %v13554_v45, %v9273_v23 }
 0x45b   : > { %v13549_v47 = vld [vmem:[%s14081_s10 + $0x1cc] sm:$0x80]   ;;  %v13486_v54 = vld [vmem:[%s14081_s10 + $0x3d2] sm:$0x80]   ;;  %v13556_v57 = vld [vmem:[%s14081_s10 + $0x156] sm:$0x20]   ;;  %v9254_v7 = vsel %vm8624_vm14, %v13548_v28, %v9250_v32  ;;  %v9009_v25 = vsel %vm8624_vm14, %v13485_v51, %v9005_v31  ;;  %v9281_v16 = vsel %vm8616_vm12, %v13555_v10, %v9277_v33 }
 0x45c   : > { %9154 = vrot.lane.b32.xlu0 %v9153_v15, %s14021_s7  ;;  %v13569_v53 = vld [vmem:[%s14081_s10 + $0x2b] sm:$0x1]   ;;  %v13557_v61 = vld [vmem:[%s14081_s10 + $0x195] sm:$0x40]   ;;  %v9013_v0 = vsel %vm8628_vm15, %v13486_v54, %v9009_v25  ;;  %v9285_v62 = vsel %vm8620_vm13, %v13556_v57, %v9281_v16  ;;  %v13506_v41 = vld [vmem:[%s14081_s10 + $0x231] sm:$0x1]   ;;  %v9258_v1 = vsel %vm8628_vm15, %v13549_v47, %v9254_v7 }
 0x45d   : > { %v13570_v36 = vld [vmem:[%s14081_s10 + $0x6a] sm:$0x2]   ;;  %v13558_v42 = vld [vmem:[%s14081_s10 + $0x1d4] sm:$0x80]   ;;  %v13507_v12 = vld [vmem:[%s14081_s10 + $0x270] sm:$0x2]   ;;  %v9289_v13 = vsel %vm8624_vm14, %v13557_v61, %v9285_v62 }
 0x45e   : > { %v13571_v34 = vld [vmem:[%s14081_s10 + $0xa9] sm:$0x4]   ;;  %v9339_v59 = vsel %vm8604_vm9, %v13570_v36, %v13569_v53  ;;  %9189 = vrot.lane.b32.xlu1 %v9188_v26, %s14021_s7  ;;  %v13508_v48 = vld [vmem:[%s14081_s10 + $0x2af] sm:$0x4]   ;;  %v9094_v50 = vsel %vm8604_vm9, %v13507_v12, %v13506_v41  ;;  %v13578_v24 = vld [vmem:[%s14081_s10 + $0x33] sm:$0x1]   ;;  %v9293_v29 = vsel %vm8628_vm15, %v13558_v42, %v9289_v13 }
 0x45f   : > { %v13572_v38 = vld [vmem:[%s14081_s10 + $0xe8] sm:$0x8]   ;;  %v9343_v2 = vsel %vm8608_vm10, %v13571_v34, %v9339_v59  ;;  %v13509_v49 = vld [vmem:[%s14081_s10 + $0x2ee] sm:$0x8]   ;;  %v9098_v56 = vsel %vm8608_vm10, %v13508_v48, %v9094_v50  ;;  %v13579_v60 = vld [vmem:[%s14081_s10 + $0x72] sm:$0x2]  }
 0x460   : > { %v13573_v37 = vld [vmem:[%s14081_s10 + $0x127] sm:$0x10]   ;;  %9014 = vrot.lane.b32.xlu2 %v9013_v0, %s14021_s7  ;;  %v9347_v40 = vsel %vm8612_vm11, %v13572_v38, %v9343_v2  ;;  %v13510_v14 = vld [vmem:[%s14081_s10 + $0x32d] sm:$0x10]   ;;  %v9102_v18 = vsel %vm8612_vm11, %v13509_v49, %v9098_v56  ;;  %v9374_v27 = vsel %vm8604_vm9, %v13579_v60, %v13578_v24  ;;  %v13580_v5 = vld [vmem:[%s14081_s10 + $0xb1] sm:$0x4]  }
 0x461   : > { %v13574_v3 = vld [vmem:[%s14081_s10 + $0x166] sm:$0x20]   ;;  %v9351_v58 = vsel %vm8616_vm12, %v13573_v37, %v9347_v40  ;;  %v13511_v19 = vld [vmem:[%s14081_s10 + $0x36c] sm:$0x20]   ;;  %v13581_v15 = vld [vmem:[%s14081_s10 + $0xf0] sm:$0x8]   ;;  %v9106_v46 = vsel %vm8616_vm12, %v13510_v14, %v9102_v18  ;;  %v9378_v35 = vsel %vm8608_vm10, %v13580_v5, %v9374_v27 }
 0x462   : > { %v13575_v17 = vld [vmem:[%s14081_s10 + $0x1a5] sm:$0x40]   ;;  %v9355_v55 = vsel %vm8620_vm13, %v13574_v3, %v9351_v58  ;;  %v13512_v22 = vld [vmem:[%s14081_s10 + $0x3ab] sm:$0x40]   ;;  %v13582_v8 = vld [vmem:[%s14081_s10 + $0x12f] sm:$0x10]   ;;  %v9110_v4 = vsel %vm8620_vm13, %v13511_v19, %v9106_v46  ;;  %v9382_v43 = vsel %vm8612_vm11, %v13581_v15, %v9378_v35 }
 0x463   : > { %v13576_v30 = vld [vmem:[%s14081_s10 + $0x1e4] sm:$0x80]   ;;  %v13513_v9 = vld [vmem:[%s14081_s10 + $0x3ea] sm:$0x80]   ;;  %v13583_v28 = vld [vmem:[%s14081_s10 + $0x16e] sm:$0x20]   ;;  %v9359_v11 = vsel %vm8624_vm14, %v13575_v17, %v9355_v55  ;;  %v9114_v44 = vsel %vm8624_vm14, %v13512_v22, %v9110_v4  ;;  %v9386_v52 = vsel %vm8616_vm12, %v13582_v8, %v9382_v43 }
 0x464   : > { %9259 = vrot.lane.b32.xlu0 %v9258_v1, %s14021_s7  ;;  %v13596_v32 = vld [vmem:[%s14081_s10 + $0x203] sm:$0x1]   ;;  %v13584_v20 = vld [vmem:[%s14081_s10 + $0x1ad] sm:$0x40]   ;;  %v9118_v10 = vsel %vm8628_vm15, %v13513_v9, %v9114_v44  ;;  %v9390_v26 = vsel %vm8620_vm13, %v13583_v28, %v9386_v52  ;;  %v13533_v23 = vld [vmem:[%s14081_s10 + $0xb] sm:$0x1]   ;;  %v9363_v57 = vsel %vm8628_vm15, %v13576_v30, %v9359_v11 }
 0x465   : > { %v13597_v6 = vld [vmem:[%s14081_s10 + $0x242] sm:$0x2]   ;;  %v13585_v47 = vld [vmem:[%s14081_s10 + $0x1ec] sm:$0x80]   ;;  %v13534_v31 = vld [vmem:[%s14081_s10 + $0x4a] sm:$0x2]   ;;  %v9394_v36 = vsel %vm8624_vm14, %v13584_v20, %v9390_v26 }
 0x466   : > { %v13598_v51 = vld [vmem:[%s14081_s10 + $0x281] sm:$0x4]   ;;  %v9444_v63 = vsel %vm8604_vm9, %v13597_v6, %v13596_v32  ;;  %9294 = vrot.lane.b32.xlu1 %v9293_v29, %s14021_s7  ;;  %v13535_v33 = vld [vmem:[%s14081_s10 + $0x89] sm:$0x4]   ;;  %v9199_v16 = vsel %vm8604_vm9, %v13534_v31, %v13533_v23  ;;  %v9398_v12 = vsel %vm8628_vm15, %v13585_v47, %v9394_v36  ;;  %v13623_v55 = vld [vmem:[%s14081_s10 + $0x21b] sm:$0x1]  }
 0x467   : > { %v13599_v39 = vld [vmem:[%s14081_s10 + $0x2c0] sm:$0x8]   ;;  %v9448_v21 = vsel %vm8608_vm10, %v13598_v51, %v9444_v63  ;;  %v13536_v53 = vld [vmem:[%s14081_s10 + $0xc8] sm:$0x8]   ;;  %v9203_v37 = vsel %vm8608_vm10, %v13535_v33, %v9199_v16  ;;  %v13624_v56 = vld [vmem:[%s14081_s10 + $0x25a] sm:$0x2]  }
 0x468   : > { %v13600_v45 = vld [vmem:[%s14081_s10 + $0x2ff] sm:$0x10]   ;;  %9119 = vrot.lane.b32.xlu2 %v9118_v10, %s14021_s7  ;;  %v9452_v7 = vsel %vm8612_vm11, %v13599_v39, %v9448_v21  ;;  %v13537_v61 = vld [vmem:[%s14081_s10 + $0x107] sm:$0x10]   ;;  %v9207_v2 = vsel %vm8612_vm11, %v13536_v53, %v9203_v37  ;;  %v13625_v22 = vld [vmem:[%s14081_s10 + $0x299] sm:$0x4]   ;;  %v9549_v27 = vsel %vm8604_vm9, %v13624_v56, %v13623_v55 }
 0x469   : > { %v13601_v54 = vld [vmem:[%s14081_s10 + $0x33e] sm:$0x20]   ;;  %v9456_v34 = vsel %vm8616_vm12, %v13600_v45, %v9452_v7  ;;  %v13538_v59 = vld [vmem:[%s14081_s10 + $0x146] sm:$0x20]   ;;  %v9211_v49 = vsel %vm8616_vm12, %v13537_v61, %v9207_v2  ;;  %v13626_v5 = vld [vmem:[%s14081_s10 + $0x2d8] sm:$0x8]   ;;  %v9553_v46 = vsel %vm8608_vm10, %v13625_v22, %v9549_v27 }
 0x46a   : > { %v13602_v25 = vld [vmem:[%s14081_s10 + $0x37d] sm:$0x40]   ;;  %v9460_v38 = vsel %vm8620_vm13, %v13601_v54, %v9456_v34  ;;  %v13539_v0 = vld [vmem:[%s14081_s10 + $0x185] sm:$0x40]   ;;  %v9215_v14 = vsel %vm8620_vm13, %v13538_v59, %v9211_v49  ;;  %v13627_v15 = vld [vmem:[%s14081_s10 + $0x317] sm:$0x10]   ;;  %v9557_v11 = vsel %vm8612_vm11, %v13626_v5, %v9553_v46 }
 0x46b   : > { %v13605_v62 = vld [vmem:[%s14081_s10 + $0x20b] sm:$0x1]   ;;  %v13603_v48 = vld [vmem:[%s14081_s10 + $0x3bc] sm:$0x80]   ;;  %v9464_v50 = vsel %vm8624_vm14, %v13602_v25, %v9460_v38  ;;  %v9219_v24 = vsel %vm8624_vm14, %v13539_v0, %v9215_v14  ;;  %v13628_v9 = vld [vmem:[%s14081_s10 + $0x356] sm:$0x20]   ;;  %v9561_v51 = vsel %vm8616_vm12, %v13627_v15, %v9557_v11 }
 0x46c   : > { %v13606_v42 = vld [vmem:[%s14081_s10 + $0x24a] sm:$0x2]   ;;  %9364 = vrot.lane.b32.xlu0 %v9363_v57, %s14021_s7  ;;  %v13560_v35 = vld [vmem:[%s14081_s10 + $0x23] sm:$0x1]   ;;  %v9468_v28 = vsel %vm8628_vm15, %v13603_v48, %v9464_v50  ;;  %v13629_v44 = vld [vmem:[%s14081_s10 + $0x395] sm:$0x40]   ;;  %v9565_v39 = vsel %vm8620_vm13, %v13628_v9, %v9561_v51 }
 0x46d   : > { %v9479_v3 = vsel %vm8604_vm9, %v13606_v42, %v13605_v62  ;;  %v13607_v41 = vld [vmem:[%s14081_s10 + $0x289] sm:$0x4]   ;;  %v13561_v4 = vld [vmem:[%s14081_s10 + $0x62] sm:$0x2]   ;;  %v13630_v33 = vld [vmem:[%s14081_s10 + $0x3d4] sm:$0x80]   ;;  %v9569_v16 = vsel %vm8624_vm14, %v13629_v44, %v9565_v39 }
 0x46e   : > { %v13608_v1 = vld [vmem:[%s14081_s10 + $0x2c8] sm:$0x8]   ;;  %v9483_v58 = vsel %vm8608_vm10, %v13607_v41, %v9479_v3  ;;  %9399 = vrot.lane.b32.xlu1 %v9398_v12, %s14021_s7  ;;  %v13562_v43 = vld [vmem:[%s14081_s10 + $0xa1] sm:$0x4]   ;;  %v9304_v52 = vsel %vm8604_vm9, %v13561_v4, %v13560_v35  ;;  %v13650_v38 = vld [vmem:[%s14081_s10 + $0x233] sm:$0x1]  }
 0x46f   : > { %v13609_v40 = vld [vmem:[%s14081_s10 + $0x307] sm:$0x10]   ;;  %v9487_v19 = vsel %vm8612_vm11, %v13608_v1, %v9483_v58  ;;  %v13563_v32 = vld [vmem:[%s14081_s10 + $0xe0] sm:$0x8]   ;;  %v9308_v45 = vsel %vm8608_vm10, %v13562_v43, %v9304_v52  ;;  %v13651_v37 = vld [vmem:[%s14081_s10 + $0x272] sm:$0x2]  }
 0x470   : > { %v13540_v13 = vld [vmem:[%s14081_s10 + $0x1c4] sm:$0x80]   ;;  %v9491_v60 = vsel %vm8616_vm12, %v13609_v40, %v9487_v19  ;;  %v13564_v20 = vld [vmem:[%s14081_s10 + $0x11f] sm:$0x10]   ;;  %v9312_v21 = vsel %vm8612_vm11, %v13563_v32, %v9308_v45  ;;  %v13652_v0 = vld [vmem:[%s14081_s10 + $0x2b1] sm:$0x4]   ;;  %v9654_v3 = vsel %vm8604_vm9, %v13651_v37, %v13650_v38 }
 0x471   : > { %v13610_v17 = vld [vmem:[%s14081_s10 + $0x346] sm:$0x20]   ;;  %v9223_v8 = vsel %vm8628_vm15, %v13540_v13, %v9219_v24  ;;  %v13565_v63 = vld [vmem:[%s14081_s10 + $0x15e] sm:$0x20]   ;;  %v9316_v53 = vsel %vm8616_vm12, %v13564_v20, %v9312_v21  ;;  %v13653_v41 = vld [vmem:[%s14081_s10 + $0x2f0] sm:$0x8]   ;;  %v9658_v49 = vsel %vm8608_vm10, %v13652_v0, %v9654_v3 }
 0x472   : > { %v13611_v18 = vld [vmem:[%s14081_s10 + $0x385] sm:$0x40]   ;;  %v9495_v29 = vsel %vm8620_vm13, %v13610_v17, %v9491_v60  ;;  %9224 = vrot.lane.b32.xlu2 %v9223_v8, %s14021_s7  ;;  %v13566_v10 = vld [vmem:[%s14081_s10 + $0x19d] sm:$0x40]   ;;  %v9320_v61 = vsel %vm8620_vm13, %v13565_v63, %v9316_v53  ;;  %v13654_v1 = vld [vmem:[%s14081_s10 + $0x32f] sm:$0x10]   ;;  %v9573_v17 = vsel %vm8628_vm15, %v13630_v33, %v9569_v16  ;;  %v9662_v50 = vsel %vm8612_vm11, %v13653_v41, %v9658_v49 }
 0x473   : > { %v13612_v30 = vld [vmem:[%s14081_s10 + $0x3c4] sm:$0x80]   ;;  %v9499_v6 = vsel %vm8624_vm14, %v13611_v18, %v9495_v29  ;;  %v13632_v26 = vld [vmem:[%s14081_s10 + $0x223] sm:$0x1]   ;;  %v9324_v62 = vsel %vm8624_vm14, %v13566_v10, %v9320_v61  ;;  %v13655_v13 = vld [vmem:[%s14081_s10 + $0x36e] sm:$0x20]   ;;  %v9666_v22 = vsel %vm8616_vm12, %v13654_v1, %v9662_v50 }
 0x474   : > { %v13633_v47 = vld [vmem:[%s14081_s10 + $0x262] sm:$0x2]   ;;  %9469 = vrot.lane.b32.xlu0 %v9468_v28, %s14021_s7  ;;  %v9503_v31 = vsel %vm8628_vm15, %v13612_v30, %v9499_v6  ;;  %v13587_v58 = vld [vmem:[%s14081_s10 + $0x3b] sm:$0x1]   ;;  %v13656_v24 = vld [vmem:[%s14081_s10 + $0x3ad] sm:$0x40]   ;;  %v9670_v5 = vsel %vm8620_vm13, %v13655_v13, %v9666_v22 }
 0x475   : > { %v9584_v54 = vsel %vm8604_vm9, %v13633_v47, %v13632_v26  ;;  %v13634_v23 = vld [vmem:[%s14081_s10 + $0x2a1] sm:$0x4]   ;;  %v13588_v14 = vld [vmem:[%s14081_s10 + $0x7a] sm:$0x2]   ;;  %v13657_v43 = vld [vmem:[%s14081_s10 + $0x3ec] sm:$0x80]   ;;  %v9674_v52 = vsel %vm8624_vm14, %v13656_v24, %v9670_v5 }
 0x476   : > { %v13635_v57 = vld [vmem:[%s14081_s10 + $0x2e0] sm:$0x8]   ;;  %v9588_v34 = vsel %vm8608_vm10, %v13634_v23, %v9584_v54  ;;  %9504 = vrot.lane.b32.xlu1 %v9503_v31, %s14021_s7  ;;  %v13589_v19 = vld [vmem:[%s14081_s10 + $0xb9] sm:$0x4]   ;;  %v9409_v60 = vsel %vm8604_vm9, %v13588_v14, %v13587_v58  ;;  %v13677_v39 = vld [vmem:[%s14081_s10 + $0xd] sm:$0x1]  }
 0x477   : > { %v13636_v7 = vld [vmem:[%s14081_s10 + $0x31f] sm:$0x10]   ;;  %v9592_v59 = vsel %vm8612_vm11, %v13635_v57, %v9588_v34  ;;  %v13590_v55 = vld [vmem:[%s14081_s10 + $0xf8] sm:$0x8]   ;;  %v9413_v15 = vsel %vm8608_vm10, %v13589_v19, %v9409_v60  ;;  %v13678_v45 = vld [vmem:[%s14081_s10 + $0x4c] sm:$0x2]  }
 0x478   : > { %v13567_v36 = vld [vmem:[%s14081_s10 + $0x1dc] sm:$0x80]   ;;  %v9596_v42 = vsel %vm8616_vm12, %v13636_v7, %v9592_v59  ;;  %v13591_v18 = vld [vmem:[%s14081_s10 + $0x137] sm:$0x10]   ;;  %v9417_v46 = vsel %vm8612_vm11, %v13590_v55, %v9413_v15  ;;  %v13679_v10 = vld [vmem:[%s14081_s10 + $0x8b] sm:$0x4]   ;;  %v9759_v54 = vsel %vm8604_vm9, %v13678_v45, %v13677_v39 }
 0x479   : > { %v13637_v25 = vld [vmem:[%s14081_s10 + $0x35e] sm:$0x20]   ;;  %v9328_v40 = vsel %vm8628_vm15, %v13567_v36, %v9324_v62  ;;  %v13592_v27 = vld [vmem:[%s14081_s10 + $0x176] sm:$0x20]   ;;  %v9421_v32 = vsel %vm8616_vm12, %v13591_v18, %v9417_v46  ;;  %v13680_v23 = vld [vmem:[%s14081_s10 + $0xca] sm:$0x8]   ;;  %v9763_v53 = vsel %vm8608_vm10, %v13679_v10, %v9759_v54 }
 0x47a   : > { %v13638_v2 = vld [vmem:[%s14081_s10 + $0x39d] sm:$0x40]   ;;  %v9600_v12 = vsel %vm8620_vm13, %v13637_v25, %v9596_v42  ;;  %9329 = vrot.lane.b32.xlu2 %v9328_v40, %s14021_s7  ;;  %v13593_v8 = vld [vmem:[%s14081_s10 + $0x1b5] sm:$0x40]   ;;  %v9425_v20 = vsel %vm8620_vm13, %v13592_v27, %v9421_v32  ;;  %v13681_v57 = vld [vmem:[%s14081_s10 + $0x109] sm:$0x10]   ;;  %v9678_v25 = vsel %vm8628_vm15, %v13657_v43, %v9674_v52  ;;  %v9767_v16 = vsel %vm8612_vm11, %v13680_v23, %v9763_v53 }
 0x47b   : > { %v13639_v48 = vld [vmem:[%s14081_s10 + $0x3dc] sm:$0x80]   ;;  %v9604_v56 = vsel %vm8624_vm14, %v13638_v2, %v9600_v12  ;;  %v13659_v29 = vld [vmem:[%s14081_s10 + $0x23b] sm:$0x1]   ;;  %v9429_v26 = vsel %vm8624_vm14, %v13593_v8, %v9425_v20  ;;  %v13682_v36 = vld [vmem:[%s14081_s10 + $0x148] sm:$0x20]   ;;  %v9771_v0 = vsel %vm8616_vm12, %v13681_v57, %v9767_v16 }
 0x47c   : > { %v13660_v30 = vld [vmem:[%s14081_s10 + $0x27a] sm:$0x2]   ;;  %9574 = vrot.lane.b32.xlu0 %v9573_v17, %s14021_s7  ;;  %v9608_v4 = vsel %vm8628_vm15, %v13639_v48, %v9604_v56  ;;  %v13614_v34 = vld [vmem:[%s14081_s10 + $0x213] sm:$0x1]   ;;  %v13683_v62 = vld [vmem:[%s14081_s10 + $0x187] sm:$0x40]   ;;  %v9775_v41 = vsel %vm8620_vm13, %v13682_v36, %v9771_v0 }
 0x47d   : > { %v9689_v9 = vsel %vm8604_vm9, %v13660_v30, %v13659_v29  ;;  %v13661_v35 = vld [vmem:[%s14081_s10 + $0x2b9] sm:$0x4]   ;;  %v13615_v61 = vld [vmem:[%s14081_s10 + $0x252] sm:$0x2]   ;;  %v13686_v12 = vld [vmem:[%s14081_s10 + $0x15] sm:$0x1]   ;;  %v9779_v60 = vsel %vm8624_vm14, %v13683_v62, %v9775_v41 }
 0x47e   : > { %v13662_v28 = vld [vmem:[%s14081_s10 + $0x2f8] sm:$0x8]   ;;  %v9693_v51 = vsel %vm8608_vm10, %v13661_v35, %v9689_v9  ;;  %9609 = vrot.lane.b32.xlu1 %v9608_v4, %s14021_s7  ;;  %v13616_v59 = vld [vmem:[%s14081_s10 + $0x291] sm:$0x4]   ;;  %v9514_v42 = vsel %vm8604_vm9, %v13615_v61, %v13614_v34  ;;  %v13687_v48 = vld [vmem:[%s14081_s10 + $0x54] sm:$0x2]  }
 0x47f   : > { %v13663_v11 = vld [vmem:[%s14081_s10 + $0x337] sm:$0x10]   ;;  %v9697_v63 = vsel %vm8612_vm11, %v13662_v28, %v9693_v51  ;;  %v13617_v38 = vld [vmem:[%s14081_s10 + $0x2d0] sm:$0x8]   ;;  %v9518_v1 = vsel %vm8608_vm10, %v13616_v59, %v9514_v42  ;;  %v9794_v13 = vsel %vm8604_vm9, %v13687_v48, %v13686_v12  ;;  %v13688_v58 = vld [vmem:[%s14081_s10 + $0x93] sm:$0x4]  }
 0x480   : > { %v13594_v6 = vld [vmem:[%s14081_s10 + $0x1f4] sm:$0x80]   ;;  %v9701_v47 = vsel %vm8616_vm12, %v13663_v11, %v9697_v63  ;;  %v13618_v2 = vld [vmem:[%s14081_s10 + $0x30f] sm:$0x10]   ;;  %v9522_v49 = vsel %vm8612_vm11, %v13617_v38, %v9518_v1  ;;  %v13689_v17 = vld [vmem:[%s14081_s10 + $0xd2] sm:$0x8]   ;;  %v9798_v22 = vsel %vm8608_vm10, %v13688_v58, %v9794_v13 }
 0x481   : > { %v13664_v44 = vld [vmem:[%s14081_s10 + $0x376] sm:$0x20]   ;;  %v9433_v7 = vsel %vm8628_vm15, %v13594_v6, %v9429_v26  ;;  %v13619_v3 = vld [vmem:[%s14081_s10 + $0x34e] sm:$0x20]   ;;  %v13690_v50 = vld [vmem:[%s14081_s10 + $0x111] sm:$0x10]   ;;  %v9526_v55 = vsel %vm8616_vm12, %v13618_v2, %v9522_v49  ;;  %v9802_v27 = vsel %vm8612_vm11, %v13689_v17, %v9798_v22 }
 0x482   : > { %v13665_v21 = vld [vmem:[%s14081_s10 + $0x3b5] sm:$0x40]   ;;  %v9705_v31 = vsel %vm8620_vm13, %v13664_v44, %v9701_v47  ;;  %9434 = vrot.lane.b32.xlu2 %v9433_v7, %s14021_s7  ;;  %v13620_v40 = vld [vmem:[%s14081_s10 + $0x38d] sm:$0x40]   ;;  %v13684_v19 = vld [vmem:[%s14081_s10 + $0x1c6] sm:$0x80]   ;;  %v9530_v18 = vsel %vm8620_vm13, %v13619_v3, %v9526_v55  ;;  %v9806_v30 = vsel %vm8616_vm12, %v13690_v50, %v9802_v27 }
 0x483   : > { %v13666_v33 = vld [vmem:[%s14081_s10 + $0x3f4] sm:$0x80]   ;;  %v9709_v37 = vsel %vm8624_vm14, %v13665_v21, %v9705_v31  ;;  %v13621_v56 = vld [vmem:[%s14081_s10 + $0x3cc] sm:$0x80]   ;;  %v13691_v24 = vld [vmem:[%s14081_s10 + $0x150] sm:$0x20]   ;;  %v9534_v29 = vsel %vm8624_vm14, %v13620_v40, %v9530_v18  ;;  %v9783_v44 = vsel %vm8628_vm15, %v13684_v19, %v9779_v60 }
 0x484   : > { %9679 = vrot.lane.b32.xlu0 %v9678_v25, %s14021_s7  ;;  %v9713_v14 = vsel %vm8628_vm15, %v13666_v33, %v9709_v37  ;;  %v13704_v5 = vld [vmem:[%s14081_s10 + $0x25] sm:$0x1]   ;;  %v13692_v46 = vld [vmem:[%s14081_s10 + $0x18f] sm:$0x40]   ;;  %v9538_v11 = vsel %vm8628_vm15, %v13621_v56, %v9534_v29  ;;  %v9810_v4 = vsel %vm8620_vm13, %v13691_v24, %v9806_v30  ;;  %v13641_v51 = vld [vmem:[%s14081_s10 + $0x22b] sm:$0x1]  }
 0x485   : > { %v13705_v15 = vld [vmem:[%s14081_s10 + $0x64] sm:$0x2]   ;;  %v13693_v43 = vld [vmem:[%s14081_s10 + $0x1ce] sm:$0x80]   ;;  %v13642_v20 = vld [vmem:[%s14081_s10 + $0x26a] sm:$0x2]   ;;  %v9814_v45 = vsel %vm8624_vm14, %v13692_v46, %v9810_v4 }
 0x486   : > { %v13706_v8 = vld [vmem:[%s14081_s10 + $0xa3] sm:$0x4]   ;;  %v9864_v9 = vsel %vm8604_vm9, %v13705_v15, %v13704_v5  ;;  %9714 = vrot.lane.b32.xlu1 %v9713_v14, %s14021_s7  ;;  %v13643_v63 = vld [vmem:[%s14081_s10 + $0x2a9] sm:$0x4]   ;;  %v9619_v47 = vsel %vm8604_vm9, %v13642_v20, %v13641_v51  ;;  %v13713_v31 = vld [vmem:[%s14081_s10 + $0x2d] sm:$0x1]   ;;  %v9818_v61 = vsel %vm8628_vm15, %v13693_v43, %v9814_v45 }
 0x487   : > { %v13707_v35 = vld [vmem:[%s14081_s10 + $0xe2] sm:$0x8]   ;;  %v9868_v32 = vsel %vm8608_vm10, %v13706_v8, %v9864_v9  ;;  %v13644_v39 = vld [vmem:[%s14081_s10 + $0x2e8] sm:$0x8]   ;;  %v9623_v57 = vsel %vm8608_vm10, %v13643_v63, %v9619_v47  ;;  %v13714_v33 = vld [vmem:[%s14081_s10 + $0x6c] sm:$0x2]  }
 0x488   : > { %v13708_v28 = vld [vmem:[%s14081_s10 + $0x121] sm:$0x10]   ;;  %v9872_v52 = vsel %vm8612_vm11, %v13707_v35, %v9868_v32  ;;  %v13645_v21 = vld [vmem:[%s14081_s10 + $0x327] sm:$0x10]   ;;  %v9627_v53 = vsel %vm8612_vm11, %v13644_v39, %v9623_v57  ;;  %v9899_v36 = vsel %vm8604_vm9, %v13714_v33, %v13713_v31  ;;  %v13715_v34 = vld [vmem:[%s14081_s10 + $0xab] sm:$0x4]  }
 0x489   : > { %v13709_v6 = vld [vmem:[%s14081_s10 + $0x160] sm:$0x20]   ;;  %v9876_v10 = vsel %vm8616_vm12, %v13708_v28, %v9872_v52  ;;  %v13646_v54 = vld [vmem:[%s14081_s10 + $0x366] sm:$0x20]   ;;  %v13716_v25 = vld [vmem:[%s14081_s10 + $0xea] sm:$0x8]   ;;  %v9631_v38 = vsel %vm8616_vm12, %v13645_v21, %v9627_v53  ;;  %v9903_v0 = vsel %vm8608_vm10, %v13715_v34, %v9899_v36 }
 0x48a   : > { %9539 = vrot.lane.b32.xlu2 %v9538_v11, %s14021_s7  ;;  %v13710_v26 = vld [vmem:[%s14081_s10 + $0x19f] sm:$0x40]   ;;  %v9880_v23 = vsel %vm8620_vm13, %v13709_v6, %v9876_v10  ;;  %v13647_v7 = vld [vmem:[%s14081_s10 + $0x3a5] sm:$0x40]   ;;  %v13717_v16 = vld [vmem:[%s14081_s10 + $0x129] sm:$0x10]   ;;  %v9635_v2 = vsel %vm8620_vm13, %v13646_v54, %v9631_v38  ;;  %v9907_v3 = vsel %vm8612_vm11, %v13716_v25, %v9903_v0 }
 0x48b   : > { %v13711_v59 = vld [vmem:[%s14081_s10 + $0x1de] sm:$0x80]   ;;  %v13648_v37 = vld [vmem:[%s14081_s10 + $0x3e4] sm:$0x80]   ;;  %v13718_v62 = vld [vmem:[%s14081_s10 + $0x168] sm:$0x20]   ;;  %v9884_v42 = vsel %vm8624_vm14, %v13710_v26, %v9880_v23  ;;  %v9639_v12 = vsel %vm8624_vm14, %v13647_v7, %v9635_v2  ;;  %v9911_v48 = vsel %vm8616_vm12, %v13717_v16, %v9907_v3 }
 0x48c   : > { %9784 = vrot.lane.b32.xlu0 %v9783_v44, %s14021_s7  ;;  %v13731_v41 = vld [vmem:[%s14081_s10 + $0x3d] sm:$0x1]   ;;  %v13719_v49 = vld [vmem:[%s14081_s10 + $0x1a7] sm:$0x40]   ;;  %v9643_v50 = vsel %vm8628_vm15, %v13648_v37, %v9639_v12  ;;  %v9915_v14 = vsel %vm8620_vm13, %v13718_v62, %v9911_v48  ;;  %v13668_v22 = vld [vmem:[%s14081_s10 + $0x5] sm:$0x1]   ;;  %v9888_v24 = vsel %vm8628_vm15, %v13711_v59, %v9884_v42 }
 0x48d   : > { %v13732_v1 = vld [vmem:[%s14081_s10 + $0x7c] sm:$0x2]   ;;  %v13720_v19 = vld [vmem:[%s14081_s10 + $0x1e6] sm:$0x80]   ;;  %v13669_v18 = vld [vmem:[%s14081_s10 + $0x44] sm:$0x2]   ;;  %v9919_v15 = vsel %vm8624_vm14, %v13719_v49, %v9915_v14 }
 0x48e   : > { %v13733_v40 = vld [vmem:[%s14081_s10 + $0xbb] sm:$0x4]   ;;  %v9969_v13 = vsel %vm8604_vm9, %v13732_v1, %v13731_v41  ;;  %9819 = vrot.lane.b32.xlu1 %v9818_v61, %s14021_s7  ;;  %v13670_v27 = vld [vmem:[%s14081_s10 + $0x83] sm:$0x4]   ;;  %v9724_v30 = vsel %vm8604_vm9, %v13669_v18, %v13668_v22  ;;  %v9923_v20 = vsel %vm8628_vm15, %v13720_v19, %v9919_v15  ;;  %v13758_v23 = vld [vmem:[%s14081_s10 + $0x215] sm:$0x1]  }
 0x48f   : > { %v13734_v58 = vld [vmem:[%s14081_s10 + $0xfa] sm:$0x8]   ;;  %v9973_v55 = vsel %vm8608_vm10, %v13733_v40, %v9969_v13  ;;  %v13671_v5 = vld [vmem:[%s14081_s10 + $0xc2] sm:$0x8]   ;;  %v9728_v28 = vsel %vm8608_vm10, %v13670_v27, %v9724_v30  ;;  %v13759_v57 = vld [vmem:[%s14081_s10 + $0x254] sm:$0x2]  }
 0x490   : > { %v13735_v17 = vld [vmem:[%s14081_s10 + $0x139] sm:$0x10]   ;;  %v9977_v60 = vsel %vm8612_vm11, %v13734_v58, %v9973_v55  ;;  %v13672_v46 = vld [vmem:[%s14081_s10 + $0x101] sm:$0x10]   ;;  %v9732_v32 = vsel %vm8612_vm11, %v13671_v5, %v9728_v28  ;;  %v13760_v7 = vld [vmem:[%s14081_s10 + $0x293] sm:$0x4]   ;;  %v10074_v36 = vsel %vm8604_vm9, %v13759_v57, %v13758_v23 }
 0x491   : > { %v13736_v56 = vld [vmem:[%s14081_s10 + $0x178] sm:$0x20]   ;;  %v9981_v8 = vsel %vm8616_vm12, %v13735_v17, %v9977_v60  ;;  %v13673_v9 = vld [vmem:[%s14081_s10 + $0x140] sm:$0x20]   ;;  %v9736_v39 = vsel %vm8616_vm12, %v13672_v46, %v9732_v32  ;;  %v13761_v34 = vld [vmem:[%s14081_s10 + $0x2d2] sm:$0x8]   ;;  %v10078_v38 = vsel %vm8608_vm10, %v13760_v7, %v10074_v36 }
 0x492   : > { %9644 = vrot.lane.b32.xlu2 %v9643_v50, %s14021_s7  ;;  %v13737_v29 = vld [vmem:[%s14081_s10 + $0x1b7] sm:$0x40]   ;;  %v9985_v35 = vsel %vm8620_vm13, %v13736_v56, %v9981_v8  ;;  %v13674_v11 = vld [vmem:[%s14081_s10 + $0x17f] sm:$0x40]   ;;  %v9740_v21 = vsel %vm8620_vm13, %v13673_v9, %v9736_v39  ;;  %v13762_v25 = vld [vmem:[%s14081_s10 + $0x311] sm:$0x10]   ;;  %v10082_v62 = vsel %vm8612_vm11, %v13761_v34, %v10078_v38 }
 0x493   : > { %v13740_v4 = vld [vmem:[%s14081_s10 + $0x205] sm:$0x1]   ;;  %v13738_v63 = vld [vmem:[%s14081_s10 + $0x1f6] sm:$0x80]   ;;  %v9989_v47 = vsel %vm8624_vm14, %v13737_v29, %v9985_v35  ;;  %v9744_v31 = vsel %vm8624_vm14, %v13674_v11, %v9740_v21  ;;  %v13763_v37 = vld [vmem:[%s14081_s10 + $0x350] sm:$0x20]   ;;  %v10086_v1 = vsel %vm8616_vm12, %v13762_v25, %v10082_v62 }
 0x494   : > { %v13741_v43 = vld [vmem:[%s14081_s10 + $0x244] sm:$0x2]   ;;  %9889 = vrot.lane.b32.xlu0 %v9888_v24, %s14021_s7  ;;  %v9993_v0 = vsel %vm8628_vm15, %v13738_v63, %v9989_v47  ;;  %v13764_v42 = vld [vmem:[%s14081_s10 + $0x38f] sm:$0x40]   ;;  %v8155_v2 = vld [vmem:[%s14081_s10] ss:$2 sm:$0xff]   ;;  %v10090_v12 = vsel %vm8620_vm13, %v13763_v37, %v10086_v1 }
 0x495   : > { %v10004_v6 = vsel %vm8604_vm9, %v13741_v43, %v13740_v4  ;;  %v13742_v51 = vld [vmem:[%s14081_s10 + $0x283] sm:$0x4]   ;;  %v13201_v3 = vld [vmem:[%s14081_s10 + $0x40] ss:$2 sm:$0xff]   ;;  %v13765_v49 = vld [vmem:[%s14081_s10 + $0x3ce] sm:$0x80]   ;;  %v10094_v50 = vsel %vm8624_vm14, %v13764_v42, %v10090_v12 }
 0x496   : > { %v13743_v44 = vld [vmem:[%s14081_s10 + $0x2c2] sm:$0x8]   ;;  %v10008_v10 = vsel %vm8608_vm10, %v13742_v51, %v10004_v6  ;;  %9924 = vrot.lane.b32.xlu1 %v9923_v20, %s14021_s7  ;;  %8157 = vst.msk [vmem:[%s14087_s14] ss:$8 sm:$0xf] %vm8156_vm0, %v8155_v2   ;;  %v10098_v56 = vsel %vm8628_vm15, %v13765_v49, %v10094_v50 }
 0x497   : > { %v13744_v52 = vld [vmem:[%s14081_s10 + $0x301] sm:$0x10]   ;;  %v10012_v54 = vsel %vm8612_vm11, %v13743_v44, %v10008_v10  ;;  %v13213_v40 = vld [vmem:[%s14081_s10 + $0x80] ss:$2 sm:$0xff]   ;;  %v13695_v55 = vld [vmem:[%s14081_s10 + $0x1d] sm:$0x1]  }
 0x498   : > { %v13675_v45 = vld [vmem:[%s14081_s10 + $0x1be] sm:$0x80]   ;;  %v10016_v33 = vsel %vm8616_vm12, %v13744_v52, %v10012_v54  ;;  %13202 = vst.msk [vmem:[%s14087_s14 + $0x1] ss:$8 sm:$0xf] %vm8156_vm0, %v13201_v3  }
 0x499   : > { %v13745_v26 = vld [vmem:[%s14081_s10 + $0x340] sm:$0x20]   ;;  %v9748_v16 = vsel %vm8628_vm15, %v13675_v45, %v9744_v31  ;;  %v13225_v48 = vld [vmem:[%s14081_s10 + $0xc0] ss:$2 sm:$0xff]   ;;  %v13696_v22 = vld [vmem:[%s14081_s10 + $0x5c] sm:$0x2]  }
 0x49a   : > { %v13746_v53 = vld [vmem:[%s14081_s10 + $0x37f] sm:$0x40]   ;;  %v10020_v61 = vsel %vm8620_vm13, %v13745_v26, %v10016_v33  ;;  %9749 = vrot.lane.b32.xlu2 %v9748_v16, %s14021_s7  ;;  %13214 = vst.msk [vmem:[%s14087_s14 + $0x2] ss:$8 sm:$0xf] %vm8156_vm0, %v13213_v40   ;;  %v9829_v24 = vsel %vm8604_vm9, %v13696_v22, %v13695_v55 }
 0x49b   : > { %v13747_v59 = vld [vmem:[%s14081_s10 + $0x3be] sm:$0x80]   ;;  %v10024_v41 = vsel %vm8624_vm14, %v13746_v53, %v10020_v61  ;;  %v13237_v13 = vld [vmem:[%s14081_s10 + $0x100] ss:$2 sm:$0xff]   ;;  %v13697_v60 = vld [vmem:[%s14081_s10 + $0x9b] sm:$0x4]  }
 0x49c   : > { %9994 = vrot.lane.b32.xlu0 %v9993_v0, %s14021_s7  ;;  %v10028_v58 = vsel %vm8628_vm15, %v13747_v59, %v10024_v41  ;;  %13226 = vst.msk [vmem:[%s14087_s14 + $0x3] ss:$8 sm:$0xf] %vm8156_vm0, %v13225_v48   ;;  %v13249_v17 = vld [vmem:[%s14081_s10 + $0x140] ss:$2 sm:$0xff]   ;;  %v9833_v27 = vsel %vm8608_vm10, %v13697_v60, %v9829_v24 }
 0x49d   : > { %13238 = vst.msk [vmem:[%s14087_s14 + $0x4] ss:$8 sm:$0xf] %vm8156_vm0, %v13237_v13   ;;  %v13261_v14 = vld [vmem:[%s14081_s10 + $0x180] ss:$2 sm:$0xff]  }
 0x49e   : > { %13250 = vst.msk [vmem:[%s14087_s14 + $0x5] ss:$8 sm:$0xf] %vm8156_vm0, %v13249_v17   ;;  %v13273_v19 = vld [vmem:[%s14081_s10 + $0x1c0] ss:$2 sm:$0xff]   ;;  %10029 = vrot.lane.b32.xlu1 %v10028_v58, %s14021_s7  ;;  %v19437_v18 = vpop.permute.xlu2 %8769  }
 0x49f   : > { %13262 = vst.msk [vmem:[%s14087_s14 + $0x6] ss:$8 sm:$0xf] %vm8156_vm0, %v13261_v14   ;;  %v13698_v5 = vld [vmem:[%s14081_s10 + $0xda] sm:$0x8]  }
 0x4a0   : > { %13274 = vst.msk [vmem:[%s14087_s14 + $0x7] ss:$8 sm:$0xf] %vm8156_vm0, %v13273_v19   ;;  %v9837_v15 = vsel %vm8612_vm11, %v13698_v5, %v9833_v27  ;;  %v13699_v8 = vld [vmem:[%s14081_s10 + $0x119] sm:$0x10]  }
 0x4a1   : > { %8158 = vst.msk [vmem:[%s14087_s14] ss:$8 sm:$0xf0] %vm8156_vm0, %v8155_v2   ;;  %v9841_v29 = vsel %vm8616_vm12, %v13699_v8, %v9837_v15  ;;  %v13700_v30 = vld [vmem:[%s14081_s10 + $0x158] sm:$0x20]  }
 0x4a2   : > { %13203 = vst.msk [vmem:[%s14087_s14 + $0x1] ss:$8 sm:$0xf0] %vm8156_vm0, %v13201_v3   ;;  %v9845_v9 = vsel %vm8620_vm13, %v13700_v30, %v9841_v29  ;;  %v13701_v35 = vld [vmem:[%s14081_s10 + $0x197] sm:$0x40]  }
 0x4a3   : > { %13215 = vst.msk [vmem:[%s14087_s14 + $0x2] ss:$8 sm:$0xf0] %vm8156_vm0, %v13213_v40   ;;  %v9849_v28 = vsel %vm8624_vm14, %v13701_v35, %v9845_v9  ;;  %v13702_v11 = vld [vmem:[%s14081_s10 + $0x1d6] sm:$0x80]  }
 0x4a4   : > { %10099 = vrot.lane.b32.xlu0 %v10098_v56, %s14021_s7  ;;  %13227 = vst.msk [vmem:[%s14087_s14 + $0x3] ss:$8 sm:$0xf0] %vm8156_vm0, %v13225_v48   ;;  %v13767_v4 = vld [vmem:[%s14081_s10 + $0x21d] sm:$0x1]   ;;  %v9853_v43 = vsel %vm8628_vm15, %v13702_v11, %v9849_v28 }
 0x4a5   : > { %13239 = vst.msk [vmem:[%s14087_s14 + $0x4] ss:$8 sm:$0xf0] %vm8156_vm0, %v13237_v13   ;;  %v13768_v32 = vld [vmem:[%s14081_s10 + $0x25c] sm:$0x2]   ;;  %9854 = vrot.lane.b32.xlu2 %v9853_v43, %s14021_s7 }
 0x4a6   : > { %v8631_v46 = vpop.permute.xlu0 %8630   ;;  %13251 = vst.msk [vmem:[%s14087_s14 + $0x5] ss:$8 sm:$0xf0] %vm8156_vm0, %v13249_v17   ;;  %v10109_v6 = vsel %vm8604_vm9, %v13768_v32, %v13767_v4  ;;  %v13769_v51 = vld [vmem:[%s14081_s10 + $0x29b] sm:$0x4]  }
 0x4a7   : > { %8633 = vst.msk [vmem:[%s14087_s14] sm:$0xff] %vm8632_vm1, %v8631_v46   ;;  %v10113_v44 = vsel %vm8608_vm10, %v13769_v51, %v10109_v6  ;;  %v13770_v52 = vld [vmem:[%s14081_s10 + $0x2da] sm:$0x8]   ;;  %v13785_v21 = vld [vmem:[%s14081_s10 + $0x22d] sm:$0x1]  }
 0x4a8   : > { %13263 = vst.msk [vmem:[%s14087_s14 + $0x6] ss:$8 sm:$0xf0] %vm8156_vm0, %v13261_v14   ;;  %v19474_v20 = vpop.permute.xlu1 %8699   ;;  %v10117_v63 = vsel %vm8612_vm11, %v13770_v52, %v10113_v44  ;;  %v13771_v39 = vld [vmem:[%s14081_s10 + $0x319] sm:$0x10]  }
 0x4a9   : > { %13275 = vst.msk [vmem:[%s14087_s14 + $0x7] ss:$8 sm:$0xf0] %vm8156_vm0, %v13273_v19   ;;  %v13772_v45 = vld [vmem:[%s14081_s10 + $0x358] sm:$0x20]   ;;  %v10121_v26 = vsel %vm8616_vm12, %v13771_v39, %v10117_v63 }
 0x4aa   : > { %v13773_v10 = vld [vmem:[%s14081_s10 + $0x397] sm:$0x40]   ;;  %v13786_v54 = vld [vmem:[%s14081_s10 + $0x26c] sm:$0x2]   ;;  %v10125_v23 = vsel %vm8620_vm13, %v13772_v45, %v10121_v26  ;;  %v13195_v37 = vld [vmem:[%s14081_s10 + $0x20] ss:$2 sm:$0xff]   ;;  %v19522_v13 = vpop.permute.xlu2 %8804  }
 0x4ab   : > { %v13774_v47 = vld [vmem:[%s14081_s10 + $0x3d6] sm:$0x80]   ;;  %v10179_v57 = vsel %vm8604_vm9, %v13786_v54, %v13785_v21  ;;  %v13787_v7 = vld [vmem:[%s14081_s10 + $0x2ab] sm:$0x4]   ;;  %v10129_v53 = vsel %vm8624_vm14, %v13773_v10, %v10125_v23  ;;  %v13207_v0 = vld [vmem:[%s14081_s10 + $0x60] ss:$2 sm:$0xff]  }
 0x4ac   : > { %v13788_v31 = vld [vmem:[%s14081_s10 + $0x2ea] sm:$0x8]   ;;  %v10183_v36 = vsel %vm8608_vm10, %v13787_v7, %v10179_v57  ;;  %v10133_v59 = vsel %vm8628_vm15, %v13774_v47, %v10129_v53  ;;  %v13219_v62 = vld [vmem:[%s14081_s10 + $0xa0] ss:$2 sm:$0xff]   ;;  %v13192_v50 = vld [vmem:[%s14081_s10 + $0x10] ss:$2 sm:$0xff]  }
 0x4ad   : > { %v13789_v33 = vld [vmem:[%s14081_s10 + $0x329] sm:$0x10]   ;;  %v10187_v38 = vsel %vm8612_vm11, %v13788_v31, %v10183_v36  ;;  %10134 = vrot.lane.b32.xlu1 %v10133_v59, %s14021_s7  ;;  %13196 = vst.msk [vmem:[%s14087_s14 + $0x80] ss:$8 sm:$0xf] %vm8156_vm0, %v13195_v37  }
 0x4ae   : > { %v13790_v34 = vld [vmem:[%s14081_s10 + $0x368] sm:$0x20]   ;;  %v19494_v61 = vpop.permute.xlu0 %8664   ;;  %v10191_v42 = vsel %vm8616_vm12, %v13789_v33, %v10187_v38  ;;  %v13231_v2 = vld [vmem:[%s14081_s10 + $0xe0] ss:$2 sm:$0xff]   ;;  %v13722_v14 = vld [vmem:[%s14081_s10 + $0x35] sm:$0x1]  }
 0x4af   : > { %v13791_v25 = vld [vmem:[%s14081_s10 + $0x3a7] sm:$0x40]   ;;  %v10195_v3 = vsel %vm8620_vm13, %v13790_v34, %v10191_v42  ;;  %13208 = vst.msk [vmem:[%s14087_s14 + $0x81] ss:$8 sm:$0xf] %vm8156_vm0, %v13207_v0  }
 0x4b0   : > { %v13792_v16 = vld [vmem:[%s14081_s10 + $0x3e6] sm:$0x80]   ;;  %v13243_v41 = vld [vmem:[%s14081_s10 + $0x120] ss:$2 sm:$0xff]   ;;  %v10199_v1 = vsel %vm8624_vm14, %v13791_v25, %v10195_v3  ;;  %v19524_v58 = vpop.permute.xlu1 %8734   ;;  %v13204_v19 = vld [vmem:[%s14081_s10 + $0x50] ss:$2 sm:$0xff]  }
 0x4b1   : > { %13220 = vst.msk [vmem:[%s14087_s14 + $0x82] ss:$8 sm:$0xf] %vm8156_vm0, %v13219_v62   ;;  %v13255_v40 = vld [vmem:[%s14081_s10 + $0x160] ss:$2 sm:$0xff]   ;;  %v10203_v12 = vsel %vm8628_vm15, %v13792_v16, %v10199_v1 }
 0x4b2   : > { %13232 = vst.msk [vmem:[%s14087_s14 + $0x83] ss:$8 sm:$0xf] %vm8156_vm0, %v13231_v2   ;;  %v13267_v48 = vld [vmem:[%s14081_s10 + $0x1a0] ss:$2 sm:$0xff]   ;;  %10204 = vrot.lane.b32.xlu0 %v10203_v12, %s14021_s7  ;;  %v19628_v25 = vpop.permute.xlu2 %8909  }
 0x4b3   : > { %13244 = vst.msk [vmem:[%s14087_s14 + $0x84] ss:$8 sm:$0xf] %vm8156_vm0, %v13243_v41   ;;  %v13279_v49 = vld [vmem:[%s14081_s10 + $0x1e0] ss:$2 sm:$0xff]  }
 0x4b4   : > { %13256 = vst.msk [vmem:[%s14087_s14 + $0x85] ss:$8 sm:$0xf] %vm8156_vm0, %v13255_v40   ;;  %v13723_v55 = vld [vmem:[%s14081_s10 + $0x74] sm:$0x2]  }
 0x4b5   : > { %13268 = vst.msk [vmem:[%s14087_s14 + $0x86] ss:$8 sm:$0xf] %vm8156_vm0, %v13267_v48   ;;  %v13216_v56 = vld [vmem:[%s14081_s10 + $0x90] ss:$2 sm:$0xff]   ;;  %v9934_v22 = vsel %vm8604_vm9, %v13723_v55, %v13722_v14 }
 0x4b6   : > { %v19530_v17 = vpop.permute.xlu0 %8839   ;;  %13280 = vst.msk [vmem:[%s14087_s14 + $0x87] ss:$8 sm:$0xf] %vm8156_vm0, %v13279_v49   ;;  %v13724_v24 = vld [vmem:[%s14081_s10 + $0xb3] sm:$0x4]  }
 0x4b7   : > { %13424 = vst.msk [vmem:[%s14087_s14 + $0x80] sm:$0xff] %vm8632_vm1, %v19437_v18   ;;  %v13228_v60 = vld [vmem:[%s14081_s10 + $0xd0] ss:$2 sm:$0xff]   ;;  %v9938_v18 = vsel %vm8608_vm10, %v13724_v24, %v9934_v22  ;;  %v13725_v27 = vld [vmem:[%s14081_s10 + $0xf2] sm:$0x8]  }
 0x4b8   : > { %13197 = vst.msk [vmem:[%s14087_s14 + $0x80] ss:$8 sm:$0xf0] %vm8156_vm0, %v13195_v37   ;;  %v13240_v5 = vld [vmem:[%s14081_s10 + $0x110] ss:$2 sm:$0xff]   ;;  %v9942_v15 = vsel %vm8612_vm11, %v13725_v27, %v9938_v18  ;;  %v19679_v55 = vpop.permute.xlu1 %8874  }
 0x4b9   : > { %13209 = vst.msk [vmem:[%s14087_s14 + $0x81] ss:$8 sm:$0xf0] %vm8156_vm0, %v13207_v0   ;;  %v13726_v8 = vld [vmem:[%s14081_s10 + $0x131] sm:$0x10]  }
 0x4ba   : > { %13221 = vst.msk [vmem:[%s14087_s14 + $0x82] ss:$8 sm:$0xf0] %vm8156_vm0, %v13219_v62   ;;  %v13252_v29 = vld [vmem:[%s14081_s10 + $0x150] ss:$2 sm:$0xff]   ;;  %v9946_v30 = vsel %vm8616_vm12, %v13726_v8, %v9942_v15 }
 0x4bb   : > { %13233 = vst.msk [vmem:[%s14087_s14 + $0x83] ss:$8 sm:$0xf0] %vm8156_vm0, %v13231_v2   ;;  %v13727_v46 = vld [vmem:[%s14081_s10 + $0x170] sm:$0x20]  }
 0x4bc   : > { %13245 = vst.msk [vmem:[%s14087_s14 + $0x84] ss:$8 sm:$0xf0] %vm8156_vm0, %v13243_v41   ;;  %v13264_v9 = vld [vmem:[%s14081_s10 + $0x190] ss:$2 sm:$0xff]   ;;  %v9950_v35 = vsel %vm8620_vm13, %v13727_v46, %v9946_v30 }
 0x4bd   : > { %13257 = vst.msk [vmem:[%s14087_s14 + $0x85] ss:$8 sm:$0xf0] %vm8156_vm0, %v13255_v40   ;;  %v13728_v28 = vld [vmem:[%s14081_s10 + $0x1af] sm:$0x40]  }
 0x4be   : > { %13269 = vst.msk [vmem:[%s14087_s14 + $0x86] ss:$8 sm:$0xf0] %vm8156_vm0, %v13267_v48   ;;  %v13276_v11 = vld [vmem:[%s14081_s10 + $0x1d0] ss:$2 sm:$0xff]   ;;  %v9954_v4 = vsel %vm8624_vm14, %v13728_v28, %v9950_v35 }
 0x4bf   : > { %13281 = vst.msk [vmem:[%s14087_s14 + $0x87] ss:$8 sm:$0xf0] %vm8156_vm0, %v13279_v49   ;;  %v13729_v43 = vld [vmem:[%s14081_s10 + $0x1ee] sm:$0x80]  }
 0x4c0   : > { %13193 = vst.msk [vmem:[%s14087_s14 + $0x40] ss:$8 sm:$0xf] %vm8156_vm0, %v13192_v50   ;;  %v9958_v32 = vsel %vm8628_vm15, %v13729_v43, %v9954_v4  ;;  %v13794_v6 = vld [vmem:[%s14081_s10 + $0x235] sm:$0x1]  }
 0x4c1   : > { %13205 = vst.msk [vmem:[%s14087_s14 + $0x41] ss:$8 sm:$0xf] %vm8156_vm0, %v13204_v19   ;;  %9959 = vrot.lane.b32.xlu2 %v9958_v32, %s14021_s7  ;;  %v13795_v51 = vld [vmem:[%s14081_s10 + $0x274] sm:$0x2]  }
 0x4c2   : > { %13217 = vst.msk [vmem:[%s14087_s14 + $0x42] ss:$8 sm:$0xf] %vm8156_vm0, %v13216_v56   ;;  %v10214_v44 = vsel %vm8604_vm9, %v13795_v51, %v13794_v6  ;;  %v13796_v52 = vld [vmem:[%s14081_s10 + $0x2b3] sm:$0x4]  }
 0x4c3   : > { %13229 = vst.msk [vmem:[%s14087_s14 + $0x43] ss:$8 sm:$0xf] %vm8156_vm0, %v13228_v60   ;;  %v10218_v63 = vsel %vm8608_vm10, %v13796_v52, %v10214_v44  ;;  %v13797_v39 = vld [vmem:[%s14081_s10 + $0x2f2] sm:$0x8]  }
 0x4c4   : > { %13241 = vst.msk [vmem:[%s14087_s14 + $0x44] ss:$8 sm:$0xf] %vm8156_vm0, %v13240_v5   ;;  %v10222_v45 = vsel %vm8612_vm11, %v13797_v39, %v10218_v63  ;;  %v13798_v10 = vld [vmem:[%s14081_s10 + $0x331] sm:$0x10]   ;;  %v19730_v63 = vpop.permute.xlu2 %9014  }
 0x4c5   : > { %13253 = vst.msk [vmem:[%s14087_s14 + $0x45] ss:$8 sm:$0xf] %vm8156_vm0, %v13252_v29   ;;  %v13799_v26 = vld [vmem:[%s14081_s10 + $0x370] sm:$0x20]  }
 0x4c6   : > { %13265 = vst.msk [vmem:[%s14087_s14 + $0x46] ss:$8 sm:$0xf] %vm8156_vm0, %v13264_v9   ;;  %v13800_v47 = vld [vmem:[%s14081_s10 + $0x3af] sm:$0x40]  }
 0x4c7   : > { %13277 = vst.msk [vmem:[%s14087_s14 + $0x47] ss:$8 sm:$0xf] %vm8156_vm0, %v13276_v11   ;;  %v13801_v54 = vld [vmem:[%s14081_s10 + $0x3ee] sm:$0x80]  }
 0x4c8   : > { %13406 = vst.msk [vmem:[%s14087_s14 + $0x40] sm:$0xff] %vm8632_vm1, %v19474_v20   ;;  %v10226_v20 = vsel %vm8616_vm12, %v13798_v10, %v10222_v45  ;;  %v13812_v57 = vld [vmem:[%s14081_s10 + $0x7] sm:$0x1]   ;;  %v13198_v2 = vld [vmem:[%s14081_s10 + $0x30] ss:$2 sm:$0xff]  }
 0x4c9   : > { %13194 = vst.msk [vmem:[%s14087_s14 + $0x40] ss:$8 sm:$0xf0] %vm8156_vm0, %v13192_v50   ;;  %v10230_v21 = vsel %vm8620_vm13, %v13799_v26, %v10226_v20  ;;  %v13813_v31 = vld [vmem:[%s14081_s10 + $0x46] sm:$0x2]  }
 0x4ca   : > { %13206 = vst.msk [vmem:[%s14087_s14 + $0x41] ss:$8 sm:$0xf0] %vm8156_vm0, %v13204_v19   ;;  %v10234_v23 = vsel %vm8624_vm14, %v13800_v47, %v10230_v21  ;;  %v10284_v33 = vsel %vm8604_vm9, %v13813_v31, %v13812_v57  ;;  %v13814_v53 = vld [vmem:[%s14081_s10 + $0x85] sm:$0x4]  }
 0x4cb   : > { %13218 = vst.msk [vmem:[%s14087_s14 + $0x42] ss:$8 sm:$0xf0] %vm8156_vm0, %v13216_v56   ;;  %v10238_v7 = vsel %vm8628_vm15, %v13801_v54, %v10234_v23  ;;  %v10288_v36 = vsel %vm8608_vm10, %v13814_v53, %v10284_v33  ;;  %v13815_v34 = vld [vmem:[%s14081_s10 + $0xc4] sm:$0x8]   ;;  %v19681_v56 = vpop.permute.xlu0 %8944  }
 0x4cc   : > { %13230 = vst.msk [vmem:[%s14087_s14 + $0x43] ss:$8 sm:$0xf0] %vm8156_vm0, %v13228_v60   ;;  %10239 = vrot.lane.b32.xlu1 %v10238_v7, %s14021_s7  ;;  %v10292_v16 = vsel %vm8612_vm11, %v13815_v34, %v10288_v36  ;;  %v13816_v59 = vld [vmem:[%s14081_s10 + $0x103] sm:$0x10]  }
 0x4cd   : > { %13242 = vst.msk [vmem:[%s14087_s14 + $0x44] ss:$8 sm:$0xf0] %vm8156_vm0, %v13240_v5   ;;  %v10296_v38 = vsel %vm8616_vm12, %v13816_v59, %v10292_v16  ;;  %v13817_v37 = vld [vmem:[%s14081_s10 + $0x142] sm:$0x20]  }
 0x4ce   : > { %13254 = vst.msk [vmem:[%s14087_s14 + $0x45] ss:$8 sm:$0xf0] %vm8156_vm0, %v13252_v29   ;;  %v10300_v0 = vsel %vm8620_vm13, %v13817_v37, %v10296_v38  ;;  %v13818_v62 = vld [vmem:[%s14081_s10 + $0x181] sm:$0x40]  }
 0x4cf   : > { %13266 = vst.msk [vmem:[%s14087_s14 + $0x46] ss:$8 sm:$0xf0] %vm8156_vm0, %v13264_v9   ;;  %v13819_v42 = vld [vmem:[%s14081_s10 + $0x1c0] sm:$0x80]  }
 0x4d0   : > { %13278 = vst.msk [vmem:[%s14087_s14 + $0x47] ss:$8 sm:$0xf0] %vm8156_vm0, %v13276_v11   ;;  %v13210_v41 = vld [vmem:[%s14081_s10 + $0x70] ss:$2 sm:$0xff]  }
 0x4d1   : > { %13397 = vst.msk [vmem:[%s14087_s14 + $0x20] sm:$0xff] %vm8632_vm1, %v19494_v61   ;;  %v10304_v61 = vsel %vm8624_vm14, %v13818_v62, %v10300_v0  ;;  %v13222_v1 = vld [vmem:[%s14081_s10 + $0xb0] ss:$2 sm:$0xff]   ;;  %v13750_v50 = vld [vmem:[%s14081_s10 + $0x24c] sm:$0x2]  }
 0x4d2   : > { %v10308_v3 = vsel %vm8628_vm15, %v13819_v42, %v10304_v61  ;;  %13433 = vst.msk [vmem:[%s14087_s14 + $0xa0] sm:$0xff] %vm8632_vm1, %v19522_v13   ;;  %v13234_v40 = vld [vmem:[%s14081_s10 + $0xf0] ss:$2 sm:$0xff]   ;;  %v13751_v19 = vld [vmem:[%s14081_s10 + $0x28b] sm:$0x4]  }
 0x4d3   : > { %10309 = vrot.lane.b32.xlu0 %v10308_v3, %s14021_s7  ;;  %13415 = vst.msk [vmem:[%s14087_s14 + $0x60] sm:$0xff] %vm8632_vm1, %v19524_v58   ;;  %v13246_v12 = vld [vmem:[%s14081_s10 + $0x130] ss:$2 sm:$0xff]   ;;  %v13749_v58 = vld [vmem:[%s14081_s10 + $0x20d] sm:$0x1]  }
 0x4d4   : > { %13199 = vst.msk [vmem:[%s14087_s14 + $0xc0] ss:$8 sm:$0xf] %vm8156_vm0, %v13198_v2   ;;  %v13258_v48 = vld [vmem:[%s14081_s10 + $0x170] ss:$2 sm:$0xff]   ;;  %v10039_v14 = vsel %vm8604_vm9, %v13750_v50, %v13749_v58 }
 0x4d5   : > { %13211 = vst.msk [vmem:[%s14087_s14 + $0xc1] ss:$8 sm:$0xf] %vm8156_vm0, %v13210_v41   ;;  %v13270_v49 = vld [vmem:[%s14081_s10 + $0x1b0] ss:$2 sm:$0xff]   ;;  %v10043_v22 = vsel %vm8608_vm10, %v13751_v19, %v10039_v14 }
 0x4d6   : > { %13223 = vst.msk [vmem:[%s14087_s14 + $0xc2] ss:$8 sm:$0xf] %vm8156_vm0, %v13222_v1   ;;  %v13282_v13 = vld [vmem:[%s14081_s10 + $0x1f0] ss:$2 sm:$0xff]  }
 0x4d7   : > { %13235 = vst.msk [vmem:[%s14087_s14 + $0xc3] ss:$8 sm:$0xf] %vm8156_vm0, %v13234_v40   ;;  %v13752_v24 = vld [vmem:[%s14081_s10 + $0x2ca] sm:$0x8]  }
 0x4d8   : > { %13247 = vst.msk [vmem:[%s14087_s14 + $0xc4] ss:$8 sm:$0xf] %vm8156_vm0, %v13246_v12   ;;  %v10047_v60 = vsel %vm8612_vm11, %v13752_v24, %v10043_v22  ;;  %v13753_v18 = vld [vmem:[%s14081_s10 + $0x309] sm:$0x10]  }
 0x4d9   : > { %13259 = vst.msk [vmem:[%s14087_s14 + $0xc5] ss:$8 sm:$0xf] %vm8156_vm0, %v13258_v48   ;;  %v13754_v27 = vld [vmem:[%s14081_s10 + $0x348] sm:$0x20]  }
 0x4da   : > { %13271 = vst.msk [vmem:[%s14087_s14 + $0xc6] ss:$8 sm:$0xf] %vm8156_vm0, %v13270_v49   ;;  %v13755_v5 = vld [vmem:[%s14081_s10 + $0x387] sm:$0x40]  }
 0x4db   : > { %13283 = vst.msk [vmem:[%s14087_s14 + $0xc7] ss:$8 sm:$0xf] %vm8156_vm0, %v13282_v13   ;;  %v13756_v8 = vld [vmem:[%s14081_s10 + $0x3c6] sm:$0x80]  }
 0x4dc   : > { %13442 = vst.msk [vmem:[%s14087_s14 + $0xc0] sm:$0xff] %vm8632_vm1, %v19530_v17   ;;  %v10051_v17 = vsel %vm8616_vm12, %v13753_v18, %v10047_v60  ;;  %v13821_v30 = vld [vmem:[%s14081_s10 + $0xf] sm:$0x1]   ;;  %v13839_v10 = vld [vmem:[%s14081_s10 + $0x1f] sm:$0x1]  }
 0x4dd   : > { %13200 = vst.msk [vmem:[%s14087_s14 + $0xc0] ss:$8 sm:$0xf0] %vm8156_vm0, %v13198_v2   ;;  %v10055_v15 = vsel %vm8620_vm13, %v13754_v27, %v10051_v17  ;;  %v13822_v9 = vld [vmem:[%s14081_s10 + $0x4e] sm:$0x2]  }
 0x4de   : > { %13212 = vst.msk [vmem:[%s14087_s14 + $0xc1] ss:$8 sm:$0xf0] %vm8156_vm0, %v13210_v41   ;;  %v10059_v29 = vsel %vm8624_vm14, %v13755_v5, %v10055_v15  ;;  %v10319_v35 = vsel %vm8604_vm9, %v13822_v9, %v13821_v30  ;;  %v13823_v28 = vld [vmem:[%s14081_s10 + $0x8d] sm:$0x4]  }
 0x4df   : > { %13224 = vst.msk [vmem:[%s14087_s14 + $0xc2] ss:$8 sm:$0xf0] %vm8156_vm0, %v13222_v1   ;;  %v10063_v46 = vsel %vm8628_vm15, %v13756_v8, %v10059_v29  ;;  %v10323_v11 = vsel %vm8608_vm10, %v13823_v28, %v10319_v35  ;;  %v13824_v4 = vld [vmem:[%s14081_s10 + $0xcc] sm:$0x8]  }
 0x4e0   : > { %13236 = vst.msk [vmem:[%s14087_s14 + $0xc3] ss:$8 sm:$0xf0] %vm8156_vm0, %v13234_v40   ;;  %10064 = vrot.lane.b32.xlu2 %v10063_v46, %s14021_s7  ;;  %v10327_v43 = vsel %vm8612_vm11, %v13824_v4, %v10323_v11  ;;  %v13825_v32 = vld [vmem:[%s14081_s10 + $0x10b] sm:$0x10]   ;;  %v19776_v40 = vpop.permute.xlu1 %8979  }
 0x4e1   : > { %13248 = vst.msk [vmem:[%s14087_s14 + $0xc4] ss:$8 sm:$0xf0] %vm8156_vm0, %v13246_v12   ;;  %v10331_v6 = vsel %vm8616_vm12, %v13825_v32, %v10327_v43  ;;  %v13826_v51 = vld [vmem:[%s14081_s10 + $0x14a] sm:$0x20]   ;;  %v19778_v12 = vpop.permute.xlu0 %9049  }
 0x4e2   : > { %13260 = vst.msk [vmem:[%s14087_s14 + $0xc5] ss:$8 sm:$0xf0] %vm8156_vm0, %v13258_v48   ;;  %v10335_v44 = vsel %vm8620_vm13, %v13826_v51, %v10331_v6  ;;  %v13827_v52 = vld [vmem:[%s14081_s10 + $0x189] sm:$0x40]  }
 0x4e3   : > { %13272 = vst.msk [vmem:[%s14087_s14 + $0xc6] ss:$8 sm:$0xf0] %vm8156_vm0, %v13270_v49   ;;  %v10339_v39 = vsel %vm8624_vm14, %v13827_v52, %v10335_v44  ;;  %v13828_v45 = vld [vmem:[%s14081_s10 + $0x1c8] sm:$0x80]  }
 0x4e4   : > { %13284 = vst.msk [vmem:[%s14087_s14 + $0xc7] ss:$8 sm:$0xf0] %vm8156_vm0, %v13282_v13   ;;  %v13840_v20 = vld [vmem:[%s14081_s10 + $0x5e] sm:$0x2]   ;;  %v10343_v26 = vsel %vm8628_vm15, %v13828_v45, %v10339_v39 }
 0x4e5   : > { %v10389_v47 = vsel %vm8604_vm9, %v13840_v20, %v13839_v10  ;;  %v13841_v21 = vld [vmem:[%s14081_s10 + $0x9d] sm:$0x4]   ;;  %10344 = vrot.lane.b32.xlu1 %v10343_v26, %s14021_s7  ;;  %v13285_v36 = vld [vmem:[%s14081_s10 + $0x200] ss:$2 sm:$0xff]   ;;  %v13776_v41 = vld [vmem:[%s14081_s10 + $0x225] sm:$0x1]  }
 0x4e6   : > { %v13842_v54 = vld [vmem:[%s14081_s10 + $0xdc] sm:$0x8]   ;;  %v10393_v57 = vsel %vm8608_vm10, %v13841_v21, %v10389_v47  ;;  %v13297_v34 = vld [vmem:[%s14081_s10 + $0x240] ss:$2 sm:$0xff]   ;;  %v13777_v1 = vld [vmem:[%s14081_s10 + $0x264] sm:$0x2]  }
 0x4e7   : > { %v13843_v23 = vld [vmem:[%s14081_s10 + $0x11b] sm:$0x10]   ;;  %v10397_v53 = vsel %vm8612_vm11, %v13842_v54, %v10393_v57  ;;  %v13309_v16 = vld [vmem:[%s14081_s10 + $0x280] ss:$2 sm:$0xff]   ;;  %v10144_v48 = vsel %vm8604_vm9, %v13777_v1, %v13776_v41  ;;  %v13778_v49 = vld [vmem:[%s14081_s10 + $0x2a3] sm:$0x4]  }
 0x4e8   : > { %v13844_v7 = vld [vmem:[%s14081_s10 + $0x15a] sm:$0x20]   ;;  %v10401_v59 = vsel %vm8616_vm12, %v13843_v23, %v10397_v53  ;;  %13286 = vst.msk [vmem:[%s14087_s14 + $0x100] ss:$8 sm:$0xf] %vm8156_vm0, %v13285_v36  }
 0x4e9   : > { %v13845_v31 = vld [vmem:[%s14081_s10 + $0x199] sm:$0x40]   ;;  %v13321_v38 = vld [vmem:[%s14081_s10 + $0x2c0] ss:$2 sm:$0xff]   ;;  %v10405_v37 = vsel %vm8620_vm13, %v13844_v7, %v10401_v59  ;;  %v13779_v13 = vld [vmem:[%s14081_s10 + $0x2e2] sm:$0x8]   ;;  %v19869_v59 = vpop.permute.xlu2 %9119  }
 0x4ea   : > { %v13846_v33 = vld [vmem:[%s14081_s10 + $0x1d8] sm:$0x80]   ;;  %13298 = vst.msk [vmem:[%s14087_s14 + $0x101] ss:$8 sm:$0xf] %vm8156_vm0, %v13297_v34   ;;  %v10409_v62 = vsel %vm8624_vm14, %v13845_v31, %v10405_v37 }
 0x4eb   : > { %v13333_v0 = vld [vmem:[%s14081_s10 + $0x300] ss:$2 sm:$0xff]   ;;  %13310 = vst.msk [vmem:[%s14087_s14 + $0x102] ss:$8 sm:$0xf] %vm8156_vm0, %v13309_v16   ;;  %v10413_v42 = vsel %vm8628_vm15, %v13846_v33, %v10409_v62 }
 0x4ec   : > { %v13345_v61 = vld [vmem:[%s14081_s10 + $0x340] ss:$2 sm:$0xff]   ;;  %13322 = vst.msk [vmem:[%s14087_s14 + $0x103] ss:$8 sm:$0xf] %vm8156_vm0, %v13321_v38   ;;  %10414 = vrot.lane.b32.xlu0 %v10413_v42, %s14021_s7 }
 0x4ed   : > { %v13357_v2 = vld [vmem:[%s14081_s10 + $0x380] ss:$2 sm:$0xff]   ;;  %13334 = vst.msk [vmem:[%s14087_s14 + $0x104] ss:$8 sm:$0xf] %vm8156_vm0, %v13333_v0  }
 0x4ee   : > { %v13369_v3 = vld [vmem:[%s14081_s10 + $0x3c0] ss:$2 sm:$0xff]   ;;  %13346 = vst.msk [vmem:[%s14087_s14 + $0x105] ss:$8 sm:$0xf] %vm8156_vm0, %v13345_v61  }
 0x4ef   : > { %13358 = vst.msk [vmem:[%s14087_s14 + $0x106] ss:$8 sm:$0xf] %vm8156_vm0, %v13357_v2   ;;  %v13780_v58 = vld [vmem:[%s14081_s10 + $0x321] sm:$0x10]  }
 0x4f0   : > { %13370 = vst.msk [vmem:[%s14087_s14 + $0x107] ss:$8 sm:$0xf] %vm8156_vm0, %v13369_v3   ;;  %v13781_v14 = vld [vmem:[%s14081_s10 + $0x360] sm:$0x20]  }
 0x4f1   : > { %13460 = vst.msk [vmem:[%s14087_s14 + $0x100] sm:$0xff] %vm8632_vm1, %v19628_v25   ;;  %v10148_v25 = vsel %vm8608_vm10, %v13778_v49, %v10144_v48  ;;  %v13782_v22 = vld [vmem:[%s14081_s10 + $0x39f] sm:$0x40]   ;;  %v13848_v17 = vld [vmem:[%s14081_s10 + $0x27] sm:$0x1]  }
 0x4f2   : > { %13287 = vst.msk [vmem:[%s14087_s14 + $0x100] ss:$8 sm:$0xf0] %vm8156_vm0, %v13285_v36   ;;  %v10152_v50 = vsel %vm8612_vm11, %v13779_v13, %v10148_v25  ;;  %v13783_v60 = vld [vmem:[%s14081_s10 + $0x3de] sm:$0x80]  }
 0x4f3   : > { %13299 = vst.msk [vmem:[%s14087_s14 + $0x101] ss:$8 sm:$0xf0] %vm8156_vm0, %v13297_v34   ;;  %v10156_v19 = vsel %vm8616_vm12, %v13780_v58, %v10152_v50  ;;  %v13849_v5 = vld [vmem:[%s14081_s10 + $0x66] sm:$0x2]  }
 0x4f4   : > { %13311 = vst.msk [vmem:[%s14087_s14 + $0x102] ss:$8 sm:$0xf0] %vm8156_vm0, %v13309_v16   ;;  %v10160_v24 = vsel %vm8620_vm13, %v13781_v14, %v10156_v19  ;;  %v10424_v15 = vsel %vm8604_vm9, %v13849_v5, %v13848_v17  ;;  %v13850_v8 = vld [vmem:[%s14081_s10 + $0xa5] sm:$0x4]   ;;  %v19930_v17 = vpop.permute.xlu1 %9084  }
 0x4f5   : > { %13323 = vst.msk [vmem:[%s14087_s14 + $0x103] ss:$8 sm:$0xf0] %vm8156_vm0, %v13321_v38   ;;  %v10164_v18 = vsel %vm8624_vm14, %v13782_v22, %v10160_v24  ;;  %v10428_v29 = vsel %vm8608_vm10, %v13850_v8, %v10424_v15  ;;  %v13851_v30 = vld [vmem:[%s14081_s10 + $0xe4] sm:$0x8]  }
 0x4f6   : > { %13335 = vst.msk [vmem:[%s14087_s14 + $0x104] ss:$8 sm:$0xf0] %vm8156_vm0, %v13333_v0   ;;  %v10168_v27 = vsel %vm8628_vm15, %v13783_v60, %v10164_v18  ;;  %v10432_v46 = vsel %vm8612_vm11, %v13851_v30, %v10428_v29  ;;  %v13852_v9 = vld [vmem:[%s14081_s10 + $0x123] sm:$0x10]  }
 0x4f7   : > { %13347 = vst.msk [vmem:[%s14087_s14 + $0x105] ss:$8 sm:$0xf0] %vm8156_vm0, %v13345_v61   ;;  %10169 = vrot.lane.b32.xlu2 %v10168_v27, %s14021_s7  ;;  %v13853_v35 = vld [vmem:[%s14081_s10 + $0x162] sm:$0x20]   ;;  %v19932_v27 = vpop.permute.xlu0 %9154  }
 0x4f8   : > { %13359 = vst.msk [vmem:[%s14087_s14 + $0x106] ss:$8 sm:$0xf0] %vm8156_vm0, %v13357_v2   ;;  %v13854_v28 = vld [vmem:[%s14081_s10 + $0x1a1] sm:$0x40]  }
 0x4f9   : > { %13371 = vst.msk [vmem:[%s14087_s14 + $0x107] ss:$8 sm:$0xf0] %vm8156_vm0, %v13369_v3   ;;  %v13855_v11 = vld [vmem:[%s14081_s10 + $0x1e0] sm:$0x80]  }
 0x4fa   : > { %13451 = vst.msk [vmem:[%s14087_s14 + $0xe0] sm:$0xff] %vm8632_vm1, %v19679_v55   ;;  %v10436_v55 = vsel %vm8616_vm12, %v13852_v9, %v10432_v46  ;;  %v13866_v4 = vld [vmem:[%s14081_s10 + $0x37] sm:$0x1]   ;;  %v13288_v47 = vld [vmem:[%s14081_s10 + $0x210] ss:$2 sm:$0xff]  }
 0x4fb   : > { %13469 = vst.msk [vmem:[%s14087_s14 + $0x120] sm:$0xff] %vm8632_vm1, %v19681_v56   ;;  %v10440_v56 = vsel %vm8620_vm13, %v13853_v35, %v10436_v55  ;;  %v13867_v32 = vld [vmem:[%s14081_s10 + $0x76] sm:$0x2]   ;;  %v13300_v21 = vld [vmem:[%s14081_s10 + $0x250] ss:$2 sm:$0xff]  }
 0x4fc   : > { %v10444_v43 = vsel %vm8624_vm14, %v13854_v28, %v10440_v56  ;;  %v13868_v6 = vld [vmem:[%s14081_s10 + $0xb5] sm:$0x4]   ;;  %v10494_v52 = vsel %vm8604_vm9, %v13867_v32, %v13866_v4  ;;  %13290 = vst.msk [vmem:[%s14087_s14 + $0x140] ss:$8 sm:$0xf0] %vm8156_vm0, %v13288_v47  }
 0x4fd   : > { %v13869_v51 = vld [vmem:[%s14081_s10 + $0xf4] sm:$0x8]   ;;  %v10448_v44 = vsel %vm8628_vm15, %v13855_v11, %v10444_v43  ;;  %v10498_v20 = vsel %vm8608_vm10, %v13868_v6, %v10494_v52  ;;  %v13312_v23 = vld [vmem:[%s14081_s10 + $0x290] ss:$2 sm:$0xff]   ;;  %v13803_v37 = vld [vmem:[%s14081_s10 + $0x23d] sm:$0x1]  }
 0x4fe   : > { %v13870_v39 = vld [vmem:[%s14081_s10 + $0x133] sm:$0x10]   ;;  %10449 = vrot.lane.b32.xlu1 %v10448_v44, %s14021_s7  ;;  %v10502_v54 = vsel %vm8612_vm11, %v13869_v51, %v10498_v20  ;;  %13302 = vst.msk [vmem:[%s14087_s14 + $0x141] ss:$8 sm:$0xf0] %vm8156_vm0, %v13300_v21   ;;  %v19982_v20 = vpop.permute.xlu2 %9224  }
 0x4ff   : > { %v13871_v45 = vld [vmem:[%s14081_s10 + $0x172] sm:$0x20]   ;;  %v10506_v57 = vsel %vm8616_vm12, %v13870_v39, %v10502_v54  ;;  %v13324_v7 = vld [vmem:[%s14081_s10 + $0x2d0] ss:$2 sm:$0xff]   ;;  %v13303_v0 = vld [vmem:[%s14081_s10 + $0x260] ss:$2 sm:$0xff]   ;;  %v19990_v54 = vpop.permute.xlu0 %9259  }
 0x500   : > { %v13872_v10 = vld [vmem:[%s14081_s10 + $0x1b1] sm:$0x40]   ;;  %v10510_v31 = vsel %vm8620_vm13, %v13871_v45, %v10506_v57  ;;  %13314 = vst.msk [vmem:[%s14087_s14 + $0x142] ss:$8 sm:$0xf0] %vm8156_vm0, %v13312_v23  }
 0x501   : > { %v13873_v26 = vld [vmem:[%s14081_s10 + $0x1f0] sm:$0x80]   ;;  %v13336_v33 = vld [vmem:[%s14081_s10 + $0x310] ss:$2 sm:$0xff]   ;;  %v10514_v53 = vsel %vm8624_vm14, %v13872_v10, %v10510_v31  ;;  %v13804_v62 = vld [vmem:[%s14081_s10 + $0x27c] sm:$0x2]  }
 0x502   : > { %13326 = vst.msk [vmem:[%s14087_s14 + $0x143] ss:$8 sm:$0xf0] %vm8156_vm0, %v13324_v7   ;;  %v13348_v36 = vld [vmem:[%s14081_s10 + $0x350] ss:$2 sm:$0xff]   ;;  %v10518_v34 = vsel %vm8628_vm15, %v13873_v26, %v10514_v53  ;;  %v10249_v42 = vsel %vm8604_vm9, %v13804_v62, %v13803_v37  ;;  %v19984_v26 = vpop.permute.xlu1 %9189  }
 0x503   : > { %13338 = vst.msk [vmem:[%s14087_s14 + $0x144] ss:$8 sm:$0xf0] %vm8156_vm0, %v13336_v33   ;;  %v13360_v16 = vld [vmem:[%s14081_s10 + $0x390] ss:$2 sm:$0xff]   ;;  %10519 = vrot.lane.b32.xlu0 %v10518_v34, %s14021_s7 }
 0x504   : > { %13350 = vst.msk [vmem:[%s14087_s14 + $0x145] ss:$8 sm:$0xf0] %vm8156_vm0, %v13348_v36   ;;  %v13372_v38 = vld [vmem:[%s14081_s10 + $0x3d0] ss:$2 sm:$0xff]  }
 0x505   : > { %13362 = vst.msk [vmem:[%s14087_s14 + $0x146] ss:$8 sm:$0xf0] %vm8156_vm0, %v13360_v16   ;;  %v13315_v61 = vld [vmem:[%s14081_s10 + $0x2a0] ss:$2 sm:$0xff]  }
 0x506   : > { %13374 = vst.msk [vmem:[%s14087_s14 + $0x147] ss:$8 sm:$0xf0] %vm8156_vm0, %v13372_v38   ;;  %v13805_v2 = vld [vmem:[%s14081_s10 + $0x2bb] sm:$0x4]   ;;  %v20020_v62 = vpop.permute.xlu2 %9329  }
 0x507   : > { %13487 = vst.msk [vmem:[%s14087_s14 + $0x160] sm:$0xff] %vm8632_vm1, %v19730_v63   ;;  %v13291_v63 = vld [vmem:[%s14081_s10 + $0x220] ss:$2 sm:$0xff]   ;;  %v10253_v41 = vsel %vm8608_vm10, %v13805_v2, %v10249_v42  ;;  %v13806_v1 = vld [vmem:[%s14081_s10 + $0x2fa] sm:$0x8]   ;;  %v20027_v2 = vpop.permute.xlu0 %9364  }
 0x508   : > { %13289 = vst.msk [vmem:[%s14087_s14 + $0x140] ss:$8 sm:$0xf] %vm8156_vm0, %v13288_v47   ;;  %v13327_v3 = vld [vmem:[%s14081_s10 + $0x2e0] ss:$2 sm:$0xff]   ;;  %v10257_v48 = vsel %vm8612_vm11, %v13806_v1, %v10253_v41 }
 0x509   : > { %13301 = vst.msk [vmem:[%s14087_s14 + $0x141] ss:$8 sm:$0xf] %vm8156_vm0, %v13300_v21   ;;  %v13807_v49 = vld [vmem:[%s14081_s10 + $0x339] sm:$0x10]  }
 0x50a   : > { %13313 = vst.msk [vmem:[%s14087_s14 + $0x142] ss:$8 sm:$0xf] %vm8156_vm0, %v13312_v23   ;;  %v13808_v25 = vld [vmem:[%s14081_s10 + $0x378] sm:$0x20]   ;;  %v10261_v58 = vsel %vm8616_vm12, %v13807_v49, %v10257_v48 }
 0x50b   : > { %13325 = vst.msk [vmem:[%s14087_s14 + $0x143] ss:$8 sm:$0xf] %vm8156_vm0, %v13324_v7   ;;  %v13351_v13 = vld [vmem:[%s14081_s10 + $0x360] ss:$2 sm:$0xff]   ;;  %v10265_v19 = vsel %vm8620_vm13, %v13808_v25, %v10261_v58 }
 0x50c   : > { %13337 = vst.msk [vmem:[%s14087_s14 + $0x144] ss:$8 sm:$0xf] %vm8156_vm0, %v13336_v33   ;;  %v13809_v50 = vld [vmem:[%s14081_s10 + $0x3b7] sm:$0x40]  }
 0x50d   : > { %13349 = vst.msk [vmem:[%s14087_s14 + $0x145] ss:$8 sm:$0xf] %vm8156_vm0, %v13348_v36   ;;  %v13363_v14 = vld [vmem:[%s14081_s10 + $0x3a0] ss:$2 sm:$0xff]   ;;  %v10269_v60 = vsel %vm8624_vm14, %v13809_v50, %v10265_v19 }
 0x50e   : > { %13361 = vst.msk [vmem:[%s14087_s14 + $0x146] ss:$8 sm:$0xf] %vm8156_vm0, %v13360_v16   ;;  %v13810_v22 = vld [vmem:[%s14081_s10 + $0x3f6] sm:$0x80]  }
 0x50f   : > { %13373 = vst.msk [vmem:[%s14087_s14 + $0x147] ss:$8 sm:$0xf] %vm8156_vm0, %v13372_v38   ;;  %v13375_v24 = vld [vmem:[%s14081_s10 + $0x3e0] ss:$2 sm:$0xff]   ;;  %v10273_v5 = vsel %vm8628_vm15, %v13810_v22, %v10269_v60 }
 0x510   : > { %13478 = vst.msk [vmem:[%s14087_s14 + $0x140] sm:$0xff] %vm8632_vm1, %v19776_v40   ;;  %v13339_v40 = vld [vmem:[%s14081_s10 + $0x320] ss:$2 sm:$0xff]   ;;  %v13875_v18 = vld [vmem:[%s14081_s10 + $0x3f] sm:$0x1]   ;;  %10274 = vrot.lane.b32.xlu2 %v10273_v5, %s14021_s7 }
 0x511   : > { %13292 = vst.msk [vmem:[%s14087_s14 + $0x180] ss:$8 sm:$0xf] %vm8156_vm0, %v13291_v63   ;;  %v13876_v15 = vld [vmem:[%s14081_s10 + $0x7e] sm:$0x2]  }
 0x512   : > { %13304 = vst.msk [vmem:[%s14087_s14 + $0x181] ss:$8 sm:$0xf] %vm8156_vm0, %v13303_v0   ;;  %v10529_v8 = vsel %vm8604_vm9, %v13876_v15, %v13875_v18  ;;  %v13877_v29 = vld [vmem:[%s14081_s10 + $0xbd] sm:$0x4]   ;;  %v20066_v15 = vpop.permute.xlu0 %9469  }
 0x513   : > { %13316 = vst.msk [vmem:[%s14087_s14 + $0x182] ss:$8 sm:$0xf] %vm8156_vm0, %v13315_v61   ;;  %v10533_v30 = vsel %vm8608_vm10, %v13877_v29, %v10529_v8  ;;  %v13878_v46 = vld [vmem:[%s14081_s10 + $0xfc] sm:$0x8]  }
 0x514   : > { %13328 = vst.msk [vmem:[%s14087_s14 + $0x183] ss:$8 sm:$0xf] %vm8156_vm0, %v13327_v3   ;;  %v10537_v9 = vsel %vm8612_vm11, %v13878_v46, %v10533_v30  ;;  %v13879_v55 = vld [vmem:[%s14081_s10 + $0x13b] sm:$0x10]  }
 0x515   : > { %13340 = vst.msk [vmem:[%s14087_s14 + $0x184] ss:$8 sm:$0xf] %vm8156_vm0, %v13339_v40   ;;  %v10541_v35 = vsel %vm8616_vm12, %v13879_v55, %v10537_v9  ;;  %v13880_v28 = vld [vmem:[%s14081_s10 + $0x17a] sm:$0x20]  }
 0x516   : > { %13352 = vst.msk [vmem:[%s14087_s14 + $0x185] ss:$8 sm:$0xf] %vm8156_vm0, %v13351_v13   ;;  %v13881_v56 = vld [vmem:[%s14081_s10 + $0x1b9] sm:$0x40]  }
 0x517   : > { %13364 = vst.msk [vmem:[%s14087_s14 + $0x186] ss:$8 sm:$0xf] %vm8156_vm0, %v13363_v14   ;;  %v13882_v11 = vld [vmem:[%s14081_s10 + $0x1f8] sm:$0x80]  }
 0x518   : > { %13376 = vst.msk [vmem:[%s14087_s14 + $0x187] ss:$8 sm:$0xf] %vm8156_vm0, %v13375_v24   ;;  %v13893_v43 = vld [vmem:[%s14081_s10 + $0x20f] sm:$0x1]  }
 0x519   : > { %13496 = vst.msk [vmem:[%s14087_s14 + $0x180] sm:$0xff] %vm8632_vm1, %v19778_v12   ;;  %v10545_v12 = vsel %vm8620_vm13, %v13880_v28, %v10541_v35  ;;  %v13894_v6 = vld [vmem:[%s14081_s10 + $0x24e] sm:$0x2]   ;;  %v13294_v53 = vld [vmem:[%s14081_s10 + $0x230] ss:$2 sm:$0xff]  }
 0x51a   : > { %13293 = vst.msk [vmem:[%s14087_s14 + $0x180] ss:$8 sm:$0xf0] %vm8156_vm0, %v13291_v63   ;;  %v10549_v4 = vsel %vm8624_vm14, %v13881_v56, %v10545_v12  ;;  %v10599_v51 = vsel %vm8604_vm9, %v13894_v6, %v13893_v43  ;;  %v13895_v44 = vld [vmem:[%s14081_s10 + $0x28d] sm:$0x4]  }
 0x51b   : > { %13305 = vst.msk [vmem:[%s14087_s14 + $0x181] ss:$8 sm:$0xf0] %vm8156_vm0, %v13303_v0   ;;  %v10553_v32 = vsel %vm8628_vm15, %v13882_v11, %v10549_v4  ;;  %v10603_v52 = vsel %vm8608_vm10, %v13895_v44, %v10599_v51  ;;  %v13896_v39 = vld [vmem:[%s14081_s10 + $0x2cc] sm:$0x8]  }
 0x51c   : > { %13317 = vst.msk [vmem:[%s14087_s14 + $0x182] ss:$8 sm:$0xf0] %vm8156_vm0, %v13315_v61   ;;  %10554 = vrot.lane.b32.xlu1 %v10553_v32, %s14021_s7  ;;  %v10607_v45 = vsel %vm8612_vm11, %v13896_v39, %v10603_v52  ;;  %v13897_v10 = vld [vmem:[%s14081_s10 + $0x30b] sm:$0x10]   ;;  %v20022_v61 = vpop.permute.xlu1 %9294  }
 0x51d   : > { %13329 = vst.msk [vmem:[%s14087_s14 + $0x183] ss:$8 sm:$0xf0] %vm8156_vm0, %v13327_v3   ;;  %v10611_v47 = vsel %vm8616_vm12, %v13897_v10, %v10607_v45  ;;  %v13898_v21 = vld [vmem:[%s14081_s10 + $0x34a] sm:$0x20]  }
 0x51e   : > { %13341 = vst.msk [vmem:[%s14087_s14 + $0x184] ss:$8 sm:$0xf0] %vm8156_vm0, %v13339_v40   ;;  %v10615_v23 = vsel %vm8620_vm13, %v13898_v21, %v10611_v47  ;;  %v13899_v57 = vld [vmem:[%s14081_s10 + $0x389] sm:$0x40]  }
 0x51f   : > { %13353 = vst.msk [vmem:[%s14087_s14 + $0x185] ss:$8 sm:$0xf0] %vm8156_vm0, %v13351_v13   ;;  %v10619_v7 = vsel %vm8624_vm14, %v13899_v57, %v10615_v23  ;;  %v13900_v31 = vld [vmem:[%s14081_s10 + $0x3c8] sm:$0x80]   ;;  %v20113_v23 = vpop.permute.xlu0 %9574  }
 0x520   : > { %13365 = vst.msk [vmem:[%s14087_s14 + $0x186] ss:$8 sm:$0xf0] %vm8156_vm0, %v13363_v14   ;;  %v10623_v33 = vsel %vm8628_vm15, %v13900_v31, %v10619_v7  ;;  %v13306_v36 = vld [vmem:[%s14081_s10 + $0x270] ss:$2 sm:$0xff]  }
 0x521   : > { %13377 = vst.msk [vmem:[%s14087_s14 + $0x187] ss:$8 sm:$0xf0] %vm8156_vm0, %v13375_v24   ;;  %v13318_v34 = vld [vmem:[%s14081_s10 + $0x2b0] ss:$2 sm:$0xff]   ;;  %10624 = vrot.lane.b32.xlu0 %v10623_v33, %s14021_s7  ;;  %v20058_v24 = vpop.permute.xlu2 %9434  }
 0x522   : > { %13295 = vst.msk [vmem:[%s14087_s14 + $0x1c0] ss:$8 sm:$0xf] %vm8156_vm0, %v13294_v53   ;;  %v13330_v16 = vld [vmem:[%s14081_s10 + $0x2f0] ss:$2 sm:$0xff]  }
 0x523   : > { %13307 = vst.msk [vmem:[%s14087_s14 + $0x1c1] ss:$8 sm:$0xf] %vm8156_vm0, %v13306_v36   ;;  %v13342_v38 = vld [vmem:[%s14081_s10 + $0x330] ss:$2 sm:$0xff]  }
 0x524   : > { %13319 = vst.msk [vmem:[%s14087_s14 + $0x1c2] ss:$8 sm:$0xf] %vm8156_vm0, %v13318_v34   ;;  %v13354_v63 = vld [vmem:[%s14081_s10 + $0x370] ss:$2 sm:$0xff]   ;;  %v20060_v60 = vpop.permute.xlu1 %9399  }
 0x525   : > { %13331 = vst.msk [vmem:[%s14087_s14 + $0x1c3] ss:$8 sm:$0xf] %vm8156_vm0, %v13330_v16   ;;  %v13366_v37 = vld [vmem:[%s14081_s10 + $0x3b0] ss:$2 sm:$0xff]  }
 0x526   : > { %13343 = vst.msk [vmem:[%s14087_s14 + $0x1c4] ss:$8 sm:$0xf] %vm8156_vm0, %v13342_v38   ;;  %v13378_v0 = vld [vmem:[%s14081_s10 + $0x3f0] ss:$2 sm:$0xff]  }
 0x527   : > { %13355 = vst.msk [vmem:[%s14087_s14 + $0x1c5] ss:$8 sm:$0xf] %vm8156_vm0, %v13354_v63   ;;  %v13830_v42 = vld [vmem:[%s14081_s10 + $0x17] sm:$0x1]  }
 0x528   : > { %13367 = vst.msk [vmem:[%s14087_s14 + $0x1c6] ss:$8 sm:$0xf] %vm8156_vm0, %v13366_v37   ;;  %v13831_v3 = vld [vmem:[%s14081_s10 + $0x56] sm:$0x2]  }
 0x529   : > { %13379 = vst.msk [vmem:[%s14087_s14 + $0x1c7] ss:$8 sm:$0xf] %vm8156_vm0, %v13378_v0   ;;  %v10354_v41 = vsel %vm8604_vm9, %v13831_v3, %v13830_v42  ;;  %v13832_v1 = vld [vmem:[%s14081_s10 + $0x95] sm:$0x4]   ;;  %v20102_v45 = vpop.permute.xlu2 %9539  }
 0x52a   : > { %13514 = vst.msk [vmem:[%s14087_s14 + $0x1c0] sm:$0xff] %vm8632_vm1, %v19869_v59   ;;  %v10358_v59 = vsel %vm8608_vm10, %v13832_v1, %v10354_v41  ;;  %v13833_v40 = vld [vmem:[%s14081_s10 + $0xd4] sm:$0x8]   ;;  %v13920_v56 = vld [vmem:[%s14081_s10 + $0x227] sm:$0x1]  }
 0x52b   : > { %v13834_v48 = vld [vmem:[%s14081_s10 + $0x113] sm:$0x10]   ;;  %13296 = vst.msk [vmem:[%s14087_s14 + $0x1c0] ss:$8 sm:$0xf0] %vm8156_vm0, %v13294_v53   ;;  %v10362_v49 = vsel %vm8612_vm11, %v13833_v40, %v10358_v59 }
 0x52c   : > { %v13835_v25 = vld [vmem:[%s14081_s10 + $0x152] sm:$0x20]   ;;  %13308 = vst.msk [vmem:[%s14087_s14 + $0x1c1] ss:$8 sm:$0xf0] %vm8156_vm0, %v13306_v36   ;;  %v10366_v13 = vsel %vm8616_vm12, %v13834_v48, %v10362_v49  ;;  %v20104_v10 = vpop.permute.xlu1 %9504  }
 0x52d   : > { %v13836_v58 = vld [vmem:[%s14081_s10 + $0x191] sm:$0x40]   ;;  %13320 = vst.msk [vmem:[%s14087_s14 + $0x1c2] ss:$8 sm:$0xf0] %vm8156_vm0, %v13318_v34   ;;  %v10370_v50 = vsel %vm8620_vm13, %v13835_v25, %v10366_v13 }
 0x52e   : > { %v13837_v14 = vld [vmem:[%s14081_s10 + $0x1d0] sm:$0x80]   ;;  %13332 = vst.msk [vmem:[%s14087_s14 + $0x1c3] ss:$8 sm:$0xf0] %vm8156_vm0, %v13330_v16   ;;  %v10374_v19 = vsel %vm8624_vm14, %v13836_v58, %v10370_v50 }
 0x52f   : > { %v13902_v22 = vld [vmem:[%s14081_s10 + $0x217] sm:$0x1]   ;;  %13344 = vst.msk [vmem:[%s14087_s14 + $0x1c4] ss:$8 sm:$0xf0] %vm8156_vm0, %v13342_v38   ;;  %v10378_v18 = vsel %vm8628_vm15, %v13837_v14, %v10374_v19 }
 0x530   : > { %v13903_v5 = vld [vmem:[%s14081_s10 + $0x256] sm:$0x2]   ;;  %13356 = vst.msk [vmem:[%s14087_s14 + $0x1c5] ss:$8 sm:$0xf0] %vm8156_vm0, %v13354_v63   ;;  %10379 = vrot.lane.b32.xlu2 %v10378_v18, %s14021_s7 }
 0x531   : > { %v10634_v8 = vsel %vm8604_vm9, %v13903_v5, %v13902_v22  ;;  %v13904_v29 = vld [vmem:[%s14081_s10 + $0x295] sm:$0x4]   ;;  %13368 = vst.msk [vmem:[%s14087_s14 + $0x1c6] ss:$8 sm:$0xf0] %vm8156_vm0, %v13366_v37  }
 0x532   : > { %v10638_v30 = vsel %vm8608_vm10, %v13904_v29, %v10634_v8  ;;  %v13905_v46 = vld [vmem:[%s14081_s10 + $0x2d4] sm:$0x8]   ;;  %13380 = vst.msk [vmem:[%s14087_s14 + $0x1c7] ss:$8 sm:$0xf0] %vm8156_vm0, %v13378_v0  }
 0x533   : > { %v10642_v9 = vsel %vm8612_vm11, %v13905_v46, %v10638_v30  ;;  %v13906_v55 = vld [vmem:[%s14081_s10 + $0x313] sm:$0x10]   ;;  %13505 = vst.msk [vmem:[%s14087_s14 + $0x1a0] sm:$0xff] %vm8632_vm1, %v19930_v17   ;;  %v13921_v4 = vld [vmem:[%s14081_s10 + $0x266] sm:$0x2]   ;;  %v20155_v30 = vpop.permute.xlu2 %9644  }
 0x534   : > { %v10646_v17 = vsel %vm8616_vm12, %v13906_v55, %v10642_v9  ;;  %v13907_v35 = vld [vmem:[%s14081_s10 + $0x352] sm:$0x20]   ;;  %13523 = vst.msk [vmem:[%s14087_s14 + $0x1e0] sm:$0xff] %vm8632_vm1, %v19932_v27   ;;  %v13922_v43 = vld [vmem:[%s14081_s10 + $0x2a5] sm:$0x4]   ;;  %v10704_v51 = vsel %vm8604_vm9, %v13921_v4, %v13920_v56  ;;  %v20157_v46 = vpop.permute.xlu1 %9609  }
 0x535   : > { %v13908_v28 = vld [vmem:[%s14081_s10 + $0x391] sm:$0x40]   ;;  %v10650_v27 = vsel %vm8620_vm13, %v13907_v35, %v10646_v17  ;;  %v13923_v32 = vld [vmem:[%s14081_s10 + $0x2e4] sm:$0x8]   ;;  %v10708_v47 = vsel %vm8608_vm10, %v13922_v43, %v10704_v51  ;;  %13541 = vst.msk [vmem:[%s14087_s14 + $0x28] sm:$0xff] %vm8632_vm1, %v19982_v20  }
 0x536   : > { %v13909_v12 = vld [vmem:[%s14081_s10 + $0x3d0] sm:$0x80]   ;;  %v10654_v11 = vsel %vm8624_vm14, %v13908_v28, %v10650_v27  ;;  %v13924_v44 = vld [vmem:[%s14081_s10 + $0x323] sm:$0x10]   ;;  %v13857_v20 = vld [vmem:[%s14081_s10 + $0x2f] sm:$0x1]   ;;  %v10712_v57 = vsel %vm8612_vm11, %v13923_v32, %v10708_v47 }
 0x537   : > { %v10658_v6 = vsel %vm8628_vm15, %v13909_v12, %v10654_v11  ;;  %v13925_v52 = vld [vmem:[%s14081_s10 + $0x362] sm:$0x20]   ;;  %13532 = vst.msk [vmem:[%s14087_s14 + $0x8] sm:$0xff] %vm8632_vm1, %v19984_v26   ;;  %v13858_v26 = vld [vmem:[%s14081_s10 + $0x6e] sm:$0x2]   ;;  %v10716_v31 = vsel %vm8616_vm12, %v13924_v44, %v10712_v57  ;;  %v20165_v12 = vpop.permute.xlu0 %9679  }
 0x538   : > { %v13926_v39 = vld [vmem:[%s14081_s10 + $0x3a1] sm:$0x40]   ;;  %10659 = vrot.lane.b32.xlu1 %v10658_v6, %s14021_s7  ;;  %v13859_v7 = vld [vmem:[%s14081_s10 + $0xad] sm:$0x4]   ;;  %13550 = vst.msk [vmem:[%s14087_s14 + $0x48] sm:$0xff] %vm8632_vm1, %v19990_v54   ;;  %v10459_v54 = vsel %vm8604_vm9, %v13858_v26, %v13857_v20  ;;  %v10720_v36 = vsel %vm8620_vm13, %v13925_v52, %v10716_v31 }
 0x539   : > { %v13927_v21 = vld [vmem:[%s14081_s10 + $0x3e0] sm:$0x80]   ;;  %v13860_v33 = vld [vmem:[%s14081_s10 + $0xec] sm:$0x8]   ;;  %v10463_v34 = vsel %vm8608_vm10, %v13859_v7, %v10459_v54  ;;  %v10724_v37 = vsel %vm8624_vm14, %v13926_v39, %v10720_v36  ;;  %v13947_v19 = vld [vmem:[%s14081_s10 + $0x23f] sm:$0x1]  }
 0x53a   : > { %v13861_v53 = vld [vmem:[%s14081_s10 + $0x12b] sm:$0x10]   ;;  %v10467_v0 = vsel %vm8612_vm11, %v13860_v33, %v10463_v34  ;;  %v10728_v1 = vsel %vm8628_vm15, %v13927_v21, %v10724_v37  ;;  %v13948_v5 = vld [vmem:[%s14081_s10 + $0x27e] sm:$0x2]   ;;  %13568 = vst.msk [vmem:[%s14087_s14 + $0x88] sm:$0xff] %vm8632_vm1, %v20020_v62  }
 0x53b   : > { %v13862_v16 = vld [vmem:[%s14081_s10 + $0x16a] sm:$0x20]   ;;  %v10471_v59 = vsel %vm8616_vm12, %v13861_v53, %v10467_v0  ;;  %10729 = vrot.lane.b32.xlu0 %v10728_v1, %s14021_s7  ;;  %v13949_v8 = vld [vmem:[%s14081_s10 + $0x2bd] sm:$0x4]   ;;  %v10809_v17 = vsel %vm8604_vm9, %v13948_v5, %v13947_v19  ;;  %v13884_v62 = vld [vmem:[%s14081_s10 + $0x207] sm:$0x1]   ;;  %v9750_v37 = vpop.permute.xlu2 %9749  }
 0x53c   : > { %v13863_v38 = vld [vmem:[%s14081_s10 + $0x1a9] sm:$0x40]   ;;  %v10475_v13 = vsel %vm8620_vm13, %v13862_v16, %v10471_v59  ;;  %v13950_v29 = vld [vmem:[%s14081_s10 + $0x2fc] sm:$0x8]   ;;  %v10813_v11 = vsel %vm8608_vm10, %v13949_v8, %v10809_v17  ;;  %13559 = vst.msk [vmem:[%s14087_s14 + $0x68] sm:$0xff] %vm8632_vm1, %v20022_v61   ;;  %v9715_v0 = vpop.permute.xlu1 %9714  }
 0x53d   : > { %v13864_v63 = vld [vmem:[%s14081_s10 + $0x1e8] sm:$0x80]   ;;  %v10479_v22 = vsel %vm8624_vm14, %v13863_v38, %v10475_v13  ;;  %v13951_v35 = vld [vmem:[%s14081_s10 + $0x33b] sm:$0x10]   ;;  %v10817_v32 = vsel %vm8612_vm11, %v13950_v29, %v10813_v11  ;;  %v13885_v61 = vld [vmem:[%s14081_s10 + $0x246] sm:$0x2]  }
 0x53e   : > { %v13929_v42 = vld [vmem:[%s14081_s10 + $0x22f] sm:$0x1]   ;;  %v10483_v9 = vsel %vm8628_vm15, %v13864_v63, %v10479_v22  ;;  %v13952_v28 = vld [vmem:[%s14081_s10 + $0x37a] sm:$0x20]   ;;  %v13886_v6 = vld [vmem:[%s14081_s10 + $0x285] sm:$0x4]   ;;  %v10821_v44 = vsel %vm8616_vm12, %v13951_v35, %v10817_v32 }
 0x53f   : > { %v13930_v3 = vld [vmem:[%s14081_s10 + $0x26e] sm:$0x2]   ;;  %v13953_v27 = vld [vmem:[%s14081_s10 + $0x3b9] sm:$0x40]   ;;  %10484 = vrot.lane.b32.xlu2 %v10483_v9, %s14021_s7  ;;  %13577 = vst.msk [vmem:[%s14087_s14 + $0xa8] sm:$0xff] %vm8632_vm1, %v20027_v2   ;;  %v10564_v2 = vsel %vm8604_vm9, %v13885_v61, %v13884_v62  ;;  %v10825_v47 = vsel %vm8620_vm13, %v13952_v28, %v10821_v44 }
 0x540   : > { %v13931_v41 = vld [vmem:[%s14081_s10 + $0x2ad] sm:$0x4]   ;;  %v10739_v40 = vsel %vm8604_vm9, %v13930_v3, %v13929_v42  ;;  %v13954_v4 = vld [vmem:[%s14081_s10 + $0x3f8] sm:$0x80]   ;;  %v13887_v52 = vld [vmem:[%s14081_s10 + $0x2c4] sm:$0x8]   ;;  %v10568_v21 = vsel %vm8608_vm10, %v13886_v6, %v10564_v2  ;;  %v10829_v7 = vsel %vm8624_vm14, %v13953_v27, %v10825_v47 }
 0x541   : > { %v13932_v48 = vld [vmem:[%s14081_s10 + $0x2ec] sm:$0x8]   ;;  %v10743_v58 = vsel %vm8608_vm10, %v13931_v41, %v10739_v40  ;;  %v13888_v39 = vld [vmem:[%s14081_s10 + $0x303] sm:$0x10]   ;;  %v10572_v31 = vsel %vm8612_vm11, %v13887_v52, %v10568_v21  ;;  %13595 = vst.msk [vmem:[%s14087_s14 + $0xe8] sm:$0xff] %vm8632_vm1, %v20058_v24   ;;  %v10833_v33 = vsel %vm8628_vm15, %v13954_v4, %v10829_v7 }
 0x542   : > { %v13933_v49 = vld [vmem:[%s14081_s10 + $0x32b] sm:$0x10]   ;;  %v10747_v18 = vsel %vm8612_vm11, %v13932_v48, %v10743_v58  ;;  %v13889_v20 = vld [vmem:[%s14081_s10 + $0x342] sm:$0x20]   ;;  %v13911_v24 = vld [vmem:[%s14081_s10 + $0x21f] sm:$0x1]   ;;  %v10576_v53 = vsel %vm8616_vm12, %v13888_v39, %v10572_v31 }
 0x543   : > { %v13934_v25 = vld [vmem:[%s14081_s10 + $0x36a] sm:$0x20]   ;;  %v10751_v55 = vsel %vm8616_vm12, %v13933_v49, %v10747_v18  ;;  %v13890_v57 = vld [vmem:[%s14081_s10 + $0x381] sm:$0x40]   ;;  %v13912_v54 = vld [vmem:[%s14081_s10 + $0x25e] sm:$0x2]   ;;  %10834 = vrot.lane.b32.xlu0 %v10833_v33, %s14021_s7  ;;  %v10580_v16 = vsel %vm8620_vm13, %v13889_v20, %v10576_v53  ;;  %v9855_v8 = vpop.permute.xlu2 %9854  }
 0x544   : > { %v13935_v50 = vld [vmem:[%s14081_s10 + $0x3a9] sm:$0x40]   ;;  %v10755_v56 = vsel %vm8620_vm13, %v13934_v25, %v10751_v55  ;;  %v13891_v26 = vld [vmem:[%s14081_s10 + $0x3c0] sm:$0x80]   ;;  %13586 = vst.msk [vmem:[%s14087_s14 + $0xc8] sm:$0xff] %vm8632_vm1, %v20060_v60   ;;  %v10669_v60 = vsel %vm8604_vm9, %v13912_v54, %v13911_v24  ;;  %v10584_v42 = vsel %vm8624_vm14, %v13890_v57, %v10580_v16  ;;  %v9820_v29 = vpop.permute.xlu1 %9819  }
 0x545   : > { %v13936_v14 = vld [vmem:[%s14081_s10 + $0x3e8] sm:$0x80]   ;;  %v10759_v43 = vsel %vm8624_vm14, %v13935_v50, %v10755_v56  ;;  %v13913_v36 = vld [vmem:[%s14081_s10 + $0x29d] sm:$0x4]   ;;  %13604 = vst.msk [vmem:[%s14087_s14 + $0x108] sm:$0xff] %vm8632_vm1, %v20066_v15   ;;  %v10588_v1 = vsel %vm8628_vm15, %v13891_v26, %v10584_v42 }
 0x546   : > { %v10763_v51 = vsel %vm8628_vm15, %v13936_v14, %v10759_v43  ;;  %v13914_v34 = vld [vmem:[%s14081_s10 + $0x2dc] sm:$0x8]   ;;  %v10673_v15 = vsel %vm8608_vm10, %v13913_v36, %v10669_v60  ;;  %13622 = vst.msk [vmem:[%s14087_s14 + $0x148] sm:$0xff] %vm8632_vm1, %v20102_v45   ;;  %v9785_v45 = vpop.permute.xlu0 %9784   ;;  %v13939_v40 = vld [vmem:[%s14081_s10 + $0x276] sm:$0x2]  }
 0x547   : > { %10764 = vrot.lane.b32.xlu1 %v10763_v51, %s14021_s7  ;;  %v13915_v38 = vld [vmem:[%s14081_s10 + $0x31b] sm:$0x10]   ;;  %v10677_v3 = vsel %vm8612_vm11, %v13914_v34, %v10673_v15  ;;  %13613 = vst.msk [vmem:[%s14087_s14 + $0x128] sm:$0xff] %vm8632_vm1, %v20104_v10   ;;  %v13938_v10 = vld [vmem:[%s14081_s10 + $0x237] sm:$0x1]  }
 0x548   : > { %v13916_v63 = vld [vmem:[%s14081_s10 + $0x35a] sm:$0x20]   ;;  %v10681_v59 = vsel %vm8616_vm12, %v13915_v38, %v10677_v3  ;;  %10589 = vrot.lane.b32.xlu2 %v10588_v1, %s14021_s7  ;;  %13631 = vst.msk [vmem:[%s14087_s14 + $0x168] sm:$0xff] %vm8632_vm1, %v20113_v23   ;;  %v10774_v23 = vsel %vm8604_vm9, %v13939_v40, %v13938_v10  ;;  %v13940_v49 = vld [vmem:[%s14081_s10 + $0x2b5] sm:$0x4]  }
 0x549   : > { %v13917_v41 = vld [vmem:[%s14081_s10 + $0x399] sm:$0x40]   ;;  %v10685_v48 = vsel %vm8620_vm13, %v13916_v63, %v10681_v59  ;;  %v13941_v25 = vld [vmem:[%s14081_s10 + $0x2f4] sm:$0x8]   ;;  %v10778_v13 = vsel %vm8608_vm10, %v13940_v49, %v10774_v23  ;;  %13649 = vst.msk [vmem:[%s14087_s14 + $0x1a8] sm:$0xff] %vm8632_vm1, %v20155_v30  }
 0x54a   : > { %v13942_v58 = vld [vmem:[%s14081_s10 + $0x333] sm:$0x10]   ;;  %v10689_v50 = vsel %vm8624_vm14, %v13917_v41, %v10685_v48  ;;  %v13918_v14 = vld [vmem:[%s14081_s10 + $0x3d8] sm:$0x80]   ;;  %v10782_v19 = vsel %vm8612_vm11, %v13941_v25, %v10778_v13  ;;  %13640 = vst.msk [vmem:[%s14087_s14 + $0x188] sm:$0xff] %vm8632_vm1, %v20157_v46  }
 0x54b   : > { %v10786_v22 = vsel %vm8616_vm12, %v13942_v58, %v10782_v19  ;;  %v13943_v18 = vld [vmem:[%s14081_s10 + $0x372] sm:$0x20]   ;;  %13658 = vst.msk [vmem:[%s14087_s14 + $0x1c8] sm:$0xff] %vm8632_vm1, %v20165_v12   ;;  %v10693_v5 = vsel %vm8628_vm15, %v13918_v14, %v10689_v50  ;;  %v9960_v28 = vpop.permute.xlu2 %9959  }
 0x54c   : > { %13676 = vst.msk [vmem:[%s14087_s14 + $0x10] sm:$0xff] %vm8632_vm1, %v9750_v37   ;;  %v10790_v46 = vsel %vm8620_vm13, %v13943_v18, %v10786_v22  ;;  %v13944_v9 = vld [vmem:[%s14081_s10 + $0x3b1] sm:$0x40]   ;;  %v9925_v27 = vpop.permute.xlu1 %9924  }
 0x54d   : > { %13667 = vst.msk [vmem:[%s14087_s14 + $0x1e8] sm:$0xff] %vm8632_vm1, %v9715_v0   ;;  %v10794_v55 = vsel %vm8624_vm14, %v13944_v9, %v10790_v46  ;;  %v13945_v17 = vld [vmem:[%s14081_s10 + $0x3f0] sm:$0x80]  }
 0x54e   : > { %v9890_v30 = vpop.permute.xlu0 %9889   ;;  %13685 = vst.msk [vmem:[%s14087_s14 + $0x30] sm:$0xff] %vm8632_vm1, %v9785_v45   ;;  %v10798_v35 = vsel %vm8628_vm15, %v13945_v17, %v10794_v55 }
 0x54f   : > { %13703 = vst.msk [vmem:[%s14087_s14 + $0x70] sm:$0xff] %vm8632_vm1, %v9855_v8  }
 0x550   : > { %10694 = vrot.lane.b32.xlu2 %v10693_v5, %s14021_s7  ;;  %13694 = vst.msk [vmem:[%s14087_s14 + $0x50] sm:$0xff] %vm8632_vm1, %v9820_v29  }
 0x551   : > { %13712 = vst.msk [vmem:[%s14087_s14 + $0x90] sm:$0xff] %vm8632_vm1, %v9890_v30  }
 0x552   : > { %13730 = vst.msk [vmem:[%s14087_s14 + $0xd0] sm:$0xff] %vm8632_vm1, %v9960_v28  }
 0x553   : > { %13721 = vst.msk [vmem:[%s14087_s14 + $0xb0] sm:$0xff] %vm8632_vm1, %v9925_v27   ;;  %v10065_v56 = vpop.permute.xlu2 %10064  }
 0x554   : > { %v10030_v11 = vpop.permute.xlu1 %10029   ;;  %13757 = vst.msk [vmem:[%s14087_s14 + $0x130] sm:$0xff] %vm8632_vm1, %v10065_v56  }
 0x555   : > { %13748 = vst.msk [vmem:[%s14087_s14 + $0x110] sm:$0xff] %vm8632_vm1, %v10030_v11  }
 0x556   : > { %v9995_v12 = vpop.permute.xlu0 %9994  }
 0x557   : > { %13739 = vst.msk [vmem:[%s14087_s14 + $0xf0] sm:$0xff] %vm8632_vm1, %v9995_v12  }
 0x558   : > { %10799 = vrot.lane.b32.xlu2 %v10798_v35, %s14021_s7 }
 0x55b   : > { %v10170_v62 = vpop.permute.xlu2 %10169  }
 0x55c   : > { %v10135_v43 = vpop.permute.xlu1 %10134   ;;  %13784 = vst.msk [vmem:[%s14087_s14 + $0x190] sm:$0xff] %vm8632_vm1, %v10170_v62  }
 0x55d   : > { %13775 = vst.msk [vmem:[%s14087_s14 + $0x170] sm:$0xff] %vm8632_vm1, %v10135_v43  }
 0x55e   : > { %v10100_v4 = vpop.permute.xlu0 %10099  }
 0x55f   : > { %13766 = vst.msk [vmem:[%s14087_s14 + $0x150] sm:$0xff] %vm8632_vm1, %v10100_v4  }
 0x564   : > { %v10240_v6 = vpop.permute.xlu1 %10239  }
 0x565   : > { %13802 = vst.msk [vmem:[%s14087_s14 + $0x1d0] sm:$0xff] %vm8632_vm1, %v10240_v6  }
 0x566   : > { %v10205_v32 = vpop.permute.xlu0 %10204  }
 0x567   : > { %13793 = vst.msk [vmem:[%s14087_s14 + $0x1b0] sm:$0xff] %vm8632_vm1, %v10205_v32  }
 0x56a   : > { %v10275_v61 = vpop.permute.xlu2 %10274  }
 0x56b   : > { %13811 = vst.msk [vmem:[%s14087_s14 + $0x1f0] sm:$0xff] %vm8632_vm1, %v10275_v61  }
 0x56c   : > { %v10345_v44 = vpop.permute.xlu1 %10344  }
 0x56d   : > { %13829 = vst.msk [vmem:[%s14087_s14 + $0x38] sm:$0xff] %vm8632_vm1, %v10345_v44  }
 0x56e   : > { %v10310_v51 = vpop.permute.xlu0 %10309  }
 0x56f   : > { %13820 = vst.msk [vmem:[%s14087_s14 + $0x18] sm:$0xff] %vm8632_vm1, %v10310_v51  }
 0x574   : > { %v10450_v52 = vpop.permute.xlu1 %10449  }
 0x575   : > { %13856 = vst.msk [vmem:[%s14087_s14 + $0x98] sm:$0xff] %vm8632_vm1, %v10450_v52  }
 0x576   : > { %v10415_v2 = vpop.permute.xlu0 %10414  }
 0x577   : > { %13847 = vst.msk [vmem:[%s14087_s14 + $0x78] sm:$0xff] %vm8632_vm1, %v10415_v2  }
 0x57e   : > { %v10520_v39 = vpop.permute.xlu0 %10519  }
 0x57f   : > { %13874 = vst.msk [vmem:[%s14087_s14 + $0xd8] sm:$0xff] %vm8632_vm1, %v10520_v39  }
 0x58a   : > { %v10380_v47 = vpop.permute.xlu2 %10379  }
 0x58b   : > { %13838 = vst.msk [vmem:[%s14087_s14 + $0x58] sm:$0xff] %vm8632_vm1, %v10380_v47  }
 0x58e   : > { %v10555_v21 = vpop.permute.xlu1 %10554  }
 0x58f   : > { %13883 = vst.msk [vmem:[%s14087_s14 + $0xf8] sm:$0xff] %vm8632_vm1, %v10555_v21  }
 0x593   : > { %v10625_v20 = vpop.permute.xlu0 %10624  }
 0x594   : > { %13901 = vst.msk [vmem:[%s14087_s14 + $0x138] sm:$0xff] %vm8632_vm1, %v10625_v20  }
 0x599   : > { %v10485_v57 = vpop.permute.xlu2 %10484  }
 0x59a   : > { %13865 = vst.msk [vmem:[%s14087_s14 + $0xb8] sm:$0xff] %vm8632_vm1, %v10485_v57  }
 0x5a2   : > { %v10590_v26 = vpop.permute.xlu2 %10589  }
 0x5a3   : > { %13892 = vst.msk [vmem:[%s14087_s14 + $0x118] sm:$0xff] %vm8632_vm1, %v10590_v26  }
 0x5aa   : > { %v10660_v7 = vpop.permute.xlu1 %10659   ;;  %v10695_v31 = vpop.permute.xlu2 %10694  }
 0x5ab   : > { %13910 = vst.msk [vmem:[%s14087_s14 + $0x158] sm:$0xff] %vm8632_vm1, %v10660_v7  }
 0x5ac   : > { %13919 = vst.msk [vmem:[%s14087_s14 + $0x178] sm:$0xff] %vm8632_vm1, %v10695_v31  }
 0x5ad   : > { %v10730_v24 = vpop.permute.xlu0 %10729  }
 0x5ae   : > { %13928 = vst.msk [vmem:[%s14087_s14 + $0x198] sm:$0xff] %vm8632_vm1, %v10730_v24  }
 0x5b2   : > { %v10800_v54 = vpop.permute.xlu2 %10799  }
 0x5b3   : > { %13946 = vst.msk [vmem:[%s14087_s14 + $0x1d8] sm:$0xff] %vm8632_vm1, %v10800_v54  }
 0x5b5   : > { %v10835_v53 = vpop.permute.xlu0 %10834  }
 0x5b6   : > { %13955 = vst.msk [vmem:[%s14087_s14 + $0x1f8] sm:$0xff] %vm8632_vm1, %v10835_v53  }
 0x5b9   : > { %v10765_v33 = vpop.permute.xlu1 %10764  }
 0x5ba   : > { %13937 = vst.msk [vmem:[%s14087_s14 + $0x1b8] sm:$0xff] %vm8632_vm1, %v10765_v33  }
 0x5bb PF: > { %s10_s6 = sadd.s32 1, %s14017_s6  }
 0x5bc   : > { %p7_p7 = scmp.ge.s32.totalorder %s10_s6, 4  }
 0x5be   :  { %9 = sbr.rel (!%p7_p7) target bundleno = 2 (0x2), region = 3119 }
 0x5c3   :  { %10862 = vsyncpa [#allocation1], 1 }
 0x5c4   :  { %10864 = vsyncpa [#allocation1 + $0x1], 1 }

// kernel: model_forward.1
= control target key start
LH: loop header
LB: loop body
LE: loop exit
PB: predicated region body
PF: predicated region fallthrough
CT: control target
= control target key end

     0   :  { %s1487_s21 = smov 0   ;;  %s1489_s22 = smov 0   ;;  %s2131_s0 = inlined_call_operand.vmem [shape: f32[64,4096], index: 0, kind: input, shape index: {}, may-alias: {0,1}]   ;;  %s2132_s1 = inlined_call_operand.vmem [shape: f32[64,4096], index: 1, kind: input, shape index: {}, may-alias: {0,1}]   ;;  %s2133_s2 = inlined_call_operand.vmem [shape: bf16[8,64], index: 2, kind: input, shape index: {}]   ;;  %s2134_s3 = inlined_call_operand.vmem [shape: f32[8,1], index: 3, kind: input, shape index: {}]   ;;  %s2135_s4 = inlined_call_operand.vmem [shape: bf16[8,72], index: 4, kind: input, shape index: {}]   ;;  %s2136_s5 = inlined_call_operand.vmem [shape: f32[8,1], index: 5, kind: input, shape index: {}]   ;;  %s2137_s6 = inlined_call_operand.vmem [shape: f32[8,4096], index: 6, kind: output, shape index: {}]  }
   0x1   :  { %s1491_s23 = smov 0   ;;  %s1493_s24 = smov 0  }
   0x2   :  { %s1495_s25 = smov 0  }
   0x3 LB: > { %s1271_s26 = sadd.s32 4294967295, %s1444_s25   ;;  %s1514_s27 = sadd.s32 1, %s1444_s25   ;;  %s1444_s25 = sphi %s1495_s25, %s2144_s25   ;;  %s1440_s24 = sphi %s1493_s24, %s2143_s24   ;;  %s1436_s23 = sphi %s1491_s23, %s2142_s23   ;;  %s1432_s22 = sphi %s1489_s22, %s2141_s22   ;;  %s1428_s21 = sphi %s1487_s21, %s2140_s21  }
   0x4   : > { %s20_s28 = ssub.s32 %s1444_s25, %s1514_s27  ;;  %s23_s29 = sadd.s32 1, %s1440_s24 }
   0x5   : > { %p21_p0 = scmp.eq.s32.totalorder %s20_s28, 0  ;;  %p30_p1 = scmp.ne.s32.totalorder %s1440_s24, %s1436_s23 }
   0x6   : > { %p31_p2 = scmp.eq.s32.totalorder %s1444_s25, 0  ;;  %s1309_s30 = sshll.u32 %s1444_s25, 2 }
   0x7   : > { %s1524_s7 = scalar_select %p21_p0, %s1440_s24, %s23_s29  }
   0x8   : > { %p1528_p3 = por %p31_p2, %p30_p1  ;;  %s1310_s9 = sadd.s32 4, %s1309_s30 }
   0x9   : > { %p48_p4 = scmp.lt.s32.totalorder %s1310_s9, 15  ;;  %s1312_s10 = sadd.s32 4, %s1310_s9 }
   0xa   : > { %p52_p5 = scmp.lt.s32.totalorder %s1312_s10, 15  ;;  %p64_p6 = scmp.ne.s32.totalorder %s1432_s22, %s1428_s21 }
   0xb   : > { %s2146_s9 = smov (!%p48_p4, %s1310_s9), 15  ;;  %s57_s12 = sadd.s32 1, %s1432_s22 }
   0xc   : > { %s2148_s10 = smov (!%p52_p5, %s1312_s10), 15  ;;  %p1540_p8 = por %p64_p6, %p31_p2 }
   0xd   : > { %s54_s11 = ssub.s32 %s2146_s9, %s2148_s10  ;;  %p1276_p9 = scmp.ge.s32.totalorder %s1444_s25, 4 }
   0xe   : > { %p55_p7 = scmp.eq.s32.totalorder %s54_s11, 0 }
   0xf   : > { %212 = sbr.rel (%p1276_p9) target bundleno = 108 (0x6c), region = 32 }
  0x10   : > { %s1545_s14 = scalar_select %p55_p7, %s1432_s22, %s57_s12  }
  0x14   : > { %215 = sbr.rel (!%p1528_p3) target bundleno = 88 (0x58), region = 36  ;;  %s217_s15 = sand.u32 (%p1528_p3), 1, %s1440_s24  }
  0x15   : > { %s1313_s16 = sshll.u32 (%p1528_p3), %s1444_s25, 6  ;;  %s1277_s17 = sshll.u32 (%p1528_p3), %s217_s15, 9 }
  0x16   : > { %s1555_s20 = scalar_lea.vmem (%p1528_p3), %s2131_s0, %s1313_s16  ;;  %s1560_s28 = scalar_lea.vmem (%p1528_p3), [#allocation2], %s1277_s17 }
  0x17   : > { %v235_v0 = vld [vmem:[%s1555_s20] sm:$0xff] (%p1528_p3)  ;;  %v237_v1 = vld [vmem:[%s1555_s20 + $0x8] sm:$0xff] (%p1528_p3)  ;;  %v239_v2 = vld [vmem:[%s1555_s20 + $0x10] sm:$0xff] (%p1528_p3) }
  0x18   : > { %236 = vst [vmem:[%s1560_s28] sm:$0xff] (%p1528_p3), %v235_v0  ;;  %v241_v3 = vld [vmem:[%s1555_s20 + $0x18] sm:$0xff] (%p1528_p3)  ;;  %v243_v4 = vld [vmem:[%s1555_s20 + $0x20] sm:$0xff] (%p1528_p3)  ;;  %v245_v5 = vld [vmem:[%s1555_s20 + $0x28] sm:$0xff] (%p1528_p3) }
  0x19   : > { %238 = vst [vmem:[%s1560_s28 + $0x8] sm:$0xff] %v237_v1  ;;  %v247_v6 = vld [vmem:[%s1555_s20 + $0x30] sm:$0xff]  ;;  %v249_v7 = vld [vmem:[%s1555_s20 + $0x38] sm:$0xff]  ;;  %v251_v8 = vld [vmem:[%s1555_s20 + $0x100] sm:$0xff] }
  0x1a   : > { %240 = vst [vmem:[%s1560_s28 + $0x10] sm:$0xff] %v239_v2  ;;  %v253_v9 = vld [vmem:[%s1555_s20 + $0x108] sm:$0xff]  ;;  %v255_v10 = vld [vmem:[%s1555_s20 + $0x110] sm:$0xff]  ;;  %v257_v11 = vld [vmem:[%s1555_s20 + $0x118] sm:$0xff] }
  0x1b   : > { %242 = vst [vmem:[%s1560_s28 + $0x18] sm:$0xff] %v241_v3  ;;  %v259_v12 = vld [vmem:[%s1555_s20 + $0x120] sm:$0xff]  ;;  %v261_v13 = vld [vmem:[%s1555_s20 + $0x128] sm:$0xff]  ;;  %v263_v14 = vld [vmem:[%s1555_s20 + $0x130] sm:$0xff] }
  0x1c   : > { %244 = vst [vmem:[%s1560_s28 + $0x20] sm:$0xff] %v243_v4  ;;  %v265_v15 = vld [vmem:[%s1555_s20 + $0x138] sm:$0xff]  ;;  %v267_v16 = vld [vmem:[%s1555_s20 + $0x200] sm:$0xff]  ;;  %v269_v17 = vld [vmem:[%s1555_s20 + $0x208] sm:$0xff] }
  0x1d   : > { %246 = vst [vmem:[%s1560_s28 + $0x28] sm:$0xff] %v245_v5  ;;  %v271_v18 = vld [vmem:[%s1555_s20 + $0x210] sm:$0xff]  ;;  %v273_v19 = vld [vmem:[%s1555_s20 + $0x218] sm:$0xff]  ;;  %v275_v20 = vld [vmem:[%s1555_s20 + $0x220] sm:$0xff] }
  0x1e   : > { %248 = vst [vmem:[%s1560_s28 + $0x30] sm:$0xff] %v247_v6  ;;  %v277_v21 = vld [vmem:[%s1555_s20 + $0x228] sm:$0xff]  ;;  %v279_v22 = vld [vmem:[%s1555_s20 + $0x230] sm:$0xff]  ;;  %v281_v23 = vld [vmem:[%s1555_s20 + $0x238] sm:$0xff] }
  0x1f   : > { %250 = vst [vmem:[%s1560_s28 + $0x38] sm:$0xff] %v249_v7  ;;  %v283_v24 = vld [vmem:[%s1555_s20 + $0x300] sm:$0xff]  ;;  %v285_v25 = vld [vmem:[%s1555_s20 + $0x308] sm:$0xff]  ;;  %v287_v26 = vld [vmem:[%s1555_s20 + $0x310] sm:$0xff] }
  0x20   : > { %252 = vst [vmem:[%s1560_s28 + $0x40] sm:$0xff] %v251_v8  ;;  %v289_v27 = vld [vmem:[%s1555_s20 + $0x318] sm:$0xff]  ;;  %v291_v28 = vld [vmem:[%s1555_s20 + $0x320] sm:$0xff]  ;;  %v293_v29 = vld [vmem:[%s1555_s20 + $0x328] sm:$0xff] }
  0x21   : > { %254 = vst [vmem:[%s1560_s28 + $0x48] sm:$0xff] %v253_v9  ;;  %v295_v30 = vld [vmem:[%s1555_s20 + $0x330] sm:$0xff]  ;;  %v297_v31 = vld [vmem:[%s1555_s20 + $0x338] sm:$0xff]  ;;  %v299_v32 = vld [vmem:[%s1555_s20 + $0x400] sm:$0xff] }
  0x22   : > { %256 = vst [vmem:[%s1560_s28 + $0x50] sm:$0xff] %v255_v10  ;;  %v301_v33 = vld [vmem:[%s1555_s20 + $0x408] sm:$0xff]  ;;  %v303_v34 = vld [vmem:[%s1555_s20 + $0x410] sm:$0xff]  ;;  %v305_v35 = vld [vmem:[%s1555_s20 + $0x418] sm:$0xff] }
  0x23   : > { %258 = vst [vmem:[%s1560_s28 + $0x58] sm:$0xff] %v257_v11  ;;  %v307_v36 = vld [vmem:[%s1555_s20 + $0x420] sm:$0xff]  ;;  %v309_v37 = vld [vmem:[%s1555_s20 + $0x428] sm:$0xff]  ;;  %v311_v38 = vld [vmem:[%s1555_s20 + $0x430] sm:$0xff] }
  0x24   : > { %260 = vst [vmem:[%s1560_s28 + $0x60] sm:$0xff] %v259_v12  ;;  %v313_v39 = vld [vmem:[%s1555_s20 + $0x438] sm:$0xff]  ;;  %v315_v40 = vld [vmem:[%s1555_s20 + $0x500] sm:$0xff]  ;;  %v317_v41 = vld [vmem:[%s1555_s20 + $0x508] sm:$0xff] }
  0x25   : > { %262 = vst [vmem:[%s1560_s28 + $0x68] sm:$0xff] %v261_v13  ;;  %v319_v42 = vld [vmem:[%s1555_s20 + $0x510] sm:$0xff]  ;;  %v321_v43 = vld [vmem:[%s1555_s20 + $0x518] sm:$0xff]  ;;  %v323_v44 = vld [vmem:[%s1555_s20 + $0x520] sm:$0xff] }
  0x26   : > { %264 = vst [vmem:[%s1560_s28 + $0x70] sm:$0xff] %v263_v14  ;;  %v325_v45 = vld [vmem:[%s1555_s20 + $0x528] sm:$0xff]  ;;  %v327_v46 = vld [vmem:[%s1555_s20 + $0x530] sm:$0xff]  ;;  %v329_v47 = vld [vmem:[%s1555_s20 + $0x538] sm:$0xff] }
  0x27   : > { %266 = vst [vmem:[%s1560_s28 + $0x78] sm:$0xff] %v265_v15  ;;  %v331_v48 = vld [vmem:[%s1555_s20 + $0x600] sm:$0xff]  ;;  %v333_v49 = vld [vmem:[%s1555_s20 + $0x608] sm:$0xff]  ;;  %v335_v50 = vld [vmem:[%s1555_s20 + $0x610] sm:$0xff] }
  0x28   : > { %268 = vst [vmem:[%s1560_s28 + $0x80] sm:$0xff] %v267_v16  ;;  %v337_v51 = vld [vmem:[%s1555_s20 + $0x618] sm:$0xff]  ;;  %v339_v52 = vld [vmem:[%s1555_s20 + $0x620] sm:$0xff]  ;;  %v341_v53 = vld [vmem:[%s1555_s20 + $0x628] sm:$0xff] }
  0x29   : > { %270 = vst [vmem:[%s1560_s28 + $0x88] sm:$0xff] %v269_v17  ;;  %v343_v54 = vld [vmem:[%s1555_s20 + $0x630] sm:$0xff]  ;;  %v345_v55 = vld [vmem:[%s1555_s20 + $0x638] sm:$0xff]  ;;  %v347_v56 = vld [vmem:[%s1555_s20 + $0x700] sm:$0xff] }
  0x2a   : > { %272 = vst [vmem:[%s1560_s28 + $0x90] sm:$0xff] %v271_v18  ;;  %v349_v57 = vld [vmem:[%s1555_s20 + $0x708] sm:$0xff]  ;;  %v351_v58 = vld [vmem:[%s1555_s20 + $0x710] sm:$0xff]  ;;  %v353_v59 = vld [vmem:[%s1555_s20 + $0x718] sm:$0xff] }
  0x2b   : > { %274 = vst [vmem:[%s1560_s28 + $0x98] sm:$0xff] %v273_v19  ;;  %v355_v60 = vld [vmem:[%s1555_s20 + $0x720] sm:$0xff]  ;;  %v357_v61 = vld [vmem:[%s1555_s20 + $0x728] sm:$0xff]  ;;  %v359_v62 = vld [vmem:[%s1555_s20 + $0x730] sm:$0xff] }
  0x2c   : > { %276 = vst [vmem:[%s1560_s28 + $0xa0] sm:$0xff] %v275_v20  ;;  %v361_v63 = vld [vmem:[%s1555_s20 + $0x738] sm:$0xff] }
  0x2d   : > { %278 = vst [vmem:[%s1560_s28 + $0xa8] sm:$0xff] %v277_v21 }
  0x2e   : > { %280 = vst [vmem:[%s1560_s28 + $0xb0] sm:$0xff] %v279_v22 }
  0x2f   : > { %282 = vst [vmem:[%s1560_s28 + $0xb8] sm:$0xff] %v281_v23 }
  0x30   : > { %284 = vst [vmem:[%s1560_s28 + $0xc0] sm:$0xff] %v283_v24 }
  0x31   : > { %286 = vst [vmem:[%s1560_s28 + $0xc8] sm:$0xff] %v285_v25 }
  0x32   : > { %288 = vst [vmem:[%s1560_s28 + $0xd0] sm:$0xff] %v287_v26 }
  0x33   : > { %290 = vst [vmem:[%s1560_s28 + $0xd8] sm:$0xff] %v289_v27 }
  0x34   : > { %292 = vst [vmem:[%s1560_s28 + $0xe0] sm:$0xff] %v291_v28 }
  0x35   : > { %294 = vst [vmem:[%s1560_s28 + $0xe8] sm:$0xff] %v293_v29 }
  0x36   : > { %296 = vst [vmem:[%s1560_s28 + $0xf0] sm:$0xff] %v295_v30 }
  0x37   : > { %298 = vst [vmem:[%s1560_s28 + $0xf8] sm:$0xff] %v297_v31 }
  0x38   : > { %300 = vst [vmem:[%s1560_s28 + $0x100] sm:$0xff] %v299_v32 }
  0x39   : > { %302 = vst [vmem:[%s1560_s28 + $0x108] sm:$0xff] %v301_v33 }
  0x3a   : > { %304 = vst [vmem:[%s1560_s28 + $0x110] sm:$0xff] %v303_v34 }
  0x3b   : > { %306 = vst [vmem:[%s1560_s28 + $0x118] sm:$0xff] %v305_v35 }
  0x3c   : > { %308 = vst [vmem:[%s1560_s28 + $0x120] sm:$0xff] %v307_v36 }
  0x3d   : > { %310 = vst [vmem:[%s1560_s28 + $0x128] sm:$0xff] %v309_v37 }
  0x3e   : > { %312 = vst [vmem:[%s1560_s28 + $0x130] sm:$0xff] %v311_v38 }
  0x3f   : > { %314 = vst [vmem:[%s1560_s28 + $0x138] sm:$0xff] %v313_v39 }
  0x40   : > { %316 = vst [vmem:[%s1560_s28 + $0x140] sm:$0xff] %v315_v40 }
  0x41   : > { %318 = vst [vmem:[%s1560_s28 + $0x148] sm:$0xff] %v317_v41 }
  0x42   : > { %320 = vst [vmem:[%s1560_s28 + $0x150] sm:$0xff] %v319_v42 }
  0x43   : > { %322 = vst [vmem:[%s1560_s28 + $0x158] sm:$0xff] %v321_v43 }
  0x44   : > { %324 = vst [vmem:[%s1560_s28 + $0x160] sm:$0xff] %v323_v44 }
  0x45   : > { %326 = vst [vmem:[%s1560_s28 + $0x168] sm:$0xff] %v325_v45 }
  0x46   : > { %328 = vst [vmem:[%s1560_s28 + $0x170] sm:$0xff] %v327_v46 }
  0x47   : > { %330 = vst [vmem:[%s1560_s28 + $0x178] sm:$0xff] %v329_v47 }
  0x48   : > { %332 = vst [vmem:[%s1560_s28 + $0x180] sm:$0xff] %v331_v48 }
  0x49   : > { %334 = vst [vmem:[%s1560_s28 + $0x188] sm:$0xff] %v333_v49 }
  0x4a   : > { %336 = vst [vmem:[%s1560_s28 + $0x190] sm:$0xff] %v335_v50 }
  0x4b   : > { %338 = vst [vmem:[%s1560_s28 + $0x198] sm:$0xff] %v337_v51 }
  0x4c   : > { %340 = vst [vmem:[%s1560_s28 + $0x1a0] sm:$0xff] %v339_v52 }
  0x4d   : > { %342 = vst [vmem:[%s1560_s28 + $0x1a8] sm:$0xff] %v341_v53 }
  0x4e   : > { %344 = vst [vmem:[%s1560_s28 + $0x1b0] sm:$0xff] %v343_v54 }
  0x4f   : > { %346 = vst [vmem:[%s1560_s28 + $0x1b8] sm:$0xff] %v345_v55 }
  0x50   : > { %348 = vst [vmem:[%s1560_s28 + $0x1c0] sm:$0xff] %v347_v56 }
  0x51   : > { %350 = vst [vmem:[%s1560_s28 + $0x1c8] sm:$0xff] %v349_v57 }
  0x52   : > { %352 = vst [vmem:[%s1560_s28 + $0x1d0] sm:$0xff] %v351_v58 }
  0x53   : > { %354 = vst [vmem:[%s1560_s28 + $0x1d8] sm:$0xff] %v353_v59 }
  0x54   : > { %356 = vst [vmem:[%s1560_s28 + $0x1e0] sm:$0xff] %v355_v60 }
  0x55   : > { %358 = vst [vmem:[%s1560_s28 + $0x1e8] sm:$0xff] %v357_v61 }
  0x56   : > { %360 = vst [vmem:[%s1560_s28 + $0x1f0] sm:$0xff] %v359_v62 }
  0x57   : > { %362 = vst [vmem:[%s1560_s28 + $0x1f8] sm:$0xff] %v361_v63 }
  0x58 PF: > { %368 = sbr.rel (!%p1540_p8) target bundleno = 108 (0x6c), region = 59  ;;  %s370_s29 = sand.u32 (%p1540_p8), 1, %s1432_s22  }
  0x59   : > { %s1316_s30 = sshll.u32 (%p1540_p8), %s2146_s9, 4  ;;  %s1280_s8 = sshll.u32 (%p1540_p8), %s370_s29, 7 }
  0x5a   : > { %s1694_s12 = scalar_lea.vmem (%p1540_p8), %s2132_s1, %s1316_s30  ;;  %s372_s9 = scalar_lea.vmem (%p1540_p8), [#allocation3], %s1280_s8 }
  0x5b   : > { %v392_v0 = vld [vmem:[%s1694_s12] sm:$0xff] (%p1540_p8)  ;;  %v394_v1 = vld [vmem:[%s1694_s12 + $0x8] sm:$0xff] (%p1540_p8) }
  0x5c   : > { %v396_v2 = vld [vmem:[%s1694_s12 + $0x100] sm:$0xff] (%p1540_p8)  ;;  %393 = vst [vmem:[%s372_s9] sm:$0xff] (%p1540_p8), %v392_v0  ;;  %v398_v3 = vld [vmem:[%s1694_s12 + $0x108] sm:$0xff] (%p1540_p8) }
  0x5d   : > { %395 = vst [vmem:[%s372_s9 + $0x8] sm:$0xff] %v394_v1  ;;  %v400_v4 = vld [vmem:[%s1694_s12 + $0x200] sm:$0xff]  ;;  %v402_v5 = vld [vmem:[%s1694_s12 + $0x208] sm:$0xff] }
  0x5e   : > { %397 = vst [vmem:[%s372_s9 + $0x10] sm:$0xff] %v396_v2  ;;  %v404_v6 = vld [vmem:[%s1694_s12 + $0x300] sm:$0xff]  ;;  %v406_v7 = vld [vmem:[%s1694_s12 + $0x308] sm:$0xff] }
  0x5f   : > { %399 = vst [vmem:[%s372_s9 + $0x18] sm:$0xff] %v398_v3  ;;  %v408_v8 = vld [vmem:[%s1694_s12 + $0x400] sm:$0xff]  ;;  %v410_v9 = vld [vmem:[%s1694_s12 + $0x408] sm:$0xff] }
  0x60   : > { %401 = vst [vmem:[%s372_s9 + $0x20] sm:$0xff] %v400_v4  ;;  %v412_v10 = vld [vmem:[%s1694_s12 + $0x500] sm:$0xff]  ;;  %v414_v11 = vld [vmem:[%s1694_s12 + $0x508] sm:$0xff] }
  0x61   : > { %403 = vst [vmem:[%s372_s9 + $0x28] sm:$0xff] %v402_v5  ;;  %v416_v12 = vld [vmem:[%s1694_s12 + $0x600] sm:$0xff]  ;;  %v418_v13 = vld [vmem:[%s1694_s12 + $0x608] sm:$0xff] }
  0x62   : > { %405 = vst [vmem:[%s372_s9 + $0x30] sm:$0xff] %v404_v6  ;;  %v420_v14 = vld [vmem:[%s1694_s12 + $0x700] sm:$0xff]  ;;  %v422_v15 = vld [vmem:[%s1694_s12 + $0x708] sm:$0xff] }
  0x63   : > { %407 = vst [vmem:[%s372_s9 + $0x38] sm:$0xff] %v406_v7 }
  0x64   : > { %409 = vst [vmem:[%s372_s9 + $0x40] sm:$0xff] %v408_v8 }
  0x65   : > { %411 = vst [vmem:[%s372_s9 + $0x48] sm:$0xff] %v410_v9 }
  0x66   : > { %413 = vst [vmem:[%s372_s9 + $0x50] sm:$0xff] %v412_v10 }
  0x67   : > { %415 = vst [vmem:[%s372_s9 + $0x58] sm:$0xff] %v414_v11 }
  0x68   : > { %417 = vst [vmem:[%s372_s9 + $0x60] sm:$0xff] %v416_v12 }
  0x69   : > { %419 = vst [vmem:[%s372_s9 + $0x68] sm:$0xff] %v418_v13 }
  0x6a   : > { %421 = vst [vmem:[%s372_s9 + $0x70] sm:$0xff] %v420_v14 }
  0x6b   : > { %423 = vst [vmem:[%s372_s9 + $0x78] sm:$0xff] %v422_v15 }
  0x6c PF: > { %p1284_p10 = scmp.ge.s32.totalorder %s1444_s25, 1  ;;  %p428_p11 = scmp.lt.s32.totalorder %s1444_s25, 5 }
  0x6e   : > { %p429_p12 = pnand %p1284_p10, %p428_p11 }
  0x6f   : > { %s435_s13 = sand.u32 (!%p429_p12), 1, %s1436_s23   ;;  %s442_s23 = sand.u32 (!%p429_p12), 1, %s1428_s21  }
  0x70   : > { %432 = sbr.rel (%p429_p12) target bundleno = 664 (0x298), region = 82  ;;  %s1285_s17 = sshll.u32 (!%p429_p12), %s435_s13, 9 }
  0x71   : > { %s1718_s18 = scalar_lea.vmem (!%p429_p12), [#allocation2], %s1285_s17  ;;  %s1286_s21 = sshll.u32 (!%p429_p12), %s442_s23, 7 }
  0x72   : > { %s1794_s28 = scalar_lea.vmem (!%p429_p12), [#allocation3], %s1286_s21  ;;  %s1447_s29 = smov (!%p429_p12), 63  }
  0x73   : > { %s1448_s30 = smov (!%p429_p12), 126   ;;  %s1449_s8 = smov (!%p429_p12), 62  }
  0x74   : > { %s1450_s10 = smov (!%p429_p12), 127   ;;  %s1451_s11 = smov (!%p429_p12), 64  }
  0x75   : > { %v585_v16 = vld [vmem:[%s2134_s3] sm:$0xff]  ;;  %v1446_v17 = vmov 0   ;;  %v537_v20 = vld [vmem:[%s1718_s18 + $0x188] sm:$0xff]  ;;  %v538_v23 = vld [vmem:[%s1718_s18 + $0x190] sm:$0xff]  ;;  %vm591_vm0 = vcmask 523264   ;;  %vm853_vm1 = vcmask 1031168  }
  0x76   : > { %1365 = vset.pattern.permute.xlu0 %v1446_v17  ;;  %v536_v18 = vld [vmem:[%s1718_s18 + $0x180] sm:$0xff]  ;;  %v545_v22 = vld [vmem:[%s1718_s18 + $0x1c8] sm:$0xff]  ;;  %v546_v24 = vld [vmem:[%s1718_s18 + $0x1d0] sm:$0xff]  ;;  %vm826_vm2 = vcmask 1039360   ;;  %vm950_vm3 = vcmask 1043456   ;;  %vm934_vm4 = vcmask 506880  }
  0x77   : > { %588 = vperm.xlu0 %1365, %v585_v16   ;;  %v544_v19 = vld [vmem:[%s1718_s18 + $0x1c0] sm:$0xff]  ;;  %v578_v25 = vpack.c.bf16 %v545_v22, %v537_v20  ;;  %v579_v26 = vpack.c.bf16 %v546_v24, %v538_v23  ;;  %v539_v27 = vld [vmem:[%s1718_s18 + $0x198] sm:$0xff]  ;;  %v521_v32 = vld [vmem:[%s1718_s18 + $0x108] sm:$0xff]  ;;  %vm907_vm5 = vcmask 515072   ;;  %vm1058_vm6 = vcmask 588800   ;;  %s1287_s16 = sshll.u32 %s1271_s26, 3 }
  0x78   : > { %v577_v21 = vpack.c.bf16 %v544_v19, %v536_v18  ;;  %v547_v28 = vld [vmem:[%s1718_s18 + $0x1d8] sm:$0xff]  ;;  %v520_v29 = vld [vmem:[%s1718_s18 + $0x100] sm:$0xff]  ;;  %v529_v33 = vld [vmem:[%s1718_s18 + $0x148] sm:$0xff]  ;;  %p482_p13 = scmp.lt.s32.totalorder %s1287_s16, 31 }
  0x79   : > { %v580_v30 = vpack.c.bf16 %v547_v28, %v539_v27  ;;  %v528_v31 = vld [vmem:[%s1718_s18 + $0x140] sm:$0xff]  ;;  %612 = vmatpush.bf16.msra.mxu1 %v578_v25  ;;  %625 = vmatpush.bf16.msra.mxu2 %v579_v26  ;;  %v570_v35 = vpack.c.bf16 %v529_v33, %v521_v32  ;;  %v522_v36 = vld [vmem:[%s1718_s18 + $0x110] sm:$0xff]  ;;  %v523_v38 = vld [vmem:[%s1718_s18 + $0x118] sm:$0xff] }
  0x7a   : > { %599 = vmatpush.bf16.msra.mxu0 %v577_v21  ;;  %v569_v34 = vpack.c.bf16 %v528_v31, %v520_v29  ;;  %v530_v37 = vld [vmem:[%s1718_s18 + $0x150] sm:$0xff]  ;;  %v531_v40 = vld [vmem:[%s1718_s18 + $0x158] sm:$0xff]  ;;  %v504_v41 = vld [vmem:[%s1718_s18 + $0x80] sm:$0xff]  ;;  %s2150_s16 = smov (!%p482_p13, %s1287_s16), 31 }
  0x7b   : > { %638 = vmatpush.bf16.msra.mxu3 %v580_v30  ;;  %v571_v39 = vpack.c.bf16 %v530_v37, %v522_v36  ;;  %v512_v42 = vld [vmem:[%s1718_s18 + $0xc0] sm:$0xff]  ;;  %v572_v43 = vpack.c.bf16 %v531_v40, %v523_v38  ;;  %v505_v44 = vld [vmem:[%s1718_s18 + $0x88] sm:$0xff]  ;;  %v506_v46 = vld [vmem:[%s1718_s18 + $0x90] sm:$0xff]  ;;  %s1288_s17 = sshll.u32 %s2150_s16, 3 }
  0x7c   : > { %v513_v45 = vld [vmem:[%s1718_s18 + $0xc8] sm:$0xff]  ;;  %v561_v47 = vpack.c.bf16 %v512_v42, %v504_v41  ;;  %v514_v48 = vld [vmem:[%s1718_s18 + $0xd0] sm:$0xff]  ;;  %v507_v49 = vld [vmem:[%s1718_s18 + $0x98] sm:$0xff]  ;;  %s485_s19 = scalar_lea.vmem %s2137_s6, %s1288_s17 }
  0x7d   : > { %v515_v50 = vld [vmem:[%s1718_s18 + $0xd8] sm:$0xff]  ;;  %613 = vmatpush.bf16.msra.mxu1 %v570_v35  ;;  %626 = vmatpush.bf16.msra.mxu2 %v571_v39  ;;  %v562_v51 = vpack.c.bf16 %v513_v45, %v505_v44  ;;  %v563_v52 = vpack.c.bf16 %v514_v48, %v506_v46  ;;  %v488_v53 = vld [vmem:[%s1718_s18] sm:$0xff]  ;;  %v489_v55 = vld [vmem:[%s1718_s18 + $0x8] sm:$0xff] }
  0x7e   : > { %600 = vmatpush.bf16.msra.mxu0 %v569_v34  ;;  %v496_v54 = vld [vmem:[%s1718_s18 + $0x40] sm:$0xff]  ;;  %v564_v56 = vpack.c.bf16 %v515_v50, %v507_v49  ;;  %v497_v57 = vld [vmem:[%s1718_s18 + $0x48] sm:$0xff]  ;;  %v490_v58 = vld [vmem:[%s1718_s18 + $0x10] sm:$0xff] }
  0x7f   : > { %639 = vmatpush.bf16.msra.mxu3 %v572_v43  ;;  %v498_v59 = vld [vmem:[%s1718_s18 + $0x50] sm:$0xff]  ;;  %v491_v60 = vld [vmem:[%s1718_s18 + $0x18] sm:$0xff]  ;;  %v540_v62 = vld [vmem:[%s1718_s18 + $0x1a0] sm:$0xff]  ;;  %v553_v63 = vpack.c.bf16 %v496_v54, %v488_v53  ;;  %v554_v3 = vpack.c.bf16 %v497_v57, %v489_v55 }
  0x80   : > { %v499_v61 = vld [vmem:[%s1718_s18 + $0x58] sm:$0xff]  ;;  %v548_v0 = vld [vmem:[%s1718_s18 + $0x1e0] sm:$0xff]  ;;  %v541_v1 = vld [vmem:[%s1718_s18 + $0x1a8] sm:$0xff]  ;;  %v555_v4 = vpack.c.bf16 %v498_v59, %v490_v58 }
  0x81   : > { %v549_v2 = vld [vmem:[%s1718_s18 + $0x1e8] sm:$0xff]  ;;  %614 = vmatpush.bf16.msra.mxu1 %v562_v51  ;;  %627 = vmatpush.bf16.msra.mxu2 %v563_v52  ;;  %v556_v5 = vpack.c.bf16 %v499_v61, %v491_v60  ;;  %v581_v6 = vpack.c.bf16 %v548_v0, %v540_v62  ;;  %v542_v7 = vld [vmem:[%s1718_s18 + $0x1b0] sm:$0xff]  ;;  %v543_v9 = vld [vmem:[%s1718_s18 + $0x1b8] sm:$0xff] }
  0x82   : > { %601 = vmatpush.bf16.msra.mxu0 %v561_v47  ;;  %v550_v8 = vld [vmem:[%s1718_s18 + $0x1f0] sm:$0xff]  ;;  %v582_v10 = vpack.c.bf16 %v549_v2, %v541_v1  ;;  %v551_v11 = vld [vmem:[%s1718_s18 + $0x1f8] sm:$0xff]  ;;  %v524_v12 = vld [vmem:[%s1718_s18 + $0x120] sm:$0xff] }
  0x83   : > { %640 = vmatpush.bf16.msra.mxu3 %v564_v56  ;;  %v532_v13 = vld [vmem:[%s1718_s18 + $0x160] sm:$0xff]  ;;  %v525_v15 = vld [vmem:[%s1718_s18 + $0x128] sm:$0xff]  ;;  %v583_v17 = vpack.c.bf16 %v550_v8, %v542_v7  ;;  %v584_v18 = vpack.c.bf16 %v551_v11, %v543_v9  ;;  %v526_v20 = vld [vmem:[%s1718_s18 + $0x130] sm:$0xff] }
  0x84   : > { %v1766_v14 = vld [vmem:[%s2133_s2] sm:$0xf]  ;;  %v533_v16 = vld [vmem:[%s1718_s18 + $0x168] sm:$0xff]  ;;  %v573_v19 = vpack.c.bf16 %v532_v13, %v524_v12  ;;  %v534_v21 = vld [vmem:[%s1718_s18 + $0x170] sm:$0xff] }
  0x85   : > { %615 = vmatpush.bf16.msra.mxu1 %v554_v3  ;;  %628 = vmatpush.bf16.msra.mxu2 %v555_v4  ;;  %v527_v22 = vld [vmem:[%s1718_s18 + $0x138] sm:$0xff]  ;;  %v574_v23 = vpack.c.bf16 %v533_v16, %v525_v15  ;;  %v508_v25 = vld [vmem:[%s1718_s18 + $0xa0] sm:$0xff]  ;;  %v509_v27 = vld [vmem:[%s1718_s18 + $0xa8] sm:$0xff]  ;;  %v575_v29 = vpack.c.bf16 %v534_v21, %v526_v20 }
  0x86   : > { %602 = vmatpush.bf16.msra.mxu0 %v553_v63  ;;  %v535_v24 = vld [vmem:[%s1718_s18 + $0x178] sm:$0xff]  ;;  %v516_v26 = vld [vmem:[%s1718_s18 + $0xe0] sm:$0xff]  ;;  %v517_v28 = vld [vmem:[%s1718_s18 + $0xe8] sm:$0xff] }
  0x87   : > { %641 = vmatpush.bf16.msra.mxu3 %v556_v5  ;;  %v510_v30 = vld [vmem:[%s1718_s18 + $0xb0] sm:$0xff]  ;;  %v576_v31 = vpack.c.bf16 %v535_v24, %v527_v22  ;;  %v565_v32 = vpack.c.bf16 %v516_v26, %v508_v25  ;;  %v511_v34 = vld [vmem:[%s1718_s18 + $0xb8] sm:$0xff]  ;;  %v566_v36 = vpack.c.bf16 %v517_v28, %v509_v27  ;;  %v492_v37 = vld [vmem:[%s1718_s18 + $0x20] sm:$0xff] }
  0x88   : > { %1290 = vmatmul.msk.bf16.vlgmr.msra.gmra.mxu1 %vm591_vm0, %v1766_v14  ;;  %1291 = vmatmul.msk.bf16.vlgmr.msra.gmra.mxu2 %vm591_vm0, %v1766_v14  ;;  %v518_v33 = vld [vmem:[%s1718_s18 + $0xf0] sm:$0xff]  ;;  %v519_v35 = vld [vmem:[%s1718_s18 + $0xf8] sm:$0xff]  ;;  %v500_v38 = vld [vmem:[%s1718_s18 + $0x60] sm:$0xff] }
  0x89   : > { %1289 = vmatmul.msk.bf16.vlgmr.msra.gmra.mxu0 %vm591_vm0, %v1766_v14  ;;  %664 = vmatpush.bf16.msrb.mxu1 %v582_v10  ;;  %v493_v39 = vld [vmem:[%s1718_s18 + $0x28] sm:$0xff]  ;;  %v731_v41 = vld [vmem:[%s1794_s28 + $0x60] sm:$0xff]  ;;  %v733_v42 = vld [vmem:[%s1794_s28 + $0x70] sm:$0xff]  ;;  %v567_v43 = vpack.c.bf16 %v518_v33, %v510_v30  ;;  %v568_v46 = vpack.c.bf16 %v519_v35, %v511_v34  ;;  %v557_v47 = vpack.c.bf16 %v500_v38, %v492_v37 }
  0x8a   : > { %651 = vmatpush.bf16.msrb.mxu0 %v581_v6  ;;  %1292 = vmatmul.msk.bf16.vlgmr.msra.gmra.mxu3 %vm591_vm0, %v1766_v14  ;;  %v501_v40 = vld [vmem:[%s1718_s18 + $0x68] sm:$0xff]  ;;  %v734_v45 = vld [vmem:[%s1794_s28 + $0x78] sm:$0xff]  ;;  %v494_v48 = vld [vmem:[%s1718_s18 + $0x30] sm:$0xff]  ;;  %v741_v53 = vpack.c.bf16 %v733_v42, %v731_v41 }
  0x8b   : > { %677 = vmatpush.bf16.msrb.mxu2 %v583_v17  ;;  %690 = vmatpush.bf16.msrb.mxu3 %v584_v18  ;;  %v732_v44 = vld [vmem:[%s1794_s28 + $0x68] sm:$0xff]  ;;  %v502_v49 = vld [vmem:[%s1718_s18 + $0x70] sm:$0xff]  ;;  %v558_v50 = vpack.c.bf16 %v501_v40, %v493_v39  ;;  %v495_v51 = vld [vmem:[%s1718_s18 + $0x38] sm:$0xff] }
  0x8c   : > { %v503_v52 = vld [vmem:[%s1718_s18 + $0x78] sm:$0xff]  ;;  %v742_v54 = vpack.c.bf16 %v734_v45, %v732_v44  ;;  %v559_v55 = vpack.c.bf16 %v502_v49, %v494_v48  ;;  %v727_v57 = vld [vmem:[%s1794_s28 + $0x40] sm:$0xff]  ;;  %v729_v58 = vld [vmem:[%s1794_s28 + $0x50] sm:$0xff] }
  0x8d   : > { %665 = vmatpush.bf16.msrb.mxu1 %v574_v23  ;;  %v560_v56 = vpack.c.bf16 %v503_v52, %v495_v51  ;;  %v728_v59 = vld [vmem:[%s1794_s28 + $0x48] sm:$0xff]  ;;  %v730_v60 = vld [vmem:[%s1794_s28 + $0x58] sm:$0xff]  ;;  %v739_v61 = vpack.c.bf16 %v729_v58, %v727_v57  ;;  %v723_v63 = vld [vmem:[%s1794_s28 + $0x20] sm:$0xff] }
  0x8e   : > { %652 = vmatpush.bf16.msrb.mxu0 %v573_v19  ;;  %v740_v62 = vpack.c.bf16 %v730_v60, %v728_v59  ;;  %v725_v0 = vld [vmem:[%s1794_s28 + $0x30] sm:$0xff]  ;;  %v724_v1 = vld [vmem:[%s1794_s28 + $0x28] sm:$0xff]  ;;  %v726_v2 = vld [vmem:[%s1794_s28 + $0x38] sm:$0xff] }
  0x8f   : > { %678 = vmatpush.bf16.msrb.mxu2 %v575_v29  ;;  %691 = vmatpush.bf16.msrb.mxu3 %v576_v31  ;;  %v737_v3 = vpack.c.bf16 %v725_v0, %v723_v63  ;;  %v738_v4 = vpack.c.bf16 %v726_v2, %v724_v1  ;;  %v719_v5 = vld [vmem:[%s1794_s28] sm:$0xff]  ;;  %v721_v6 = vld [vmem:[%s1794_s28 + $0x10] sm:$0xff]  ;;  %v720_v7 = vld [vmem:[%s1794_s28 + $0x8] sm:$0xff] }
  0x90   : > { %v722_v8 = vld [vmem:[%s1794_s28 + $0x18] sm:$0xff]  ;;  %v735_v9 = vpack.c.bf16 %v721_v6, %v719_v5 }
  0x91   : > { %666 = vmatpush.bf16.msrb.mxu1 %v566_v36  ;;  %v736_v10 = vpack.c.bf16 %v722_v8, %v720_v7 }
  0x92   : > { %653 = vmatpush.bf16.msrb.mxu0 %v565_v32 }
  0x93   : > { %679 = vmatpush.bf16.msrb.mxu2 %v567_v43  ;;  %692 = vmatpush.bf16.msrb.mxu3 %v568_v46 }
  0x95   : > { %667 = vmatpush.bf16.msrb.mxu1 %v558_v50 }
  0x96   : > { %654 = vmatpush.bf16.msrb.mxu0 %v557_v47 }
  0x97   : > { %680 = vmatpush.bf16.msrb.mxu2 %v559_v55  ;;  %693 = vmatpush.bf16.msrb.mxu3 %v560_v56 }
  0x98   : > { %1294 = vmatmul.msk.bf16.vlgmr.msrb.gmra.mxu1 %vm591_vm0, %v1766_v14 }
  0x99   : > { %760 = vmatpush.bf16.msra.mxu1 %v742_v54  ;;  %1293 = vmatmul.msk.bf16.vlgmr.msrb.gmra.mxu0 %vm591_vm0, %v1766_v14 }
  0x9a   : > { %747 = vmatpush.bf16.msra.mxu0 %v741_v53  ;;  %1295 = vmatmul.msk.bf16.vlgmr.msrb.gmra.mxu2 %vm591_vm0, %v1766_v14 }
  0x9b   : > { %1296 = vmatmul.msk.bf16.vlgmr.msrb.gmra.mxu3 %vm591_vm0, %v1766_v14 }
  0x9d   : > { %761 = vmatpush.bf16.msra.mxu1 %v740_v62 }
  0x9e   : > { %748 = vmatpush.bf16.msra.mxu0 %v739_v61 }
  0xa1   : > { %762 = vmatpush.bf16.msra.mxu1 %v738_v4 }
  0xa2   : > { %749 = vmatpush.bf16.msra.mxu0 %v737_v3 }
  0xa5   : > { %763 = vmatpush.bf16.msra.mxu1 %v736_v10 }
  0xa6   : > { %750 = vmatpush.bf16.msra.mxu0 %v735_v9 }
  0xa8   : > { %1298 = vmatmul.msk.bf16.vlgmr.msra.gmra.mxu1 %vm591_vm0, %v1766_v14 }
  0xa9   : > { %1297 = vmatmul.msk.bf16.vlgmr.msra.gmra.mxu0 %vm591_vm0, %v1766_v14 }
  0xe9   : > { %v1828_v11 = vpop.permute.xlu0 %588 }
 0x105   : > { %v617_v15 = vpop.f32.mrf.mxu1 }
 0x106   : > { %v604_v12 = vpop.f32.mrf.mxu0  ;;  %v618_v16 = vadd.f32 %v617_v15, %v1828_v11 }
 0x107   : > { %v605_v13 = vadd.f32 %v604_v12, %v1828_v11 }
 0x109   : > { %1366 = vtanh.f32 %v605_v13 }
 0x10a   : > { %1368 = vtanh.f32 %v618_v16 }
 0x10b   : > { %v630_v17 = vpop.f32.mrf.mxu2 }
 0x10c   : > { %v631_v18 = vadd.f32 %v630_v17, %v1828_v11 }
 0x10d   : > { %v643_v19 = vpop.f32.mrf.mxu3  ;;  %v619_v23 = vpop.f32.mrf.mxu1 }
 0x10e   : > { %v606_v20 = vpop.f32.mrf.mxu0  ;;  %v644_v22 = vadd.f32 %v643_v19, %v1828_v11 }
 0x10f   : > { %v1367_v21 = vpop.eup %1366 }
 0x110   : > { %v1369_v14 = vpop.eup %1368  ;;  %1370 = vtanh.f32 %v1367_v21 }
 0x111   : > { %1372 = vtanh.f32 %v1369_v14 }
 0x112   : > { %1374 = vtanh.f32 %v631_v18 }
 0x113   : > { %1376 = vtanh.f32 %v644_v22  ;;  %v632_v24 = vpop.f32.mrf.mxu2 }
 0x115   : > { %v645_v26 = vpop.f32.mrf.mxu3  ;;  %v669_v29 = vpop.f32.mrf.mxu1 }
 0x116   : > { %v1371_v25 = vpop.eup %1370  ;;  %v656_v27 = vpop.f32.mrf.mxu0  ;;  %v670_v53 = vadd.f32 %v669_v29, %v1828_v11 }
 0x117   : > { %v1373_v28 = vpop.eup %1372  ;;  %v657_v51 = vadd.f32 %v656_v27, %v1828_v11 }
 0x118   : > { %v1375_v30 = vpop.eup %1374  ;;  %v715_v31 = vpack.c.bf16 %v1373_v28, %v1371_v25 }
 0x119   : > { %v1377_v32 = vpop.eup %1376  ;;  %1378 = vtanh.f32 %v1375_v30 }
 0x11a   : > { %v779_v33 = vunpack.c.h.b16 %v715_v31  ;;  %v778_v34 = vunpack.c.l.b16 %v715_v31  ;;  %1380 = vtanh.f32 %v1377_v32 }
 0x11c   : > { %v1834_v35 = vpack.c.b16 %v779_v33, %v779_v33  ;;  %v1836_v36 = vpack.c.b16 %v778_v34, %v778_v34 }
 0x11d   : > { %v1838_v37 = vpop.f32.mrf.mxu2  ;;  %v671_v40 = vpop.f32.mrf.mxu1 }
 0x11e   : > { %v1840_v38 = vpop.f32.mrf.mxu3  ;;  %891 = vrot.lane.b32.xlu1 %v1834_v35, %s1447_s29  ;;  %837 = vrot.lane.b32.xlu0 %v1834_v35, %s1448_s30  ;;  %v658_v39 = vpop.f32.mrf.mxu0  ;;  %v800_v43 = vrot.slane %v1834_v35, 4  ;;  %v799_v54 = vrot.slane %v1836_v36, 4  ;;  %v683_v9 = vadd.f32 %v1838_v37, %v1828_v11 }
 0x11f   : > { %835 = vrot.lane.b32.xlu2 %v1836_v36, %s1448_s30  ;;  %v1379_v41 = vpop.eup %1378  ;;  %v696_v10 = vadd.f32 %v1840_v38, %v1828_v11 }
 0x120   : > { %v1381_v42 = vpop.eup %1380 }
 0x121   : > { %v716_v44 = vpack.c.bf16 %v1381_v42, %v1379_v41  ;;  %v1052_v41 = vld [vmem:[%s2136_s5] sm:$0xff] }
 0x123   : > { %v780_v52 = vunpack.c.l.b16 %v716_v44  ;;  %v781_v1 = vunpack.c.h.b16 %v716_v44 }
 0x125   : > { %v684_v45 = vpop.f32.mrf.mxu2  ;;  %v765_v49 = vpop.f32.mrf.mxu1  ;;  %v1858_v55 = vpack.c.b16 %v780_v52, %v780_v52  ;;  %v1870_v4 = vpack.c.b16 %v781_v1, %v781_v1 }
 0x126   : > { %918 = vrot.lane.b32.xlu1 %v800_v43, %s1449_s8  ;;  %889 = vrot.lane.b32.xlu0 %v1836_v36, %s1447_s29  ;;  %v752_v46 = vpop.f32.mrf.mxu0  ;;  %v697_v47 = vpop.f32.mrf.mxu3  ;;  %v766_v50 = vadd.f32 %v765_v49, %v1828_v11 }
 0x127   : > { %810 = vrot.lane.b32.xlu2 %v800_v43, %s1450_s10  ;;  %v753_v48 = vadd.f32 %v752_v46, %v1828_v11  ;;  %v801_v62 = vrot.slane %v1858_v55, 4  ;;  %v802_v8 = vrot.slane %v1870_v4, 4 }
 0x129   : > { %1382 = vtanh.f32 %v753_v48 }
 0x12a   : > { %1384 = vtanh.f32 %v766_v50 }
 0x12b   : > { %1386 = vtanh.f32 %v657_v51 }
 0x12c   : > { %1388 = vtanh.f32 %v670_v53 }
 0x12d   : > { %v767_v58 = vpop.f32.mrf.mxu1 }
 0x12e   : > { %864 = vrot.lane.b32.xlu1 %v800_v43, %s1451_s11  ;;  %916 = vrot.lane.b32.xlu0 %v799_v54, %s1449_s8  ;;  %v754_v56 = vpop.f32.mrf.mxu0 }
 0x12f   : > { %v1383_v57 = vpop.eup %1382  ;;  %893 = vrot.lane.b32.xlu2 %v1858_v55, %s1447_s29 }
 0x130   : > { %v1385_v59 = vpop.eup %1384  ;;  %1390 = vtanh.f32 %v1383_v57 }
 0x131   : > { %1392 = vtanh.f32 %v1385_v59  ;;  %v1387_v60 = vpop.eup %1386 }
 0x132   : > { %v1389_v61 = vpop.eup %1388  ;;  %1394 = vtanh.f32 %v1387_v60 }
 0x133   : > { %1396 = vtanh.f32 %v1389_v61 }
 0x134   : > { %1398 = vtanh.f32 %v683_v9 }
 0x135   : > { %1400 = vtanh.f32 %v696_v10 }
 0x136   : > { %v1391_v63 = vpop.eup %1390  ;;  %808 = vrot.lane.b32.xlu1 %v799_v54, %s1450_s10  ;;  %862 = vrot.lane.b32.xlu0 %v799_v54, %s1451_s11 }
 0x137   : > { %v1393_v0 = vpop.eup %1392  ;;  %812 = vrot.lane.b32.xlu2 %v801_v62, %s1450_s10 }
 0x138   : > { %v1868_v2 = vpack.c.bf16 %v1393_v0, %v1391_v63  ;;  %v1395_v3 = vpop.eup %1394 }
 0x139   : > { %v1397_v5 = vpop.eup %1396 }
 0x13a   : > { %v717_v6 = vpack.c.bf16 %v1397_v5, %v1395_v3  ;;  %v1399_v15 = vpop.eup %1398  ;;  %v796_v26 = vunpack.c.h.b16 %v1868_v2  ;;  %v795_v31 = vunpack.c.l.b16 %v1868_v2 }
 0x13b   : > { %v1401_v11 = vpop.eup %1400  ;;  %1402 = vtanh.f32 %v1399_v15 }
 0x13c   : > { %v782_v7 = vunpack.c.l.b16 %v717_v6  ;;  %v783_v16 = vunpack.c.h.b16 %v717_v6  ;;  %1404 = vtanh.f32 %v1401_v11  ;;  %v798_v29 = vpack.c.b16 %v796_v26, %v796_v26 }
 0x13d   : > { %v1929_v33 = vpack.c.b16 %v795_v31, %v795_v31 }
 0x13e   : > { %839 = vrot.lane.b32.xlu1 %v1858_v55, %s1448_s30  ;;  %895 = vrot.lane.b32.xlu0 %v1870_v4, %s1447_s29  ;;  %v1886_v12 = vpack.c.b16 %v782_v7, %v782_v7  ;;  %v1892_v17 = vpack.c.b16 %v783_v16, %v783_v16  ;;  %v943_v32 = vrot.slane %v798_v29, 4 }
 0x13f   : > { %920 = vrot.lane.b32.xlu2 %v801_v62, %s1449_s8  ;;  %v807_v37 = vrot.slane %v1929_v33, 4 }
 0x140   : > { %v803_v13 = vrot.slane %v1886_v12, 4  ;;  %v804_v21 = vrot.slane %v1892_v17, 4 }
 0x141   : > { %v1403_v18 = vpop.eup %1402 }
 0x142   : > { %v1405_v19 = vpop.eup %1404 }
 0x143   : > { %v718_v20 = vpack.c.bf16 %v1405_v19, %v1403_v18 }
 0x145   : > { %v785_v22 = vunpack.c.h.b16 %v718_v20  ;;  %v784_v23 = vunpack.c.l.b16 %v718_v20  ;;  %v1991_v20 = vld [vmem:[%s2135_s4] sm:$0xf] }
 0x146   : > { %841 = vrot.lane.b32.xlu1 %v1870_v4, %s1448_s30  ;;  %814 = vrot.lane.b32.xlu0 %v802_v8, %s1450_s10 }
 0x147   : > { %866 = vrot.lane.b32.xlu2 %v801_v62, %s1451_s11  ;;  %v1904_v14 = vpack.c.b16 %v785_v22, %v785_v22  ;;  %v1906_v24 = vpack.c.b16 %v784_v23, %v784_v23 }
 0x149   : > { %v805_v25 = vrot.slane %v1906_v24, 4  ;;  %v806_v28 = vrot.slane %v1904_v14, 4 }
 0x14e   : > { %868 = vrot.lane.b32.xlu1 %v802_v8, %s1451_s11  ;;  %816 = vrot.lane.b32.xlu0 %v803_v13, %s1450_s10 }
 0x14f   : > { %922 = vrot.lane.b32.xlu2 %v802_v8, %s1449_s8 }
 0x156   : > { %843 = vrot.lane.b32.xlu1 %v1886_v12, %s1448_s30  ;;  %924 = vrot.lane.b32.xlu0 %v803_v13, %s1449_s8 }
 0x157   : > { %845 = vrot.lane.b32.xlu2 %v1892_v17, %s1448_s30 }
 0x15e   : > { %897 = vrot.lane.b32.xlu1 %v1886_v12, %s1447_s29  ;;  %926 = vrot.lane.b32.xlu0 %v804_v21, %s1449_s8 }
 0x15f   : > { %870 = vrot.lane.b32.xlu2 %v803_v13, %s1451_s11 }
 0x166   : > { %899 = vrot.lane.b32.xlu1 %v1892_v17, %s1447_s29  ;;  %849 = vrot.lane.b32.xlu0 %v1904_v14, %s1448_s30 }
 0x167   : > { %847 = vrot.lane.b32.xlu2 %v1906_v24, %s1448_s30 }
 0x16e   : > { %818 = vrot.lane.b32.xlu1 %v804_v21, %s1450_s10  ;;  %903 = vrot.lane.b32.xlu0 %v1904_v14, %s1447_s29 }
 0x16f   : > { %901 = vrot.lane.b32.xlu2 %v1906_v24, %s1447_s29 }
 0x176   : > { %872 = vrot.lane.b32.xlu1 %v804_v21, %s1451_s11  ;;  %820 = vrot.lane.b32.xlu0 %v805_v25, %s1450_s10 }
 0x177   : > { %874 = vrot.lane.b32.xlu2 %v805_v25, %s1451_s11 }
 0x179   : > { %v836_v27 = vpop.permute.xlu2 %835 }
 0x17e   : > { %822 = vrot.lane.b32.xlu1 %v806_v28, %s1450_s10  ;;  %947 = vrot.lane.b32.xlu0 %v798_v29, %s1448_s30 }
 0x17f   : > { %930 = vrot.lane.b32.xlu2 %v806_v28, %s1449_s8 }
 0x181   : > { %v811_v30 = vpop.permute.xlu2 %810 }
 0x186   : > { %928 = vrot.lane.b32.xlu1 %v805_v25, %s1449_s8  ;;  %944 = vrot.lane.b32.xlu0 %v943_v32, %s1450_s10 }
 0x187   : > { %851 = vrot.lane.b32.xlu2 %v1929_v33, %s1448_s30 }
 0x189   : > { %v1935_v34 = vpop.permute.xlu2 %893 }
 0x18e   : > { %905 = vrot.lane.b32.xlu1 %v1929_v33, %s1447_s29  ;;  %932 = vrot.lane.b32.xlu0 %v807_v37, %s1449_s8 }
 0x18f   : > { %824 = vrot.lane.b32.xlu2 %v807_v37, %s1450_s10 }
 0x190   : > { %v892_v38 = vpop.permute.xlu1 %891  ;;  %v838_v39 = vpop.permute.xlu0 %837 }
 0x191   : > { %v813_v40 = vpop.permute.xlu2 %812  ;;  %v854_v5 = vsel %vm853_vm1, %v836_v27, %v838_v39  ;;  %v909_v15 = vsel %vm907_vm5, %v892_v38, %v1935_v34 }
 0x192   : > { %v828_v57 = vsel %vm826_vm2, %v811_v30, %v813_v40 }
 0x193   : > { %v957_v58 = vsel %vm950_vm3, %v1834_v35, %v828_v57 }
 0x196   : > { %876 = vrot.lane.b32.xlu1 %v806_v28, %s1451_s11  ;;  %1055 = vperm.xlu0 %1365, %v1052_v41  }
 0x197   : > { %878 = vrot.lane.b32.xlu2 %v807_v37, %s1451_s11 }
 0x198   : > { %v919_v42 = vpop.permute.xlu1 %918  ;;  %v890_v43 = vpop.permute.xlu0 %889 }
 0x199   : > { %v1947_v44 = vpop.permute.xlu2 %920  ;;  %v908_v62 = vsel %vm907_vm5, %v890_v43, %v892_v38 }
 0x19a   : > { %v936_v8 = vsel %vm934_vm4, %v919_v42, %v1947_v44 }
 0x19b   : > { %v1021_v18 = vsel %vm950_vm3, %v909_v15, %v936_v8 }
 0x1a0   : > { %v865_v45 = vpop.permute.xlu1 %864  ;;  %v917_v46 = vpop.permute.xlu0 %916 }
 0x1a1   : > { %v1949_v47 = vpop.permute.xlu2 %866  ;;  %v935_v59 = vsel %vm934_vm4, %v917_v46, %v919_v42 }
 0x1a2   : > { %v1017_v2 = vsel %vm950_vm3, %v908_v62, %v935_v59  ;;  %v882_v21 = vsel %vm591_vm0, %v865_v45, %v1949_v47 }
 0x1a8   : > { %v809_v48 = vpop.permute.xlu1 %808  ;;  %v863_v49 = vpop.permute.xlu0 %862 }
 0x1a9   : > { %v1951_v50 = vpop.permute.xlu2 %922  ;;  %v881_v3 = vsel %vm591_vm0, %v863_v49, %v865_v45  ;;  %v827_v9 = vsel %vm826_vm2, %v809_v48, %v811_v30 }
 0x1aa   : > { %v985_v6 = vsel %vm950_vm3, %v854_v5, %v881_v3 }
 0x1b0   : > { %v840_v51 = vpop.permute.xlu1 %839  ;;  %v1953_v52 = vpop.permute.xlu0 %895 }
 0x1b1   : > { %v846_v53 = vpop.permute.xlu2 %845  ;;  %v855_v54 = vsel %vm853_vm1, %v838_v39, %v840_v51  ;;  %v910_v32 = vsel %vm907_vm5, %v1935_v34, %v1953_v52  ;;  %v937_v39 = vsel %vm934_vm4, %v1947_v44, %v1951_v50 }
 0x1b2   : > { %v1062_v56 = vsel %vm950_vm3, %v855_v54, 0  ;;  %v1025_v41 = vsel %vm950_vm3, %v910_v32, %v937_v39 }
 0x1b3   : > { %1082 = vmatpush.bf16.msra.mxu2 %v1062_v56 }
 0x1b7   : > { %1083 = vmatpush.bf16.msra.mxu2 %v957_v58 }
 0x1b8   : > { %v842_v60 = vpop.permute.xlu1 %841  ;;  %v815_v61 = vpop.permute.xlu0 %814 }
 0x1b9   : > { %v1962_v63 = vpop.permute.xlu2 %870  ;;  %v856_v0 = vsel %vm853_vm1, %v840_v51, %v842_v60  ;;  %v829_v35 = vsel %vm826_vm2, %v813_v40, %v815_v61 }
 0x1ba   : > { %v1064_v1 = vsel %vm950_vm3, %v856_v0, 0  ;;  %v961_v7 = vsel %vm950_vm3, %v1858_v55, %v829_v35  ;;  %v953_v55 = vsel %vm950_vm3, %v1836_v36, %v827_v9  ;;  %v989_v36 = vsel %vm950_vm3, %v855_v54, %v882_v21 }
 0x1bb   : > { %1084 = vmatpush.bf16.msra.mxu2 %v1017_v2  ;;  %1095 = vmatpush.bf16.msra.mxu3 %v1064_v1 }
 0x1bf   : > { %1085 = vmatpush.bf16.msra.mxu2 %v985_v6  ;;  %1096 = vmatpush.bf16.msra.mxu3 %v961_v7 }
 0x1c0   : > { %v1976_v10 = vpop.permute.xlu1 %868  ;;  %v817_v13 = vpop.permute.xlu0 %816 }
 0x1c1   : > { %v848_v11 = vpop.permute.xlu2 %847  ;;  %v830_v30 = vsel %vm826_vm2, %v815_v61, %v817_v13 }
 0x1c2   : > { %v1981_v16 = vsel %vm853_vm1, %v846_v53, %v848_v11  ;;  %v965_v31 = vsel %vm950_vm3, %v1870_v4, %v830_v30  ;;  %v883_v4 = vsel %vm591_vm0, %v1949_v47, %v1976_v10 }
 0x1c3   : > { %v1070_v19 = vsel %vm950_vm3, %v1981_v16, 0  ;;  %1086 = vmatpush.bf16.msra.mxu2 %v953_v55  ;;  %1097 = vmatpush.bf16.msra.mxu3 %v1021_v18  ;;  %v993_v42 = vsel %vm950_vm3, %v856_v0, %v883_v4 }
 0x1c6   : > { %1299 = vmatmul.msk.bf16.vlgmr.msra.gmra.mxu2 %vm1058_vm6, %v1991_v20 }
 0x1c7   : > { %1134 = vmatpush.bf16.msrb.mxu2 %v1070_v19  ;;  %1098 = vmatpush.bf16.msra.mxu3 %v989_v36 }
 0x1c8   : > { %v844_v22 = vpop.permute.xlu1 %843  ;;  %v925_v23 = vpop.permute.xlu0 %924 }
 0x1c9   : > { %v1998_v25 = vpop.permute.xlu2 %901  ;;  %v857_v26 = vsel %vm853_vm1, %v842_v60, %v844_v22  ;;  %v2002_v27 = vsel %vm853_vm1, %v844_v22, %v846_v53 }
 0x1ca   : > { %v1066_v28 = vsel %vm950_vm3, %v857_v26, 0  ;;  %v1068_v29 = vsel %vm950_vm3, %v2002_v27, 0 }
 0x1cb   : > { %1099 = vmatpush.bf16.msra.mxu3 %v957_v58  ;;  %1108 = vmatpush.bf16.msrb.mxu0 %v1066_v28  ;;  %v938_v58 = vsel %vm934_vm4, %v1951_v50, %v925_v23 }
 0x1cc   : > { %1121 = vmatpush.bf16.msrb.mxu1 %v1068_v29 }
 0x1ce   : > { %1300 = vmatmul.msk.bf16.vlgmr.msra.gmra.mxu3 %vm1058_vm6, %v1991_v20 }
 0x1cf   : > { %1109 = vmatpush.bf16.msrb.mxu0 %v965_v31 }
 0x1d0   : > { %v898_v37 = vpop.permute.xlu1 %897  ;;  %v2015_v38 = vpop.permute.xlu0 %926 }
 0x1d1   : > { %v2020_v40 = vpop.permute.xlu2 %874  ;;  %v911_v56 = vsel %vm907_vm5, %v1953_v52, %v898_v37  ;;  %v939_v50 = vsel %vm934_vm4, %v925_v23, %v2015_v38 }
 0x1d2   : > { %v1029_v59 = vsel %vm950_vm3, %v911_v56, %v938_v58 }
 0x1d3   : > { %1110 = vmatpush.bf16.msrb.mxu0 %v1025_v41 }
 0x1d7   : > { %1111 = vmatpush.bf16.msrb.mxu0 %v993_v42 }
 0x1d8   : > { %v900_v34 = vpop.permute.xlu1 %899  ;;  %v850_v43 = vpop.permute.xlu0 %849 }
 0x1d9   : > { %v2027_v45 = vpop.permute.xlu2 %930  ;;  %v2030_v46 = vsel %vm853_vm1, %v848_v11, %v850_v43  ;;  %v912_v1 = vsel %vm907_vm5, %v898_v37, %v900_v34  ;;  %v913_v15 = vsel %vm907_vm5, %v900_v34, %v1998_v25 }
 0x1da   : > { %v1072_v44 = vsel %vm950_vm3, %v2030_v46, 0  ;;  %v1033_v2 = vsel %vm950_vm3, %v912_v1, %v939_v50 }
 0x1db   : > { %1112 = vmatpush.bf16.msrb.mxu0 %v961_v7  ;;  %1147 = vmatpush.bf16.msrb.mxu3 %v1072_v44 }
 0x1de   : > { %1301 = vmatmul.msk.bf16.vlgmr.msrb.gmra.mxu0 %vm1058_vm6, %v1991_v20 }
 0x1e0   : > { %v819_v47 = vpop.permute.xlu1 %818  ;;  %v904_v48 = vpop.permute.xlu0 %903 }
 0x1e1   : > { %v852_v49 = vpop.permute.xlu2 %851  ;;  %v831_v51 = vsel %vm826_vm2, %v817_v13, %v819_v47  ;;  %v914_v18 = vsel %vm907_vm5, %v1998_v25, %v904_v48 }
 0x1e2   : > { %v2038_v53 = vsel %vm853_vm1, %v850_v43, %v852_v49  ;;  %v969_v54 = vsel %vm950_vm3, %v1886_v12, %v831_v51  ;;  %v884_v12 = vsel %vm591_vm0, %v1976_v10, %v1962_v63 }
 0x1e3   : > { %v1074_v57 = vsel %vm950_vm3, %v2038_v53, 0  ;;  %1122 = vmatpush.bf16.msrb.mxu1 %v969_v54  ;;  %v997_v52 = vsel %vm950_vm3, %v857_v26, %v884_v12 }
 0x1e4   : > { %1160 = vmatpush.bf16.msra.mxu0 %v1074_v57 }
 0x1e7   : > { %1123 = vmatpush.bf16.msrb.mxu1 %v1029_v59 }
 0x1e8   : > { %v873_v60 = vpop.permute.xlu1 %872  ;;  %v821_v61 = vpop.permute.xlu0 %820 }
 0x1e9   : > { %v832_v62 = vsel %vm826_vm2, %v819_v47, %v821_v61  ;;  %v825_v3 = vpop.permute.xlu2 %824  ;;  %v885_v35 = vsel %vm591_vm0, %v1962_v63, %v873_v60  ;;  %v886_v23 = vsel %vm591_vm0, %v873_v60, %v2020_v40 }
 0x1ea   : > { %v973_v0 = vsel %vm950_vm3, %v1892_v17, %v832_v62  ;;  %v1001_v10 = vsel %vm950_vm3, %v2002_v27, %v885_v35  ;;  %v1005_v25 = vsel %vm950_vm3, %v1981_v16, %v886_v23 }
 0x1eb   : > { %1124 = vmatpush.bf16.msrb.mxu1 %v997_v52  ;;  %1135 = vmatpush.bf16.msrb.mxu2 %v973_v0 }
 0x1ef   : > { %1125 = vmatpush.bf16.msrb.mxu1 %v965_v31  ;;  %1136 = vmatpush.bf16.msrb.mxu2 %v1033_v2 }
 0x1f0   : > { %v823_v5 = vpop.permute.xlu1 %822  ;;  %v948_v6 = vpop.permute.xlu0 %947 }
 0x1f1   : > { %v833_v7 = vsel %vm826_vm2, %v821_v61, %v823_v5  ;;  %v834_v17 = vsel %vm826_vm2, %v823_v5, %v825_v3  ;;  %v949_v8 = vsel %vm853_vm1, %v852_v49, %v948_v6 }
 0x1f2   : > { %v1077_v9 = vsel %vm950_vm3, %v949_v8, 0  ;;  %1302 = vmatmul.msk.bf16.vlgmr.msrb.gmra.mxu1 %vm1058_vm6, %v1991_v20  ;;  %v977_v63 = vsel %vm950_vm3, %v1906_v24, %v833_v7  ;;  %v981_v13 = vsel %vm950_vm3, %v1904_v14, %v834_v17 }
 0x1f3   : > { %1137 = vmatpush.bf16.msrb.mxu2 %v1001_v10  ;;  %1148 = vmatpush.bf16.msrb.mxu3 %v977_v63 }
 0x1f4   : > { %1161 = vmatpush.bf16.msra.mxu0 %v981_v13  ;;  %1173 = vmatpush.bf16.msra.mxu1 %v1077_v9 }
 0x1f7   : > { %1138 = vmatpush.bf16.msrb.mxu2 %v969_v54 }
 0x1f8   : > { %v929_v11 = vpop.permute.xlu1 %928  ;;  %v945_v55 = vpop.permute.xlu0 %944 }
 0x1f9   : > { %v940_v19 = vsel %vm934_vm4, %v2015_v38, %v929_v11  ;;  %v941_v24 = vsel %vm934_vm4, %v929_v11, %v2027_v45  ;;  %v946_v14 = vsel %vm826_vm2, %v825_v3, %v945_v55 }
 0x1fa   : > { %1303 = vmatmul.msk.bf16.vlgmr.msrb.gmra.mxu2 %vm1058_vm6, %v1991_v20  ;;  %v1037_v21 = vsel %vm950_vm3, %v913_v15, %v940_v19  ;;  %v1041_v36 = vsel %vm950_vm3, %v914_v18, %v941_v24  ;;  %v1049_v22 = vsel %vm950_vm3, %v1929_v33, %v946_v14  ;;  %v879_v33 = vpop.permute.xlu2 %878 }
 0x1fb   : > { %1149 = vmatpush.bf16.msrb.mxu3 %v1037_v21  ;;  %1162 = vmatpush.bf16.msra.mxu0 %v1041_v36 }
 0x1fc   : > { %1174 = vmatpush.bf16.msra.mxu1 %v1049_v22 }
 0x1ff   : > { %1150 = vmatpush.bf16.msrb.mxu3 %v1005_v25 }
 0x200   : > { %v906_v26 = vpop.permute.xlu1 %905  ;;  %v933_v27 = vpop.permute.xlu0 %932 }
 0x201   : > { %v915_v28 = vsel %vm907_vm5, %v904_v48, %v906_v26  ;;  %v942_v29 = vsel %vm934_vm4, %v2027_v45, %v933_v27 }
 0x202   : > { %v1045_v30 = vsel %vm950_vm3, %v915_v28, %v942_v29 }
 0x203   : > { %1151 = vmatpush.bf16.msrb.mxu3 %v973_v0  ;;  %1175 = vmatpush.bf16.msra.mxu1 %v1045_v30 }
 0x206   : > { %1304 = vmatmul.msk.bf16.vlgmr.msrb.gmra.mxu3 %vm1058_vm6, %v1991_v20 }
 0x208   : > { %v877_v31 = vpop.permute.xlu1 %876  ;;  %v1056_v39 = vpop.permute.xlu0 %1055 }
 0x209   : > { %v887_v16 = vsel %vm591_vm0, %v2020_v40, %v877_v31  ;;  %v888_v32 = vsel %vm591_vm0, %v877_v31, %v879_v33 }
 0x20a   : > { %v1009_v37 = vsel %vm950_vm3, %v2030_v46, %v887_v16  ;;  %v1013_v38 = vsel %vm950_vm3, %v2038_v53, %v888_v32 }
 0x20b   : > { %1163 = vmatpush.bf16.msra.mxu0 %v1009_v37  ;;  %1176 = vmatpush.bf16.msra.mxu1 %v1013_v38 }
 0x20f   : > { %1164 = vmatpush.bf16.msra.mxu0 %v977_v63  ;;  %1177 = vmatpush.bf16.msra.mxu1 %v981_v13 }
 0x212   : > { %1305 = vmatmul.msk.bf16.vlgmr.msra.gmra.mxu0 %vm1058_vm6, %v1991_v20  ;;  %1306 = vmatmul.msk.bf16.vlgmr.msra.gmra.mxu1 %vm1058_vm6, %v1991_v20 }
 0x249   : > { %v1088_v40 = vpop.f32.mrf.mxu2 }
 0x24a   : > { %v1089_v41 = vadd.f32 %v1088_v40, %v1056_v39 }
 0x24c   : > { %1183 = vst [vmem:[%s485_s19] sm:$0xff] %v1089_v41 }
 0x251   : > { %v1101_v4 = vpop.f32.mrf.mxu3  ;;  %v1090_v42 = vpop.f32.mrf.mxu2 }
 0x252   : > { %v1102_v34 = vadd.f32 %v1101_v4, %v1056_v39 }
 0x254   : > { %1184 = vst [vmem:[%s485_s19 + $0x8] sm:$0xff] %v1102_v34 }
 0x259   : > { %v1103_v43 = vpop.f32.mrf.mxu3 }
 0x25b   : > { %v1114_v45 = vpop.f32.mrf.mxu0 }
 0x25c   : > { %v1115_v20 = vadd.f32 %v1114_v45, %v1056_v39 }
 0x25e   : > { %1185 = vst [vmem:[%s485_s19 + $0x10] sm:$0xff] %v1115_v20 }
 0x263   : > { %v1116_v46 = vpop.f32.mrf.mxu0 }
 0x26f   : > { %v1127_v44 = vpop.f32.mrf.mxu1 }
 0x270   : > { %v1128_v47 = vadd.f32 %v1127_v44, %v1056_v39 }
 0x272   : > { %1186 = vst [vmem:[%s485_s19 + $0x18] sm:$0xff] %v1128_v47 }
 0x277   : > { %v1129_v48 = vpop.f32.mrf.mxu1 }
 0x27d   : > { %v1140_v49 = vpop.f32.mrf.mxu2 }
 0x27e   : > { %v1141_v51 = vadd.f32 %v1140_v49, %v1056_v39 }
 0x280   : > { %1187 = vst [vmem:[%s485_s19 + $0x20] sm:$0xff] %v1141_v51 }
 0x285   : > { %v1142_v53 = vpop.f32.mrf.mxu2 }
 0x289   : > { %v1153_v54 = vpop.f32.mrf.mxu3 }
 0x28a   : > { %v1154_v56 = vadd.f32 %v1153_v54, %v1056_v39 }
 0x28c   : > { %1188 = vst [vmem:[%s485_s19 + $0x28] sm:$0xff] %v1154_v56 }
 0x28f   : > { %v1166_v57 = vpop.f32.mrf.mxu0  ;;  %v1179_v58 = vpop.f32.mrf.mxu1 }
 0x290   : > { %v1167_v59 = vadd.f32 %v1166_v57, %v1056_v39  ;;  %v1180_v60 = vadd.f32 %v1179_v58, %v1056_v39 }
 0x291   : > { %v1155_v61 = vpop.f32.mrf.mxu3 }
 0x292   : > { %1189 = vst [vmem:[%s485_s19 + $0x30] sm:$0xff] %v1167_v59 }
 0x293   : > { %1190 = vst [vmem:[%s485_s19 + $0x38] sm:$0xff] %v1180_v60 }
 0x297   : > { %v1168_v12 = vpop.f32.mrf.mxu0  ;;  %v1181_v62 = vpop.f32.mrf.mxu1 }
 0x298 PF: > { %p13_p0 = scmp.ge.s32.totalorder %s1514_s27, 6   ;;  %s2140_s21 = smov %s1432_s22 }
 0x299   : > { %s2141_s22 = smov %s1545_s14  ;;  %s2142_s23 = smov %s1440_s24 }
 0x29a   : > { %s2143_s24 = smov %s1524_s7  ;;  %s2144_s25 = smov %s1514_s27 }
 0x29b   :  { %15 = sbr.rel (!%p13_p0) target bundleno = 3 (0x3), region = 133 }

</bundles_post_ra>
